<compile_context>
chip_gen: v5e
topology: v5e:2x2
jax: 0.10.0
libtpu: 0.0.40
codegen_flags: <defaults>
</compile_context>

<pallas_src>
import functools

import jax
import jax.numpy as jnp
from jax.experimental import pallas as pl
from jax.experimental.pallas import tpu as pltpu

LANE = 128
SUBLANE = 8


def _round_up(n, m):
    return ((n + m - 1) // m) * m


def _pad_to(x, axis, target):
    pad = target - x.shape[axis]
    if pad <= 0:
        return x
    widths = [(0, 0)] * x.ndim
    widths[axis] = (0, pad)
    return jnp.pad(x, widths)


# ----------------------------------------------------------------------------
# The single fused kernel.
#   grid axis = tiles of the first FC layer's (huge) contraction, expressed as
#   groups of conv spatial positions (each position owns one (cpad, hpad)
#   weight tile of w1).
#   step 0      : conv-as-matmul + ReLU -> VMEM scratch (never leaves VMEM)
#   every step  : partial first-layer matmul into a VMEM f32 accumulator
#   last step   : remaining hidden layers + output layer, all VMEM-resident
# ----------------------------------------------------------------------------
def _fused_kernel(p_ref, w0_ref, b0_ref, w1_ref, b1_ref, wh_ref, bh_ref,
                  wo_ref, bo_ref, o_ref, conv_ref, acc_ref, *,
                  n_hidden, rows_per_tile, bpad):
    k = pl.program_id(0)

    # ---- step 0: encoder conv (im2col matmul) + ReLU ----
    @pl.when(k == 0)
    def _():
        acc_ref[...] = jnp.zeros_like(acc_ref)
        conv = jnp.dot(p_ref[...], w0_ref[...],
                       preferred_element_type=jnp.float32)
        conv_ref[...] = jnp.maximum(conv + b0_ref[...], 0.0)

    # ---- every step: this tile of the first (K = HoWo*cpad) FC layer ----
    # conv rows are ordered (spatial, batch): spatial position h lives in the
    # sublane-aligned row block [h*bpad, (h+1)*bpad) of the scratch.
    base = k * rows_per_tile
    acc = acc_ref[...]
    for r in range(rows_per_tile):                    # static unroll
        row0 = pl.multiple_of((base + r) * bpad, bpad)
        lhs = conv_ref[pl.ds(row0, bpad), :].astype(jnp.bfloat16)
        acc = acc + jnp.dot(lhs, w1_ref[r],
                            preferred_element_type=jnp.float32)
    acc_ref[...] = acc

    # ---- last step: bias+ReLU, hidden layers, output layer ----
    @pl.when(k == pl.num_programs(0) - 1)
    def _():
        a = jnp.maximum(acc_ref[...] + b1_ref[...], 0.0)
        for i in range(n_hidden):
            a = jnp.dot(a.astype(jnp.bfloat16), wh_ref[i],
                        preferred_element_type=jnp.float32) + bh_ref[i]
            a = jnp.maximum(a, 0.0)
        out = jnp.dot(a.astype(jnp.bfloat16), wo_ref[...],
                      preferred_element_type=jnp.float32) + bo_ref[...]
        o_ref[...] = out.astype(o_ref.dtype)


def fused_forward(patches, pk, *, bpad, howo):
    """patches: (howo*bpad, kpad) bf16, spatial-major / batch-minor rows."""
    mpad, kpad = patches.shape
    cpad = pk["w0"].shape[1]
    hpad = pk["w1"].shape[2]
    lpad = pk["wo"].shape[1]
    n_hidden = pk["wh"].shape[0]

    # Largest spatial-row tile whose w1 block stays <= 4 MiB.  Double-buffered
    # that keeps total VMEM (~9.5 MiB here) under the *default* scoped limit on
    # every TPU generation while minimizing per-grid-step overhead
    # (HoWo = 64 -> rows_per_tile = 32, i.e. K-tile of 8192, grid of 2).
    block_budget = 4 * 1024 * 1024
    rows_per_tile = 1
    for cand in (64, 32, 16, 8, 4, 2, 1):
        if howo % cand == 0 and cand * cpad * hpad * 2 <= block_budget:
            rows_per_tile = cand
            break
    grid = (howo // rows_per_tile,)

    kernel = functools.partial(_fused_kernel, n_hidden=n_hidden,
                               rows_per_tile=rows_per_tile, bpad=bpad)

    return pl.pallas_call(
        kernel,
        out_shape=jax.ShapeDtypeStruct((bpad, lpad), jnp.float32),
        grid_spec=pltpu.PrefetchScalarGridSpec(
            num_scalar_prefetch=0,
            grid=grid,
            in_specs=[
                pl.BlockSpec((mpad, kpad), lambda k: (0, 0)),            # patches
                pl.BlockSpec((kpad, cpad), lambda k: (0, 0)),            # w0
                pl.BlockSpec((1, cpad), lambda k: (0, 0)),               # b0
                pl.BlockSpec((rows_per_tile, cpad, hpad),
                             lambda k: (k, 0, 0)),                       # w1 (K-tiled)
                pl.BlockSpec((1, hpad), lambda k: (0, 0)),               # b1
                pl.BlockSpec((n_hidden, hpad, hpad), lambda k: (0, 0, 0)),  # wh
                pl.BlockSpec((n_hidden, 1, hpad), lambda k: (0, 0, 0)),  # bh
                pl.BlockSpec((hpad, lpad), lambda k: (0, 0)),            # wo
                pl.BlockSpec((1, lpad), lambda k: (0, 0)),               # bo
            ],
            out_specs=pl.BlockSpec((bpad, lpad), lambda k: (0, 0)),
            scratch_shapes=[
                pltpu.VMEM((mpad, cpad), jnp.float32),   # conv activation
                pltpu.VMEM((bpad, hpad), jnp.float32),   # first-layer accumulator
            ],
        ),
        compiler_params=pltpu.CompilerParams(
            dimension_semantics=("arbitrary",)),
    )(patches, pk["w0"], pk["b0"], pk["w1"], pk["b1"],
      pk["wh"], pk["bh"], pk["wo"], pk["bo"])


# ----------------------------------------------------------------------------
# JAX glue: im2col patch extraction (tiny here — ~6 KiB image; for large images
# the patch rows would be built in-kernel from a windowed DMA instead).
# Rows are ordered (ho, wo, batch) so the in-kernel conv output maps to the
# flattened FC input with no relayout; columns are (c, kh, kw) to match the
# PyTorch conv weight reshape(O, -1).
# ----------------------------------------------------------------------------
def _im2col_patches(x_nchw, bpad, kpad, k=3, stride=2, pad=1):
    B, C, H, W = x_nchw.shape
    if bpad > B:
        x_nchw = jnp.pad(x_nchw, ((0, bpad - B), (0, 0), (0, 0), (0, 0)))
    xp = jnp.pad(x_nchw, ((0, 0), (0, 0), (pad, pad), (pad, pad)))
    Ho = (H + 2 * pad - k) // stride + 1
    Wo = (W + 2 * pad - k) // stride + 1
    cols = []
    for di in range(k):
        for dj in range(k):
            cols.append(
                xp[:, :, di:di + stride * Ho:stride, dj:dj + stride * Wo:stride])
    p = jnp.stack(cols, axis=2)                       # (Bpad, C, 9, Ho, Wo)
    p = p.transpose(3, 4, 0, 1, 2).reshape(Ho * Wo * bpad, C * k * k)
    kdim = C * k * k
    if kdim < kpad:
        p = jnp.pad(p, ((0, 0), (0, kpad - kdim)))
    return p.astype(jnp.bfloat16), Ho, Wo


# ----------------------------------------------------------------------------
# Parameters: logical (unpadded, f32) init, then pack into padded bf16 kernel
# layouts.  Zero padding keeps the math exact; the NCHW flatten permutation of
# the reference model is folded into the first FC weight at pack time.
# ----------------------------------------------------------------------------
def init_params(key, in_ch=3, enc_ch=132, spatial_out=8, hidden=132,
                n_hidden_layers=3, latent_dim=64):
    keys = jax.random.split(key, 2 + n_hidden_layers + 2)
    ki = iter(range(len(keys)))

    def lin(k, fan_in, fan_out):
        s = 1.0 / jnp.sqrt(fan_in)
        w = jax.random.uniform(k, (fan_in, fan_out), jnp.float32, -s, s)
        b = jnp.zeros((fan_out,), jnp.float32)
        return w, b

    fan_in = in_ch * 3 * 3
    s = 1.0 / jnp.sqrt(fan_in)
    conv_w = jax.random.uniform(keys[next(ki)], (enc_ch, in_ch, 3, 3),
                                jnp.float32, -s, s)
    conv_b = jnp.zeros((enc_ch,), jnp.float32)

    in_feat = enc_ch * spatial_out * spatial_out        # NCHW flatten order
    fc_params = [lin(keys[next(ki)], in_feat, hidden)]
    for _ in range(n_hidden_layers):
        fc_params.append(lin(keys[next(ki)], hidden, hidden))
    fc_params.append(lin(keys[next(ki)], hidden, latent_dim))

    return {"conv_w": conv_w, "conv_b": conv_b, "fc": fc_params}


def pack_params(params, Ho, Wo):
    conv_w = params["conv_w"]                 # (O, C, 3, 3)
    O, C = conv_w.shape[0], conv_w.shape[1]
    kdim = C * 9
    kpad = _round_up(kdim, SUBLANE)
    cpad = _round_up(O, LANE)

    w0 = conv_w.reshape(O, -1).T              # (C*kh*kw, O), rows = (c, kh, kw)
    w0 = _pad_to(_pad_to(w0, 0, kpad), 1, cpad).astype(jnp.bfloat16)
    b0 = _pad_to(params["conv_b"], 0, cpad).reshape(1, cpad).astype(jnp.float32)

    fc = params["fc"]
    w1, b1 = fc[0]                            # (enc_ch*Ho*Wo, hidden), row = c*HoWo + hw
    hidden = w1.shape[1]
    hpad = _round_up(hidden, LANE)
    HoWo = Ho * Wo
    w1 = w1.reshape(O, HoWo, hidden)          # (c, hw, n)
    w1 = _pad_to(w1, 0, cpad)                 # zero rows for padded channels
    w1 = jnp.transpose(w1, (1, 0, 2))         # (hw, c, n) — per-position weight tiles
    w1 = _pad_to(w1, 2, hpad).astype(jnp.bfloat16)       # (HoWo, cpad, hpad)
    b1 = _pad_to(b1, 0, hpad).reshape(1, hpad).astype(jnp.float32)

    hidden_layers = fc[1:-1]
    wh = jnp.stack([_pad_to(_pad_to(w, 0, hpad), 1, hpad)
                    for (w, _) in hidden_layers]).astype(jnp.bfloat16)
    bh = jnp.stack([_pad_to(b, 0, hpad).reshape(1, hpad)
                    for (_, b) in hidden_layers]).astype(jnp.float32)

    wo, bo = fc[-1]
    latent = wo.shape[1]
    lpad = _round_up(latent, LANE)
    wo = _pad_to(_pad_to(wo, 0, hpad), 1, lpad).astype(jnp.bfloat16)
    bo = _pad_to(bo, 0, lpad).reshape(1, lpad).astype(jnp.float32)

    return {"w0": w0, "b0": b0, "w1": w1, "b1": b1,
            "wh": wh, "bh": bh, "wo": wo, "bo": bo}


# ----------------------------------------------------------------------------
# Full forward pass
# ----------------------------------------------------------------------------
@functools.partial(jax.jit, static_argnames=("latent_dim",))
def geometric_autoencoder_forward(packed, image, *, latent_dim,
                                  concept_struct=None):
    # find_concept_struct(image) returns 0 in the reference; nothing to compute.
    del concept_struct
    B = image.shape[0]
    bpad = max(_round_up(B, SUBLANE), SUBLANE)     # full-vreg epilogue / stores
    kpad = packed["w0"].shape[0]

    patches, Ho, Wo = _im2col_patches(image, bpad, kpad)     # JAX glue (~8 KiB)
    out = fused_forward(patches, packed, bpad=bpad, howo=Ho * Wo)
    # TODO(synk): GeometricStructure decoder (clear/make_dag/realize/sample) is
    # symbolic program execution with no Pallas equivalent; return the latent.
    return out[:B, :latent_dim]


if __name__ == "__main__":
    key = jax.random.PRNGKey(0)
    kp, kx = jax.random.split(key)

    B, C, H, W = 2, 3, 16, 16          # small NCHW image
    latent_dim = 64
    image = jax.random.normal(kx, (B, C, H, W), dtype=jnp.float32)

    params = init_params(kp, in_ch=C, enc_ch=132, spatial_out=H // 2,
                         hidden=132, n_hidden_layers=3, latent_dim=latent_dim)
    packed = pack_params(params, Ho=H // 2, Wo=W // 2)

    out = geometric_autoencoder_forward(packed, image, latent_dim=latent_dim)
    out = jax.block_until_ready(out)
    assert out.shape == (B, latent_dim), out.shape
    print("KERNEL_OK")
</pallas_src>

<mosaic_0001>
module attributes {stable_mosaic.version = 11 : i64} {
  func.func @_fused_kernel(%arg0: i32, %arg1: memref<512x32xbf16, #tpu.memory_space<vmem>>, %arg2: memref<32x256xbf16, #tpu.memory_space<vmem>>, %arg3: memref<1x256xf32, #tpu.memory_space<vmem>>, %arg4: memref<32x256x256xbf16, #tpu.memory_space<vmem>>, %arg5: memref<1x256xf32, #tpu.memory_space<vmem>>, %arg6: memref<3x256x256xbf16, #tpu.memory_space<vmem>>, %arg7: memref<3x1x256xf32, #tpu.memory_space<vmem>>, %arg8: memref<256x128xbf16, #tpu.memory_space<vmem>>, %arg9: memref<1x128xf32, #tpu.memory_space<vmem>>, %arg10: memref<8x128xf32, #tpu.memory_space<vmem>>, %arg11: memref<512x256xf32, #tpu.memory_space<vmem>>, %arg12: memref<8x256xf32, #tpu.memory_space<vmem>>) attributes {dimension_semantics = [#tpu.dimension_semantics<arbitrary>], iteration_bounds = array<i64: 2>, scalar_prefetch = 0 : i64, scratch_operands = 2 : i64, tpu.core_type = #tpu.core_type<tc>, window_params = [{pipeline_mode = #tpu.pipeline_mode<synchronous>, transform_indices = @transform_0, window_bounds = array<i64: 512, 32>}, {pipeline_mode = #tpu.pipeline_mode<synchronous>, transform_indices = @transform_1, window_bounds = array<i64: 32, 256>}, {pipeline_mode = #tpu.pipeline_mode<synchronous>, transform_indices = @transform_2, window_bounds = array<i64: 1, 256>}, {transform_indices = @transform_3, window_bounds = array<i64: 32, 256, 256>}, {pipeline_mode = #tpu.pipeline_mode<synchronous>, transform_indices = @transform_4, window_bounds = array<i64: 1, 256>}, {pipeline_mode = #tpu.pipeline_mode<synchronous>, transform_indices = @transform_5, window_bounds = array<i64: 3, 256, 256>}, {pipeline_mode = #tpu.pipeline_mode<synchronous>, transform_indices = @transform_6, window_bounds = array<i64: 3, 1, 256>}, {pipeline_mode = #tpu.pipeline_mode<synchronous>, transform_indices = @transform_7, window_bounds = array<i64: 256, 128>}, {pipeline_mode = #tpu.pipeline_mode<synchronous>, transform_indices = @transform_8, window_bounds = array<i64: 1, 128>}, {pipeline_mode = #tpu.pipeline_mode<synchronous>, transform_indices = @transform_9, window_bounds = array<i64: 8, 128>}]} {
    %c0_i32 = arith.constant 0 : i32
    %0 = arith.cmpi eq, %arg0, %c0_i32 : i32
    %1 = arith.extui %0 : i1 to i32
    %c0_i32_0 = arith.constant 0 : i32
    %2 = arith.cmpi ne, %1, %c0_i32_0 : i32
    scf.if %2 {
      %cst_167 = arith.constant 0.000000e+00 : f32
      %329 = vector.broadcast %cst_167 : f32 to vector<8x256xf32>
      %c0_168 = arith.constant 0 : index
      %c0_169 = arith.constant 0 : index
      %330 = vector.load %arg12[%c0_168, %c0_169] : memref<8x256xf32, #tpu.memory_space<vmem>>, vector<8x256xf32>
      tpu.vector_store %arg12[%c0_168, %c0_169], %329 {strides = array<i32>} : memref<8x256xf32, #tpu.memory_space<vmem>>, vector<8x256xf32>,
      %c0_170 = arith.constant 0 : index
      %c0_171 = arith.constant 0 : index
      %331 = vector.load %arg1[%c0_170, %c0_171] : memref<512x32xbf16, #tpu.memory_space<vmem>>, vector<512x32xbf16>
      %c0_172 = arith.constant 0 : index
      %c0_173 = arith.constant 0 : index
      %332 = vector.load %arg2[%c0_172, %c0_173] : memref<32x256xbf16, #tpu.memory_space<vmem>>, vector<32x256xbf16>
      %cst_174 = arith.constant dense<0.000000e+00> : vector<512x256xf32>
      %333 = tpu.matmul %331, %332, %cst_174 {dimension_numbers = #tpu.dot_dimension_numbers<[1], [0], [0], [1], [0, 0, 1, 1], [], []>} : vector<512x32xbf16>, vector<32x256xbf16>, vector<512x256xf32> -> vector<512x256xf32>
      %c0_175 = arith.constant 0 : index
      %c0_176 = arith.constant 0 : index
      %334 = vector.load %arg3[%c0_175, %c0_176] : memref<1x256xf32, #tpu.memory_space<vmem>>, vector<1x256xf32>
      %335 = vector.broadcast %334 : vector<1x256xf32> to vector<512x256xf32>
      %336 = arith.addf %333, %335 : vector<512x256xf32>
      %cst_177 = arith.constant 0.000000e+00 : f32
      %337 = vector.broadcast %cst_177 : f32 to vector<512x256xf32>
      %338 = arith.maximumf %336, %337 : vector<512x256xf32>
      %c0_178 = arith.constant 0 : index
      %c0_179 = arith.constant 0 : index
      %339 = vector.load %arg11[%c0_178, %c0_179] : memref<512x256xf32, #tpu.memory_space<vmem>>, vector<512x256xf32>
      tpu.vector_store %arg11[%c0_178, %c0_179], %338 {strides = array<i32>} : memref<512x256xf32, #tpu.memory_space<vmem>>, vector<512x256xf32>,
    } else {
    }
    %c32_i32 = arith.constant 32 : i32
    %3 = arith.muli %arg0, %c32_i32 : i32
    %c0 = arith.constant 0 : index
    %c0_1 = arith.constant 0 : index
    %4 = vector.load %arg12[%c0, %c0_1] : memref<8x256xf32, #tpu.memory_space<vmem>>, vector<8x256xf32>
    %c0_i32_2 = arith.constant 0 : i32
    %5 = arith.addi %3, %c0_i32_2 : i32
    %c8_i32 = arith.constant 8 : i32
    %6 = arith.muli %5, %c8_i32 : i32
    %7 = tpu.assume_multiple %6, 8 : i32
    %8 = arith.index_cast %7 : i32 to index
    %c0_3 = arith.constant 0 : index
    %9 = vector.load %arg11[%8, %c0_3] : memref<512x256xf32, #tpu.memory_space<vmem>>, vector<8x256xf32>
    %10 = arith.truncf %9 : vector<8x256xf32> to vector<8x256xbf16>
    %c0_4 = arith.constant 0 : index
    %c0_5 = arith.constant 0 : index
    %c0_6 = arith.constant 0 : index
    %11 = vector.load %arg4[%c0_4, %c0_5, %c0_6] : memref<32x256x256xbf16, #tpu.memory_space<vmem>>, vector<1x256x256xbf16>
    %12 = vector.shape_cast %11 : vector<1x256x256xbf16> to vector<256x256xbf16>
    %cst = arith.constant dense<0.000000e+00> : vector<8x256xf32>
    %13 = tpu.matmul %10, %12, %cst {dimension_numbers = #tpu.dot_dimension_numbers<[1], [0], [0], [1], [0, 0, 1, 1], [], []>} : vector<8x256xbf16>, vector<256x256xbf16>, vector<8x256xf32> -> vector<8x256xf32>
    %14 = arith.addf %4, %13 : vector<8x256xf32>
    %c1_i32 = arith.constant 1 : i32
    %15 = arith.addi %3, %c1_i32 : i32
    %c8_i32_7 = arith.constant 8 : i32
    %16 = arith.muli %15, %c8_i32_7 : i32
    %17 = tpu.assume_multiple %16, 8 : i32
    %18 = arith.index_cast %17 : i32 to index
    %c0_8 = arith.constant 0 : index
    %19 = vector.load %arg11[%18, %c0_8] : memref<512x256xf32, #tpu.memory_space<vmem>>, vector<8x256xf32>
    %20 = arith.truncf %19 : vector<8x256xf32> to vector<8x256xbf16>
    %c1 = arith.constant 1 : index
    %c0_9 = arith.constant 0 : index
    %c0_10 = arith.constant 0 : index
    %21 = vector.load %arg4[%c1, %c0_9, %c0_10] : memref<32x256x256xbf16, #tpu.memory_space<vmem>>, vector<1x256x256xbf16>
    %22 = vector.shape_cast %21 : vector<1x256x256xbf16> to vector<256x256xbf16>
    %cst_11 = arith.constant dense<0.000000e+00> : vector<8x256xf32>
    %23 = tpu.matmul %20, %22, %cst_11 {dimension_numbers = #tpu.dot_dimension_numbers<[1], [0], [0], [1], [0, 0, 1, 1], [], []>} : vector<8x256xbf16>, vector<256x256xbf16>, vector<8x256xf32> -> vector<8x256xf32>
    %24 = arith.addf %14, %23 : vector<8x256xf32>
    %c2_i32 = arith.constant 2 : i32
    %25 = arith.addi %3, %c2_i32 : i32
    %c8_i32_12 = arith.constant 8 : i32
    %26 = arith.muli %25, %c8_i32_12 : i32
    %27 = tpu.assume_multiple %26, 8 : i32
    %28 = arith.index_cast %27 : i32 to index
    %c0_13 = arith.constant 0 : index
    %29 = vector.load %arg11[%28, %c0_13] : memref<512x256xf32, #tpu.memory_space<vmem>>, vector<8x256xf32>
    %30 = arith.truncf %29 : vector<8x256xf32> to vector<8x256xbf16>
    %c2 = arith.constant 2 : index
    %c0_14 = arith.constant 0 : index
    %c0_15 = arith.constant 0 : index
    %31 = vector.load %arg4[%c2, %c0_14, %c0_15] : memref<32x256x256xbf16, #tpu.memory_space<vmem>>, vector<1x256x256xbf16>
    %32 = vector.shape_cast %31 : vector<1x256x256xbf16> to vector<256x256xbf16>
    %cst_16 = arith.constant dense<0.000000e+00> : vector<8x256xf32>
    %33 = tpu.matmul %30, %32, %cst_16 {dimension_numbers = #tpu.dot_dimension_numbers<[1], [0], [0], [1], [0, 0, 1, 1], [], []>} : vector<8x256xbf16>, vector<256x256xbf16>, vector<8x256xf32> -> vector<8x256xf32>
    %34 = arith.addf %24, %33 : vector<8x256xf32>
    %c3_i32 = arith.constant 3 : i32
    %35 = arith.addi %3, %c3_i32 : i32
    %c8_i32_17 = arith.constant 8 : i32
    %36 = arith.muli %35, %c8_i32_17 : i32
    %37 = tpu.assume_multiple %36, 8 : i32
    %38 = arith.index_cast %37 : i32 to index
    %c0_18 = arith.constant 0 : index
    %39 = vector.load %arg11[%38, %c0_18] : memref<512x256xf32, #tpu.memory_space<vmem>>, vector<8x256xf32>
    %40 = arith.truncf %39 : vector<8x256xf32> to vector<8x256xbf16>
    %c3 = arith.constant 3 : index
    %c0_19 = arith.constant 0 : index
    %c0_20 = arith.constant 0 : index
    %41 = vector.load %arg4[%c3, %c0_19, %c0_20] : memref<32x256x256xbf16, #tpu.memory_space<vmem>>, vector<1x256x256xbf16>
    %42 = vector.shape_cast %41 : vector<1x256x256xbf16> to vector<256x256xbf16>
    %cst_21 = arith.constant dense<0.000000e+00> : vector<8x256xf32>
    %43 = tpu.matmul %40, %42, %cst_21 {dimension_numbers = #tpu.dot_dimension_numbers<[1], [0], [0], [1], [0, 0, 1, 1], [], []>} : vector<8x256xbf16>, vector<256x256xbf16>, vector<8x256xf32> -> vector<8x256xf32>
    %44 = arith.addf %34, %43 : vector<8x256xf32>
    %c4_i32 = arith.constant 4 : i32
    %45 = arith.addi %3, %c4_i32 : i32
    %c8_i32_22 = arith.constant 8 : i32
    %46 = arith.muli %45, %c8_i32_22 : i32
    %47 = tpu.assume_multiple %46, 8 : i32
    %48 = arith.index_cast %47 : i32 to index
    %c0_23 = arith.constant 0 : index
    %49 = vector.load %arg11[%48, %c0_23] : memref<512x256xf32, #tpu.memory_space<vmem>>, vector<8x256xf32>
    %50 = arith.truncf %49 : vector<8x256xf32> to vector<8x256xbf16>
    %c4 = arith.constant 4 : index
    %c0_24 = arith.constant 0 : index
    %c0_25 = arith.constant 0 : index
    %51 = vector.load %arg4[%c4, %c0_24, %c0_25] : memref<32x256x256xbf16, #tpu.memory_space<vmem>>, vector<1x256x256xbf16>
    %52 = vector.shape_cast %51 : vector<1x256x256xbf16> to vector<256x256xbf16>
    %cst_26 = arith.constant dense<0.000000e+00> : vector<8x256xf32>
    %53 = tpu.matmul %50, %52, %cst_26 {dimension_numbers = #tpu.dot_dimension_numbers<[1], [0], [0], [1], [0, 0, 1, 1], [], []>} : vector<8x256xbf16>, vector<256x256xbf16>, vector<8x256xf32> -> vector<8x256xf32>
    %54 = arith.addf %44, %53 : vector<8x256xf32>
    %c5_i32 = arith.constant 5 : i32
    %55 = arith.addi %3, %c5_i32 : i32
    %c8_i32_27 = arith.constant 8 : i32
    %56 = arith.muli %55, %c8_i32_27 : i32
    %57 = tpu.assume_multiple %56, 8 : i32
    %58 = arith.index_cast %57 : i32 to index
    %c0_28 = arith.constant 0 : index
    %59 = vector.load %arg11[%58, %c0_28] : memref<512x256xf32, #tpu.memory_space<vmem>>, vector<8x256xf32>
    %60 = arith.truncf %59 : vector<8x256xf32> to vector<8x256xbf16>
    %c5 = arith.constant 5 : index
    %c0_29 = arith.constant 0 : index
    %c0_30 = arith.constant 0 : index
    %61 = vector.load %arg4[%c5, %c0_29, %c0_30] : memref<32x256x256xbf16, #tpu.memory_space<vmem>>, vector<1x256x256xbf16>
    %62 = vector.shape_cast %61 : vector<1x256x256xbf16> to vector<256x256xbf16>
    %cst_31 = arith.constant dense<0.000000e+00> : vector<8x256xf32>
    %63 = tpu.matmul %60, %62, %cst_31 {dimension_numbers = #tpu.dot_dimension_numbers<[1], [0], [0], [1], [0, 0, 1, 1], [], []>} : vector<8x256xbf16>, vector<256x256xbf16>, vector<8x256xf32> -> vector<8x256xf32>
    %64 = arith.addf %54, %63 : vector<8x256xf32>
    %c6_i32 = arith.constant 6 : i32
    %65 = arith.addi %3, %c6_i32 : i32
    %c8_i32_32 = arith.constant 8 : i32
    %66 = arith.muli %65, %c8_i32_32 : i32
    %67 = tpu.assume_multiple %66, 8 : i32
    %68 = arith.index_cast %67 : i32 to index
    %c0_33 = arith.constant 0 : index
    %69 = vector.load %arg11[%68, %c0_33] : memref<512x256xf32, #tpu.memory_space<vmem>>, vector<8x256xf32>
    %70 = arith.truncf %69 : vector<8x256xf32> to vector<8x256xbf16>
    %c6 = arith.constant 6 : index
    %c0_34 = arith.constant 0 : index
    %c0_35 = arith.constant 0 : index
    %71 = vector.load %arg4[%c6, %c0_34, %c0_35] : memref<32x256x256xbf16, #tpu.memory_space<vmem>>, vector<1x256x256xbf16>
    %72 = vector.shape_cast %71 : vector<1x256x256xbf16> to vector<256x256xbf16>
    %cst_36 = arith.constant dense<0.000000e+00> : vector<8x256xf32>
    %73 = tpu.matmul %70, %72, %cst_36 {dimension_numbers = #tpu.dot_dimension_numbers<[1], [0], [0], [1], [0, 0, 1, 1], [], []>} : vector<8x256xbf16>, vector<256x256xbf16>, vector<8x256xf32> -> vector<8x256xf32>
    %74 = arith.addf %64, %73 : vector<8x256xf32>
    %c7_i32 = arith.constant 7 : i32
    %75 = arith.addi %3, %c7_i32 : i32
    %c8_i32_37 = arith.constant 8 : i32
    %76 = arith.muli %75, %c8_i32_37 : i32
    %77 = tpu.assume_multiple %76, 8 : i32
    %78 = arith.index_cast %77 : i32 to index
    %c0_38 = arith.constant 0 : index
    %79 = vector.load %arg11[%78, %c0_38] : memref<512x256xf32, #tpu.memory_space<vmem>>, vector<8x256xf32>
    %80 = arith.truncf %79 : vector<8x256xf32> to vector<8x256xbf16>
    %c7 = arith.constant 7 : index
    %c0_39 = arith.constant 0 : index
    %c0_40 = arith.constant 0 : index
    %81 = vector.load %arg4[%c7, %c0_39, %c0_40] : memref<32x256x256xbf16, #tpu.memory_space<vmem>>, vector<1x256x256xbf16>
    %82 = vector.shape_cast %81 : vector<1x256x256xbf16> to vector<256x256xbf16>
    %cst_41 = arith.constant dense<0.000000e+00> : vector<8x256xf32>
    %83 = tpu.matmul %80, %82, %cst_41 {dimension_numbers = #tpu.dot_dimension_numbers<[1], [0], [0], [1], [0, 0, 1, 1], [], []>} : vector<8x256xbf16>, vector<256x256xbf16>, vector<8x256xf32> -> vector<8x256xf32>
    %84 = arith.addf %74, %83 : vector<8x256xf32>
    %c8_i32_42 = arith.constant 8 : i32
    %85 = arith.addi %3, %c8_i32_42 : i32
    %c8_i32_43 = arith.constant 8 : i32
    %86 = arith.muli %85, %c8_i32_43 : i32
    %87 = tpu.assume_multiple %86, 8 : i32
    %88 = arith.index_cast %87 : i32 to index
    %c0_44 = arith.constant 0 : index
    %89 = vector.load %arg11[%88, %c0_44] : memref<512x256xf32, #tpu.memory_space<vmem>>, vector<8x256xf32>
    %90 = arith.truncf %89 : vector<8x256xf32> to vector<8x256xbf16>
    %c8 = arith.constant 8 : index
    %c0_45 = arith.constant 0 : index
    %c0_46 = arith.constant 0 : index
    %91 = vector.load %arg4[%c8, %c0_45, %c0_46] : memref<32x256x256xbf16, #tpu.memory_space<vmem>>, vector<1x256x256xbf16>
    %92 = vector.shape_cast %91 : vector<1x256x256xbf16> to vector<256x256xbf16>
    %cst_47 = arith.constant dense<0.000000e+00> : vector<8x256xf32>
    %93 = tpu.matmul %90, %92, %cst_47 {dimension_numbers = #tpu.dot_dimension_numbers<[1], [0], [0], [1], [0, 0, 1, 1], [], []>} : vector<8x256xbf16>, vector<256x256xbf16>, vector<8x256xf32> -> vector<8x256xf32>
    %94 = arith.addf %84, %93 : vector<8x256xf32>
    %c9_i32 = arith.constant 9 : i32
    %95 = arith.addi %3, %c9_i32 : i32
    %c8_i32_48 = arith.constant 8 : i32
    %96 = arith.muli %95, %c8_i32_48 : i32
    %97 = tpu.assume_multiple %96, 8 : i32
    %98 = arith.index_cast %97 : i32 to index
    %c0_49 = arith.constant 0 : index
    %99 = vector.load %arg11[%98, %c0_49] : memref<512x256xf32, #tpu.memory_space<vmem>>, vector<8x256xf32>
    %100 = arith.truncf %99 : vector<8x256xf32> to vector<8x256xbf16>
    %c9 = arith.constant 9 : index
    %c0_50 = arith.constant 0 : index
    %c0_51 = arith.constant 0 : index
    %101 = vector.load %arg4[%c9, %c0_50, %c0_51] : memref<32x256x256xbf16, #tpu.memory_space<vmem>>, vector<1x256x256xbf16>
    %102 = vector.shape_cast %101 : vector<1x256x256xbf16> to vector<256x256xbf16>
    %cst_52 = arith.constant dense<0.000000e+00> : vector<8x256xf32>
    %103 = tpu.matmul %100, %102, %cst_52 {dimension_numbers = #tpu.dot_dimension_numbers<[1], [0], [0], [1], [0, 0, 1, 1], [], []>} : vector<8x256xbf16>, vector<256x256xbf16>, vector<8x256xf32> -> vector<8x256xf32>
    %104 = arith.addf %94, %103 : vector<8x256xf32>
    %c10_i32 = arith.constant 10 : i32
    %105 = arith.addi %3, %c10_i32 : i32
    %c8_i32_53 = arith.constant 8 : i32
    %106 = arith.muli %105, %c8_i32_53 : i32
    %107 = tpu.assume_multiple %106, 8 : i32
    %108 = arith.index_cast %107 : i32 to index
    %c0_54 = arith.constant 0 : index
    %109 = vector.load %arg11[%108, %c0_54] : memref<512x256xf32, #tpu.memory_space<vmem>>, vector<8x256xf32>
    %110 = arith.truncf %109 : vector<8x256xf32> to vector<8x256xbf16>
    %c10 = arith.constant 10 : index
    %c0_55 = arith.constant 0 : index
    %c0_56 = arith.constant 0 : index
    %111 = vector.load %arg4[%c10, %c0_55, %c0_56] : memref<32x256x256xbf16, #tpu.memory_space<vmem>>, vector<1x256x256xbf16>
    %112 = vector.shape_cast %111 : vector<1x256x256xbf16> to vector<256x256xbf16>
    %cst_57 = arith.constant dense<0.000000e+00> : vector<8x256xf32>
    %113 = tpu.matmul %110, %112, %cst_57 {dimension_numbers = #tpu.dot_dimension_numbers<[1], [0], [0], [1], [0, 0, 1, 1], [], []>} : vector<8x256xbf16>, vector<256x256xbf16>, vector<8x256xf32> -> vector<8x256xf32>
    %114 = arith.addf %104, %113 : vector<8x256xf32>
    %c11_i32 = arith.constant 11 : i32
    %115 = arith.addi %3, %c11_i32 : i32
    %c8_i32_58 = arith.constant 8 : i32
    %116 = arith.muli %115, %c8_i32_58 : i32
    %117 = tpu.assume_multiple %116, 8 : i32
    %118 = arith.index_cast %117 : i32 to index
    %c0_59 = arith.constant 0 : index
    %119 = vector.load %arg11[%118, %c0_59] : memref<512x256xf32, #tpu.memory_space<vmem>>, vector<8x256xf32>
    %120 = arith.truncf %119 : vector<8x256xf32> to vector<8x256xbf16>
    %c11 = arith.constant 11 : index
    %c0_60 = arith.constant 0 : index
    %c0_61 = arith.constant 0 : index
    %121 = vector.load %arg4[%c11, %c0_60, %c0_61] : memref<32x256x256xbf16, #tpu.memory_space<vmem>>, vector<1x256x256xbf16>
    %122 = vector.shape_cast %121 : vector<1x256x256xbf16> to vector<256x256xbf16>
    %cst_62 = arith.constant dense<0.000000e+00> : vector<8x256xf32>
    %123 = tpu.matmul %120, %122, %cst_62 {dimension_numbers = #tpu.dot_dimension_numbers<[1], [0], [0], [1], [0, 0, 1, 1], [], []>} : vector<8x256xbf16>, vector<256x256xbf16>, vector<8x256xf32> -> vector<8x256xf32>
    %124 = arith.addf %114, %123 : vector<8x256xf32>
    %c12_i32 = arith.constant 12 : i32
    %125 = arith.addi %3, %c12_i32 : i32
    %c8_i32_63 = arith.constant 8 : i32
    %126 = arith.muli %125, %c8_i32_63 : i32
    %127 = tpu.assume_multiple %126, 8 : i32
    %128 = arith.index_cast %127 : i32 to index
    %c0_64 = arith.constant 0 : index
    %129 = vector.load %arg11[%128, %c0_64] : memref<512x256xf32, #tpu.memory_space<vmem>>, vector<8x256xf32>
    %130 = arith.truncf %129 : vector<8x256xf32> to vector<8x256xbf16>
    %c12 = arith.constant 12 : index
    %c0_65 = arith.constant 0 : index
    %c0_66 = arith.constant 0 : index
    %131 = vector.load %arg4[%c12, %c0_65, %c0_66] : memref<32x256x256xbf16, #tpu.memory_space<vmem>>, vector<1x256x256xbf16>
    %132 = vector.shape_cast %131 : vector<1x256x256xbf16> to vector<256x256xbf16>
    %cst_67 = arith.constant dense<0.000000e+00> : vector<8x256xf32>
    %133 = tpu.matmul %130, %132, %cst_67 {dimension_numbers = #tpu.dot_dimension_numbers<[1], [0], [0], [1], [0, 0, 1, 1], [], []>} : vector<8x256xbf16>, vector<256x256xbf16>, vector<8x256xf32> -> vector<8x256xf32>
    %134 = arith.addf %124, %133 : vector<8x256xf32>
    %c13_i32 = arith.constant 13 : i32
    %135 = arith.addi %3, %c13_i32 : i32
    %c8_i32_68 = arith.constant 8 : i32
    %136 = arith.muli %135, %c8_i32_68 : i32
    %137 = tpu.assume_multiple %136, 8 : i32
    %138 = arith.index_cast %137 : i32 to index
    %c0_69 = arith.constant 0 : index
    %139 = vector.load %arg11[%138, %c0_69] : memref<512x256xf32, #tpu.memory_space<vmem>>, vector<8x256xf32>
    %140 = arith.truncf %139 : vector<8x256xf32> to vector<8x256xbf16>
    %c13 = arith.constant 13 : index
    %c0_70 = arith.constant 0 : index
    %c0_71 = arith.constant 0 : index
    %141 = vector.load %arg4[%c13, %c0_70, %c0_71] : memref<32x256x256xbf16, #tpu.memory_space<vmem>>, vector<1x256x256xbf16>
    %142 = vector.shape_cast %141 : vector<1x256x256xbf16> to vector<256x256xbf16>
    %cst_72 = arith.constant dense<0.000000e+00> : vector<8x256xf32>
    %143 = tpu.matmul %140, %142, %cst_72 {dimension_numbers = #tpu.dot_dimension_numbers<[1], [0], [0], [1], [0, 0, 1, 1], [], []>} : vector<8x256xbf16>, vector<256x256xbf16>, vector<8x256xf32> -> vector<8x256xf32>
    %144 = arith.addf %134, %143 : vector<8x256xf32>
    %c14_i32 = arith.constant 14 : i32
    %145 = arith.addi %3, %c14_i32 : i32
    %c8_i32_73 = arith.constant 8 : i32
    %146 = arith.muli %145, %c8_i32_73 : i32
    %147 = tpu.assume_multiple %146, 8 : i32
    %148 = arith.index_cast %147 : i32 to index
    %c0_74 = arith.constant 0 : index
    %149 = vector.load %arg11[%148, %c0_74] : memref<512x256xf32, #tpu.memory_space<vmem>>, vector<8x256xf32>
    %150 = arith.truncf %149 : vector<8x256xf32> to vector<8x256xbf16>
    %c14 = arith.constant 14 : index
    %c0_75 = arith.constant 0 : index
    %c0_76 = arith.constant 0 : index
    %151 = vector.load %arg4[%c14, %c0_75, %c0_76] : memref<32x256x256xbf16, #tpu.memory_space<vmem>>, vector<1x256x256xbf16>
    %152 = vector.shape_cast %151 : vector<1x256x256xbf16> to vector<256x256xbf16>
    %cst_77 = arith.constant dense<0.000000e+00> : vector<8x256xf32>
    %153 = tpu.matmul %150, %152, %cst_77 {dimension_numbers = #tpu.dot_dimension_numbers<[1], [0], [0], [1], [0, 0, 1, 1], [], []>} : vector<8x256xbf16>, vector<256x256xbf16>, vector<8x256xf32> -> vector<8x256xf32>
    %154 = arith.addf %144, %153 : vector<8x256xf32>
    %c15_i32 = arith.constant 15 : i32
    %155 = arith.addi %3, %c15_i32 : i32
    %c8_i32_78 = arith.constant 8 : i32
    %156 = arith.muli %155, %c8_i32_78 : i32
    %157 = tpu.assume_multiple %156, 8 : i32
    %158 = arith.index_cast %157 : i32 to index
    %c0_79 = arith.constant 0 : index
    %159 = vector.load %arg11[%158, %c0_79] : memref<512x256xf32, #tpu.memory_space<vmem>>, vector<8x256xf32>
    %160 = arith.truncf %159 : vector<8x256xf32> to vector<8x256xbf16>
    %c15 = arith.constant 15 : index
    %c0_80 = arith.constant 0 : index
    %c0_81 = arith.constant 0 : index
    %161 = vector.load %arg4[%c15, %c0_80, %c0_81] : memref<32x256x256xbf16, #tpu.memory_space<vmem>>, vector<1x256x256xbf16>
    %162 = vector.shape_cast %161 : vector<1x256x256xbf16> to vector<256x256xbf16>
    %cst_82 = arith.constant dense<0.000000e+00> : vector<8x256xf32>
    %163 = tpu.matmul %160, %162, %cst_82 {dimension_numbers = #tpu.dot_dimension_numbers<[1], [0], [0], [1], [0, 0, 1, 1], [], []>} : vector<8x256xbf16>, vector<256x256xbf16>, vector<8x256xf32> -> vector<8x256xf32>
    %164 = arith.addf %154, %163 : vector<8x256xf32>
    %c16_i32 = arith.constant 16 : i32
    %165 = arith.addi %3, %c16_i32 : i32
    %c8_i32_83 = arith.constant 8 : i32
    %166 = arith.muli %165, %c8_i32_83 : i32
    %167 = tpu.assume_multiple %166, 8 : i32
    %168 = arith.index_cast %167 : i32 to index
    %c0_84 = arith.constant 0 : index
    %169 = vector.load %arg11[%168, %c0_84] : memref<512x256xf32, #tpu.memory_space<vmem>>, vector<8x256xf32>
    %170 = arith.truncf %169 : vector<8x256xf32> to vector<8x256xbf16>
    %c16 = arith.constant 16 : index
    %c0_85 = arith.constant 0 : index
    %c0_86 = arith.constant 0 : index
    %171 = vector.load %arg4[%c16, %c0_85, %c0_86] : memref<32x256x256xbf16, #tpu.memory_space<vmem>>, vector<1x256x256xbf16>
    %172 = vector.shape_cast %171 : vector<1x256x256xbf16> to vector<256x256xbf16>
    %cst_87 = arith.constant dense<0.000000e+00> : vector<8x256xf32>
    %173 = tpu.matmul %170, %172, %cst_87 {dimension_numbers = #tpu.dot_dimension_numbers<[1], [0], [0], [1], [0, 0, 1, 1], [], []>} : vector<8x256xbf16>, vector<256x256xbf16>, vector<8x256xf32> -> vector<8x256xf32>
    %174 = arith.addf %164, %173 : vector<8x256xf32>
    %c17_i32 = arith.constant 17 : i32
    %175 = arith.addi %3, %c17_i32 : i32
    %c8_i32_88 = arith.constant 8 : i32
    %176 = arith.muli %175, %c8_i32_88 : i32
    %177 = tpu.assume_multiple %176, 8 : i32
    %178 = arith.index_cast %177 : i32 to index
    %c0_89 = arith.constant 0 : index
    %179 = vector.load %arg11[%178, %c0_89] : memref<512x256xf32, #tpu.memory_space<vmem>>, vector<8x256xf32>
    %180 = arith.truncf %179 : vector<8x256xf32> to vector<8x256xbf16>
    %c17 = arith.constant 17 : index
    %c0_90 = arith.constant 0 : index
    %c0_91 = arith.constant 0 : index
    %181 = vector.load %arg4[%c17, %c0_90, %c0_91] : memref<32x256x256xbf16, #tpu.memory_space<vmem>>, vector<1x256x256xbf16>
    %182 = vector.shape_cast %181 : vector<1x256x256xbf16> to vector<256x256xbf16>
    %cst_92 = arith.constant dense<0.000000e+00> : vector<8x256xf32>
    %183 = tpu.matmul %180, %182, %cst_92 {dimension_numbers = #tpu.dot_dimension_numbers<[1], [0], [0], [1], [0, 0, 1, 1], [], []>} : vector<8x256xbf16>, vector<256x256xbf16>, vector<8x256xf32> -> vector<8x256xf32>
    %184 = arith.addf %174, %183 : vector<8x256xf32>
    %c18_i32 = arith.constant 18 : i32
    %185 = arith.addi %3, %c18_i32 : i32
    %c8_i32_93 = arith.constant 8 : i32
    %186 = arith.muli %185, %c8_i32_93 : i32
    %187 = tpu.assume_multiple %186, 8 : i32
    %188 = arith.index_cast %187 : i32 to index
    %c0_94 = arith.constant 0 : index
    %189 = vector.load %arg11[%188, %c0_94] : memref<512x256xf32, #tpu.memory_space<vmem>>, vector<8x256xf32>
    %190 = arith.truncf %189 : vector<8x256xf32> to vector<8x256xbf16>
    %c18 = arith.constant 18 : index
    %c0_95 = arith.constant 0 : index
    %c0_96 = arith.constant 0 : index
    %191 = vector.load %arg4[%c18, %c0_95, %c0_96] : memref<32x256x256xbf16, #tpu.memory_space<vmem>>, vector<1x256x256xbf16>
    %192 = vector.shape_cast %191 : vector<1x256x256xbf16> to vector<256x256xbf16>
    %cst_97 = arith.constant dense<0.000000e+00> : vector<8x256xf32>
    %193 = tpu.matmul %190, %192, %cst_97 {dimension_numbers = #tpu.dot_dimension_numbers<[1], [0], [0], [1], [0, 0, 1, 1], [], []>} : vector<8x256xbf16>, vector<256x256xbf16>, vector<8x256xf32> -> vector<8x256xf32>
    %194 = arith.addf %184, %193 : vector<8x256xf32>
    %c19_i32 = arith.constant 19 : i32
    %195 = arith.addi %3, %c19_i32 : i32
    %c8_i32_98 = arith.constant 8 : i32
    %196 = arith.muli %195, %c8_i32_98 : i32
    %197 = tpu.assume_multiple %196, 8 : i32
    %198 = arith.index_cast %197 : i32 to index
    %c0_99 = arith.constant 0 : index
    %199 = vector.load %arg11[%198, %c0_99] : memref<512x256xf32, #tpu.memory_space<vmem>>, vector<8x256xf32>
    %200 = arith.truncf %199 : vector<8x256xf32> to vector<8x256xbf16>
    %c19 = arith.constant 19 : index
    %c0_100 = arith.constant 0 : index
    %c0_101 = arith.constant 0 : index
    %201 = vector.load %arg4[%c19, %c0_100, %c0_101] : memref<32x256x256xbf16, #tpu.memory_space<vmem>>, vector<1x256x256xbf16>
    %202 = vector.shape_cast %201 : vector<1x256x256xbf16> to vector<256x256xbf16>
    %cst_102 = arith.constant dense<0.000000e+00> : vector<8x256xf32>
    %203 = tpu.matmul %200, %202, %cst_102 {dimension_numbers = #tpu.dot_dimension_numbers<[1], [0], [0], [1], [0, 0, 1, 1], [], []>} : vector<8x256xbf16>, vector<256x256xbf16>, vector<8x256xf32> -> vector<8x256xf32>
    %204 = arith.addf %194, %203 : vector<8x256xf32>
    %c20_i32 = arith.constant 20 : i32
    %205 = arith.addi %3, %c20_i32 : i32
    %c8_i32_103 = arith.constant 8 : i32
    %206 = arith.muli %205, %c8_i32_103 : i32
    %207 = tpu.assume_multiple %206, 8 : i32
    %208 = arith.index_cast %207 : i32 to index
    %c0_104 = arith.constant 0 : index
    %209 = vector.load %arg11[%208, %c0_104] : memref<512x256xf32, #tpu.memory_space<vmem>>, vector<8x256xf32>
    %210 = arith.truncf %209 : vector<8x256xf32> to vector<8x256xbf16>
    %c20 = arith.constant 20 : index
    %c0_105 = arith.constant 0 : index
    %c0_106 = arith.constant 0 : index
    %211 = vector.load %arg4[%c20, %c0_105, %c0_106] : memref<32x256x256xbf16, #tpu.memory_space<vmem>>, vector<1x256x256xbf16>
    %212 = vector.shape_cast %211 : vector<1x256x256xbf16> to vector<256x256xbf16>
    %cst_107 = arith.constant dense<0.000000e+00> : vector<8x256xf32>
    %213 = tpu.matmul %210, %212, %cst_107 {dimension_numbers = #tpu.dot_dimension_numbers<[1], [0], [0], [1], [0, 0, 1, 1], [], []>} : vector<8x256xbf16>, vector<256x256xbf16>, vector<8x256xf32> -> vector<8x256xf32>
    %214 = arith.addf %204, %213 : vector<8x256xf32>
    %c21_i32 = arith.constant 21 : i32
    %215 = arith.addi %3, %c21_i32 : i32
    %c8_i32_108 = arith.constant 8 : i32
    %216 = arith.muli %215, %c8_i32_108 : i32
    %217 = tpu.assume_multiple %216, 8 : i32
    %218 = arith.index_cast %217 : i32 to index
    %c0_109 = arith.constant 0 : index
    %219 = vector.load %arg11[%218, %c0_109] : memref<512x256xf32, #tpu.memory_space<vmem>>, vector<8x256xf32>
    %220 = arith.truncf %219 : vector<8x256xf32> to vector<8x256xbf16>
    %c21 = arith.constant 21 : index
    %c0_110 = arith.constant 0 : index
    %c0_111 = arith.constant 0 : index
    %221 = vector.load %arg4[%c21, %c0_110, %c0_111] : memref<32x256x256xbf16, #tpu.memory_space<vmem>>, vector<1x256x256xbf16>
    %222 = vector.shape_cast %221 : vector<1x256x256xbf16> to vector<256x256xbf16>
    %cst_112 = arith.constant dense<0.000000e+00> : vector<8x256xf32>
    %223 = tpu.matmul %220, %222, %cst_112 {dimension_numbers = #tpu.dot_dimension_numbers<[1], [0], [0], [1], [0, 0, 1, 1], [], []>} : vector<8x256xbf16>, vector<256x256xbf16>, vector<8x256xf32> -> vector<8x256xf32>
    %224 = arith.addf %214, %223 : vector<8x256xf32>
    %c22_i32 = arith.constant 22 : i32
    %225 = arith.addi %3, %c22_i32 : i32
    %c8_i32_113 = arith.constant 8 : i32
    %226 = arith.muli %225, %c8_i32_113 : i32
    %227 = tpu.assume_multiple %226, 8 : i32
    %228 = arith.index_cast %227 : i32 to index
    %c0_114 = arith.constant 0 : index
    %229 = vector.load %arg11[%228, %c0_114] : memref<512x256xf32, #tpu.memory_space<vmem>>, vector<8x256xf32>
    %230 = arith.truncf %229 : vector<8x256xf32> to vector<8x256xbf16>
    %c22 = arith.constant 22 : index
    %c0_115 = arith.constant 0 : index
    %c0_116 = arith.constant 0 : index
    %231 = vector.load %arg4[%c22, %c0_115, %c0_116] : memref<32x256x256xbf16, #tpu.memory_space<vmem>>, vector<1x256x256xbf16>
    %232 = vector.shape_cast %231 : vector<1x256x256xbf16> to vector<256x256xbf16>
    %cst_117 = arith.constant dense<0.000000e+00> : vector<8x256xf32>
    %233 = tpu.matmul %230, %232, %cst_117 {dimension_numbers = #tpu.dot_dimension_numbers<[1], [0], [0], [1], [0, 0, 1, 1], [], []>} : vector<8x256xbf16>, vector<256x256xbf16>, vector<8x256xf32> -> vector<8x256xf32>
    %234 = arith.addf %224, %233 : vector<8x256xf32>
    %c23_i32 = arith.constant 23 : i32
    %235 = arith.addi %3, %c23_i32 : i32
    %c8_i32_118 = arith.constant 8 : i32
    %236 = arith.muli %235, %c8_i32_118 : i32
    %237 = tpu.assume_multiple %236, 8 : i32
    %238 = arith.index_cast %237 : i32 to index
    %c0_119 = arith.constant 0 : index
    %239 = vector.load %arg11[%238, %c0_119] : memref<512x256xf32, #tpu.memory_space<vmem>>, vector<8x256xf32>
    %240 = arith.truncf %239 : vector<8x256xf32> to vector<8x256xbf16>
    %c23 = arith.constant 23 : index
    %c0_120 = arith.constant 0 : index
    %c0_121 = arith.constant 0 : index
    %241 = vector.load %arg4[%c23, %c0_120, %c0_121] : memref<32x256x256xbf16, #tpu.memory_space<vmem>>, vector<1x256x256xbf16>
    %242 = vector.shape_cast %241 : vector<1x256x256xbf16> to vector<256x256xbf16>
    %cst_122 = arith.constant dense<0.000000e+00> : vector<8x256xf32>
    %243 = tpu.matmul %240, %242, %cst_122 {dimension_numbers = #tpu.dot_dimension_numbers<[1], [0], [0], [1], [0, 0, 1, 1], [], []>} : vector<8x256xbf16>, vector<256x256xbf16>, vector<8x256xf32> -> vector<8x256xf32>
    %244 = arith.addf %234, %243 : vector<8x256xf32>
    %c24_i32 = arith.constant 24 : i32
    %245 = arith.addi %3, %c24_i32 : i32
    %c8_i32_123 = arith.constant 8 : i32
    %246 = arith.muli %245, %c8_i32_123 : i32
    %247 = tpu.assume_multiple %246, 8 : i32
    %248 = arith.index_cast %247 : i32 to index
    %c0_124 = arith.constant 0 : index
    %249 = vector.load %arg11[%248, %c0_124] : memref<512x256xf32, #tpu.memory_space<vmem>>, vector<8x256xf32>
    %250 = arith.truncf %249 : vector<8x256xf32> to vector<8x256xbf16>
    %c24 = arith.constant 24 : index
    %c0_125 = arith.constant 0 : index
    %c0_126 = arith.constant 0 : index
    %251 = vector.load %arg4[%c24, %c0_125, %c0_126] : memref<32x256x256xbf16, #tpu.memory_space<vmem>>, vector<1x256x256xbf16>
    %252 = vector.shape_cast %251 : vector<1x256x256xbf16> to vector<256x256xbf16>
    %cst_127 = arith.constant dense<0.000000e+00> : vector<8x256xf32>
    %253 = tpu.matmul %250, %252, %cst_127 {dimension_numbers = #tpu.dot_dimension_numbers<[1], [0], [0], [1], [0, 0, 1, 1], [], []>} : vector<8x256xbf16>, vector<256x256xbf16>, vector<8x256xf32> -> vector<8x256xf32>
    %254 = arith.addf %244, %253 : vector<8x256xf32>
    %c25_i32 = arith.constant 25 : i32
    %255 = arith.addi %3, %c25_i32 : i32
    %c8_i32_128 = arith.constant 8 : i32
    %256 = arith.muli %255, %c8_i32_128 : i32
    %257 = tpu.assume_multiple %256, 8 : i32
    %258 = arith.index_cast %257 : i32 to index
    %c0_129 = arith.constant 0 : index
    %259 = vector.load %arg11[%258, %c0_129] : memref<512x256xf32, #tpu.memory_space<vmem>>, vector<8x256xf32>
    %260 = arith.truncf %259 : vector<8x256xf32> to vector<8x256xbf16>
    %c25 = arith.constant 25 : index
    %c0_130 = arith.constant 0 : index
    %c0_131 = arith.constant 0 : index
    %261 = vector.load %arg4[%c25, %c0_130, %c0_131] : memref<32x256x256xbf16, #tpu.memory_space<vmem>>, vector<1x256x256xbf16>
    %262 = vector.shape_cast %261 : vector<1x256x256xbf16> to vector<256x256xbf16>
    %cst_132 = arith.constant dense<0.000000e+00> : vector<8x256xf32>
    %263 = tpu.matmul %260, %262, %cst_132 {dimension_numbers = #tpu.dot_dimension_numbers<[1], [0], [0], [1], [0, 0, 1, 1], [], []>} : vector<8x256xbf16>, vector<256x256xbf16>, vector<8x256xf32> -> vector<8x256xf32>
    %264 = arith.addf %254, %263 : vector<8x256xf32>
    %c26_i32 = arith.constant 26 : i32
    %265 = arith.addi %3, %c26_i32 : i32
    %c8_i32_133 = arith.constant 8 : i32
    %266 = arith.muli %265, %c8_i32_133 : i32
    %267 = tpu.assume_multiple %266, 8 : i32
    %268 = arith.index_cast %267 : i32 to index
    %c0_134 = arith.constant 0 : index
    %269 = vector.load %arg11[%268, %c0_134] : memref<512x256xf32, #tpu.memory_space<vmem>>, vector<8x256xf32>
    %270 = arith.truncf %269 : vector<8x256xf32> to vector<8x256xbf16>
    %c26 = arith.constant 26 : index
    %c0_135 = arith.constant 0 : index
    %c0_136 = arith.constant 0 : index
    %271 = vector.load %arg4[%c26, %c0_135, %c0_136] : memref<32x256x256xbf16, #tpu.memory_space<vmem>>, vector<1x256x256xbf16>
    %272 = vector.shape_cast %271 : vector<1x256x256xbf16> to vector<256x256xbf16>
    %cst_137 = arith.constant dense<0.000000e+00> : vector<8x256xf32>
    %273 = tpu.matmul %270, %272, %cst_137 {dimension_numbers = #tpu.dot_dimension_numbers<[1], [0], [0], [1], [0, 0, 1, 1], [], []>} : vector<8x256xbf16>, vector<256x256xbf16>, vector<8x256xf32> -> vector<8x256xf32>
    %274 = arith.addf %264, %273 : vector<8x256xf32>
    %c27_i32 = arith.constant 27 : i32
    %275 = arith.addi %3, %c27_i32 : i32
    %c8_i32_138 = arith.constant 8 : i32
    %276 = arith.muli %275, %c8_i32_138 : i32
    %277 = tpu.assume_multiple %276, 8 : i32
    %278 = arith.index_cast %277 : i32 to index
    %c0_139 = arith.constant 0 : index
    %279 = vector.load %arg11[%278, %c0_139] : memref<512x256xf32, #tpu.memory_space<vmem>>, vector<8x256xf32>
    %280 = arith.truncf %279 : vector<8x256xf32> to vector<8x256xbf16>
    %c27 = arith.constant 27 : index
    %c0_140 = arith.constant 0 : index
    %c0_141 = arith.constant 0 : index
    %281 = vector.load %arg4[%c27, %c0_140, %c0_141] : memref<32x256x256xbf16, #tpu.memory_space<vmem>>, vector<1x256x256xbf16>
    %282 = vector.shape_cast %281 : vector<1x256x256xbf16> to vector<256x256xbf16>
    %cst_142 = arith.constant dense<0.000000e+00> : vector<8x256xf32>
    %283 = tpu.matmul %280, %282, %cst_142 {dimension_numbers = #tpu.dot_dimension_numbers<[1], [0], [0], [1], [0, 0, 1, 1], [], []>} : vector<8x256xbf16>, vector<256x256xbf16>, vector<8x256xf32> -> vector<8x256xf32>
    %284 = arith.addf %274, %283 : vector<8x256xf32>
    %c28_i32 = arith.constant 28 : i32
    %285 = arith.addi %3, %c28_i32 : i32
    %c8_i32_143 = arith.constant 8 : i32
    %286 = arith.muli %285, %c8_i32_143 : i32
    %287 = tpu.assume_multiple %286, 8 : i32
    %288 = arith.index_cast %287 : i32 to index
    %c0_144 = arith.constant 0 : index
    %289 = vector.load %arg11[%288, %c0_144] : memref<512x256xf32, #tpu.memory_space<vmem>>, vector<8x256xf32>
    %290 = arith.truncf %289 : vector<8x256xf32> to vector<8x256xbf16>
    %c28 = arith.constant 28 : index
    %c0_145 = arith.constant 0 : index
    %c0_146 = arith.constant 0 : index
    %291 = vector.load %arg4[%c28, %c0_145, %c0_146] : memref<32x256x256xbf16, #tpu.memory_space<vmem>>, vector<1x256x256xbf16>
    %292 = vector.shape_cast %291 : vector<1x256x256xbf16> to vector<256x256xbf16>
    %cst_147 = arith.constant dense<0.000000e+00> : vector<8x256xf32>
    %293 = tpu.matmul %290, %292, %cst_147 {dimension_numbers = #tpu.dot_dimension_numbers<[1], [0], [0], [1], [0, 0, 1, 1], [], []>} : vector<8x256xbf16>, vector<256x256xbf16>, vector<8x256xf32> -> vector<8x256xf32>
    %294 = arith.addf %284, %293 : vector<8x256xf32>
    %c29_i32 = arith.constant 29 : i32
    %295 = arith.addi %3, %c29_i32 : i32
    %c8_i32_148 = arith.constant 8 : i32
    %296 = arith.muli %295, %c8_i32_148 : i32
    %297 = tpu.assume_multiple %296, 8 : i32
    %298 = arith.index_cast %297 : i32 to index
    %c0_149 = arith.constant 0 : index
    %299 = vector.load %arg11[%298, %c0_149] : memref<512x256xf32, #tpu.memory_space<vmem>>, vector<8x256xf32>
    %300 = arith.truncf %299 : vector<8x256xf32> to vector<8x256xbf16>
    %c29 = arith.constant 29 : index
    %c0_150 = arith.constant 0 : index
    %c0_151 = arith.constant 0 : index
    %301 = vector.load %arg4[%c29, %c0_150, %c0_151] : memref<32x256x256xbf16, #tpu.memory_space<vmem>>, vector<1x256x256xbf16>
    %302 = vector.shape_cast %301 : vector<1x256x256xbf16> to vector<256x256xbf16>
    %cst_152 = arith.constant dense<0.000000e+00> : vector<8x256xf32>
    %303 = tpu.matmul %300, %302, %cst_152 {dimension_numbers = #tpu.dot_dimension_numbers<[1], [0], [0], [1], [0, 0, 1, 1], [], []>} : vector<8x256xbf16>, vector<256x256xbf16>, vector<8x256xf32> -> vector<8x256xf32>
    %304 = arith.addf %294, %303 : vector<8x256xf32>
    %c30_i32 = arith.constant 30 : i32
    %305 = arith.addi %3, %c30_i32 : i32
    %c8_i32_153 = arith.constant 8 : i32
    %306 = arith.muli %305, %c8_i32_153 : i32
    %307 = tpu.assume_multiple %306, 8 : i32
    %308 = arith.index_cast %307 : i32 to index
    %c0_154 = arith.constant 0 : index
    %309 = vector.load %arg11[%308, %c0_154] : memref<512x256xf32, #tpu.memory_space<vmem>>, vector<8x256xf32>
    %310 = arith.truncf %309 : vector<8x256xf32> to vector<8x256xbf16>
    %c30 = arith.constant 30 : index
    %c0_155 = arith.constant 0 : index
    %c0_156 = arith.constant 0 : index
    %311 = vector.load %arg4[%c30, %c0_155, %c0_156] : memref<32x256x256xbf16, #tpu.memory_space<vmem>>, vector<1x256x256xbf16>
    %312 = vector.shape_cast %311 : vector<1x256x256xbf16> to vector<256x256xbf16>
    %cst_157 = arith.constant dense<0.000000e+00> : vector<8x256xf32>
    %313 = tpu.matmul %310, %312, %cst_157 {dimension_numbers = #tpu.dot_dimension_numbers<[1], [0], [0], [1], [0, 0, 1, 1], [], []>} : vector<8x256xbf16>, vector<256x256xbf16>, vector<8x256xf32> -> vector<8x256xf32>
    %314 = arith.addf %304, %313 : vector<8x256xf32>
    %c31_i32 = arith.constant 31 : i32
    %315 = arith.addi %3, %c31_i32 : i32
    %c8_i32_158 = arith.constant 8 : i32
    %316 = arith.muli %315, %c8_i32_158 : i32
    %317 = tpu.assume_multiple %316, 8 : i32
    %318 = arith.index_cast %317 : i32 to index
    %c0_159 = arith.constant 0 : index
    %319 = vector.load %arg11[%318, %c0_159] : memref<512x256xf32, #tpu.memory_space<vmem>>, vector<8x256xf32>
    %320 = arith.truncf %319 : vector<8x256xf32> to vector<8x256xbf16>
    %c31 = arith.constant 31 : index
    %c0_160 = arith.constant 0 : index
    %c0_161 = arith.constant 0 : index
    %321 = vector.load %arg4[%c31, %c0_160, %c0_161] : memref<32x256x256xbf16, #tpu.memory_space<vmem>>, vector<1x256x256xbf16>
    %322 = vector.shape_cast %321 : vector<1x256x256xbf16> to vector<256x256xbf16>
    %cst_162 = arith.constant dense<0.000000e+00> : vector<8x256xf32>
    %323 = tpu.matmul %320, %322, %cst_162 {dimension_numbers = #tpu.dot_dimension_numbers<[1], [0], [0], [1], [0, 0, 1, 1], [], []>} : vector<8x256xbf16>, vector<256x256xbf16>, vector<8x256xf32> -> vector<8x256xf32>
    %324 = arith.addf %314, %323 : vector<8x256xf32>
    %c0_163 = arith.constant 0 : index
    %c0_164 = arith.constant 0 : index
    %325 = vector.load %arg12[%c0_163, %c0_164] : memref<8x256xf32, #tpu.memory_space<vmem>>, vector<8x256xf32>
    tpu.vector_store %arg12[%c0_163, %c0_164], %324 {strides = array<i32>} : memref<8x256xf32, #tpu.memory_space<vmem>>, vector<8x256xf32>,
    %c1_i32_165 = arith.constant 1 : i32
    %326 = arith.cmpi eq, %arg0, %c1_i32_165 : i32
    %327 = arith.extui %326 : i1 to i32
    %c0_i32_166 = arith.constant 0 : i32
    %328 = arith.cmpi ne, %327, %c0_i32_166 : i32
    scf.if %328 {
      %c0_167 = arith.constant 0 : index
      %c0_168 = arith.constant 0 : index
      %329 = vector.load %arg12[%c0_167, %c0_168] : memref<8x256xf32, #tpu.memory_space<vmem>>, vector<8x256xf32>
      %c0_169 = arith.constant 0 : index
      %c0_170 = arith.constant 0 : index
      %330 = vector.load %arg5[%c0_169, %c0_170] : memref<1x256xf32, #tpu.memory_space<vmem>>, vector<1x256xf32>
      %331 = vector.broadcast %330 : vector<1x256xf32> to vector<8x256xf32>
      %332 = arith.addf %329, %331 : vector<8x256xf32>
      %cst_171 = arith.constant 0.000000e+00 : f32
      %333 = vector.broadcast %cst_171 : f32 to vector<8x256xf32>
      %334 = arith.maximumf %332, %333 : vector<8x256xf32>
      %335 = arith.truncf %334 : vector<8x256xf32> to vector<8x256xbf16>
      %c0_172 = arith.constant 0 : index
      %c0_173 = arith.constant 0 : index
      %c0_174 = arith.constant 0 : index
      %336 = vector.load %arg6[%c0_172, %c0_173, %c0_174] : memref<3x256x256xbf16, #tpu.memory_space<vmem>>, vector<1x256x256xbf16>
      %337 = vector.shape_cast %336 : vector<1x256x256xbf16> to vector<256x256xbf16>
      %cst_175 = arith.constant dense<0.000000e+00> : vector<8x256xf32>
      %338 = tpu.matmul %335, %337, %cst_175 {dimension_numbers = #tpu.dot_dimension_numbers<[1], [0], [0], [1], [0, 0, 1, 1], [], []>} : vector<8x256xbf16>, vector<256x256xbf16>, vector<8x256xf32> -> vector<8x256xf32>
      %c0_176 = arith.constant 0 : index
      %c0_177 = arith.constant 0 : index
      %c0_178 = arith.constant 0 : index
      %339 = vector.load %arg7[%c0_176, %c0_177, %c0_178] : memref<3x1x256xf32, #tpu.memory_space<vmem>>, vector<1x1x256xf32>
      %340 = vector.shape_cast %339 : vector<1x1x256xf32> to vector<1x256xf32>
      %341 = vector.broadcast %340 : vector<1x256xf32> to vector<8x256xf32>
      %342 = arith.addf %338, %341 : vector<8x256xf32>
      %cst_179 = arith.constant 0.000000e+00 : f32
      %343 = vector.broadcast %cst_179 : f32 to vector<8x256xf32>
      %344 = arith.maximumf %342, %343 : vector<8x256xf32>
      %345 = arith.truncf %344 : vector<8x256xf32> to vector<8x256xbf16>
      %c1_180 = arith.constant 1 : index
      %c0_181 = arith.constant 0 : index
      %c0_182 = arith.constant 0 : index
      %346 = vector.load %arg6[%c1_180, %c0_181, %c0_182] : memref<3x256x256xbf16, #tpu.memory_space<vmem>>, vector<1x256x256xbf16>
      %347 = vector.shape_cast %346 : vector<1x256x256xbf16> to vector<256x256xbf16>
      %cst_183 = arith.constant dense<0.000000e+00> : vector<8x256xf32>
      %348 = tpu.matmul %345, %347, %cst_183 {dimension_numbers = #tpu.dot_dimension_numbers<[1], [0], [0], [1], [0, 0, 1, 1], [], []>} : vector<8x256xbf16>, vector<256x256xbf16>, vector<8x256xf32> -> vector<8x256xf32>
      %c1_184 = arith.constant 1 : index
      %c0_185 = arith.constant 0 : index
      %c0_186 = arith.constant 0 : index
      %349 = vector.load %arg7[%c1_184, %c0_185, %c0_186] : memref<3x1x256xf32, #tpu.memory_space<vmem>>, vector<1x1x256xf32>
      %350 = vector.shape_cast %349 : vector<1x1x256xf32> to vector<1x256xf32>
      %351 = vector.broadcast %350 : vector<1x256xf32> to vector<8x256xf32>
      %352 = arith.addf %348, %351 : vector<8x256xf32>
      %cst_187 = arith.constant 0.000000e+00 : f32
      %353 = vector.broadcast %cst_187 : f32 to vector<8x256xf32>
      %354 = arith.maximumf %352, %353 : vector<8x256xf32>
      %355 = arith.truncf %354 : vector<8x256xf32> to vector<8x256xbf16>
      %c2_188 = arith.constant 2 : index
      %c0_189 = arith.constant 0 : index
      %c0_190 = arith.constant 0 : index
      %356 = vector.load %arg6[%c2_188, %c0_189, %c0_190] : memref<3x256x256xbf16, #tpu.memory_space<vmem>>, vector<1x256x256xbf16>
      %357 = vector.shape_cast %356 : vector<1x256x256xbf16> to vector<256x256xbf16>
      %cst_191 = arith.constant dense<0.000000e+00> : vector<8x256xf32>
      %358 = tpu.matmul %355, %357, %cst_191 {dimension_numbers = #tpu.dot_dimension_numbers<[1], [0], [0], [1], [0, 0, 1, 1], [], []>} : vector<8x256xbf16>, vector<256x256xbf16>, vector<8x256xf32> -> vector<8x256xf32>
      %c2_192 = arith.constant 2 : index
      %c0_193 = arith.constant 0 : index
      %c0_194 = arith.constant 0 : index
      %359 = vector.load %arg7[%c2_192, %c0_193, %c0_194] : memref<3x1x256xf32, #tpu.memory_space<vmem>>, vector<1x1x256xf32>
      %360 = vector.shape_cast %359 : vector<1x1x256xf32> to vector<1x256xf32>
      %361 = vector.broadcast %360 : vector<1x256xf32> to vector<8x256xf32>
      %362 = arith.addf %358, %361 : vector<8x256xf32>
      %cst_195 = arith.constant 0.000000e+00 : f32
      %363 = vector.broadcast %cst_195 : f32 to vector<8x256xf32>
      %364 = arith.maximumf %362, %363 : vector<8x256xf32>
      %365 = arith.truncf %364 : vector<8x256xf32> to vector<8x256xbf16>
      %c0_196 = arith.constant 0 : index
      %c0_197 = arith.constant 0 : index
      %366 = vector.load %arg8[%c0_196, %c0_197] : memref<256x128xbf16, #tpu.memory_space<vmem>>, vector<256x128xbf16>
      %cst_198 = arith.constant dense<0.000000e+00> : vector<8x128xf32>
      %367 = tpu.matmul %365, %366, %cst_198 {dimension_numbers = #tpu.dot_dimension_numbers<[1], [0], [0], [1], [0, 0, 1, 1], [], []>} : vector<8x256xbf16>, vector<256x128xbf16>, vector<8x128xf32> -> vector<8x128xf32>
      %c0_199 = arith.constant 0 : index
      %c0_200 = arith.constant 0 : index
      %368 = vector.load %arg9[%c0_199, %c0_200] : memref<1x128xf32, #tpu.memory_space<vmem>>, vector<1x128xf32>
      %369 = vector.broadcast %368 : vector<1x128xf32> to vector<8x128xf32>
      %370 = arith.addf %367, %369 : vector<8x128xf32>
      %c0_201 = arith.constant 0 : index
      %c0_202 = arith.constant 0 : index
      %371 = vector.load %arg10[%c0_201, %c0_202] : memref<8x128xf32, #tpu.memory_space<vmem>>, vector<8x128xf32>
      tpu.vector_store %arg10[%c0_201, %c0_202], %370 {strides = array<i32>} : memref<8x128xf32, #tpu.memory_space<vmem>>, vector<8x128xf32>,
    } else {
    }
    return
  }
  func.func @transform_0(%arg0: i32) -> (i32, i32) {
    %c0_i32 = arith.constant 0 : i32
    %c0_i32_0 = arith.constant 0 : i32
    %c0_i32_1 = arith.constant 0 : i32
    return %c0_i32, %c0_i32_0 : i32, i32
  }
  func.func @transform_1(%arg0: i32) -> (i32, i32) {
    %c0_i32 = arith.constant 0 : i32
    %c0_i32_0 = arith.constant 0 : i32
    %c0_i32_1 = arith.constant 0 : i32
    return %c0_i32, %c0_i32_0 : i32, i32
  }
  func.func @transform_2(%arg0: i32) -> (i32, i32) {
    %c0_i32 = arith.constant 0 : i32
    %c0_i32_0 = arith.constant 0 : i32
    %c0_i32_1 = arith.constant 0 : i32
    return %c0_i32, %c0_i32_0 : i32, i32
  }
  func.func @transform_3(%arg0: i32) -> (i32, i32, i32) {
    %c0_i32 = arith.constant 0 : i32
    %c0_i32_0 = arith.constant 0 : i32
    %c0_i32_1 = arith.constant 0 : i32
    return %arg0, %c0_i32, %c0_i32_0 : i32, i32, i32
  }
  func.func @transform_4(%arg0: i32) -> (i32, i32) {
    %c0_i32 = arith.constant 0 : i32
    %c0_i32_0 = arith.constant 0 : i32
    %c0_i32_1 = arith.constant 0 : i32
    return %c0_i32, %c0_i32_0 : i32, i32
  }
  func.func @transform_5(%arg0: i32) -> (i32, i32, i32) {
    %c0_i32 = arith.constant 0 : i32
    %c0_i32_0 = arith.constant 0 : i32
    %c0_i32_1 = arith.constant 0 : i32
    %c0_i32_2 = arith.constant 0 : i32
    return %c0_i32, %c0_i32_0, %c0_i32_1 : i32, i32, i32
  }
  func.func @transform_6(%arg0: i32) -> (i32, i32, i32) {
    %c0_i32 = arith.constant 0 : i32
    %c0_i32_0 = arith.constant 0 : i32
    %c0_i32_1 = arith.constant 0 : i32
    %c0_i32_2 = arith.constant 0 : i32
    return %c0_i32, %c0_i32_0, %c0_i32_1 : i32, i32, i32
  }
  func.func @transform_7(%arg0: i32) -> (i32, i32) {
    %c0_i32 = arith.constant 0 : i32
    %c0_i32_0 = arith.constant 0 : i32
    %c0_i32_1 = arith.constant 0 : i32
    return %c0_i32, %c0_i32_0 : i32, i32
  }
  func.func @transform_8(%arg0: i32) -> (i32, i32) {
    %c0_i32 = arith.constant 0 : i32
    %c0_i32_0 = arith.constant 0 : i32
    %c0_i32_1 = arith.constant 0 : i32
    return %c0_i32, %c0_i32_0 : i32, i32
  }
  func.func @transform_9(%arg0: i32) -> (i32, i32) {
    %c0_i32 = arith.constant 0 : i32
    %c0_i32_0 = arith.constant 0 : i32
    %c0_i32_1 = arith.constant 0 : i32
    return %c0_i32, %c0_i32_0 : i32, i32
  }
}

</mosaic_0001>

<bundles_post_ra>
// kernel: geometric_autoencoder_forward.1
= control target key start
LH: loop header
LB: loop body
LE: loop exit
PB: predicated region body
PF: predicated region fallthrough
CT: control target
= control target key end

     0   :  { %s21283_s0 = inlined_call_operand.vmem [shape: bf16[512,32], index: 0, kind: input, shape index: {}]   ;;  %s21284_s1 = inlined_call_operand.hbm [shape: bf16[32,256], index: 1, kind: input, shape index: {}]   ;;  %s21285_s2 = inlined_call_operand.hbm [shape: f32[1,256], index: 2, kind: input, shape index: {}]   ;;  %s21286_s3 = inlined_call_operand.hbm [shape: bf16[64,256,256], index: 3, kind: input, shape index: {}]   ;;  %s21287_s4 = inlined_call_operand.hbm [shape: f32[1,256], index: 4, kind: input, shape index: {}]   ;;  %s21288_s5 = inlined_call_operand.hbm [shape: bf16[3,256,256], index: 5, kind: input, shape index: {}]   ;;  %s21289_s6 = inlined_call_operand.hbm [shape: f32[3,1,256], index: 6, kind: input, shape index: {}]   ;;  %s21290_s7 = inlined_call_operand.hbm [shape: bf16[256,128], index: 7, kind: input, shape index: {}]   ;;  %s21291_s8 = inlined_call_operand.hbm [shape: f32[1,128], index: 8, kind: input, shape index: {}]   ;;  %s21292_s9 = inlined_call_operand.vmem [shape: f32[8,128], index: 9, kind: output, shape index: {}]  }
   0x1   :  { %21294 = sst [smem:[#allocation22_spill]] %s21284_s1 }
   0x2   :  { %21295 = sst [smem:[#allocation23_spill]] %s21285_s2 }
   0x3   :  { %14 = vsyncpa [#allocation5], 0 }
   0x4   :  { %15 = vsyncpa [#allocation7], 0 }
   0x5   :  { %16 = vsyncpa [#allocation11], 0 }
   0x6   :  { %17 = vsyncpa [#allocation14], 0  ;;  %s18421_s30 = smov 0   ;;  %s18423_s10 = smov 0  }
   0x7   :  { %s18425_s11 = smov 0   ;;  %s18427_s12 = smov 0  }
   0x8 LB: > { %s21296_s1 = sld [smem:[#allocation22_spill]]  ;;  %s18445_s16 = sadd.s32 4294967295, %s18355_s12   ;;  %s18355_s12 = sphi %s18427_s12, %s21306_s12   ;;  %s18351_s11 = sphi %s18425_s11, %s21305_s11   ;;  %s18347_s10 = sphi %s18423_s10, %s21304_s10   ;;  %s18343_s30 = sphi %s18421_s30, %s21303_s30  }
   0x9   : > { %p10773_p0 = scmp.ge.s32.totalorder %s18355_s12, 1  ;;  %p107_p1 = scmp.eq.s32.totalorder %s18445_s16, 0 }
   0xa   : > { %p243_p2 = scmp.lt.s32.totalorder %s18355_s12, 3  ;;  %p10774_p3 = scmp.ne.s32.totalorder %s18445_s16, 0 }
   0xb   : > { %s18357_s18 = smov [#allocation4]   ;;  %s21298_s2 = sld [smem:[#allocation23_spill]] }
   0xc   : > { %p18451_p4 = pnand %p10773_p0, %p243_p2  ;;  %s259_s19 = sshll.u32 %s18357_s18, 4  ;;  %s260_s19 = int_to_ptr.vmem [resolvable:$true] %s259_s19 }
   0xd   : > { %s295_s26 = sshll.u32 %s21288_s5, 4  ;;  %s18358_s27 = smov [#allocation6]   ;;  %s296_s26 = int_to_ptr.hbm [resolvable:$true] %s295_s26 }
   0xe   : > { %s257_s15 = sshll.u32 %s21296_s1, 4  ;;  %p17973_p5 = pneg %p18451_p4  ;;  %s258_s15 = int_to_ptr.hbm [resolvable:$true] %s257_s15 }
   0xf   : > { %s274_s28 = sshll.u32 %s18358_s27, 4  ;;  %s21293_s29 = smov 128   ;;  %s275_s28 = int_to_ptr.vmem [resolvable:$true] %s274_s28 }
  0x10   : > { %p18462_p6 = pnand %p17973_p5, %p107_p1  ;;  %s18360_s13 = smov 8  }
  0x11   : > { %s272_s22 = sshll.u32 %s21298_s2, 4  ;;  %s323_s20 = sshll.u32 %s21290_s7, 4  ;;  %s273_s22 = int_to_ptr.hbm [resolvable:$true] %s272_s22  ;;  %s324_s20 = int_to_ptr.hbm [resolvable:$true] %s323_s20 }
  0x12   : > { %17976 = dma.hbm_to_vmem [thread:$0]  (!%p18462_p6), %s258_s15, 512, %s260_s19, [#allocation5], %s21293_s29, %s21293_s29, %s18360_s13  }
  0x13   : > { %17979 = dma.hbm_to_vmem [thread:$0]  (!%p18462_p6), %s273_s22, 32, %s275_s28, [#allocation7]  }
  0x14   : > { %s18361_s21 = smov [#allocation10]   ;;  %s18362_s25 = smov [#allocation13]  }
  0x15   : > { %s297_s24 = sshll.u32 %s18361_s21, 4  ;;  %s325_s15 = sshll.u32 %s18362_s25, 4  ;;  %s298_s24 = int_to_ptr.vmem [resolvable:$true] %s297_s24  ;;  %s326_s15 = int_to_ptr.vmem [resolvable:$true] %s325_s15 }
  0x16   : > { %17985 = dma.hbm_to_vmem [thread:$0]  (!%p18462_p6), %s296_s26, 12288, %s298_s24, [#allocation11], %s21293_s29, %s21293_s29, %s18360_s13  }
  0x17   : > { %s18363_s19 = smov 64   ;;  %s18364_s22 = smov 4  }
  0x18   : > { %17991 = dma.hbm_to_vmem [thread:$0]  (!%p18462_p6), %s324_s20, 2048, %s326_s15, [#allocation14], %s18363_s19, %s18363_s19, %s18364_s22  }
  0x19   : > { %s284_s14 = sshll.u32 %s21287_s4, 4  ;;  %s18365_s18 = smov [#allocation9]   ;;  %s285_s14 = int_to_ptr.hbm [resolvable:$true] %s284_s14 }
  0x1a   : > { %s286_s21 = sshll.u32 %s18365_s18, 4  ;;  %s309_s26 = sshll.u32 %s21289_s6, 4  ;;  %s287_s21 = int_to_ptr.vmem [resolvable:$true] %s286_s21  ;;  %s310_s26 = int_to_ptr.hbm [resolvable:$true] %s309_s26 }
  0x1b   : > { %17982 = dma.hbm_to_vmem [thread:$0]  (!%p18462_p6), %s285_s14, 32, %s287_s21, [#allocation7]  }
  0x1c   : > { %s18366_s20 = smov [#allocation12]   ;;  %s18367_s25 = smov 32  }
  0x1d   : > { %s311_s24 = sshll.u32 %s18366_s20, 4  ;;  %s18368_s15 = smov 2   ;;  %s312_s24 = int_to_ptr.vmem [resolvable:$true] %s311_s24 }
  0x1e   : > { %17988 = dma.hbm_to_vmem [thread:$0]  (!%p18462_p6), %s310_s26, 96, %s312_s24, [#allocation11], %s18367_s25, %s18367_s25, %s18368_s15  }
  0x1f   : > { %s338_s19 = sshll.u32 %s21291_s8, 4  ;;  %s18369_s22 = smov [#allocation15]   ;;  %s339_s19 = int_to_ptr.hbm [resolvable:$true] %s338_s19 }
  0x20   : > { %s340_s27 = sshll.u32 %s18369_s22, 4  ;;  %s18502_s28 = sadd.s32 1, %s18355_s12   ;;  %s341_s27 = int_to_ptr.vmem [resolvable:$true] %s340_s27 }
  0x21   : > { %17994 = dma.hbm_to_vmem [thread:$0]  (!%p18462_p6), %s339_s19, 16, %s341_s27, [#allocation14]  }
  0x22   : > { %s90_s14 = ssub.s32 %s18355_s12, %s18502_s28  ;;  %s93_s18 = sadd.s32 1, %s18351_s11 }
  0x23   : > { %p91_p7 = scmp.eq.s32.totalorder %s90_s14, 0  ;;  %p100_p8 = scmp.ne.s32.totalorder %s18351_s11, %s18347_s10 }
  0x24   : > { %p101_p9 = scmp.eq.s32.totalorder %s18355_s12, 0  ;;  %p106_p10 = scmp.ne.s32.totalorder %s18347_s10, %s18343_s30 }
  0x25   : > { %s18513_s21 = scalar_select %p91_p7, %s18351_s11, %s93_s18  }
  0x26   : > { %p18517_p11 = por %p107_p1, %p106_p10  ;;  %p102_p12 = por %p101_p9, %p100_p8 }
  0x27   : > { %p18006_p13 = scmp.lt.s32.totalorder %s18355_s12, 2  ;;  %s351_s23 = sand.u32 1, %s18355_s12  }
  0x28   : > { %s353_s20 = sand.u32 1, %s18351_s11   ;;  %s16641_s25 = sshll.u32 %s18355_s12, 13 }
  0x29   : > { %s10782_s24 = sshll.u32 %s353_s20, 13  ;;  %s361_s2 = scalar_lea.hbm %s21286_s3, %s16641_s25 }
  0x2a   : > { %s362_s19 = sshll.u32 %s361_s2, 4  ;;  %s355_s22 = scalar_lea.vmem [#allocation8], %s10782_s24  ;;  %s363_s19 = int_to_ptr.hbm [resolvable:$true] %s362_s19 }
  0x2b   : > { %s364_s30 = sshll.u32 %s355_s22, 4  ;;  %p18528_p0 = pnand %p18006_p13, %p102_p12  ;;  %s365_s30 = int_to_ptr.vmem [resolvable:$true] %s364_s30 }
  0x2c   : > { %s352_s14 = scalar_lea.sflag [#allocation5], %s351_s23  ;;  %s18271_s18 = sshra.s32 %s363_s19, 4  ;;  %s18272_s18 = int_to_ptr.hbm [resolvable:$true] %s18271_s18 }
  0x2d   : > { %s18273_s29 = scalar_lea.hbm %s18272_s18, 8192  ;;  %p18275_p5 = pneg %p18528_p0 }
  0x2e   : > { %p18274_p2 = scmp.ne.s32.totalorder %s18272_s18, %s18273_s29  ;;  %s18278_s24 = scalar_lea.hbm %s21286_s3, 16384 }
  0x2f   : > { %p18279_p8 = scmp.lt.s32.totalorder %s18272_s18, %s21286_s3  ;;  %p18280_p9 = scmp.lt.s32.totalorder %s18278_s24, %s18273_s29 }
  0x30   : > { %p18276_p6 = pnand %p18275_p5, %p18274_p2 }
  0x31   : > { %p18281_p10 = por %p18280_p9, %p18279_p8 }
  0x32   : > { %p18277_p7 = pneg %p18276_p6 }
  0x34   : > { %p18282_p12 = pnand %p18281_p10, %p18277_p7 }
  0x36   : > { %18285 = shalt.err (!%p18282_p12)
}
  0x37   : > { %s21302_s23 = smov 128   ;;  %376 = sbr.rel (%p18451_p4) target bundleno = 2229 (0x8b5), region = 56 }
  0x38   : > { %17998 = dma.hbm_to_vmem [thread:$0]  (!%p18528_p0), %s363_s19, 131072, %s365_s30, %s352_s14, %s21302_s23, %s21302_s23, %s18360_s13  }
  0x3c   : > { %18318 = dma.done.wait (%p107_p1), [#allocation5], 512  }
  0x3d   : > { %18320 = vsyncadd (%p107_p1), [#allocation5], 4294966784 }
  0x3e   : > { %18322 = dma.done.wait (%p107_p1), [#allocation7], 32  }
  0x3f   : > { %18324 = vsyncadd (%p107_p1), [#allocation7], 4294967264  ;;  %s388_s29 = sand.u32 1, %s18445_s16   ;;  %s390_s13 = sand.u32 1, %s18347_s10  }
  0x40   : > { %s10789_s1 = sshll.u32 %s390_s13, 13  ;;  %s389_s17 = scalar_lea.sflag [#allocation5], %s388_s29 }
  0x41   : > { %s18557_s2 = scalar_lea.vmem [#allocation8], %s10789_s1 }
  0x42   : > { %18326 = dma.done.wait (%p18517_p11), %s389_s17, 131072  }
  0x43   : > { %18328 = vsyncadd (%p18517_p11), %s389_s17, 4294836224 }
  0x44   : > { %18330 = dma.done.wait (%p107_p1), [#allocation7], 32  }
  0x45   : > { %18332 = vsyncadd (%p107_p1), [#allocation7], 4294967264 }
  0x46   : > { %18334 = dma.done.wait (%p107_p1), [#allocation11], 12384  }
  0x47   : > { %18336 = vsyncadd (%p107_p1), [#allocation11], 4294954912 }
  0x48   : > { %18338 = dma.done.wait (%p107_p1), [#allocation14], 2064  }
  0x49   : > { %18340 = vsyncadd (%p107_p1), [#allocation14], 4294965232  ;;  %453 = sbr.rel (%p10774_p3) target bundleno = 474 (0x1da), region = 92 }
  0x4e   : > { %v10934_v0 = vld [vmem:[#allocation4 + $0x10] sm:$0xf]  ;;  %v16677_v1 = vld [vmem:[#allocation4 + $0x14] sm:$0xf0]  ;;  %v18370_v2 = vmov 0.0   ;;  %vm710_vm0 = vcmask 261120  }
  0x4f   : > { %454 = vst [vmem:[#allocation3] sm:$0xff] %v18370_v2  ;;  %v10935_v3 = vor.u32 %v16677_v1, %v10934_v0  ;;  %v16676_v4 = vld [vmem:[#allocation4 + $0x14] sm:$0xf]  ;;  %v10936_v5 = vld [vmem:[#allocation4 + $0x18] sm:$0xf0]  ;;  %v16644_v17 = vld [vmem:[%s21283_s0 + $0x10] sm:$0xff] }
  0x50   : > { %455 = vst [vmem:[#allocation3 + $0x8] sm:$0xff] %v18370_v2  ;;  %v10939_v6 = vor.u32 %v16676_v4, %v10936_v5  ;;  %v10926_v7 = vld [vmem:[#allocation4] sm:$0xf]  ;;  %v16675_v8 = vld [vmem:[#allocation4 + $0x4] sm:$0xf0]  ;;  %v16642_v13 = vld [vmem:[%s21283_s0] sm:$0xff] }
  0x51   : > { %813 = vmatpush.bf16.msra.mxu0 %v10935_v3  ;;  %17939 = vmatpush.bf16.msra.mxu2 %v10935_v3  ;;  %v10927_v9 = vor.u32 %v16675_v8, %v10926_v7  ;;  %v16674_v10 = vld [vmem:[#allocation4 + $0x4] sm:$0xf]  ;;  %v10928_v11 = vld [vmem:[#allocation4 + $0x8] sm:$0xf0]  ;;  %v16658_v14 = vld [vmem:[%s21283_s0 + $0x80] sm:$0xff] }
  0x52   : > { %982 = vmatpush.bf16.msra.mxu1 %v10939_v6  ;;  %17941 = vmatpush.bf16.msra.mxu3 %v10939_v6  ;;  %v10931_v12 = vor.u32 %v16674_v10, %v10928_v11  ;;  %v16643_v15 = vld [vmem:[%s21283_s0 + $0x8] sm:$0xff]  ;;  %v16660_v18 = vld [vmem:[%s21283_s0 + $0x90] sm:$0xff]  ;;  %v16645_v19 = vld [vmem:[%s21283_s0 + $0x18] sm:$0xff] }
  0x53   : > { %v16659_v16 = vld [vmem:[%s21283_s0 + $0x88] sm:$0xff]  ;;  %v16661_v20 = vld [vmem:[%s21283_s0 + $0x98] sm:$0xff]  ;;  %v16646_v21 = vld [vmem:[%s21283_s0 + $0x20] sm:$0xff] }
  0x54   : > { %v16662_v22 = vld [vmem:[%s21283_s0 + $0xa0] sm:$0xff]  ;;  %v16647_v23 = vld [vmem:[%s21283_s0 + $0x28] sm:$0xff]  ;;  %v16648_v25 = vld [vmem:[%s21283_s0 + $0x30] sm:$0xff] }
  0x55   : > { %814 = vmatpush.bf16.msra.mxu0 %v10927_v9  ;;  %17940 = vmatpush.bf16.msra.mxu2 %v10927_v9  ;;  %v16663_v24 = vld [vmem:[%s21283_s0 + $0xa8] sm:$0xff]  ;;  %v16664_v26 = vld [vmem:[%s21283_s0 + $0xb0] sm:$0xff]  ;;  %v16649_v27 = vld [vmem:[%s21283_s0 + $0x38] sm:$0xff] }
  0x56   : > { %983 = vmatpush.bf16.msra.mxu1 %v10931_v12  ;;  %17942 = vmatpush.bf16.msra.mxu3 %v10931_v12  ;;  %v16665_v28 = vld [vmem:[%s21283_s0 + $0xb8] sm:$0xff]  ;;  %v524_v29 = vld [vmem:[#allocation6] sm:$0x3]  ;;  %v16650_v32 = vld [vmem:[%s21283_s0 + $0x40] sm:$0xff] }
  0x57   : > { %v18657_v30 = vperm.slane %v524_v29, 0  ;;  %v18659_v31 = vperm.slane %v524_v29, 1  ;;  %v16666_v33 = vld [vmem:[%s21283_s0 + $0xc0] sm:$0xff]  ;;  %v16651_v55 = vld [vmem:[%s21283_s0 + $0x48] sm:$0xff] }
  0x58   : > { %10940 = vmatmul.msk.bf16.vlgmr.msra.gmra.mxu0 %vm710_vm0, %v16642_v13  ;;  %10956 = vmatmul.msk.bf16.vlgmr.msra.gmra.mxu2 %vm710_vm0, %v16658_v14  ;;  %v16667_v56 = vld [vmem:[%s21283_s0 + $0xc8] sm:$0xff] }
  0x59   : > { %10972 = vmatmul.msk.bf16.vlgmr.msra.gmra.mxu1 %vm710_vm0, %v16642_v13  ;;  %10988 = vmatmul.msk.bf16.vlgmr.msra.gmra.mxu3 %vm710_vm0, %v16658_v14 }
  0x68   : > { %10941 = vmatmul.msk.bf16.gmra.mxu0 %vm710_vm0, %v16643_v15  ;;  %10957 = vmatmul.msk.bf16.gmra.mxu2 %vm710_vm0, %v16659_v16 }
  0x69   : > { %10973 = vmatmul.msk.bf16.gmra.mxu1 %vm710_vm0, %v16643_v15  ;;  %10989 = vmatmul.msk.bf16.gmra.mxu3 %vm710_vm0, %v16659_v16 }
  0x78   : > { %10942 = vmatmul.msk.bf16.gmra.mxu0 %vm710_vm0, %v16644_v17  ;;  %10958 = vmatmul.msk.bf16.gmra.mxu2 %vm710_vm0, %v16660_v18 }
  0x79   : > { %10974 = vmatmul.msk.bf16.gmra.mxu1 %vm710_vm0, %v16644_v17  ;;  %10990 = vmatmul.msk.bf16.gmra.mxu3 %vm710_vm0, %v16660_v18  ;;  %v16652_v17 = vld [vmem:[%s21283_s0 + $0x50] sm:$0xff] }
  0x7a   : > { %v16668_v18 = vld [vmem:[%s21283_s0 + $0xd0] sm:$0xff] }
  0x88   : > { %10943 = vmatmul.msk.bf16.gmra.mxu0 %vm710_vm0, %v16645_v19  ;;  %10959 = vmatmul.msk.bf16.gmra.mxu2 %vm710_vm0, %v16661_v20 }
  0x89   : > { %10975 = vmatmul.msk.bf16.gmra.mxu1 %vm710_vm0, %v16645_v19  ;;  %10991 = vmatmul.msk.bf16.gmra.mxu3 %vm710_vm0, %v16661_v20 }
  0x98   : > { %10944 = vmatmul.msk.bf16.gmra.mxu0 %vm710_vm0, %v16646_v21  ;;  %10960 = vmatmul.msk.bf16.gmra.mxu2 %vm710_vm0, %v16662_v22 }
  0x99   : > { %10976 = vmatmul.msk.bf16.gmra.mxu1 %vm710_vm0, %v16646_v21  ;;  %10992 = vmatmul.msk.bf16.gmra.mxu3 %vm710_vm0, %v16662_v22 }
  0xa8   : > { %10945 = vmatmul.msk.bf16.gmra.mxu0 %vm710_vm0, %v16647_v23  ;;  %10961 = vmatmul.msk.bf16.gmra.mxu2 %vm710_vm0, %v16663_v24 }
  0xa9   : > { %10977 = vmatmul.msk.bf16.gmra.mxu1 %vm710_vm0, %v16647_v23  ;;  %10993 = vmatmul.msk.bf16.gmra.mxu3 %vm710_vm0, %v16663_v24 }
  0xb8   : > { %10946 = vmatmul.msk.bf16.gmra.mxu0 %vm710_vm0, %v16648_v25  ;;  %10962 = vmatmul.msk.bf16.gmra.mxu2 %vm710_vm0, %v16664_v26 }
  0xb9   : > { %10978 = vmatmul.msk.bf16.gmra.mxu1 %vm710_vm0, %v16648_v25  ;;  %10994 = vmatmul.msk.bf16.gmra.mxu3 %vm710_vm0, %v16664_v26 }
  0xc8   : > { %10947 = vmatmul.msk.bf16.gmra.mxu0 %vm710_vm0, %v16649_v27  ;;  %10963 = vmatmul.msk.bf16.gmra.mxu2 %vm710_vm0, %v16665_v28 }
  0xc9   : > { %10979 = vmatmul.msk.bf16.gmra.mxu1 %vm710_vm0, %v16649_v27  ;;  %10995 = vmatmul.msk.bf16.gmra.mxu3 %vm710_vm0, %v16665_v28 }
  0xd5   : > { %v816_v34 = vpop.f32.mrf.mxu0 }
  0xd6   : > { %v817_v35 = vadd.f32 %v816_v34, %v18657_v30  ;;  %v985_v36 = vpop.f32.mrf.mxu1 }
  0xd7   : > { %v986_v37 = vadd.f32 %v985_v36, %v18659_v31 }
  0xd8   : > { %v1145_v38 = vmax.f32 %v817_v35, 0.0  ;;  %10948 = vmatmul.msk.bf16.gmra.mxu0 %vm710_vm0, %v16650_v32  ;;  %10964 = vmatmul.msk.bf16.gmra.mxu2 %vm710_vm0, %v16666_v33 }
  0xd9   : > { %v1146_v39 = vmax.f32 %v986_v37, 0.0  ;;  %10980 = vmatmul.msk.bf16.gmra.mxu1 %vm710_vm0, %v16650_v32  ;;  %10996 = vmatmul.msk.bf16.gmra.mxu3 %vm710_vm0, %v16666_v33 }
  0xda   : > { %1273 = vst [vmem:[#allocation2] sm:$0xff] %v1145_v38 }
  0xdb   : > { %1274 = vst [vmem:[#allocation2 + $0x8] sm:$0xff] %v1146_v39  ;;  %v896_v40 = vpop.f32.mrf.mxu2 }
  0xdc   : > { %v897_v41 = vadd.f32 %v896_v40, %v18657_v30  ;;  %v1065_v42 = vpop.f32.mrf.mxu3 }
  0xdd   : > { %v1066_v43 = vadd.f32 %v1065_v42, %v18659_v31  ;;  %v818_v44 = vpop.f32.mrf.mxu0 }
  0xde   : > { %v1209_v45 = vmax.f32 %v897_v41, 0.0  ;;  %v819_v46 = vadd.f32 %v818_v44, %v18657_v30  ;;  %v987_v47 = vpop.f32.mrf.mxu1 }
  0xdf   : > { %v1210_v48 = vmax.f32 %v1066_v43, 0.0  ;;  %v988_v49 = vadd.f32 %v987_v47, %v18659_v31 }
  0xe0   : > { %1337 = vst [vmem:[#allocation2 + $0x200] sm:$0xff] %v1209_v45  ;;  %v1147_v50 = vmax.f32 %v819_v46, 0.0  ;;  %v16653_v45 = vld [vmem:[%s21283_s0 + $0x58] sm:$0xff] }
  0xe1   : > { %1338 = vst [vmem:[#allocation2 + $0x208] sm:$0xff] %v1210_v48  ;;  %v1148_v51 = vmax.f32 %v988_v49, 0.0  ;;  %v16669_v46 = vld [vmem:[%s21283_s0 + $0xd8] sm:$0xff] }
  0xe2   : > { %1275 = vst [vmem:[#allocation2 + $0x10] sm:$0xff] %v1147_v50 }
  0xe3   : > { %1276 = vst [vmem:[#allocation2 + $0x18] sm:$0xff] %v1148_v51  ;;  %v898_v52 = vpop.f32.mrf.mxu2 }
  0xe4   : > { %v899_v53 = vadd.f32 %v898_v52, %v18657_v30  ;;  %v1067_v54 = vpop.f32.mrf.mxu3 }
  0xe5   : > { %v1068_v57 = vadd.f32 %v1067_v54, %v18659_v31  ;;  %v821_v58 = vpop.f32.mrf.mxu0 }
  0xe6   : > { %v1211_v59 = vmax.f32 %v899_v53, 0.0  ;;  %v822_v60 = vadd.f32 %v821_v58, %v18657_v30  ;;  %v990_v61 = vpop.f32.mrf.mxu1 }
  0xe7   : > { %v1212_v62 = vmax.f32 %v1068_v57, 0.0  ;;  %v991_v63 = vadd.f32 %v990_v61, %v18659_v31 }
  0xe8   : > { %1339 = vst [vmem:[#allocation2 + $0x210] sm:$0xff] %v1211_v59  ;;  %v1149_v0 = vmax.f32 %v822_v60, 0.0  ;;  %10949 = vmatmul.msk.bf16.gmra.mxu0 %vm710_vm0, %v16651_v55  ;;  %10965 = vmatmul.msk.bf16.gmra.mxu2 %vm710_vm0, %v16667_v56 }
  0xe9   : > { %1340 = vst [vmem:[#allocation2 + $0x218] sm:$0xff] %v1212_v62  ;;  %v1150_v1 = vmax.f32 %v991_v63, 0.0  ;;  %10981 = vmatmul.msk.bf16.gmra.mxu1 %vm710_vm0, %v16651_v55  ;;  %10997 = vmatmul.msk.bf16.gmra.mxu3 %vm710_vm0, %v16667_v56 }
  0xea   : > { %1277 = vst [vmem:[#allocation2 + $0x20] sm:$0xff] %v1149_v0 }
  0xeb   : > { %1278 = vst [vmem:[#allocation2 + $0x28] sm:$0xff] %v1150_v1  ;;  %v901_v2 = vpop.f32.mrf.mxu2 }
  0xec   : > { %v902_v3 = vadd.f32 %v901_v2, %v18657_v30  ;;  %v1070_v4 = vpop.f32.mrf.mxu3 }
  0xed   : > { %v1071_v5 = vadd.f32 %v1070_v4, %v18659_v31  ;;  %v823_v6 = vpop.f32.mrf.mxu0 }
  0xee   : > { %v1213_v7 = vmax.f32 %v902_v3, 0.0  ;;  %v824_v8 = vadd.f32 %v823_v6, %v18657_v30  ;;  %v992_v9 = vpop.f32.mrf.mxu1 }
  0xef   : > { %v1214_v10 = vmax.f32 %v1071_v5, 0.0  ;;  %v993_v11 = vadd.f32 %v992_v9, %v18659_v31 }
  0xf0   : > { %1341 = vst [vmem:[#allocation2 + $0x220] sm:$0xff] %v1213_v7  ;;  %v1151_v12 = vmax.f32 %v824_v8, 0.0  ;;  %v16654_v7 = vld [vmem:[%s21283_s0 + $0x60] sm:$0xff] }
  0xf1   : > { %1342 = vst [vmem:[#allocation2 + $0x228] sm:$0xff] %v1214_v10  ;;  %v1152_v13 = vmax.f32 %v993_v11, 0.0  ;;  %v16670_v8 = vld [vmem:[%s21283_s0 + $0xe0] sm:$0xff] }
  0xf2   : > { %1279 = vst [vmem:[#allocation2 + $0x30] sm:$0xff] %v1151_v12 }
  0xf3   : > { %1280 = vst [vmem:[#allocation2 + $0x38] sm:$0xff] %v1152_v13  ;;  %v903_v14 = vpop.f32.mrf.mxu2 }
  0xf4   : > { %v904_v15 = vadd.f32 %v903_v14, %v18657_v30  ;;  %v1072_v16 = vpop.f32.mrf.mxu3 }
  0xf5   : > { %v1073_v19 = vadd.f32 %v1072_v16, %v18659_v31  ;;  %v826_v20 = vpop.f32.mrf.mxu0 }
  0xf6   : > { %v1215_v21 = vmax.f32 %v904_v15, 0.0  ;;  %v827_v22 = vadd.f32 %v826_v20, %v18657_v30  ;;  %v995_v23 = vpop.f32.mrf.mxu1 }
  0xf7   : > { %v1216_v24 = vmax.f32 %v1073_v19, 0.0  ;;  %v996_v25 = vadd.f32 %v995_v23, %v18659_v31 }
  0xf8   : > { %1343 = vst [vmem:[#allocation2 + $0x230] sm:$0xff] %v1215_v21  ;;  %v1153_v26 = vmax.f32 %v827_v22, 0.0  ;;  %10950 = vmatmul.msk.bf16.gmra.mxu0 %vm710_vm0, %v16652_v17  ;;  %10966 = vmatmul.msk.bf16.gmra.mxu2 %vm710_vm0, %v16668_v18 }
  0xf9   : > { %1344 = vst [vmem:[#allocation2 + $0x238] sm:$0xff] %v1216_v24  ;;  %v1154_v27 = vmax.f32 %v996_v25, 0.0  ;;  %10982 = vmatmul.msk.bf16.gmra.mxu1 %vm710_vm0, %v16652_v17  ;;  %10998 = vmatmul.msk.bf16.gmra.mxu3 %vm710_vm0, %v16668_v18 }
  0xfa   : > { %1281 = vst [vmem:[#allocation2 + $0x40] sm:$0xff] %v1153_v26 }
  0xfb   : > { %1282 = vst [vmem:[#allocation2 + $0x48] sm:$0xff] %v1154_v27  ;;  %v906_v28 = vpop.f32.mrf.mxu2 }
  0xfc   : > { %v907_v29 = vadd.f32 %v906_v28, %v18657_v30  ;;  %v1075_v32 = vpop.f32.mrf.mxu3 }
  0xfd   : > { %v1076_v33 = vadd.f32 %v1075_v32, %v18659_v31  ;;  %v828_v34 = vpop.f32.mrf.mxu0 }
  0xfe   : > { %v1217_v35 = vmax.f32 %v907_v29, 0.0  ;;  %v829_v36 = vadd.f32 %v828_v34, %v18657_v30  ;;  %v997_v37 = vpop.f32.mrf.mxu1 }
  0xff   : > { %v1218_v38 = vmax.f32 %v1076_v33, 0.0  ;;  %v998_v39 = vadd.f32 %v997_v37, %v18659_v31 }
 0x100   : > { %1345 = vst [vmem:[#allocation2 + $0x240] sm:$0xff] %v1217_v35  ;;  %v1155_v40 = vmax.f32 %v829_v36, 0.0  ;;  %v16655_v35 = vld [vmem:[%s21283_s0 + $0x68] sm:$0xff] }
 0x101   : > { %1346 = vst [vmem:[#allocation2 + $0x248] sm:$0xff] %v1218_v38  ;;  %v1156_v41 = vmax.f32 %v998_v39, 0.0  ;;  %v16671_v36 = vld [vmem:[%s21283_s0 + $0xe8] sm:$0xff] }
 0x102   : > { %1283 = vst [vmem:[#allocation2 + $0x50] sm:$0xff] %v1155_v40 }
 0x103   : > { %1284 = vst [vmem:[#allocation2 + $0x58] sm:$0xff] %v1156_v41  ;;  %v908_v42 = vpop.f32.mrf.mxu2 }
 0x104   : > { %v909_v43 = vadd.f32 %v908_v42, %v18657_v30  ;;  %v1077_v44 = vpop.f32.mrf.mxu3 }
 0x105   : > { %v1078_v47 = vadd.f32 %v1077_v44, %v18659_v31  ;;  %v831_v48 = vpop.f32.mrf.mxu0 }
 0x106   : > { %v1219_v49 = vmax.f32 %v909_v43, 0.0  ;;  %v832_v50 = vadd.f32 %v831_v48, %v18657_v30  ;;  %v1000_v51 = vpop.f32.mrf.mxu1 }
 0x107   : > { %v1220_v52 = vmax.f32 %v1078_v47, 0.0  ;;  %v1001_v53 = vadd.f32 %v1000_v51, %v18659_v31 }
 0x108   : > { %1347 = vst [vmem:[#allocation2 + $0x250] sm:$0xff] %v1219_v49  ;;  %v1157_v54 = vmax.f32 %v832_v50, 0.0  ;;  %10951 = vmatmul.msk.bf16.gmra.mxu0 %vm710_vm0, %v16653_v45  ;;  %10967 = vmatmul.msk.bf16.gmra.mxu2 %vm710_vm0, %v16669_v46 }
 0x109   : > { %1348 = vst [vmem:[#allocation2 + $0x258] sm:$0xff] %v1220_v52  ;;  %v1158_v55 = vmax.f32 %v1001_v53, 0.0  ;;  %10983 = vmatmul.msk.bf16.gmra.mxu1 %vm710_vm0, %v16653_v45  ;;  %10999 = vmatmul.msk.bf16.gmra.mxu3 %vm710_vm0, %v16669_v46 }
 0x10a   : > { %1285 = vst [vmem:[#allocation2 + $0x60] sm:$0xff] %v1157_v54 }
 0x10b   : > { %1286 = vst [vmem:[#allocation2 + $0x68] sm:$0xff] %v1158_v55  ;;  %v911_v56 = vpop.f32.mrf.mxu2 }
 0x10c   : > { %v912_v57 = vadd.f32 %v911_v56, %v18657_v30  ;;  %v1080_v58 = vpop.f32.mrf.mxu3 }
 0x10d   : > { %v1081_v59 = vadd.f32 %v1080_v58, %v18659_v31  ;;  %v833_v60 = vpop.f32.mrf.mxu0 }
 0x10e   : > { %v1221_v61 = vmax.f32 %v912_v57, 0.0  ;;  %v834_v62 = vadd.f32 %v833_v60, %v18657_v30  ;;  %v1002_v63 = vpop.f32.mrf.mxu1 }
 0x10f   : > { %v1222_v0 = vmax.f32 %v1081_v59, 0.0  ;;  %v1003_v1 = vadd.f32 %v1002_v63, %v18659_v31 }
 0x110   : > { %1349 = vst [vmem:[#allocation2 + $0x260] sm:$0xff] %v1221_v61  ;;  %v1159_v2 = vmax.f32 %v834_v62, 0.0  ;;  %v16656_v61 = vld [vmem:[%s21283_s0 + $0x70] sm:$0xff] }
 0x111   : > { %1350 = vst [vmem:[#allocation2 + $0x268] sm:$0xff] %v1222_v0  ;;  %v1160_v3 = vmax.f32 %v1003_v1, 0.0  ;;  %v16672_v62 = vld [vmem:[%s21283_s0 + $0xf0] sm:$0xff] }
 0x112   : > { %1287 = vst [vmem:[#allocation2 + $0x70] sm:$0xff] %v1159_v2 }
 0x113   : > { %1288 = vst [vmem:[#allocation2 + $0x78] sm:$0xff] %v1160_v3  ;;  %v913_v4 = vpop.f32.mrf.mxu2 }
 0x114   : > { %v914_v5 = vadd.f32 %v913_v4, %v18657_v30  ;;  %v1082_v6 = vpop.f32.mrf.mxu3 }
 0x115   : > { %v1083_v9 = vadd.f32 %v1082_v6, %v18659_v31  ;;  %v836_v10 = vpop.f32.mrf.mxu0 }
 0x116   : > { %v1223_v11 = vmax.f32 %v914_v5, 0.0  ;;  %v837_v12 = vadd.f32 %v836_v10, %v18657_v30  ;;  %v1005_v13 = vpop.f32.mrf.mxu1 }
 0x117   : > { %v1224_v14 = vmax.f32 %v1083_v9, 0.0  ;;  %v1006_v15 = vadd.f32 %v1005_v13, %v18659_v31 }
 0x118   : > { %1351 = vst [vmem:[#allocation2 + $0x270] sm:$0xff] %v1223_v11  ;;  %v1161_v16 = vmax.f32 %v837_v12, 0.0  ;;  %10952 = vmatmul.msk.bf16.gmra.mxu0 %vm710_vm0, %v16654_v7  ;;  %10968 = vmatmul.msk.bf16.gmra.mxu2 %vm710_vm0, %v16670_v8 }
 0x119   : > { %1352 = vst [vmem:[#allocation2 + $0x278] sm:$0xff] %v1224_v14  ;;  %v1162_v17 = vmax.f32 %v1006_v15, 0.0  ;;  %10984 = vmatmul.msk.bf16.gmra.mxu1 %vm710_vm0, %v16654_v7  ;;  %11000 = vmatmul.msk.bf16.gmra.mxu3 %vm710_vm0, %v16670_v8 }
 0x11a   : > { %1289 = vst [vmem:[#allocation2 + $0x80] sm:$0xff] %v1161_v16 }
 0x11b   : > { %1290 = vst [vmem:[#allocation2 + $0x88] sm:$0xff] %v1162_v17  ;;  %v916_v18 = vpop.f32.mrf.mxu2 }
 0x11c   : > { %v917_v19 = vadd.f32 %v916_v18, %v18657_v30  ;;  %v1085_v20 = vpop.f32.mrf.mxu3 }
 0x11d   : > { %v1086_v21 = vadd.f32 %v1085_v20, %v18659_v31  ;;  %v838_v22 = vpop.f32.mrf.mxu0 }
 0x11e   : > { %v1225_v23 = vmax.f32 %v917_v19, 0.0  ;;  %v839_v24 = vadd.f32 %v838_v22, %v18657_v30  ;;  %v1007_v25 = vpop.f32.mrf.mxu1 }
 0x11f   : > { %v1226_v26 = vmax.f32 %v1086_v21, 0.0  ;;  %v1008_v27 = vadd.f32 %v1007_v25, %v18659_v31 }
 0x120   : > { %1353 = vst [vmem:[#allocation2 + $0x280] sm:$0xff] %v1225_v23  ;;  %v1163_v28 = vmax.f32 %v839_v24, 0.0  ;;  %v16657_v23 = vld [vmem:[%s21283_s0 + $0x78] sm:$0xff] }
 0x121   : > { %1354 = vst [vmem:[#allocation2 + $0x288] sm:$0xff] %v1226_v26  ;;  %v1164_v29 = vmax.f32 %v1008_v27, 0.0  ;;  %v16673_v24 = vld [vmem:[%s21283_s0 + $0xf8] sm:$0xff] }
 0x122   : > { %1291 = vst [vmem:[#allocation2 + $0x90] sm:$0xff] %v1163_v28 }
 0x123   : > { %1292 = vst [vmem:[#allocation2 + $0x98] sm:$0xff] %v1164_v29  ;;  %v918_v32 = vpop.f32.mrf.mxu2 }
 0x124   : > { %v919_v33 = vadd.f32 %v918_v32, %v18657_v30  ;;  %v1087_v34 = vpop.f32.mrf.mxu3 }
 0x125   : > { %v1088_v37 = vadd.f32 %v1087_v34, %v18659_v31  ;;  %v841_v38 = vpop.f32.mrf.mxu0 }
 0x126   : > { %v1227_v39 = vmax.f32 %v919_v33, 0.0  ;;  %v842_v40 = vadd.f32 %v841_v38, %v18657_v30  ;;  %v1010_v41 = vpop.f32.mrf.mxu1 }
 0x127   : > { %v1228_v42 = vmax.f32 %v1088_v37, 0.0  ;;  %v1011_v43 = vadd.f32 %v1010_v41, %v18659_v31 }
 0x128   : > { %1355 = vst [vmem:[#allocation2 + $0x290] sm:$0xff] %v1227_v39  ;;  %v1165_v44 = vmax.f32 %v842_v40, 0.0  ;;  %10953 = vmatmul.msk.bf16.gmra.mxu0 %vm710_vm0, %v16655_v35  ;;  %10969 = vmatmul.msk.bf16.gmra.mxu2 %vm710_vm0, %v16671_v36 }
 0x129   : > { %1356 = vst [vmem:[#allocation2 + $0x298] sm:$0xff] %v1228_v42  ;;  %v1166_v45 = vmax.f32 %v1011_v43, 0.0  ;;  %10985 = vmatmul.msk.bf16.gmra.mxu1 %vm710_vm0, %v16655_v35  ;;  %11001 = vmatmul.msk.bf16.gmra.mxu3 %vm710_vm0, %v16671_v36 }
 0x12a   : > { %1293 = vst [vmem:[#allocation2 + $0xa0] sm:$0xff] %v1165_v44 }
 0x12b   : > { %1294 = vst [vmem:[#allocation2 + $0xa8] sm:$0xff] %v1166_v45  ;;  %v921_v46 = vpop.f32.mrf.mxu2 }
 0x12c   : > { %v922_v47 = vadd.f32 %v921_v46, %v18657_v30  ;;  %v1090_v48 = vpop.f32.mrf.mxu3 }
 0x12d   : > { %v1091_v49 = vadd.f32 %v1090_v48, %v18659_v31  ;;  %v843_v50 = vpop.f32.mrf.mxu0 }
 0x12e   : > { %v1229_v51 = vmax.f32 %v922_v47, 0.0  ;;  %v844_v52 = vadd.f32 %v843_v50, %v18657_v30  ;;  %v1012_v53 = vpop.f32.mrf.mxu1 }
 0x12f   : > { %v1230_v54 = vmax.f32 %v1091_v49, 0.0  ;;  %v1013_v55 = vadd.f32 %v1012_v53, %v18659_v31 }
 0x130   : > { %1357 = vst [vmem:[#allocation2 + $0x2a0] sm:$0xff] %v1229_v51  ;;  %v1167_v56 = vmax.f32 %v844_v52, 0.0 }
 0x131   : > { %1358 = vst [vmem:[#allocation2 + $0x2a8] sm:$0xff] %v1230_v54  ;;  %v1168_v57 = vmax.f32 %v1013_v55, 0.0 }
 0x132   : > { %1295 = vst [vmem:[#allocation2 + $0xb0] sm:$0xff] %v1167_v56 }
 0x133   : > { %1296 = vst [vmem:[#allocation2 + $0xb8] sm:$0xff] %v1168_v57  ;;  %v923_v58 = vpop.f32.mrf.mxu2 }
 0x134   : > { %v924_v59 = vadd.f32 %v923_v58, %v18657_v30  ;;  %v1092_v60 = vpop.f32.mrf.mxu3 }
 0x135   : > { %v1093_v63 = vadd.f32 %v1092_v60, %v18659_v31  ;;  %v846_v0 = vpop.f32.mrf.mxu0 }
 0x136   : > { %v1231_v1 = vmax.f32 %v924_v59, 0.0  ;;  %v847_v2 = vadd.f32 %v846_v0, %v18657_v30  ;;  %v1015_v3 = vpop.f32.mrf.mxu1 }
 0x137   : > { %v1232_v4 = vmax.f32 %v1093_v63, 0.0  ;;  %v1016_v5 = vadd.f32 %v1015_v3, %v18659_v31 }
 0x138   : > { %1359 = vst [vmem:[#allocation2 + $0x2b0] sm:$0xff] %v1231_v1  ;;  %v1169_v6 = vmax.f32 %v847_v2, 0.0  ;;  %10954 = vmatmul.msk.bf16.gmra.mxu0 %vm710_vm0, %v16656_v61  ;;  %10970 = vmatmul.msk.bf16.gmra.mxu2 %vm710_vm0, %v16672_v62 }
 0x139   : > { %1360 = vst [vmem:[#allocation2 + $0x2b8] sm:$0xff] %v1232_v4  ;;  %v1170_v7 = vmax.f32 %v1016_v5, 0.0  ;;  %10986 = vmatmul.msk.bf16.gmra.mxu1 %vm710_vm0, %v16656_v61  ;;  %11002 = vmatmul.msk.bf16.gmra.mxu3 %vm710_vm0, %v16672_v62 }
 0x13a   : > { %1297 = vst [vmem:[#allocation2 + $0xc0] sm:$0xff] %v1169_v6 }
 0x13b   : > { %1298 = vst [vmem:[#allocation2 + $0xc8] sm:$0xff] %v1170_v7  ;;  %v926_v8 = vpop.f32.mrf.mxu2 }
 0x13c   : > { %v927_v9 = vadd.f32 %v926_v8, %v18657_v30  ;;  %v1095_v10 = vpop.f32.mrf.mxu3 }
 0x13d   : > { %v1096_v11 = vadd.f32 %v1095_v10, %v18659_v31  ;;  %v848_v12 = vpop.f32.mrf.mxu0 }
 0x13e   : > { %v1233_v13 = vmax.f32 %v927_v9, 0.0  ;;  %v849_v14 = vadd.f32 %v848_v12, %v18657_v30  ;;  %v1017_v15 = vpop.f32.mrf.mxu1 }
 0x13f   : > { %v1234_v16 = vmax.f32 %v1096_v11, 0.0  ;;  %v1018_v17 = vadd.f32 %v1017_v15, %v18659_v31 }
 0x140   : > { %1361 = vst [vmem:[#allocation2 + $0x2c0] sm:$0xff] %v1233_v13  ;;  %v1171_v18 = vmax.f32 %v849_v14, 0.0 }
 0x141   : > { %1362 = vst [vmem:[#allocation2 + $0x2c8] sm:$0xff] %v1234_v16  ;;  %v1172_v19 = vmax.f32 %v1018_v17, 0.0 }
 0x142   : > { %1299 = vst [vmem:[#allocation2 + $0xd0] sm:$0xff] %v1171_v18 }
 0x143   : > { %1300 = vst [vmem:[#allocation2 + $0xd8] sm:$0xff] %v1172_v19  ;;  %v928_v20 = vpop.f32.mrf.mxu2 }
 0x144   : > { %v929_v21 = vadd.f32 %v928_v20, %v18657_v30  ;;  %v1097_v22 = vpop.f32.mrf.mxu3 }
 0x145   : > { %v1098_v25 = vadd.f32 %v1097_v22, %v18659_v31  ;;  %v851_v26 = vpop.f32.mrf.mxu0 }
 0x146   : > { %v1235_v27 = vmax.f32 %v929_v21, 0.0  ;;  %v852_v28 = vadd.f32 %v851_v26, %v18657_v30  ;;  %v1020_v29 = vpop.f32.mrf.mxu1 }
 0x147   : > { %v1236_v32 = vmax.f32 %v1098_v25, 0.0  ;;  %v1021_v33 = vadd.f32 %v1020_v29, %v18659_v31 }
 0x148   : > { %1363 = vst [vmem:[#allocation2 + $0x2d0] sm:$0xff] %v1235_v27  ;;  %v1173_v34 = vmax.f32 %v852_v28, 0.0  ;;  %10955 = vmatmul.msk.bf16.gmra.mxu0 %vm710_vm0, %v16657_v23  ;;  %10971 = vmatmul.msk.bf16.gmra.mxu2 %vm710_vm0, %v16673_v24 }
 0x149   : > { %1364 = vst [vmem:[#allocation2 + $0x2d8] sm:$0xff] %v1236_v32  ;;  %v1174_v35 = vmax.f32 %v1021_v33, 0.0  ;;  %10987 = vmatmul.msk.bf16.gmra.mxu1 %vm710_vm0, %v16657_v23  ;;  %11003 = vmatmul.msk.bf16.gmra.mxu3 %vm710_vm0, %v16673_v24 }
 0x14a   : > { %1301 = vst [vmem:[#allocation2 + $0xe0] sm:$0xff] %v1173_v34 }
 0x14b   : > { %1302 = vst [vmem:[#allocation2 + $0xe8] sm:$0xff] %v1174_v35  ;;  %v931_v36 = vpop.f32.mrf.mxu2 }
 0x14c   : > { %v932_v37 = vadd.f32 %v931_v36, %v18657_v30  ;;  %v1100_v38 = vpop.f32.mrf.mxu3 }
 0x14d   : > { %v1101_v39 = vadd.f32 %v1100_v38, %v18659_v31  ;;  %v853_v40 = vpop.f32.mrf.mxu0 }
 0x14e   : > { %v1237_v41 = vmax.f32 %v932_v37, 0.0  ;;  %v854_v42 = vadd.f32 %v853_v40, %v18657_v30  ;;  %v1022_v43 = vpop.f32.mrf.mxu1 }
 0x14f   : > { %v1238_v44 = vmax.f32 %v1101_v39, 0.0  ;;  %v1023_v45 = vadd.f32 %v1022_v43, %v18659_v31 }
 0x150   : > { %1365 = vst [vmem:[#allocation2 + $0x2e0] sm:$0xff] %v1237_v41  ;;  %v1175_v46 = vmax.f32 %v854_v42, 0.0 }
 0x151   : > { %1366 = vst [vmem:[#allocation2 + $0x2e8] sm:$0xff] %v1238_v44  ;;  %v1176_v47 = vmax.f32 %v1023_v45, 0.0 }
 0x152   : > { %1303 = vst [vmem:[#allocation2 + $0xf0] sm:$0xff] %v1175_v46 }
 0x153   : > { %1304 = vst [vmem:[#allocation2 + $0xf8] sm:$0xff] %v1176_v47  ;;  %v933_v48 = vpop.f32.mrf.mxu2 }
 0x154   : > { %v934_v49 = vadd.f32 %v933_v48, %v18657_v30  ;;  %v1102_v50 = vpop.f32.mrf.mxu3 }
 0x155   : > { %v1103_v51 = vadd.f32 %v1102_v50, %v18659_v31  ;;  %v856_v52 = vpop.f32.mrf.mxu0 }
 0x156   : > { %v1239_v53 = vmax.f32 %v934_v49, 0.0  ;;  %v857_v54 = vadd.f32 %v856_v52, %v18657_v30  ;;  %v1025_v55 = vpop.f32.mrf.mxu1 }
 0x157   : > { %v1240_v56 = vmax.f32 %v1103_v51, 0.0  ;;  %v1026_v57 = vadd.f32 %v1025_v55, %v18659_v31 }
 0x158   : > { %1367 = vst [vmem:[#allocation2 + $0x2f0] sm:$0xff] %v1239_v53  ;;  %v1177_v58 = vmax.f32 %v857_v54, 0.0 }
 0x159   : > { %1368 = vst [vmem:[#allocation2 + $0x2f8] sm:$0xff] %v1240_v56  ;;  %v1178_v59 = vmax.f32 %v1026_v57, 0.0 }
 0x15a   : > { %1305 = vst [vmem:[#allocation2 + $0x100] sm:$0xff] %v1177_v58 }
 0x15b   : > { %1306 = vst [vmem:[#allocation2 + $0x108] sm:$0xff] %v1178_v59  ;;  %v936_v60 = vpop.f32.mrf.mxu2 }
 0x15c   : > { %v937_v61 = vadd.f32 %v936_v60, %v18657_v30  ;;  %v1105_v62 = vpop.f32.mrf.mxu3 }
 0x15d   : > { %v1106_v63 = vadd.f32 %v1105_v62, %v18659_v31  ;;  %v858_v0 = vpop.f32.mrf.mxu0 }
 0x15e   : > { %v1241_v1 = vmax.f32 %v937_v61, 0.0  ;;  %v859_v2 = vadd.f32 %v858_v0, %v18657_v30  ;;  %v1027_v3 = vpop.f32.mrf.mxu1 }
 0x15f   : > { %v1242_v4 = vmax.f32 %v1106_v63, 0.0  ;;  %v1028_v5 = vadd.f32 %v1027_v3, %v18659_v31 }
 0x160   : > { %1369 = vst [vmem:[#allocation2 + $0x300] sm:$0xff] %v1241_v1  ;;  %v1179_v6 = vmax.f32 %v859_v2, 0.0 }
 0x161   : > { %1370 = vst [vmem:[#allocation2 + $0x308] sm:$0xff] %v1242_v4  ;;  %v1180_v7 = vmax.f32 %v1028_v5, 0.0 }
 0x162   : > { %1307 = vst [vmem:[#allocation2 + $0x110] sm:$0xff] %v1179_v6 }
 0x163   : > { %1308 = vst [vmem:[#allocation2 + $0x118] sm:$0xff] %v1180_v7  ;;  %v938_v8 = vpop.f32.mrf.mxu2 }
 0x164   : > { %v939_v9 = vadd.f32 %v938_v8, %v18657_v30  ;;  %v1107_v10 = vpop.f32.mrf.mxu3 }
 0x165   : > { %v1108_v11 = vadd.f32 %v1107_v10, %v18659_v31  ;;  %v861_v12 = vpop.f32.mrf.mxu0 }
 0x166   : > { %v1243_v13 = vmax.f32 %v939_v9, 0.0  ;;  %v862_v14 = vadd.f32 %v861_v12, %v18657_v30  ;;  %v1030_v15 = vpop.f32.mrf.mxu1 }
 0x167   : > { %v1244_v16 = vmax.f32 %v1108_v11, 0.0  ;;  %v1031_v17 = vadd.f32 %v1030_v15, %v18659_v31 }
 0x168   : > { %1371 = vst [vmem:[#allocation2 + $0x310] sm:$0xff] %v1243_v13  ;;  %v1181_v18 = vmax.f32 %v862_v14, 0.0 }
 0x169   : > { %1372 = vst [vmem:[#allocation2 + $0x318] sm:$0xff] %v1244_v16  ;;  %v1182_v19 = vmax.f32 %v1031_v17, 0.0 }
 0x16a   : > { %1309 = vst [vmem:[#allocation2 + $0x120] sm:$0xff] %v1181_v18 }
 0x16b   : > { %1310 = vst [vmem:[#allocation2 + $0x128] sm:$0xff] %v1182_v19  ;;  %v941_v20 = vpop.f32.mrf.mxu2 }
 0x16c   : > { %v942_v21 = vadd.f32 %v941_v20, %v18657_v30  ;;  %v1110_v22 = vpop.f32.mrf.mxu3 }
 0x16d   : > { %v1111_v23 = vadd.f32 %v1110_v22, %v18659_v31  ;;  %v863_v24 = vpop.f32.mrf.mxu0 }
 0x16e   : > { %v1245_v25 = vmax.f32 %v942_v21, 0.0  ;;  %v864_v26 = vadd.f32 %v863_v24, %v18657_v30  ;;  %v1032_v27 = vpop.f32.mrf.mxu1 }
 0x16f   : > { %v1246_v28 = vmax.f32 %v1111_v23, 0.0  ;;  %v1033_v29 = vadd.f32 %v1032_v27, %v18659_v31 }
 0x170   : > { %1373 = vst [vmem:[#allocation2 + $0x320] sm:$0xff] %v1245_v25  ;;  %v1183_v32 = vmax.f32 %v864_v26, 0.0 }
 0x171   : > { %1374 = vst [vmem:[#allocation2 + $0x328] sm:$0xff] %v1246_v28  ;;  %v1184_v33 = vmax.f32 %v1033_v29, 0.0 }
 0x172   : > { %1311 = vst [vmem:[#allocation2 + $0x130] sm:$0xff] %v1183_v32 }
 0x173   : > { %1312 = vst [vmem:[#allocation2 + $0x138] sm:$0xff] %v1184_v33  ;;  %v943_v34 = vpop.f32.mrf.mxu2 }
 0x174   : > { %v944_v35 = vadd.f32 %v943_v34, %v18657_v30  ;;  %v1112_v36 = vpop.f32.mrf.mxu3 }
 0x175   : > { %v1113_v37 = vadd.f32 %v1112_v36, %v18659_v31  ;;  %v866_v38 = vpop.f32.mrf.mxu0 }
 0x176   : > { %v1247_v39 = vmax.f32 %v944_v35, 0.0  ;;  %v867_v40 = vadd.f32 %v866_v38, %v18657_v30  ;;  %v1035_v41 = vpop.f32.mrf.mxu1 }
 0x177   : > { %v1248_v42 = vmax.f32 %v1113_v37, 0.0  ;;  %v1036_v43 = vadd.f32 %v1035_v41, %v18659_v31 }
 0x178   : > { %1375 = vst [vmem:[#allocation2 + $0x330] sm:$0xff] %v1247_v39  ;;  %v1185_v44 = vmax.f32 %v867_v40, 0.0 }
 0x179   : > { %1376 = vst [vmem:[#allocation2 + $0x338] sm:$0xff] %v1248_v42  ;;  %v1186_v45 = vmax.f32 %v1036_v43, 0.0 }
 0x17a   : > { %1313 = vst [vmem:[#allocation2 + $0x140] sm:$0xff] %v1185_v44 }
 0x17b   : > { %1314 = vst [vmem:[#allocation2 + $0x148] sm:$0xff] %v1186_v45  ;;  %v946_v46 = vpop.f32.mrf.mxu2 }
 0x17c   : > { %v947_v47 = vadd.f32 %v946_v46, %v18657_v30  ;;  %v1115_v48 = vpop.f32.mrf.mxu3 }
 0x17d   : > { %v1116_v49 = vadd.f32 %v1115_v48, %v18659_v31  ;;  %v868_v50 = vpop.f32.mrf.mxu0 }
 0x17e   : > { %v1249_v51 = vmax.f32 %v947_v47, 0.0  ;;  %v869_v52 = vadd.f32 %v868_v50, %v18657_v30  ;;  %v1037_v53 = vpop.f32.mrf.mxu1 }
 0x17f   : > { %v1250_v54 = vmax.f32 %v1116_v49, 0.0  ;;  %v1038_v55 = vadd.f32 %v1037_v53, %v18659_v31 }
 0x180   : > { %1377 = vst [vmem:[#allocation2 + $0x340] sm:$0xff] %v1249_v51  ;;  %v1187_v56 = vmax.f32 %v869_v52, 0.0 }
 0x181   : > { %1378 = vst [vmem:[#allocation2 + $0x348] sm:$0xff] %v1250_v54  ;;  %v1188_v57 = vmax.f32 %v1038_v55, 0.0 }
 0x182   : > { %1315 = vst [vmem:[#allocation2 + $0x150] sm:$0xff] %v1187_v56 }
 0x183   : > { %1316 = vst [vmem:[#allocation2 + $0x158] sm:$0xff] %v1188_v57  ;;  %v948_v58 = vpop.f32.mrf.mxu2 }
 0x184   : > { %v949_v59 = vadd.f32 %v948_v58, %v18657_v30  ;;  %v1117_v60 = vpop.f32.mrf.mxu3 }
 0x185   : > { %v1118_v61 = vadd.f32 %v1117_v60, %v18659_v31  ;;  %v871_v62 = vpop.f32.mrf.mxu0 }
 0x186   : > { %v1251_v63 = vmax.f32 %v949_v59, 0.0  ;;  %v872_v0 = vadd.f32 %v871_v62, %v18657_v30  ;;  %v1040_v1 = vpop.f32.mrf.mxu1 }
 0x187   : > { %v1252_v2 = vmax.f32 %v1118_v61, 0.0  ;;  %v1041_v3 = vadd.f32 %v1040_v1, %v18659_v31 }
 0x188   : > { %1379 = vst [vmem:[#allocation2 + $0x350] sm:$0xff] %v1251_v63  ;;  %v1189_v4 = vmax.f32 %v872_v0, 0.0 }
 0x189   : > { %1380 = vst [vmem:[#allocation2 + $0x358] sm:$0xff] %v1252_v2  ;;  %v1190_v5 = vmax.f32 %v1041_v3, 0.0 }
 0x18a   : > { %1317 = vst [vmem:[#allocation2 + $0x160] sm:$0xff] %v1189_v4 }
 0x18b   : > { %1318 = vst [vmem:[#allocation2 + $0x168] sm:$0xff] %v1190_v5  ;;  %v951_v6 = vpop.f32.mrf.mxu2 }
 0x18c   : > { %v952_v7 = vadd.f32 %v951_v6, %v18657_v30  ;;  %v1120_v8 = vpop.f32.mrf.mxu3 }
 0x18d   : > { %v1121_v9 = vadd.f32 %v1120_v8, %v18659_v31  ;;  %v873_v10 = vpop.f32.mrf.mxu0 }
 0x18e   : > { %v1253_v11 = vmax.f32 %v952_v7, 0.0  ;;  %v874_v12 = vadd.f32 %v873_v10, %v18657_v30  ;;  %v1042_v13 = vpop.f32.mrf.mxu1 }
 0x18f   : > { %v1254_v14 = vmax.f32 %v1121_v9, 0.0  ;;  %v1043_v15 = vadd.f32 %v1042_v13, %v18659_v31 }
 0x190   : > { %1381 = vst [vmem:[#allocation2 + $0x360] sm:$0xff] %v1253_v11  ;;  %v1191_v16 = vmax.f32 %v874_v12, 0.0 }
 0x191   : > { %1382 = vst [vmem:[#allocation2 + $0x368] sm:$0xff] %v1254_v14  ;;  %v1192_v17 = vmax.f32 %v1043_v15, 0.0 }
 0x192   : > { %1319 = vst [vmem:[#allocation2 + $0x170] sm:$0xff] %v1191_v16 }
 0x193   : > { %1320 = vst [vmem:[#allocation2 + $0x178] sm:$0xff] %v1192_v17  ;;  %v953_v18 = vpop.f32.mrf.mxu2 }
 0x194   : > { %v954_v19 = vadd.f32 %v953_v18, %v18657_v30  ;;  %v1122_v20 = vpop.f32.mrf.mxu3 }
 0x195   : > { %v1123_v21 = vadd.f32 %v1122_v20, %v18659_v31  ;;  %v876_v22 = vpop.f32.mrf.mxu0 }
 0x196   : > { %v1255_v23 = vmax.f32 %v954_v19, 0.0  ;;  %v877_v24 = vadd.f32 %v876_v22, %v18657_v30  ;;  %v1045_v25 = vpop.f32.mrf.mxu1 }
 0x197   : > { %v1256_v26 = vmax.f32 %v1123_v21, 0.0  ;;  %v1046_v27 = vadd.f32 %v1045_v25, %v18659_v31 }
 0x198   : > { %1383 = vst [vmem:[#allocation2 + $0x370] sm:$0xff] %v1255_v23  ;;  %v1193_v28 = vmax.f32 %v877_v24, 0.0 }
 0x199   : > { %1384 = vst [vmem:[#allocation2 + $0x378] sm:$0xff] %v1256_v26  ;;  %v1194_v29 = vmax.f32 %v1046_v27, 0.0 }
 0x19a   : > { %1321 = vst [vmem:[#allocation2 + $0x180] sm:$0xff] %v1193_v28 }
 0x19b   : > { %1322 = vst [vmem:[#allocation2 + $0x188] sm:$0xff] %v1194_v29  ;;  %v956_v32 = vpop.f32.mrf.mxu2 }
 0x19c   : > { %v957_v33 = vadd.f32 %v956_v32, %v18657_v30  ;;  %v1125_v34 = vpop.f32.mrf.mxu3 }
 0x19d   : > { %v1126_v35 = vadd.f32 %v1125_v34, %v18659_v31  ;;  %v878_v36 = vpop.f32.mrf.mxu0 }
 0x19e   : > { %v1257_v37 = vmax.f32 %v957_v33, 0.0  ;;  %v879_v38 = vadd.f32 %v878_v36, %v18657_v30  ;;  %v1047_v39 = vpop.f32.mrf.mxu1 }
 0x19f   : > { %v1258_v40 = vmax.f32 %v1126_v35, 0.0  ;;  %v1048_v41 = vadd.f32 %v1047_v39, %v18659_v31 }
 0x1a0   : > { %1385 = vst [vmem:[#allocation2 + $0x380] sm:$0xff] %v1257_v37  ;;  %v1195_v42 = vmax.f32 %v879_v38, 0.0 }
 0x1a1   : > { %1386 = vst [vmem:[#allocation2 + $0x388] sm:$0xff] %v1258_v40  ;;  %v1196_v43 = vmax.f32 %v1048_v41, 0.0 }
 0x1a2   : > { %1323 = vst [vmem:[#allocation2 + $0x190] sm:$0xff] %v1195_v42 }
 0x1a3   : > { %1324 = vst [vmem:[#allocation2 + $0x198] sm:$0xff] %v1196_v43  ;;  %v958_v44 = vpop.f32.mrf.mxu2 }
 0x1a4   : > { %v959_v45 = vadd.f32 %v958_v44, %v18657_v30  ;;  %v1127_v46 = vpop.f32.mrf.mxu3 }
 0x1a5   : > { %v1128_v47 = vadd.f32 %v1127_v46, %v18659_v31  ;;  %v881_v48 = vpop.f32.mrf.mxu0 }
 0x1a6   : > { %v1259_v49 = vmax.f32 %v959_v45, 0.0  ;;  %v882_v50 = vadd.f32 %v881_v48, %v18657_v30  ;;  %v1050_v51 = vpop.f32.mrf.mxu1 }
 0x1a7   : > { %v1260_v52 = vmax.f32 %v1128_v47, 0.0  ;;  %v1051_v53 = vadd.f32 %v1050_v51, %v18659_v31 }
 0x1a8   : > { %1387 = vst [vmem:[#allocation2 + $0x390] sm:$0xff] %v1259_v49  ;;  %v1197_v54 = vmax.f32 %v882_v50, 0.0 }
 0x1a9   : > { %1388 = vst [vmem:[#allocation2 + $0x398] sm:$0xff] %v1260_v52  ;;  %v1198_v55 = vmax.f32 %v1051_v53, 0.0 }
 0x1aa   : > { %1325 = vst [vmem:[#allocation2 + $0x1a0] sm:$0xff] %v1197_v54 }
 0x1ab   : > { %1326 = vst [vmem:[#allocation2 + $0x1a8] sm:$0xff] %v1198_v55  ;;  %v961_v56 = vpop.f32.mrf.mxu2 }
 0x1ac   : > { %v962_v57 = vadd.f32 %v961_v56, %v18657_v30  ;;  %v1130_v58 = vpop.f32.mrf.mxu3 }
 0x1ad   : > { %v1131_v59 = vadd.f32 %v1130_v58, %v18659_v31  ;;  %v883_v60 = vpop.f32.mrf.mxu0 }
 0x1ae   : > { %v1261_v61 = vmax.f32 %v962_v57, 0.0  ;;  %v884_v62 = vadd.f32 %v883_v60, %v18657_v30  ;;  %v1052_v63 = vpop.f32.mrf.mxu1 }
 0x1af   : > { %v1262_v0 = vmax.f32 %v1131_v59, 0.0  ;;  %v1053_v1 = vadd.f32 %v1052_v63, %v18659_v31 }
 0x1b0   : > { %1389 = vst [vmem:[#allocation2 + $0x3a0] sm:$0xff] %v1261_v61  ;;  %v1199_v2 = vmax.f32 %v884_v62, 0.0 }
 0x1b1   : > { %1390 = vst [vmem:[#allocation2 + $0x3a8] sm:$0xff] %v1262_v0  ;;  %v1200_v3 = vmax.f32 %v1053_v1, 0.0 }
 0x1b2   : > { %1327 = vst [vmem:[#allocation2 + $0x1b0] sm:$0xff] %v1199_v2 }
 0x1b3   : > { %1328 = vst [vmem:[#allocation2 + $0x1b8] sm:$0xff] %v1200_v3  ;;  %v963_v4 = vpop.f32.mrf.mxu2 }
 0x1b4   : > { %v964_v5 = vadd.f32 %v963_v4, %v18657_v30  ;;  %v1132_v6 = vpop.f32.mrf.mxu3 }
 0x1b5   : > { %v1133_v7 = vadd.f32 %v1132_v6, %v18659_v31  ;;  %v886_v8 = vpop.f32.mrf.mxu0 }
 0x1b6   : > { %v1263_v9 = vmax.f32 %v964_v5, 0.0  ;;  %v887_v10 = vadd.f32 %v886_v8, %v18657_v30  ;;  %v1055_v11 = vpop.f32.mrf.mxu1 }
 0x1b7   : > { %v1264_v12 = vmax.f32 %v1133_v7, 0.0  ;;  %v1056_v13 = vadd.f32 %v1055_v11, %v18659_v31 }
 0x1b8   : > { %1391 = vst [vmem:[#allocation2 + $0x3b0] sm:$0xff] %v1263_v9  ;;  %v1201_v14 = vmax.f32 %v887_v10, 0.0 }
 0x1b9   : > { %1392 = vst [vmem:[#allocation2 + $0x3b8] sm:$0xff] %v1264_v12  ;;  %v1202_v15 = vmax.f32 %v1056_v13, 0.0 }
 0x1ba   : > { %1329 = vst [vmem:[#allocation2 + $0x1c0] sm:$0xff] %v1201_v14 }
 0x1bb   : > { %1330 = vst [vmem:[#allocation2 + $0x1c8] sm:$0xff] %v1202_v15  ;;  %v966_v16 = vpop.f32.mrf.mxu2 }
 0x1bc   : > { %v967_v17 = vadd.f32 %v966_v16, %v18657_v30  ;;  %v1135_v18 = vpop.f32.mrf.mxu3 }
 0x1bd   : > { %v1136_v19 = vadd.f32 %v1135_v18, %v18659_v31  ;;  %v888_v20 = vpop.f32.mrf.mxu0 }
 0x1be   : > { %v1265_v21 = vmax.f32 %v967_v17, 0.0  ;;  %v889_v22 = vadd.f32 %v888_v20, %v18657_v30  ;;  %v1057_v23 = vpop.f32.mrf.mxu1 }
 0x1bf   : > { %v1266_v24 = vmax.f32 %v1136_v19, 0.0  ;;  %v1058_v25 = vadd.f32 %v1057_v23, %v18659_v31 }
 0x1c0   : > { %1393 = vst [vmem:[#allocation2 + $0x3c0] sm:$0xff] %v1265_v21  ;;  %v1203_v26 = vmax.f32 %v889_v22, 0.0 }
 0x1c1   : > { %1394 = vst [vmem:[#allocation2 + $0x3c8] sm:$0xff] %v1266_v24  ;;  %v1204_v27 = vmax.f32 %v1058_v25, 0.0 }
 0x1c2   : > { %1331 = vst [vmem:[#allocation2 + $0x1d0] sm:$0xff] %v1203_v26 }
 0x1c3   : > { %1332 = vst [vmem:[#allocation2 + $0x1d8] sm:$0xff] %v1204_v27  ;;  %v968_v28 = vpop.f32.mrf.mxu2 }
 0x1c4   : > { %v969_v29 = vadd.f32 %v968_v28, %v18657_v30  ;;  %v1137_v32 = vpop.f32.mrf.mxu3 }
 0x1c5   : > { %v1138_v33 = vadd.f32 %v1137_v32, %v18659_v31  ;;  %v891_v34 = vpop.f32.mrf.mxu0 }
 0x1c6   : > { %v1267_v35 = vmax.f32 %v969_v29, 0.0  ;;  %v892_v36 = vadd.f32 %v891_v34, %v18657_v30  ;;  %v1060_v37 = vpop.f32.mrf.mxu1 }
 0x1c7   : > { %v1268_v38 = vmax.f32 %v1138_v33, 0.0  ;;  %v1061_v39 = vadd.f32 %v1060_v37, %v18659_v31 }
 0x1c8   : > { %1395 = vst [vmem:[#allocation2 + $0x3d0] sm:$0xff] %v1267_v35  ;;  %v1205_v40 = vmax.f32 %v892_v36, 0.0 }
 0x1c9   : > { %1396 = vst [vmem:[#allocation2 + $0x3d8] sm:$0xff] %v1268_v38  ;;  %v1206_v41 = vmax.f32 %v1061_v39, 0.0 }
 0x1ca   : > { %1333 = vst [vmem:[#allocation2 + $0x1e0] sm:$0xff] %v1205_v40 }
 0x1cb   : > { %1334 = vst [vmem:[#allocation2 + $0x1e8] sm:$0xff] %v1206_v41  ;;  %v971_v42 = vpop.f32.mrf.mxu2 }
 0x1cc   : > { %v972_v43 = vadd.f32 %v971_v42, %v18657_v30  ;;  %v1140_v44 = vpop.f32.mrf.mxu3 }
 0x1cd   : > { %v1141_v45 = vadd.f32 %v1140_v44, %v18659_v31  ;;  %v893_v46 = vpop.f32.mrf.mxu0 }
 0x1ce   : > { %v1269_v47 = vmax.f32 %v972_v43, 0.0  ;;  %v894_v48 = vadd.f32 %v893_v46, %v18657_v30  ;;  %v1062_v49 = vpop.f32.mrf.mxu1 }
 0x1cf   : > { %v1270_v50 = vmax.f32 %v1141_v45, 0.0  ;;  %v1063_v51 = vadd.f32 %v1062_v49, %v18659_v31 }
 0x1d0   : > { %1397 = vst [vmem:[#allocation2 + $0x3e0] sm:$0xff] %v1269_v47  ;;  %v1207_v52 = vmax.f32 %v894_v48, 0.0 }
 0x1d1   : > { %1398 = vst [vmem:[#allocation2 + $0x3e8] sm:$0xff] %v1270_v50  ;;  %v1208_v53 = vmax.f32 %v1063_v51, 0.0 }
 0x1d2   : > { %1335 = vst [vmem:[#allocation2 + $0x1f0] sm:$0xff] %v1207_v52 }
 0x1d3   : > { %1336 = vst [vmem:[#allocation2 + $0x1f8] sm:$0xff] %v1208_v53  ;;  %v973_v54 = vpop.f32.mrf.mxu2 }
 0x1d4   : > { %v974_v55 = vadd.f32 %v973_v54, %v18657_v30  ;;  %v1142_v56 = vpop.f32.mrf.mxu3 }
 0x1d5   : > { %v1143_v57 = vadd.f32 %v1142_v56, %v18659_v31 }
 0x1d6   : > { %v1271_v58 = vmax.f32 %v974_v55, 0.0 }
 0x1d7   : > { %v1272_v59 = vmax.f32 %v1143_v57, 0.0 }
 0x1d8   : > { %1399 = vst [vmem:[#allocation2 + $0x3f0] sm:$0xff] %v1271_v58 }
 0x1d9   : > { %1400 = vst [vmem:[#allocation2 + $0x3f8] sm:$0xff] %v1272_v59 }
 0x1da PF: > { %v11066_v30 = vld [vmem:[%s18557_s2 + $0x70] sm:$0xf]  ;;  %v16694_v60 = vld [vmem:[%s18557_s2 + $0x74] sm:$0xf0]  ;;  %v16693_v63 = vld [vmem:[%s18557_s2 + $0x74] sm:$0xf] }
 0x1db   : > { %v11130_v31 = vld [vmem:[%s18557_s2 + $0xf0] sm:$0xf]  ;;  %v11067_v61 = vor.u32 %v16694_v60, %v11066_v30  ;;  %v16710_v62 = vld [vmem:[%s18557_s2 + $0xf4] sm:$0xf0]  ;;  %v11068_v0 = vld [vmem:[%s18557_s2 + $0x78] sm:$0xf0] }
 0x1dc   : > { %v11131_v1 = vor.u32 %v16710_v62, %v11130_v31  ;;  %v11071_v2 = vor.u32 %v16693_v63, %v11068_v0  ;;  %v16709_v3 = vld [vmem:[%s18557_s2 + $0xf4] sm:$0xf]  ;;  %v11132_v4 = vld [vmem:[%s18557_s2 + $0xf8] sm:$0xf0]  ;;  %v11058_v5 = vld [vmem:[%s18557_s2 + $0x60] sm:$0xf] }
 0x1dd   : > { %1606 = vmatpush.bf16.msra.mxu0 %v11067_v61  ;;  %v11135_v6 = vor.u32 %v16709_v3, %v11132_v4  ;;  %v16692_v7 = vld [vmem:[%s18557_s2 + $0x64] sm:$0xf0]  ;;  %v11122_v8 = vld [vmem:[%s18557_s2 + $0xe0] sm:$0xf]  ;;  %v16691_v12 = vld [vmem:[%s18557_s2 + $0x64] sm:$0xf] }
 0x1de   : > { %v16708_v9 = vld [vmem:[%s18557_s2 + $0xe4] sm:$0xf0]  ;;  %1619 = vmatpush.bf16.msra.mxu1 %v11131_v1  ;;  %1632 = vmatpush.bf16.msra.mxu2 %v11071_v2  ;;  %v11059_v10 = vor.u32 %v16692_v7, %v11058_v5  ;;  %v11060_v13 = vld [vmem:[%s18557_s2 + $0x68] sm:$0xf0]  ;;  %v16707_v14 = vld [vmem:[%s18557_s2 + $0xe4] sm:$0xf] }
 0x1df   : > { %v11123_v11 = vor.u32 %v16708_v9, %v11122_v8  ;;  %1645 = vmatpush.bf16.msra.mxu3 %v11135_v6  ;;  %v11063_v15 = vor.u32 %v16691_v12, %v11060_v13  ;;  %v11124_v16 = vld [vmem:[%s18557_s2 + $0xe8] sm:$0xf0]  ;;  %v11050_v17 = vld [vmem:[%s18557_s2 + $0x50] sm:$0xf]  ;;  %v16690_v18 = vld [vmem:[%s18557_s2 + $0x54] sm:$0xf0] }
 0x1e0   : > { %v11127_v19 = vor.u32 %v16707_v14, %v11124_v16  ;;  %v11114_v20 = vld [vmem:[%s18557_s2 + $0xd0] sm:$0xf]  ;;  %v16706_v21 = vld [vmem:[%s18557_s2 + $0xd4] sm:$0xf0]  ;;  %v16689_v22 = vld [vmem:[%s18557_s2 + $0x54] sm:$0xf]  ;;  %v11051_v23 = vor.u32 %v16690_v18, %v11050_v17 }
 0x1e1   : > { %1607 = vmatpush.bf16.msra.mxu0 %v11059_v10  ;;  %v11052_v24 = vld [vmem:[%s18557_s2 + $0x58] sm:$0xf0]  ;;  %v16705_v25 = vld [vmem:[%s18557_s2 + $0xd4] sm:$0xf]  ;;  %v11115_v27 = vor.u32 %v16706_v21, %v11114_v20  ;;  %v11042_v29 = vld [vmem:[%s18557_s2 + $0x40] sm:$0xf] }
 0x1e2   : > { %v11116_v26 = vld [vmem:[%s18557_s2 + $0xd8] sm:$0xf0]  ;;  %1620 = vmatpush.bf16.msra.mxu1 %v11123_v11  ;;  %1633 = vmatpush.bf16.msra.mxu2 %v11063_v15  ;;  %v11055_v28 = vor.u32 %v16689_v22, %v11052_v24  ;;  %v16688_v32 = vld [vmem:[%s18557_s2 + $0x44] sm:$0xf0]  ;;  %v11106_v33 = vld [vmem:[%s18557_s2 + $0xc0] sm:$0xf] }
 0x1e3   : > { %1646 = vmatpush.bf16.msra.mxu3 %v11127_v19  ;;  %v11119_v34 = vor.u32 %v16705_v25, %v11116_v26  ;;  %v16704_v35 = vld [vmem:[%s18557_s2 + $0xc4] sm:$0xf0]  ;;  %v16687_v36 = vld [vmem:[%s18557_s2 + $0x44] sm:$0xf]  ;;  %v11044_v37 = vld [vmem:[%s18557_s2 + $0x48] sm:$0xf0]  ;;  %v11043_v40 = vor.u32 %v16688_v32, %v11042_v29 }
 0x1e4   : > { %v16703_v38 = vld [vmem:[%s18557_s2 + $0xc4] sm:$0xf]  ;;  %v11108_v39 = vld [vmem:[%s18557_s2 + $0xc8] sm:$0xf0]  ;;  %v11107_v41 = vor.u32 %v16704_v35, %v11106_v33  ;;  %v11047_v42 = vor.u32 %v16687_v36, %v11044_v37  ;;  %v11034_v43 = vld [vmem:[%s18557_s2 + $0x30] sm:$0xf] }
 0x1e5   : > { %1608 = vmatpush.bf16.msra.mxu0 %v11051_v23  ;;  %v16686_v44 = vld [vmem:[%s18557_s2 + $0x34] sm:$0xf0]  ;;  %v11098_v45 = vld [vmem:[%s18557_s2 + $0xb0] sm:$0xf]  ;;  %v11111_v46 = vor.u32 %v16703_v38, %v11108_v39  ;;  %v16685_v48 = vld [vmem:[%s18557_s2 + $0x34] sm:$0xf] }
 0x1e6   : > { %1621 = vmatpush.bf16.msra.mxu1 %v11115_v27  ;;  %1634 = vmatpush.bf16.msra.mxu2 %v11055_v28  ;;  %v16702_v47 = vld [vmem:[%s18557_s2 + $0xb4] sm:$0xf0]  ;;  %v11036_v49 = vld [vmem:[%s18557_s2 + $0x38] sm:$0xf0]  ;;  %v16701_v50 = vld [vmem:[%s18557_s2 + $0xb4] sm:$0xf]  ;;  %v11035_v52 = vor.u32 %v16686_v44, %v11034_v43 }
 0x1e7   : > { %1647 = vmatpush.bf16.msra.mxu3 %v11119_v34  ;;  %v11100_v51 = vld [vmem:[%s18557_s2 + $0xb8] sm:$0xf0]  ;;  %v11099_v53 = vor.u32 %v16702_v47, %v11098_v45  ;;  %v11039_v54 = vor.u32 %v16685_v48, %v11036_v49  ;;  %v11026_v55 = vld [vmem:[%s18557_s2 + $0x20] sm:$0xf]  ;;  %v16684_v56 = vld [vmem:[%s18557_s2 + $0x24] sm:$0xf0] }
 0x1e8   : > { %v11090_v57 = vld [vmem:[%s18557_s2 + $0xa0] sm:$0xf]  ;;  %v11103_v58 = vor.u32 %v16701_v50, %v11100_v51  ;;  %v16700_v59 = vld [vmem:[%s18557_s2 + $0xa4] sm:$0xf0]  ;;  %v16683_v30 = vld [vmem:[%s18557_s2 + $0x24] sm:$0xf]  ;;  %v11027_v62 = vor.u32 %v16684_v56, %v11026_v55 }
 0x1e9   : > { %1609 = vmatpush.bf16.msra.mxu0 %v11043_v40  ;;  %v11028_v60 = vld [vmem:[%s18557_s2 + $0x28] sm:$0xf0]  ;;  %v16699_v31 = vld [vmem:[%s18557_s2 + $0xa4] sm:$0xf]  ;;  %v11091_v63 = vor.u32 %v16700_v59, %v11090_v57  ;;  %v11018_v1 = vld [vmem:[%s18557_s2 + $0x10] sm:$0xf] }
 0x1ea   : > { %1622 = vmatpush.bf16.msra.mxu1 %v11107_v41  ;;  %1635 = vmatpush.bf16.msra.mxu2 %v11047_v42  ;;  %v11092_v61 = vld [vmem:[%s18557_s2 + $0xa8] sm:$0xf0]  ;;  %v11031_v0 = vor.u32 %v16683_v30, %v11028_v60  ;;  %v16682_v2 = vld [vmem:[%s18557_s2 + $0x14] sm:$0xf0]  ;;  %v11082_v3 = vld [vmem:[%s18557_s2 + $0x90] sm:$0xf] }
 0x1eb   : > { %1648 = vmatpush.bf16.msra.mxu3 %v11111_v46  ;;  %v11095_v4 = vor.u32 %v16699_v31, %v11092_v61  ;;  %v16698_v5 = vld [vmem:[%s18557_s2 + $0x94] sm:$0xf0]  ;;  %v16681_v6 = vld [vmem:[%s18557_s2 + $0x14] sm:$0xf]  ;;  %v11020_v7 = vld [vmem:[%s18557_s2 + $0x18] sm:$0xf0]  ;;  %v11019_v10 = vor.u32 %v16682_v2, %v11018_v1 }
 0x1ec   : > { %v16697_v8 = vld [vmem:[%s18557_s2 + $0x94] sm:$0xf]  ;;  %v11084_v9 = vld [vmem:[%s18557_s2 + $0x98] sm:$0xf0]  ;;  %v11010_v11 = vld [vmem:[%s18557_s2] sm:$0xf]  ;;  %v11083_v13 = vor.u32 %v16698_v5, %v11082_v3  ;;  %v11023_v14 = vor.u32 %v16681_v6, %v11020_v7 }
 0x1ed   : > { %1610 = vmatpush.bf16.msra.mxu0 %v11035_v52  ;;  %v16680_v12 = vld [vmem:[%s18557_s2 + $0x4] sm:$0xf0]  ;;  %v11074_v15 = vld [vmem:[%s18557_s2 + $0x80] sm:$0xf]  ;;  %v16679_v17 = vld [vmem:[%s18557_s2 + $0x4] sm:$0xf]  ;;  %v11087_v18 = vor.u32 %v16697_v8, %v11084_v9 }
 0x1ee   : > { %1623 = vmatpush.bf16.msra.mxu1 %v11099_v53  ;;  %1636 = vmatpush.bf16.msra.mxu2 %v11039_v54  ;;  %v16696_v16 = vld [vmem:[%s18557_s2 + $0x84] sm:$0xf0]  ;;  %v11012_v19 = vld [vmem:[%s18557_s2 + $0x8] sm:$0xf0]  ;;  %v16695_v20 = vld [vmem:[%s18557_s2 + $0x84] sm:$0xf]  ;;  %v11011_v25 = vor.u32 %v16680_v12, %v11010_v11 }
 0x1ef   : > { %1649 = vmatpush.bf16.msra.mxu3 %v11103_v58  ;;  %v11076_v21 = vld [vmem:[%s18557_s2 + $0x88] sm:$0xf0]  ;;  %v11229_v22 = vld [vmem:[%s18557_s2 + $0x170] sm:$0xf]  ;;  %v16729_v23 = vld [vmem:[%s18557_s2 + $0x174] sm:$0xf0]  ;;  %v11075_v29 = vor.u32 %v16696_v16, %v11074_v15  ;;  %v11015_v32 = vor.u32 %v16679_v17, %v11012_v19 }
 0x1f0   : > { %v11293_v24 = vld [vmem:[%s18557_s2 + $0x1f0] sm:$0xf]  ;;  %v16745_v26 = vld [vmem:[%s18557_s2 + $0x1f4] sm:$0xf0]  ;;  %v16728_v27 = vld [vmem:[%s18557_s2 + $0x174] sm:$0xf]  ;;  %v11079_v35 = vor.u32 %v16695_v20, %v11076_v21  ;;  %v11230_v36 = vor.u32 %v16729_v23, %v11229_v22 }
 0x1f1   : > { %1611 = vmatpush.bf16.msra.mxu0 %v11027_v62  ;;  %v11231_v28 = vld [vmem:[%s18557_s2 + $0x178] sm:$0xf0]  ;;  %v16744_v33 = vld [vmem:[%s18557_s2 + $0x1f4] sm:$0xf]  ;;  %v11221_v37 = vld [vmem:[%s18557_s2 + $0x160] sm:$0xf]  ;;  %v11294_v38 = vor.u32 %v16745_v26, %v11293_v24 }
 0x1f2   : > { %1624 = vmatpush.bf16.msra.mxu1 %v11091_v63  ;;  %1637 = vmatpush.bf16.msra.mxu2 %v11031_v0  ;;  %v11295_v34 = vld [vmem:[%s18557_s2 + $0x1f8] sm:$0xf0]  ;;  %v11234_v39 = vor.u32 %v16728_v27, %v11231_v28  ;;  %v16727_v40 = vld [vmem:[%s18557_s2 + $0x164] sm:$0xf0]  ;;  %v11285_v41 = vld [vmem:[%s18557_s2 + $0x1e0] sm:$0xf] }
 0x1f3   : > { %1650 = vmatpush.bf16.msra.mxu3 %v11095_v4  ;;  %v16743_v42 = vld [vmem:[%s18557_s2 + $0x1e4] sm:$0xf0]  ;;  %v11298_v43 = vor.u32 %v16744_v33, %v11295_v34  ;;  %v16726_v44 = vld [vmem:[%s18557_s2 + $0x164] sm:$0xf]  ;;  %v11223_v45 = vld [vmem:[%s18557_s2 + $0x168] sm:$0xf0]  ;;  %v11222_v49 = vor.u32 %v16727_v40, %v11221_v37 }
 0x1f4   : > { %v16742_v46 = vld [vmem:[%s18557_s2 + $0x1e4] sm:$0xf]  ;;  %v11287_v47 = vld [vmem:[%s18557_s2 + $0x1e8] sm:$0xf0]  ;;  %v11213_v48 = vld [vmem:[%s18557_s2 + $0x150] sm:$0xf]  ;;  %v11286_v52 = vor.u32 %v16743_v42, %v11285_v41  ;;  %v11226_v53 = vor.u32 %v16726_v44, %v11223_v45 }
 0x1f5   : > { %1612 = vmatpush.bf16.msra.mxu0 %v11019_v10  ;;  %s18951_s29 = sshll.u32 %s18445_s16, 8  ;;  %v16725_v50 = vld [vmem:[%s18557_s2 + $0x154] sm:$0xf0]  ;;  %v11277_v51 = vld [vmem:[%s18557_s2 + $0x1d0] sm:$0xf]  ;;  %v11290_v56 = vor.u32 %v16742_v46, %v11287_v47  ;;  %p16189_p1 = scmp.ne.s32.totalorder %s18445_s16, 1 }
 0x1f6   : > { %1625 = vmatpush.bf16.msra.mxu1 %v11083_v13  ;;  %1638 = vmatpush.bf16.msra.mxu2 %v11023_v14  ;;  %s1405_s13 = sshra.s32 %s18951_s29, 3  ;;  %v16741_v54 = vld [vmem:[%s18557_s2 + $0x1d4] sm:$0xf0]  ;;  %v16724_v55 = vld [vmem:[%s18557_s2 + $0x154] sm:$0xf]  ;;  %v11214_v31 = vor.u32 %v16725_v50, %v11213_v48  ;;  %s16712_s26 = sadd.s32 8, %s18951_s29 }
 0x1f7   : > { %1651 = vmatpush.bf16.msra.mxu3 %v11087_v18  ;;  %s16678_s1 = sshll.u32 %s1405_s13, 4  ;;  %v11215_v57 = vld [vmem:[%s18557_s2 + $0x158] sm:$0xf0]  ;;  %v16740_v58 = vld [vmem:[%s18557_s2 + $0x1d4] sm:$0xf]  ;;  %v11278_v63 = vor.u32 %v16741_v54, %v11277_v51  ;;  %s18978_s19 = sshra.s32 %s16712_s26, 3 }
 0x1f8   : > { %v11279_v59 = vld [vmem:[%s18557_s2 + $0x1d8] sm:$0xf0]  ;;  %s1409_s17 = scalar_lea.vmem [#allocation2], %s16678_s1  ;;  %v11218_v0 = vor.u32 %v16724_v55, %v11215_v57  ;;  %v11205_v1 = vld [vmem:[%s18557_s2 + $0x140] sm:$0xf]  ;;  %s16713_s22 = sshll.u32 %s18978_s19, 4 }
 0x1f9   : > { %1613 = vmatpush.bf16.msra.mxu0 %v11011_v25  ;;  %v1410_v30 = vld [vmem:[%s1409_s17] sm:$0xff]  ;;  %v1411_v60 = vld [vmem:[%s1409_s17 + $0x8] sm:$0xff]  ;;  %v16723_v2 = vld [vmem:[%s18557_s2 + $0x144] sm:$0xf0]  ;;  %v11282_v4 = vor.u32 %v16740_v58, %v11279_v59  ;;  %s1666_s30 = scalar_lea.vmem [#allocation2], %s16713_s22  ;;  %s16747_s27 = sadd.s32 16, %s18951_s29 }
 0x1fa   : > { %1626 = vmatpush.bf16.msra.mxu1 %v11075_v29  ;;  %1639 = vmatpush.bf16.msra.mxu2 %v11015_v32  ;;  %v1412_v61 = vpack.c.bf16 %v1410_v30, %v1410_v30  ;;  %v1413_v62 = vpack.c.bf16 %v1411_v60, %v1411_v60  ;;  %v11269_v3 = vld [vmem:[%s18557_s2 + $0x1c0] sm:$0xf]  ;;  %v16739_v5 = vld [vmem:[%s18557_s2 + $0x1c4] sm:$0xf0]  ;;  %v16722_v6 = vld [vmem:[%s18557_s2 + $0x144] sm:$0xf]  ;;  %v11206_v10 = vor.u32 %v16723_v2, %v11205_v1 }
 0x1fb   : > { %1652 = vmatpush.bf16.msra.mxu3 %v11079_v35  ;;  %v11207_v7 = vld [vmem:[%s18557_s2 + $0x148] sm:$0xf0]  ;;  %v16738_v8 = vld [vmem:[%s18557_s2 + $0x1c4] sm:$0xf]  ;;  %v11197_v11 = vld [vmem:[%s18557_s2 + $0x130] sm:$0xf]  ;;  %v11270_v12 = vor.u32 %v16739_v5, %v11269_v3 }
 0x1fc   : > { %v11271_v9 = vld [vmem:[%s18557_s2 + $0x1c8] sm:$0xf0]  ;;  %1614 = vmatmul.bf16.vlgmr.msra.gmra.mxu0 %v1412_v61  ;;  %v11210_v13 = vor.u32 %v16722_v6, %v11207_v7  ;;  %v16721_v14 = vld [vmem:[%s18557_s2 + $0x134] sm:$0xf0]  ;;  %v11261_v15 = vld [vmem:[%s18557_s2 + $0x1b0] sm:$0xf] }
 0x1fd   : > { %1864 = vmatpush.bf16.msrb.mxu0 %v11230_v36  ;;  %1640 = vmatmul.bf16.vlgmr.msra.gmra.mxu2 %v1412_v61  ;;  %v11274_v16 = vor.u32 %v16738_v8, %v11271_v9  ;;  %v16737_v17 = vld [vmem:[%s18557_s2 + $0x1b4] sm:$0xf0]  ;;  %v16720_v18 = vld [vmem:[%s18557_s2 + $0x134] sm:$0xf]  ;;  %v11199_v19 = vld [vmem:[%s18557_s2 + $0x138] sm:$0xf0]  ;;  %v11198_v22 = vor.u32 %v16721_v14, %v11197_v11 }
 0x1fe   : > { %1877 = vmatpush.bf16.msrb.mxu1 %v11294_v38  ;;  %1890 = vmatpush.bf16.msrb.mxu2 %v11234_v39  ;;  %v16736_v20 = vld [vmem:[%s18557_s2 + $0x1b4] sm:$0xf]  ;;  %v11263_v21 = vld [vmem:[%s18557_s2 + $0x1b8] sm:$0xf0]  ;;  %v11262_v23 = vor.u32 %v16737_v17, %v11261_v15  ;;  %v11202_v24 = vor.u32 %v16720_v18, %v11199_v19  ;;  %v11189_v25 = vld [vmem:[%s18557_s2 + $0x120] sm:$0xf] }
 0x1ff   : > { %1903 = vmatpush.bf16.msrb.mxu3 %v11298_v43  ;;  %1627 = vmatmul.bf16.vlgmr.msra.gmra.mxu1 %v1413_v62  ;;  %v16719_v26 = vld [vmem:[%s18557_s2 + $0x124] sm:$0xf0]  ;;  %v11253_v27 = vld [vmem:[%s18557_s2 + $0x1a0] sm:$0xf]  ;;  %v11266_v28 = vor.u32 %v16736_v20, %v11263_v21  ;;  %v16718_v32 = vld [vmem:[%s18557_s2 + $0x124] sm:$0xf] }
 0x200   : > { %1653 = vmatmul.bf16.vlgmr.msra.gmra.mxu3 %v1413_v62  ;;  %v16735_v29 = vld [vmem:[%s18557_s2 + $0x1a4] sm:$0xf0]  ;;  %v11191_v33 = vld [vmem:[%s18557_s2 + $0x128] sm:$0xf0]  ;;  %v16734_v34 = vld [vmem:[%s18557_s2 + $0x1a4] sm:$0xf]  ;;  %v11190_v36 = vor.u32 %v16719_v26, %v11189_v25 }
 0x201   : > { %1865 = vmatpush.bf16.msrb.mxu0 %v11222_v49  ;;  %v11255_v35 = vld [vmem:[%s18557_s2 + $0x1a8] sm:$0xf0]  ;;  %v11254_v37 = vor.u32 %v16735_v29, %v11253_v27  ;;  %v11194_v38 = vor.u32 %v16718_v32, %v11191_v33  ;;  %v11181_v39 = vld [vmem:[%s18557_s2 + $0x110] sm:$0xf]  ;;  %v16717_v40 = vld [vmem:[%s18557_s2 + $0x114] sm:$0xf0] }
 0x202   : > { %1878 = vmatpush.bf16.msrb.mxu1 %v11286_v52  ;;  %1891 = vmatpush.bf16.msrb.mxu2 %v11226_v53  ;;  %v11245_v41 = vld [vmem:[%s18557_s2 + $0x190] sm:$0xf]  ;;  %v11258_v42 = vor.u32 %v16734_v34, %v11255_v35  ;;  %v16733_v43 = vld [vmem:[%s18557_s2 + $0x194] sm:$0xf0]  ;;  %v16716_v44 = vld [vmem:[%s18557_s2 + $0x114] sm:$0xf]  ;;  %v11182_v48 = vor.u32 %v16717_v40, %v11181_v39 }
 0x203   : > { %1904 = vmatpush.bf16.msrb.mxu3 %v11290_v56  ;;  %v11183_v45 = vld [vmem:[%s18557_s2 + $0x118] sm:$0xf0]  ;;  %v16732_v46 = vld [vmem:[%s18557_s2 + $0x194] sm:$0xf]  ;;  %v11173_v49 = vld [vmem:[%s18557_s2 + $0x100] sm:$0xf]  ;;  %v11246_v51 = vor.u32 %v16733_v43, %v11245_v41 }
 0x204   : > { %v11247_v47 = vld [vmem:[%s18557_s2 + $0x198] sm:$0xf0]  ;;  %v16715_v50 = vld [vmem:[%s18557_s2 + $0x104] sm:$0xf0]  ;;  %v11186_v52 = vor.u32 %v16716_v44, %v11183_v45  ;;  %v11237_v53 = vld [vmem:[%s18557_s2 + $0x180] sm:$0xf] }
 0x205   : > { %1866 = vmatpush.bf16.msrb.mxu0 %v11214_v31  ;;  %v16731_v54 = vld [vmem:[%s18557_s2 + $0x184] sm:$0xf0]  ;;  %v16714_v55 = vld [vmem:[%s18557_s2 + $0x104] sm:$0xf]  ;;  %v11250_v56 = vor.u32 %v16732_v46, %v11247_v47  ;;  %v11175_v57 = vld [vmem:[%s18557_s2 + $0x108] sm:$0xf0]  ;;  %v11174_v61 = vor.u32 %v16715_v50, %v11173_v49 }
 0x206   : > { %1879 = vmatpush.bf16.msrb.mxu1 %v11278_v63  ;;  %1892 = vmatpush.bf16.msrb.mxu2 %v11218_v0  ;;  %v16730_v58 = vld [vmem:[%s18557_s2 + $0x184] sm:$0xf]  ;;  %v11239_v59 = vld [vmem:[%s18557_s2 + $0x188] sm:$0xf0]  ;;  %v11392_v30 = vld [vmem:[%s18557_s2 + $0x270] sm:$0xf]  ;;  %v11238_v1 = vor.u32 %v16731_v54, %v11237_v53  ;;  %v11178_v2 = vor.u32 %v16714_v55, %v11175_v57 }
 0x207   : > { %1905 = vmatpush.bf16.msrb.mxu3 %v11282_v4  ;;  %v16764_v60 = vld [vmem:[%s18557_s2 + $0x274] sm:$0xf0]  ;;  %v11456_v31 = vld [vmem:[%s18557_s2 + $0x2f0] sm:$0xf]  ;;  %v16763_v63 = vld [vmem:[%s18557_s2 + $0x274] sm:$0xf]  ;;  %v11242_v6 = vor.u32 %v16730_v58, %v11239_v59 }
 0x208   : > { %v16780_v62 = vld [vmem:[%s18557_s2 + $0x2f4] sm:$0xf0]  ;;  %v11394_v0 = vld [vmem:[%s18557_s2 + $0x278] sm:$0xf0]  ;;  %v16779_v3 = vld [vmem:[%s18557_s2 + $0x2f4] sm:$0xf]  ;;  %v11393_v7 = vor.u32 %v16764_v60, %v11392_v30 }
 0x209   : > { %1867 = vmatpush.bf16.msrb.mxu0 %v11206_v10  ;;  %v11458_v4 = vld [vmem:[%s18557_s2 + $0x2f8] sm:$0xf0]  ;;  %v1667_v5 = vld [vmem:[%s1666_s30] sm:$0xff]  ;;  %v11457_v9 = vor.u32 %v16780_v62, %v11456_v31  ;;  %v11397_v10 = vor.u32 %v16763_v63, %v11394_v0  ;;  %v11384_v11 = vld [vmem:[%s18557_s2 + $0x260] sm:$0xf]  ;;  %s19056_s14 = sshra.s32 %s16747_s27, 3 }
 0x20a   : > { %1880 = vmatpush.bf16.msrb.mxu1 %v11270_v12  ;;  %1893 = vmatpush.bf16.msrb.mxu2 %v11210_v13  ;;  %v1668_v8 = vld [vmem:[%s1666_s30 + $0x8] sm:$0xff]  ;;  %v16762_v12 = vld [vmem:[%s18557_s2 + $0x264] sm:$0xf0]  ;;  %v11448_v13 = vld [vmem:[%s18557_s2 + $0x2e0] sm:$0xf]  ;;  %v11461_v14 = vor.u32 %v16779_v3, %v11458_v4  ;;  %v1669_v15 = vpack.c.bf16 %v1667_v5, %v1667_v5  ;;  %s16748_s18 = sshll.u32 %s19056_s14, 4 }
 0x20b   : > { %1906 = vmatpush.bf16.msrb.mxu3 %v11274_v16  ;;  %v16778_v16 = vld [vmem:[%s18557_s2 + $0x2e4] sm:$0xf0]  ;;  %v16761_v17 = vld [vmem:[%s18557_s2 + $0x264] sm:$0xf]  ;;  %v11386_v18 = vld [vmem:[%s18557_s2 + $0x268] sm:$0xf0]  ;;  %v1670_v19 = vpack.c.bf16 %v1668_v8, %v1668_v8 }
 0x20c   : > { %v16777_v20 = vld [vmem:[%s18557_s2 + $0x2e4] sm:$0xf]  ;;  %v11450_v21 = vld [vmem:[%s18557_s2 + $0x2e8] sm:$0xf0]  ;;  %v11376_v25 = vld [vmem:[%s18557_s2 + $0x250] sm:$0xf] }
 0x20d   : > { %1868 = vmatpush.bf16.msrb.mxu0 %v11198_v22  ;;  %v11385_v22 = vor.u32 %v16762_v12, %v11384_v11  ;;  %v16760_v26 = vld [vmem:[%s18557_s2 + $0x254] sm:$0xf0]  ;;  %v11440_v27 = vld [vmem:[%s18557_s2 + $0x2d0] sm:$0xf]  ;;  %v16759_v32 = vld [vmem:[%s18557_s2 + $0x254] sm:$0xf] }
 0x20e   : > { %1881 = vmatpush.bf16.msrb.mxu1 %v11262_v23  ;;  %1894 = vmatpush.bf16.msrb.mxu2 %v11202_v24  ;;  %v11449_v23 = vor.u32 %v16778_v16, %v11448_v13  ;;  %v11389_v24 = vor.u32 %v16761_v17, %v11386_v18  ;;  %v16776_v29 = vld [vmem:[%s18557_s2 + $0x2d4] sm:$0xf0]  ;;  %v11378_v33 = vld [vmem:[%s18557_s2 + $0x258] sm:$0xf0]  ;;  %v16775_v34 = vld [vmem:[%s18557_s2 + $0x2d4] sm:$0xf] }
 0x20f   : > { %1907 = vmatpush.bf16.msrb.mxu3 %v11266_v28  ;;  %v11453_v28 = vor.u32 %v16777_v20, %v11450_v21  ;;  %v11442_v35 = vld [vmem:[%s18557_s2 + $0x2d8] sm:$0xf0]  ;;  %v11368_v39 = vld [vmem:[%s18557_s2 + $0x240] sm:$0xf]  ;;  %v16758_v40 = vld [vmem:[%s18557_s2 + $0x244] sm:$0xf0] }
 0x210   : > { %v11432_v41 = vld [vmem:[%s18557_s2 + $0x2c0] sm:$0xf]  ;;  %v16774_v43 = vld [vmem:[%s18557_s2 + $0x2c4] sm:$0xf0]  ;;  %v16757_v44 = vld [vmem:[%s18557_s2 + $0x244] sm:$0xf] }
 0x211   : > { %1869 = vmatpush.bf16.msrb.mxu0 %v11190_v36  ;;  %v11377_v36 = vor.u32 %v16760_v26, %v11376_v25  ;;  %v11370_v45 = vld [vmem:[%s18557_s2 + $0x248] sm:$0xf0]  ;;  %v16773_v46 = vld [vmem:[%s18557_s2 + $0x2c4] sm:$0xf]  ;;  %v11433_v49 = vor.u32 %v16774_v43, %v11432_v41  ;;  %v11424_v53 = vld [vmem:[%s18557_s2 + $0x2b0] sm:$0xf] }
 0x212   : > { %1882 = vmatpush.bf16.msrb.mxu1 %v11254_v37  ;;  %1895 = vmatpush.bf16.msrb.mxu2 %v11194_v38  ;;  %v11441_v37 = vor.u32 %v16776_v29, %v11440_v27  ;;  %v11381_v38 = vor.u32 %v16759_v32, %v11378_v33  ;;  %v11434_v47 = vld [vmem:[%s18557_s2 + $0x2c8] sm:$0xf0]  ;;  %v11373_v50 = vor.u32 %v16757_v44, %v11370_v45  ;;  %v16772_v55 = vld [vmem:[%s18557_s2 + $0x2b4] sm:$0xf0]  ;;  %v11362_v57 = vld [vmem:[%s18557_s2 + $0x238] sm:$0xf0] }
 0x213   : > { %1908 = vmatpush.bf16.msrb.mxu3 %v11258_v42  ;;  %v11445_v42 = vor.u32 %v16775_v34, %v11442_v35  ;;  %v11437_v54 = vor.u32 %v16773_v46, %v11434_v47  ;;  %v16771_v58 = vld [vmem:[%s18557_s2 + $0x2b4] sm:$0xf]  ;;  %v11426_v59 = vld [vmem:[%s18557_s2 + $0x2b8] sm:$0xf0]  ;;  %v11425_v60 = vor.u32 %v16772_v55, %v11424_v53  ;;  %v16754_v62 = vld [vmem:[%s18557_s2 + $0x224] sm:$0xf0] }
 0x214   : > { %v11416_v63 = vld [vmem:[%s18557_s2 + $0x2a0] sm:$0xf]  ;;  %v11429_v0 = vor.u32 %v16771_v58, %v11426_v59  ;;  %v11354_v3 = vld [vmem:[%s18557_s2 + $0x228] sm:$0xf0]  ;;  %v16769_v4 = vld [vmem:[%s18557_s2 + $0x2a4] sm:$0xf] }
 0x215   : > { %1870 = vmatpush.bf16.msrb.mxu0 %v11182_v48  ;;  %v11369_v48 = vor.u32 %v16758_v40, %v11368_v39  ;;  %v11418_v5 = vld [vmem:[%s18557_s2 + $0x2a8] sm:$0xf0]  ;;  %v11408_v11 = vld [vmem:[%s18557_s2 + $0x290] sm:$0xf]  ;;  %v16768_v13 = vld [vmem:[%s18557_s2 + $0x294] sm:$0xf0] }
 0x216   : > { %1883 = vmatpush.bf16.msrb.mxu1 %v11246_v51  ;;  %1896 = vmatpush.bf16.msrb.mxu2 %v11186_v52  ;;  %v11360_v51 = vld [vmem:[%s18557_s2 + $0x230] sm:$0xf]  ;;  %v16756_v52 = vld [vmem:[%s18557_s2 + $0x234] sm:$0xf0]  ;;  %v11421_v12 = vor.u32 %v16769_v4, %v11418_v5  ;;  %v16767_v16 = vld [vmem:[%s18557_s2 + $0x294] sm:$0xf] }
 0x217   : > { %1909 = vmatpush.bf16.msrb.mxu3 %v11250_v56  ;;  %v16755_v56 = vld [vmem:[%s18557_s2 + $0x234] sm:$0xf]  ;;  %v11361_v30 = vor.u32 %v16756_v52, %v11360_v51  ;;  %v11410_v17 = vld [vmem:[%s18557_s2 + $0x298] sm:$0xf0]  ;;  %v16750_v20 = vld [vmem:[%s18557_s2 + $0x204] sm:$0xf0] }
 0x218   : > { %v11365_v31 = vor.u32 %v16755_v56, %v11362_v57  ;;  %v11400_v21 = vld [vmem:[%s18557_s2 + $0x280] sm:$0xf]  ;;  %v16749_v25 = vld [vmem:[%s18557_s2 + $0x204] sm:$0xf]  ;;  %v11338_v26 = vld [vmem:[%s18557_s2 + $0x208] sm:$0xf0]  ;;  %v11413_v27 = vor.u32 %v16767_v16, %v11410_v17 }
 0x219   : > { %1871 = vmatpush.bf16.msrb.mxu0 %v11174_v61  ;;  %v11352_v61 = vld [vmem:[%s18557_s2 + $0x220] sm:$0xf]  ;;  %v11402_v29 = vld [vmem:[%s18557_s2 + $0x288] sm:$0xf0]  ;;  %v11555_v32 = vld [vmem:[%s18557_s2 + $0x370] sm:$0xf]  ;;  %v11341_v40 = vor.u32 %v16749_v25, %v11338_v26 }
 0x21a   : > { %1884 = vmatpush.bf16.msrb.mxu1 %v11238_v1  ;;  %1897 = vmatpush.bf16.msrb.mxu2 %v11178_v2  ;;  %v16770_v1 = vld [vmem:[%s18557_s2 + $0x2a4] sm:$0xf0]  ;;  %v16753_v2 = vld [vmem:[%s18557_s2 + $0x224] sm:$0xf]  ;;  %v16799_v33 = vld [vmem:[%s18557_s2 + $0x374] sm:$0xf0] }
 0x21b   : > { %1910 = vmatpush.bf16.msrb.mxu3 %v11242_v6  ;;  %v11353_v6 = vor.u32 %v16754_v62, %v11352_v61  ;;  %v11357_v8 = vor.u32 %v16753_v2, %v11354_v3  ;;  %v11619_v34 = vld [vmem:[%s18557_s2 + $0x3f0] sm:$0xf]  ;;  %v16814_v41 = vld [vmem:[%s18557_s2 + $0x3f4] sm:$0xf]  ;;  %s1924_s12 = scalar_lea.vmem [#allocation2], %s16748_s18  ;;  %v11556_v45 = vor.u32 %v16799_v33, %v11555_v32  ;;  %s16782_s20 = sadd.s32 24, %s18951_s29 }
 0x21c   : > { %1872 = vmatmul.bf16.vlgmr.msrb.gmra.mxu0 %v1669_v15  ;;  %v1925_v43 = vld [vmem:[%s1924_s12] sm:$0xff]  ;;  %v1926_v46 = vld [vmem:[%s1924_s12 + $0x8] sm:$0xff]  ;;  %v11611_v51 = vld [vmem:[%s18557_s2 + $0x3e0] sm:$0xf]  ;;  %s19118_s24 = sshra.s32 %s16782_s20, 3  ;;  %s16817_s23 = sadd.s32 32, %s18951_s29 }
 0x21d   : > { %2122 = vmatpush.bf16.msra.mxu0 %v11393_v7  ;;  %1898 = vmatmul.bf16.vlgmr.msrb.gmra.mxu2 %v1669_v15  ;;  %v11417_v7 = vor.u32 %v16770_v1, %v11416_v63  ;;  %v11346_v15 = vld [vmem:[%s18557_s2 + $0x218] sm:$0xf0]  ;;  %v1927_v53 = vpack.c.bf16 %v1925_v43, %v1925_v43  ;;  %v16796_v55 = vld [vmem:[%s18557_s2 + $0x364] sm:$0xf]  ;;  %v11549_v56 = vld [vmem:[%s18557_s2 + $0x368] sm:$0xf0]  ;;  %v1928_v57 = vpack.c.bf16 %v1926_v46, %v1926_v46 }
 0x21e   : > { %2135 = vmatpush.bf16.msra.mxu1 %v11457_v9  ;;  %2148 = vmatpush.bf16.msra.mxu2 %v11397_v10  ;;  %v11344_v9 = vld [vmem:[%s18557_s2 + $0x210] sm:$0xf]  ;;  %v16752_v10 = vld [vmem:[%s18557_s2 + $0x214] sm:$0xf0]  ;;  %v16812_v58 = vld [vmem:[%s18557_s2 + $0x3e4] sm:$0xf] }
 0x21f   : > { %2161 = vmatpush.bf16.msra.mxu3 %v11461_v14  ;;  %1885 = vmatmul.bf16.vlgmr.msrb.gmra.mxu1 %v1670_v19  ;;  %v16751_v14 = vld [vmem:[%s18557_s2 + $0x214] sm:$0xf]  ;;  %v11345_v18 = vor.u32 %v16752_v10, %v11344_v9  ;;  %v11613_v59 = vld [vmem:[%s18557_s2 + $0x3e8] sm:$0xf0]  ;;  %v11539_v61 = vld [vmem:[%s18557_s2 + $0x350] sm:$0xf] }
 0x220   : > { %1911 = vmatmul.bf16.vlgmr.msrb.gmra.mxu3 %v1670_v19  ;;  %v11336_v19 = vld [vmem:[%s18557_s2 + $0x200] sm:$0xf]  ;;  %v16795_v62 = vld [vmem:[%s18557_s2 + $0x354] sm:$0xf0]  ;;  %v11603_v63 = vld [vmem:[%s18557_s2 + $0x3d0] sm:$0xf] }
 0x221   : > { %2123 = vmatpush.bf16.msra.mxu0 %v11385_v22  ;;  %v11409_v22 = vor.u32 %v16768_v13, %v11408_v11  ;;  %v11337_v35 = vor.u32 %v16750_v20, %v11336_v19  ;;  %v16811_v1 = vld [vmem:[%s18557_s2 + $0x3d4] sm:$0xf0]  ;;  %v16794_v2 = vld [vmem:[%s18557_s2 + $0x354] sm:$0xf]  ;;  %v11541_v3 = vld [vmem:[%s18557_s2 + $0x358] sm:$0xf0] }
 0x222   : > { %2136 = vmatpush.bf16.msra.mxu1 %v11449_v23  ;;  %2149 = vmatpush.bf16.msra.mxu2 %v11389_v24  ;;  %v11349_v23 = vor.u32 %v16751_v14, %v11346_v15  ;;  %v16766_v24 = vld [vmem:[%s18557_s2 + $0x284] sm:$0xf0]  ;;  %v16810_v4 = vld [vmem:[%s18557_s2 + $0x3d4] sm:$0xf]  ;;  %v11605_v5 = vld [vmem:[%s18557_s2 + $0x3d8] sm:$0xf0] }
 0x223   : > { %2162 = vmatpush.bf16.msra.mxu3 %v11453_v28  ;;  %v16765_v28 = vld [vmem:[%s18557_s2 + $0x284] sm:$0xf]  ;;  %v11401_v39 = vor.u32 %v16766_v24, %v11400_v21  ;;  %v11531_v9 = vld [vmem:[%s18557_s2 + $0x340] sm:$0xf]  ;;  %v16793_v10 = vld [vmem:[%s18557_s2 + $0x344] sm:$0xf0] }
 0x224   : > { %v11405_v44 = vor.u32 %v16765_v28, %v11402_v29  ;;  %v11595_v11 = vld [vmem:[%s18557_s2 + $0x3c0] sm:$0xf]  ;;  %v16809_v13 = vld [vmem:[%s18557_s2 + $0x3c4] sm:$0xf0]  ;;  %v16792_v14 = vld [vmem:[%s18557_s2 + $0x344] sm:$0xf] }
 0x225   : > { %2124 = vmatpush.bf16.msra.mxu0 %v11377_v36  ;;  %v16815_v36 = vld [vmem:[%s18557_s2 + $0x3f4] sm:$0xf0]  ;;  %v11533_v15 = vld [vmem:[%s18557_s2 + $0x348] sm:$0xf0]  ;;  %v16808_v16 = vld [vmem:[%s18557_s2 + $0x3c4] sm:$0xf]  ;;  %v11596_v19 = vor.u32 %v16809_v13, %v11595_v11 }
 0x226   : > { %2137 = vmatpush.bf16.msra.mxu1 %v11441_v37  ;;  %2150 = vmatpush.bf16.msra.mxu2 %v11381_v38  ;;  %v16798_v37 = vld [vmem:[%s18557_s2 + $0x374] sm:$0xf]  ;;  %v11557_v38 = vld [vmem:[%s18557_s2 + $0x378] sm:$0xf0]  ;;  %v11620_v47 = vor.u32 %v16815_v36, %v11619_v34  ;;  %v11597_v17 = vld [vmem:[%s18557_s2 + $0x3c8] sm:$0xf0]  ;;  %v11536_v20 = vor.u32 %v16792_v14, %v11533_v15 }
 0x227   : > { %2163 = vmatpush.bf16.msra.mxu3 %v11445_v42  ;;  %v11621_v42 = vld [vmem:[%s18557_s2 + $0x3f8] sm:$0xf0]  ;;  %v11523_v21 = vld [vmem:[%s18557_s2 + $0x330] sm:$0xf]  ;;  %v11600_v24 = vor.u32 %v16808_v16, %v11597_v17  ;;  %v16807_v25 = vld [vmem:[%s18557_s2 + $0x3b4] sm:$0xf0] }
 0x228   : > { %v11624_v52 = vor.u32 %v16814_v41, %v11621_v42  ;;  %v16790_v26 = vld [vmem:[%s18557_s2 + $0x334] sm:$0xf]  ;;  %v11589_v29 = vld [vmem:[%s18557_s2 + $0x3b8] sm:$0xf0]  ;;  %v16789_v36 = vld [vmem:[%s18557_s2 + $0x324] sm:$0xf0] }
 0x229   : > { %2125 = vmatpush.bf16.msra.mxu0 %v11369_v48  ;;  %v11560_v48 = vor.u32 %v16798_v37, %v11557_v38  ;;  %v16806_v28 = vld [vmem:[%s18557_s2 + $0x3b4] sm:$0xf]  ;;  %v11579_v37 = vld [vmem:[%s18557_s2 + $0x3a0] sm:$0xf]  ;;  %v11517_v41 = vld [vmem:[%s18557_s2 + $0x328] sm:$0xf0] }
 0x22a   : > { %2138 = vmatpush.bf16.msra.mxu1 %v11433_v49  ;;  %2151 = vmatpush.bf16.msra.mxu2 %v11373_v50  ;;  %v11547_v49 = vld [vmem:[%s18557_s2 + $0x360] sm:$0xf]  ;;  %v16797_v50 = vld [vmem:[%s18557_s2 + $0x364] sm:$0xf0]  ;;  %v11592_v38 = vor.u32 %v16806_v28, %v11589_v29  ;;  %v16804_v42 = vld [vmem:[%s18557_s2 + $0x3a4] sm:$0xf] }
 0x22b   : > { %2164 = vmatpush.bf16.msra.mxu3 %v11437_v54  ;;  %v16813_v54 = vld [vmem:[%s18557_s2 + $0x3e4] sm:$0xf0]  ;;  %v11581_v43 = vld [vmem:[%s18557_s2 + $0x3a8] sm:$0xf0]  ;;  %s16783_s25 = sshll.u32 %s19118_s24, 4  ;;  %s19188_s13 = sshra.s32 %s16817_s23, 3 }
 0x22c   : > { %v16849_v11 = vld [vmem:[%s18557_s2 + $0x4f4] sm:$0xf]  ;;  %s2182_s15 = scalar_lea.vmem [#allocation2], %s16783_s25  ;;  %v16847_v28 = vld [vmem:[%s18557_s2 + $0x4e4] sm:$0xf]  ;;  %s16818_s1 = sshll.u32 %s19188_s13, 4 }
 0x22d   : > { %2126 = vmatpush.bf16.msra.mxu0 %v11361_v30  ;;  %v11548_v30 = vor.u32 %v16797_v50, %v11547_v49  ;;  %v11571_v49 = vld [vmem:[%s18557_s2 + $0x390] sm:$0xf]  ;;  %v11584_v50 = vor.u32 %v16804_v42, %v11581_v43  ;;  %v2184_v16 = vld [vmem:[%s2182_s15 + $0x8] sm:$0xff]  ;;  %v11776_v29 = vld [vmem:[%s18557_s2 + $0x4e8] sm:$0xf0]  ;;  %s2440_s17 = scalar_lea.vmem [#allocation2], %s16818_s1 }
 0x22e   : > { %2139 = vmatpush.bf16.msra.mxu1 %v11425_v60  ;;  %2152 = vmatpush.bf16.msra.mxu2 %v11365_v31  ;;  %v11612_v60 = vor.u32 %v16813_v54, %v11611_v51  ;;  %v11552_v31 = vor.u32 %v16796_v55, %v11549_v56  ;;  %v16803_v51 = vld [vmem:[%s18557_s2 + $0x394] sm:$0xf0]  ;;  %v16802_v54 = vld [vmem:[%s18557_s2 + $0x394] sm:$0xf]  ;;  %v11573_v55 = vld [vmem:[%s18557_s2 + $0x398] sm:$0xf0] }
 0x22f   : > { %2165 = vmatpush.bf16.msra.mxu3 %v11429_v0  ;;  %v11616_v0 = vor.u32 %v16812_v58, %v11613_v59  ;;  %v16785_v58 = vld [vmem:[%s18557_s2 + $0x304] sm:$0xf0]  ;;  %v11572_v59 = vor.u32 %v16803_v51, %v11571_v49  ;;  %v2183_v13 = vld [vmem:[%s2182_s15] sm:$0xff]  ;;  %v11768_v43 = vld [vmem:[%s18557_s2 + $0x4d8] sm:$0xf0]  ;;  %s16852_s26 = sadd.s32 40, %s18951_s29 }
 0x230   : > { %v16845_v42 = vld [vmem:[%s18557_s2 + $0x4d4] sm:$0xf]  ;;  %v11758_v49 = vld [vmem:[%s18557_s2 + $0x4c0] sm:$0xf]  ;;  %v16844_v51 = vld [vmem:[%s18557_s2 + $0x4c4] sm:$0xf0] }
 0x231   : > { %2127 = vmatpush.bf16.msra.mxu0 %v11353_v6  ;;  %v11540_v6 = vor.u32 %v16795_v62, %v11539_v61  ;;  %v16784_v61 = vld [vmem:[%s18557_s2 + $0x304] sm:$0xf]  ;;  %v11576_v62 = vor.u32 %v16802_v54, %v11573_v55  ;;  %v11760_v55 = vld [vmem:[%s18557_s2 + $0x4c8] sm:$0xf0]  ;;  %s19258_s19 = sshra.s32 %s16852_s26, 3  ;;  %s16887_s27 = sadd.s32 48, %s18951_s29 }
 0x232   : > { %2140 = vmatpush.bf16.msra.mxu1 %v11417_v7  ;;  %2153 = vmatpush.bf16.msra.mxu2 %v11357_v8  ;;  %v11604_v7 = vor.u32 %v16811_v1, %v11603_v63  ;;  %v11544_v8 = vor.u32 %v16794_v2, %v11541_v3  ;;  %v11501_v63 = vld [vmem:[%s18557_s2 + $0x308] sm:$0xf0]  ;;  %v11718_v2 = vld [vmem:[%s18557_s2 + $0x470] sm:$0xf]  ;;  %v16834_v3 = vld [vmem:[%s18557_s2 + $0x474] sm:$0xf0] }
 0x233   : > { %2166 = vmatpush.bf16.msra.mxu3 %v11421_v12  ;;  %v11608_v12 = vor.u32 %v16810_v4, %v11605_v5  ;;  %v11565_v1 = vld [vmem:[%s18557_s2 + $0x388] sm:$0xf0]  ;;  %v11782_v4 = vld [vmem:[%s18557_s2 + $0x4f0] sm:$0xf]  ;;  %v11719_v15 = vor.u32 %v16834_v3, %v11718_v2  ;;  %v16843_v54 = vld [vmem:[%s18557_s2 + $0x4c4] sm:$0xf] }
 0x234   : > { %s16853_s22 = sshll.u32 %s19258_s19, 4  ;;  %s19335_s14 = sshra.s32 %s16887_s27, 3 }
 0x235   : > { %2128 = vmatpush.bf16.msra.mxu0 %v11345_v18  ;;  %v11532_v18 = vor.u32 %v16793_v10, %v11531_v9  ;;  %v11504_v10 = vor.u32 %v16784_v61, %v11501_v63  ;;  %v16842_v61 = vld [vmem:[%s18557_s2 + $0x4b4] sm:$0xf0]  ;;  %v11688_v63 = vld [vmem:[%s18557_s2 + $0x438] sm:$0xf0]  ;;  %s2698_s30 = scalar_lea.vmem [#allocation2], %s16853_s22  ;;  %s16888_s18 = sshll.u32 %s19335_s14, 4 }
 0x236   : > { %2141 = vmatpush.bf16.msra.mxu1 %v11409_v22  ;;  %2154 = vmatpush.bf16.msra.mxu2 %v11349_v23  ;;  %v16791_v22 = vld [vmem:[%s18557_s2 + $0x334] sm:$0xf0]  ;;  %v11587_v23 = vld [vmem:[%s18557_s2 + $0x3b0] sm:$0xf]  ;;  %s2956_s12 = scalar_lea.vmem [#allocation2], %s16888_s18  ;;  %s16922_s20 = sadd.s32 56, %s18951_s29 }
 0x237   : > { %2167 = vmatpush.bf16.msra.mxu3 %v11413_v27  ;;  %v11525_v27 = vld [vmem:[%s18557_s2 + $0x338] sm:$0xf0]  ;;  %v11524_v32 = vor.u32 %v16791_v22, %v11523_v21  ;;  %v11588_v33 = vor.u32 %v16807_v25, %v11587_v23  ;;  %v11774_v21 = vld [vmem:[%s18557_s2 + $0x4e0] sm:$0xf]  ;;  %v2185_v23 = vpack.c.bf16 %v2183_v13, %v2183_v13  ;;  %v16831_v25 = vld [vmem:[%s18557_s2 + $0x464] sm:$0xf] }
 0x238   : > { %v11528_v34 = vor.u32 %v16790_v26, %v11525_v27  ;;  %v11712_v26 = vld [vmem:[%s18557_s2 + $0x468] sm:$0xf0]  ;;  %v2186_v27 = vpack.c.bf16 %v2184_v16, %v2184_v16  ;;  %s19411_s24 = sshra.s32 %s16922_s20, 3  ;;  %s16957_s23 = sadd.s32 64, %s18951_s29 }
 0x239   : > { %2129 = vmatpush.bf16.msra.mxu0 %v11337_v35  ;;  %v11515_v35 = vld [vmem:[%s18557_s2 + $0x320] sm:$0xf]  ;;  %v11744_v13 = vld [vmem:[%s18557_s2 + $0x4a8] sm:$0xf0]  ;;  %s16923_s25 = sshll.u32 %s19411_s24, 4  ;;  %s19487_s13 = sshra.s32 %s16957_s23, 3 }
 0x23a   : > { %2142 = vmatpush.bf16.msra.mxu1 %v11401_v39  ;;  %2155 = vmatpush.bf16.msra.mxu2 %v11341_v40  ;;  %v16805_v39 = vld [vmem:[%s18557_s2 + $0x3a4] sm:$0xf0]  ;;  %v16788_v40 = vld [vmem:[%s18557_s2 + $0x324] sm:$0xf]  ;;  %s3214_s15 = scalar_lea.vmem [#allocation2], %s16923_s25  ;;  %s16958_s1 = sshll.u32 %s19487_s13, 4 }
 0x23b   : > { %2168 = vmatpush.bf16.msra.mxu3 %v11405_v44  ;;  %v11516_v44 = vor.u32 %v16789_v36, %v11515_v35  ;;  %v11520_v46 = vor.u32 %v16788_v40, %v11517_v41  ;;  %v11702_v35 = vld [vmem:[%s18557_s2 + $0x450] sm:$0xf]  ;;  %v16830_v36 = vld [vmem:[%s18557_s2 + $0x454] sm:$0xf0]  ;;  %v16829_v40 = vld [vmem:[%s18557_s2 + $0x454] sm:$0xf] }
 0x23c   : > { %2130 = vmatmul.bf16.vlgmr.msra.gmra.mxu0 %v1927_v53  ;;  %v11704_v41 = vld [vmem:[%s18557_s2 + $0x458] sm:$0xf0]  ;;  %s16992_s26 = sadd.s32 72, %s18951_s29  ;;  %s17027_s27 = sadd.s32 80, %s18951_s29 }
 0x23d   : > { %2380 = vmatpush.bf16.msrb.mxu0 %v11556_v45  ;;  %2143 = vmatmul.bf16.vlgmr.msra.gmra.mxu1 %v1928_v57  ;;  %v11580_v45 = vor.u32 %v16805_v39, %v11579_v37  ;;  %v11766_v37 = vld [vmem:[%s18557_s2 + $0x4d0] sm:$0xf]  ;;  %v16846_v39 = vld [vmem:[%s18557_s2 + $0x4d4] sm:$0xf0]  ;;  %s19563_s19 = sshra.s32 %s16992_s26, 3  ;;  %s19639_s14 = sshra.s32 %s17027_s27, 3 }
 0x23e   : > { %2393 = vmatpush.bf16.msrb.mxu1 %v11620_v47  ;;  %2406 = vmatpush.bf16.msrb.mxu2 %v11560_v48  ;;  %v11507_v47 = vld [vmem:[%s18557_s2 + $0x310] sm:$0xf]  ;;  %v16787_v48 = vld [vmem:[%s18557_s2 + $0x314] sm:$0xf0]  ;;  %s16993_s22 = sshll.u32 %s19563_s19, 4  ;;  %s17028_s18 = sshll.u32 %s19639_s14, 4 }
 0x23f   : > { %2419 = vmatpush.bf16.msrb.mxu3 %v11624_v52  ;;  %2156 = vmatmul.bf16.vlgmr.msra.gmra.mxu2 %v1927_v53  ;;  %v16786_v52 = vld [vmem:[%s18557_s2 + $0x314] sm:$0xf]  ;;  %v11509_v53 = vld [vmem:[%s18557_s2 + $0x318] sm:$0xf0]  ;;  %v11508_v56 = vor.u32 %v16787_v48, %v11507_v47  ;;  %v11694_v47 = vld [vmem:[%s18557_s2 + $0x440] sm:$0xf] }
 0x240   : > { %2169 = vmatmul.bf16.vlgmr.msra.gmra.mxu3 %v1928_v57  ;;  %v11499_v57 = vld [vmem:[%s18557_s2 + $0x300] sm:$0xf]  ;;  %v16828_v48 = vld [vmem:[%s18557_s2 + $0x444] sm:$0xf0]  ;;  %s17062_s20 = sadd.s32 88, %s18951_s29  ;;  %s17097_s23 = sadd.s32 96, %s18951_s29 }
 0x241   : > { %2381 = vmatpush.bf16.msrb.mxu0 %v11548_v30  ;;  %v11512_v30 = vor.u32 %v16786_v52, %v11509_v53  ;;  %v11500_v5 = vor.u32 %v16785_v58, %v11499_v57  ;;  %v16827_v52 = vld [vmem:[%s18557_s2 + $0x444] sm:$0xf]  ;;  %v11696_v53 = vld [vmem:[%s18557_s2 + $0x448] sm:$0xf0]  ;;  %v11759_v57 = vor.u32 %v16844_v51, %v11758_v49  ;;  %v16884_v49 = vld [vmem:[%s18557_s2 + $0x5f4] sm:$0xf] }
 0x242   : > { %2394 = vmatpush.bf16.msrb.mxu1 %v11612_v60  ;;  %2407 = vmatpush.bf16.msrb.mxu2 %v11552_v31  ;;  %v11563_v60 = vld [vmem:[%s18557_s2 + $0x380] sm:$0xf]  ;;  %v16801_v31 = vld [vmem:[%s18557_s2 + $0x384] sm:$0xf0]  ;;  %v11699_v58 = vor.u32 %v16827_v52, %v11696_v53  ;;  %v2441_v51 = vld [vmem:[%s2440_s17] sm:$0xff]  ;;  %s19715_s24 = sshra.s32 %s17062_s20, 3 }
 0x243   : > { %2420 = vmatpush.bf16.msrb.mxu3 %v11616_v0  ;;  %v16800_v0 = vld [vmem:[%s18557_s2 + $0x384] sm:$0xf]  ;;  %v11564_v9 = vor.u32 %v16801_v31, %v11563_v60  ;;  %v11750_v60 = vld [vmem:[%s18557_s2 + $0x4b0] sm:$0xf]  ;;  %v11763_v31 = vor.u32 %v16843_v54, %v11760_v55  ;;  %v2442_v54 = vld [vmem:[%s2440_s17 + $0x8] sm:$0xff]  ;;  %s3472_s17 = scalar_lea.vmem [#allocation2], %s16958_s1 }
 0x244   : > { %v11568_v14 = vor.u32 %v16800_v0, %v11565_v1  ;;  %v16841_v0 = vld [vmem:[%s18557_s2 + $0x4b4] sm:$0xf]  ;;  %v11752_v1 = vld [vmem:[%s18557_s2 + $0x4b8] sm:$0xf0]  ;;  %v11751_v3 = vor.u32 %v16842_v61, %v11750_v60  ;;  %v2443_v60 = vpack.c.bf16 %v2441_v51, %v2441_v51  ;;  %v16866_v61 = vld [vmem:[%s18557_s2 + $0x564] sm:$0xf] }
 0x245   : > { %2382 = vmatpush.bf16.msrb.mxu0 %v11540_v6  ;;  %v16850_v6 = vld [vmem:[%s18557_s2 + $0x4f4] sm:$0xf0]  ;;  %v11843_v51 = vld [vmem:[%s18557_s2 + $0x528] sm:$0xf0]  ;;  %s17063_s25 = sshll.u32 %s19715_s24, 4  ;;  %s19791_s13 = sshra.s32 %s17097_s23, 3 }
 0x246   : > { %2395 = vmatpush.bf16.msrb.mxu1 %v11604_v7  ;;  %2408 = vmatpush.bf16.msrb.mxu2 %v11544_v8  ;;  %v16833_v7 = vld [vmem:[%s18557_s2 + $0x474] sm:$0xf]  ;;  %v11720_v8 = vld [vmem:[%s18557_s2 + $0x478] sm:$0xf0]  ;;  %v11783_v17 = vor.u32 %v16850_v6, %v11782_v4  ;;  %v16824_v6 = vld [vmem:[%s18557_s2 + $0x424] sm:$0xf0] }
 0x247   : > { %2421 = vmatpush.bf16.msrb.mxu3 %v11608_v12  ;;  %v11784_v12 = vld [vmem:[%s18557_s2 + $0x4f8] sm:$0xf0]  ;;  %s17098_s1 = sshll.u32 %s19791_s13, 4  ;;  %s17132_s26 = sadd.s32 104, %s18951_s29 }
 0x248   : > { %v11787_v22 = vor.u32 %v16849_v11, %v11784_v12  ;;  %v11680_v11 = vld [vmem:[%s18557_s2 + $0x428] sm:$0xf0]  ;;  %v16839_v12 = vld [vmem:[%s18557_s2 + $0x4a4] sm:$0xf]  ;;  %s19867_s19 = sshra.s32 %s17132_s26, 3  ;;  %s17167_s27 = sadd.s32 112, %s18951_s29 }
 0x249   : > { %2383 = vmatpush.bf16.msrb.mxu0 %v11532_v18  ;;  %v11723_v18 = vor.u32 %v16833_v7, %v11720_v8  ;;  %v11742_v7 = vld [vmem:[%s18557_s2 + $0x4a0] sm:$0xf]  ;;  %v11755_v8 = vor.u32 %v16841_v0, %v11752_v1  ;;  %v16882_v0 = vld [vmem:[%s18557_s2 + $0x5e4] sm:$0xf]  ;;  %v11939_v1 = vld [vmem:[%s18557_s2 + $0x5e8] sm:$0xf0] }
 0x24a   : > { %2396 = vmatpush.bf16.msrb.mxu1 %v11596_v19  ;;  %2409 = vmatpush.bf16.msrb.mxu2 %v11536_v20  ;;  %v11710_v19 = vld [vmem:[%s18557_s2 + $0x460] sm:$0xf]  ;;  %v16832_v20 = vld [vmem:[%s18557_s2 + $0x464] sm:$0xf0]  ;;  %s19943_s14 = sshra.s32 %s17167_s27, 3  ;;  %s17202_s20 = sadd.s32 120, %s18951_s29 }
 0x24b   : > { %2422 = vmatpush.bf16.msrb.mxu3 %v11600_v24  ;;  %v16848_v24 = vld [vmem:[%s18557_s2 + $0x4e4] sm:$0xf0]  ;;  %s20019_s24 = sshra.s32 %s17202_s20, 3  ;;  %s17237_s23 = sadd.s32 128, %s18951_s29 }
 0x24c   : > { %s20095_s13 = sshra.s32 %s17237_s23, 3  ;;  %s17272_s26 = sadd.s32 136, %s18951_s29 }
 0x24d   : > { %2384 = vmatpush.bf16.msrb.mxu0 %v11524_v32  ;;  %v11711_v32 = vor.u32 %v16832_v20, %v11710_v19  ;;  %v11734_v19 = vld [vmem:[%s18557_s2 + $0x490] sm:$0xf]  ;;  %v11747_v20 = vor.u32 %v16839_v12, %v11744_v13  ;;  %v16880_v12 = vld [vmem:[%s18557_s2 + $0x5d4] sm:$0xf]  ;;  %v11931_v13 = vld [vmem:[%s18557_s2 + $0x5d8] sm:$0xf0] }
 0x24e   : > { %2397 = vmatpush.bf16.msrb.mxu1 %v11588_v33  ;;  %2410 = vmatpush.bf16.msrb.mxu2 %v11528_v34  ;;  %v11775_v33 = vor.u32 %v16848_v24, %v11774_v21  ;;  %v11715_v34 = vor.u32 %v16831_v25, %v11712_v26  ;;  %v16838_v21 = vld [vmem:[%s18557_s2 + $0x494] sm:$0xf0]  ;;  %v16837_v24 = vld [vmem:[%s18557_s2 + $0x494] sm:$0xf]  ;;  %v11736_v25 = vld [vmem:[%s18557_s2 + $0x498] sm:$0xf0] }
 0x24f   : > { %2423 = vmatpush.bf16.msrb.mxu3 %v11592_v38  ;;  %v11779_v38 = vor.u32 %v16847_v28, %v11776_v29  ;;  %v16820_v28 = vld [vmem:[%s18557_s2 + $0x404] sm:$0xf0]  ;;  %v11735_v29 = vor.u32 %v16838_v21, %v11734_v19  ;;  %v11921_v19 = vld [vmem:[%s18557_s2 + $0x5c0] sm:$0xf]  ;;  %s17307_s27 = sadd.s32 144, %s18951_s29  ;;  %s17342_s20 = sadd.s32 152, %s18951_s29 }
 0x250   : > { %v16879_v21 = vld [vmem:[%s18557_s2 + $0x5c4] sm:$0xf0]  ;;  %s17377_s23 = sadd.s32 160, %s18951_s29 }
 0x251   : > { %2385 = vmatpush.bf16.msrb.mxu0 %v11516_v44  ;;  %v11703_v44 = vor.u32 %v16830_v36, %v11702_v35  ;;  %v16819_v35 = vld [vmem:[%s18557_s2 + $0x404] sm:$0xf]  ;;  %v11739_v36 = vor.u32 %v16837_v24, %v11736_v25  ;;  %v11923_v25 = vld [vmem:[%s18557_s2 + $0x5c8] sm:$0xf0] }
 0x252   : > { %2398 = vmatpush.bf16.msrb.mxu1 %v11580_v45  ;;  %2411 = vmatpush.bf16.msrb.mxu2 %v11520_v46  ;;  %v11767_v45 = vor.u32 %v16846_v39, %v11766_v37  ;;  %v11707_v46 = vor.u32 %v16829_v40, %v11704_v41  ;;  %v11664_v37 = vld [vmem:[%s18557_s2 + $0x408] sm:$0xf0]  ;;  %v11881_v40 = vld [vmem:[%s18557_s2 + $0x570] sm:$0xf]  ;;  %v16869_v41 = vld [vmem:[%s18557_s2 + $0x574] sm:$0xf0] }
 0x253   : > { %2424 = vmatpush.bf16.msrb.mxu3 %v11584_v50  ;;  %v11771_v50 = vor.u32 %v16845_v42, %v11768_v43  ;;  %v11728_v39 = vld [vmem:[%s18557_s2 + $0x488] sm:$0xf0]  ;;  %v11945_v42 = vld [vmem:[%s18557_s2 + $0x5f0] sm:$0xf]  ;;  %v11882_v53 = vor.u32 %v16869_v41, %v11881_v40  ;;  %v16878_v24 = vld [vmem:[%s18557_s2 + $0x5c4] sm:$0xf] }
 0x255   : > { %2386 = vmatpush.bf16.msrb.mxu0 %v11508_v56  ;;  %v11695_v56 = vor.u32 %v16828_v48, %v11694_v47  ;;  %v11667_v48 = vor.u32 %v16819_v35, %v11664_v37  ;;  %v16877_v35 = vld [vmem:[%s18557_s2 + $0x5b4] sm:$0xf0]  ;;  %v11851_v37 = vld [vmem:[%s18557_s2 + $0x538] sm:$0xf0] }
 0x256   : > { %2399 = vmatpush.bf16.msrb.mxu1 %v11572_v59  ;;  %2412 = vmatpush.bf16.msrb.mxu2 %v11512_v30  ;;  %v11686_v59 = vld [vmem:[%s18557_s2 + $0x430] sm:$0xf]  ;;  %v16826_v30 = vld [vmem:[%s18557_s2 + $0x434] sm:$0xf0] }
 0x257   : > { %2425 = vmatpush.bf16.msrb.mxu3 %v11576_v62  ;;  %v16825_v62 = vld [vmem:[%s18557_s2 + $0x434] sm:$0xf]  ;;  %v11687_v2 = vor.u32 %v16826_v30, %v11686_v59  ;;  %v11937_v59 = vld [vmem:[%s18557_s2 + $0x5e0] sm:$0xf] }
 0x258   : > { %v11691_v4 = vor.u32 %v16825_v62, %v11688_v63  ;;  %v11875_v62 = vld [vmem:[%s18557_s2 + $0x568] sm:$0xf0]  ;;  %v2444_v63 = vpack.c.bf16 %v2442_v54, %v2442_v54 }
 0x259   : > { %2387 = vmatpush.bf16.msrb.mxu0 %v11500_v5  ;;  %v11678_v5 = vld [vmem:[%s18557_s2 + $0x420] sm:$0xf]  ;;  %v11907_v54 = vld [vmem:[%s18557_s2 + $0x5a8] sm:$0xf0] }
 0x25a   : > { %2400 = vmatpush.bf16.msrb.mxu1 %v11564_v9  ;;  %2413 = vmatpush.bf16.msrb.mxu2 %v11504_v10  ;;  %v16840_v9 = vld [vmem:[%s18557_s2 + $0x4a4] sm:$0xf0]  ;;  %v16823_v10 = vld [vmem:[%s18557_s2 + $0x424] sm:$0xf] }
 0x25b   : > { %2426 = vmatpush.bf16.msrb.mxu3 %v11568_v14  ;;  %v11679_v14 = vor.u32 %v16824_v6, %v11678_v5  ;;  %v11683_v16 = vor.u32 %v16823_v10, %v11680_v11  ;;  %v11865_v5 = vld [vmem:[%s18557_s2 + $0x550] sm:$0xf]  ;;  %v16865_v6 = vld [vmem:[%s18557_s2 + $0x554] sm:$0xf0]  ;;  %v16864_v10 = vld [vmem:[%s18557_s2 + $0x554] sm:$0xf] }
 0x25c   : > { %2388 = vmatmul.bf16.vlgmr.msrb.gmra.mxu0 %v2185_v23  ;;  %v11867_v11 = vld [vmem:[%s18557_s2 + $0x558] sm:$0xf0] }
 0x25d   : > { %2638 = vmatpush.bf16.msra.mxu0 %v11719_v15  ;;  %2401 = vmatmul.bf16.vlgmr.msrb.gmra.mxu1 %v2186_v27  ;;  %v11743_v15 = vor.u32 %v16840_v9, %v11742_v7  ;;  %v11929_v7 = vld [vmem:[%s18557_s2 + $0x5d0] sm:$0xf]  ;;  %v16881_v9 = vld [vmem:[%s18557_s2 + $0x5d4] sm:$0xf0] }
 0x25e   : > { %2651 = vmatpush.bf16.msra.mxu1 %v11783_v17  ;;  %2664 = vmatpush.bf16.msra.mxu2 %v11723_v18  ;;  %v11670_v17 = vld [vmem:[%s18557_s2 + $0x410] sm:$0xf]  ;;  %v16822_v18 = vld [vmem:[%s18557_s2 + $0x414] sm:$0xf0] }
 0x25f   : > { %2677 = vmatpush.bf16.msra.mxu3 %v11787_v22  ;;  %2414 = vmatmul.bf16.vlgmr.msrb.gmra.mxu2 %v2185_v23  ;;  %v16821_v22 = vld [vmem:[%s18557_s2 + $0x414] sm:$0xf]  ;;  %v11672_v23 = vld [vmem:[%s18557_s2 + $0x418] sm:$0xf0]  ;;  %v11671_v26 = vor.u32 %v16822_v18, %v11670_v17  ;;  %v11857_v17 = vld [vmem:[%s18557_s2 + $0x540] sm:$0xf] }
 0x260   : > { %2427 = vmatmul.bf16.vlgmr.msrb.gmra.mxu3 %v2186_v27  ;;  %v11662_v27 = vld [vmem:[%s18557_s2 + $0x400] sm:$0xf]  ;;  %v16863_v18 = vld [vmem:[%s18557_s2 + $0x544] sm:$0xf0] }
 0x261   : > { %2639 = vmatpush.bf16.msra.mxu0 %v11711_v32  ;;  %v11675_v32 = vor.u32 %v16821_v22, %v11672_v23  ;;  %v11663_v43 = vor.u32 %v16820_v28, %v11662_v27  ;;  %v16862_v22 = vld [vmem:[%s18557_s2 + $0x544] sm:$0xf]  ;;  %v11859_v23 = vld [vmem:[%s18557_s2 + $0x548] sm:$0xf0]  ;;  %v11922_v27 = vor.u32 %v16879_v21, %v11921_v19  ;;  %v16904_v19 = vld [vmem:[%s18557_s2 + $0x674] sm:$0xf0] }
 0x262   : > { %2652 = vmatpush.bf16.msra.mxu1 %v11775_v33  ;;  %2665 = vmatpush.bf16.msra.mxu2 %v11715_v34  ;;  %v11726_v33 = vld [vmem:[%s18557_s2 + $0x480] sm:$0xf]  ;;  %v16836_v34 = vld [vmem:[%s18557_s2 + $0x484] sm:$0xf0]  ;;  %v11862_v28 = vor.u32 %v16862_v22, %v11859_v23  ;;  %v16920_v22 = vld [vmem:[%s18557_s2 + $0x6f4] sm:$0xf0] }
 0x263   : > { %2678 = vmatpush.bf16.msra.mxu3 %v11779_v38  ;;  %v16835_v38 = vld [vmem:[%s18557_s2 + $0x484] sm:$0xf]  ;;  %v11727_v47 = vor.u32 %v16836_v34, %v11726_v33  ;;  %v11913_v33 = vld [vmem:[%s18557_s2 + $0x5b0] sm:$0xf]  ;;  %v11926_v34 = vor.u32 %v16878_v24, %v11923_v25  ;;  %v16903_v23 = vld [vmem:[%s18557_s2 + $0x674] sm:$0xf] }
 0x264   : > { %v11731_v52 = vor.u32 %v16835_v38, %v11728_v39  ;;  %v16876_v38 = vld [vmem:[%s18557_s2 + $0x5b4] sm:$0xf]  ;;  %v11915_v39 = vld [vmem:[%s18557_s2 + $0x5b8] sm:$0xf0] }
 0x265   : > { %2640 = vmatpush.bf16.msra.mxu0 %v11703_v44  ;;  %v16885_v44 = vld [vmem:[%s18557_s2 + $0x5f4] sm:$0xf0]  ;;  %v12046_v24 = vld [vmem:[%s18557_s2 + $0x678] sm:$0xf0] }
 0x266   : > { %2653 = vmatpush.bf16.msra.mxu1 %v11767_v45  ;;  %2666 = vmatpush.bf16.msra.mxu2 %v11707_v46  ;;  %v16868_v45 = vld [vmem:[%s18557_s2 + $0x574] sm:$0xf]  ;;  %v11883_v46 = vld [vmem:[%s18557_s2 + $0x578] sm:$0xf0]  ;;  %v11946_v55 = vor.u32 %v16885_v44, %v11945_v42  ;;  %v11914_v42 = vor.u32 %v16877_v35, %v11913_v33  ;;  %v11841_v44 = vld [vmem:[%s18557_s2 + $0x520] sm:$0xf] }
 0x267   : > { %2679 = vmatpush.bf16.msra.mxu3 %v11771_v50  ;;  %v11947_v50 = vld [vmem:[%s18557_s2 + $0x5f8] sm:$0xf0] }
 0x268   : > { %v11950_v30 = vor.u32 %v16884_v49, %v11947_v50  ;;  %v16875_v49 = vld [vmem:[%s18557_s2 + $0x5a4] sm:$0xf0]  ;;  %v16858_v50 = vld [vmem:[%s18557_s2 + $0x524] sm:$0xf]  ;;  %v2700_v35 = vld [vmem:[%s2698_s30 + $0x8] sm:$0xff] }
 0x269   : > { %2641 = vmatpush.bf16.msra.mxu0 %v11695_v56  ;;  %v11886_v56 = vor.u32 %v16868_v45, %v11883_v46  ;;  %v16859_v45 = vld [vmem:[%s18557_s2 + $0x524] sm:$0xf0]  ;;  %v11905_v46 = vld [vmem:[%s18557_s2 + $0x5a0] sm:$0xf] }
 0x26a   : > { %2654 = vmatpush.bf16.msra.mxu1 %v11759_v57  ;;  %2667 = vmatpush.bf16.msra.mxu2 %v11699_v58  ;;  %v11873_v57 = vld [vmem:[%s18557_s2 + $0x560] sm:$0xf]  ;;  %v16867_v58 = vld [vmem:[%s18557_s2 + $0x564] sm:$0xf0] }
 0x26b   : > { %2680 = vmatpush.bf16.msra.mxu3 %v11763_v31  ;;  %v16883_v31 = vld [vmem:[%s18557_s2 + $0x5e4] sm:$0xf0] }
 0x26d   : > { %2642 = vmatpush.bf16.msra.mxu0 %v11687_v2  ;;  %v11874_v2 = vor.u32 %v16867_v58, %v11873_v57  ;;  %v11846_v57 = vor.u32 %v16858_v50, %v11843_v51  ;;  %v11833_v58 = vld [vmem:[%s18557_s2 + $0x510] sm:$0xf] }
 0x26e   : > { %2655 = vmatpush.bf16.msra.mxu1 %v11751_v3  ;;  %2668 = vmatpush.bf16.msra.mxu2 %v11691_v4  ;;  %v11938_v3 = vor.u32 %v16883_v31, %v11937_v59  ;;  %v11878_v4 = vor.u32 %v16866_v61, %v11875_v62  ;;  %v16857_v59 = vld [vmem:[%s18557_s2 + $0x514] sm:$0xf0]  ;;  %v16856_v62 = vld [vmem:[%s18557_s2 + $0x514] sm:$0xf] }
 0x26f   : > { %2681 = vmatpush.bf16.msra.mxu3 %v11755_v8  ;;  %v11942_v8 = vor.u32 %v16882_v0, %v11939_v1  ;;  %v16873_v61 = vld [vmem:[%s18557_s2 + $0x594] sm:$0xf0]  ;;  %v16872_v1 = vld [vmem:[%s18557_s2 + $0x594] sm:$0xf] }
 0x271   : > { %2643 = vmatpush.bf16.msra.mxu0 %v11679_v14  ;;  %v11866_v14 = vor.u32 %v16865_v6, %v11865_v5  ;;  %v11825_v5 = vld [vmem:[%s18557_s2 + $0x500] sm:$0xf]  ;;  %v16855_v6 = vld [vmem:[%s18557_s2 + $0x504] sm:$0xf0] }
 0x272   : > { %2656 = vmatpush.bf16.msra.mxu1 %v11743_v15  ;;  %2669 = vmatpush.bf16.msra.mxu2 %v11683_v16  ;;  %v11930_v15 = vor.u32 %v16881_v9, %v11929_v7  ;;  %v11870_v16 = vor.u32 %v16864_v10, %v11867_v11  ;;  %v11889_v10 = vld [vmem:[%s18557_s2 + $0x580] sm:$0xf]  ;;  %v16871_v11 = vld [vmem:[%s18557_s2 + $0x584] sm:$0xf0]  ;;  %v11826_v21 = vor.u32 %v16855_v6, %v11825_v5 }
 0x273   : > { %2682 = vmatpush.bf16.msra.mxu3 %v11747_v20  ;;  %v11934_v20 = vor.u32 %v16880_v12, %v11931_v13  ;;  %v16854_v12 = vld [vmem:[%s18557_s2 + $0x504] sm:$0xf]  ;;  %v11890_v25 = vor.u32 %v16871_v11, %v11889_v10  ;;  %v16914_v6 = vld [vmem:[%s18557_s2 + $0x6c4] sm:$0xf0]  ;;  %v12086_v10 = vld [vmem:[%s18557_s2 + $0x6c8] sm:$0xf0] }
 0x275   : > { %2644 = vmatpush.bf16.msra.mxu0 %v11671_v26  ;;  %v11858_v26 = vor.u32 %v16863_v18, %v11857_v17  ;;  %v11891_v17 = vld [vmem:[%s18557_s2 + $0x588] sm:$0xf0]  ;;  %v12044_v18 = vld [vmem:[%s18557_s2 + $0x670] sm:$0xf] }
 0x276   : > { %2657 = vmatpush.bf16.msra.mxu1 %v11735_v29  ;;  %2670 = vmatpush.bf16.msra.mxu2 %v11675_v32  ;;  %v11849_v29 = vld [vmem:[%s18557_s2 + $0x530] sm:$0xf]  ;;  %v16861_v32 = vld [vmem:[%s18557_s2 + $0x534] sm:$0xf0] }
 0x277   : > { %2683 = vmatpush.bf16.msra.mxu3 %v11739_v36  ;;  %v16860_v36 = vld [vmem:[%s18557_s2 + $0x534] sm:$0xf]  ;;  %v11850_v40 = vor.u32 %v16861_v32, %v11849_v29 }
 0x278   : > { %v2699_v29 = vld [vmem:[%s2698_s30] sm:$0xff]  ;;  %s3730_s30 = scalar_lea.vmem [#allocation2], %s16993_s22  ;;  %s17133_s22 = sshll.u32 %s19867_s19, 4 }
 0x279   : > { %2645 = vmatpush.bf16.msra.mxu0 %v11663_v43  ;;  %v1615_v41 = vpop.f32.mrf.mxu0  ;;  %v11854_v43 = vor.u32 %v16860_v36, %v11851_v37  ;;  %s20171_s19 = sshra.s32 %s17272_s26, 3  ;;  %s17412_s26 = sadd.s32 168, %s18951_s29 }
 0x27a   : > { %2658 = vmatpush.bf16.msra.mxu1 %v11727_v47  ;;  %2671 = vmatpush.bf16.msra.mxu2 %v11667_v48  ;;  %v11918_v48 = vor.u32 %v16876_v38, %v11915_v39  ;;  %v12049_v38 = vor.u32 %v16903_v23, %v12046_v24  ;;  %v12036_v39 = vld [vmem:[%s18557_s2 + $0x660] sm:$0xf]  ;;  %v12014_v23 = vld [vmem:[%s18557_s2 + $0x638] sm:$0xf0] }
 0x27b   : > { %2684 = vmatpush.bf16.msra.mxu3 %v11731_v52 }
 0x27c   : > { %2646 = vmatmul.bf16.vlgmr.msra.gmra.mxu0 %v2443_v60  ;;  %v1628_v47 = vpop.f32.mrf.mxu1 }
 0x27d   : > { %2896 = vmatpush.bf16.msrb.mxu0 %v11882_v53  ;;  %2659 = vmatmul.bf16.vlgmr.msra.gmra.mxu1 %v2444_v63  ;;  %v19266_v52 = vadd.f32 %v1628_v47, %v1615_v41  ;;  %v16874_v53 = vld [vmem:[%s18557_s2 + $0x5a4] sm:$0xf]  ;;  %v12100_v41 = vld [vmem:[%s18557_s2 + $0x6e0] sm:$0xf]  ;;  %v2702_v47 = vpack.c.bf16 %v2700_v35, %v2700_v35 }
 0x27e   : > { %2909 = vmatpush.bf16.msrb.mxu1 %v11946_v55  ;;  %2922 = vmatpush.bf16.msrb.mxu2 %v11886_v56  ;;  %v11842_v55 = vor.u32 %v16859_v45, %v11841_v44  ;;  %v11906_v56 = vor.u32 %v16875_v49, %v11905_v46  ;;  %v11910_v31 = vor.u32 %v16874_v53, %v11907_v54  ;;  %v16918_v44 = vld [vmem:[%s18557_s2 + $0x6e4] sm:$0xf0]  ;;  %v16901_v45 = vld [vmem:[%s18557_s2 + $0x664] sm:$0xf]  ;;  %v12038_v46 = vld [vmem:[%s18557_s2 + $0x668] sm:$0xf0] }
 0x27f   : > { %2935 = vmatpush.bf16.msrb.mxu3 %v11950_v30  ;;  %2672 = vmatmul.bf16.vlgmr.msra.gmra.mxu2 %v2443_v60  ;;  %v11897_v30 = vld [vmem:[%s18557_s2 + $0x590] sm:$0xf]  ;;  %v12102_v49 = vld [vmem:[%s18557_s2 + $0x6e8] sm:$0xf0]  ;;  %v12101_v51 = vor.u32 %v16918_v44, %v12100_v41  ;;  %v12041_v53 = vor.u32 %v16901_v45, %v12038_v46  ;;  %v12004_v35 = vld [vmem:[%s18557_s2 + $0x620] sm:$0xf] }
 0x280   : > { %2685 = vmatmul.bf16.vlgmr.msra.gmra.mxu3 %v2444_v63  ;;  %v1641_v60 = vpop.f32.mrf.mxu2  ;;  %v11835_v63 = vld [vmem:[%s18557_s2 + $0x518] sm:$0xf0]  ;;  %v12028_v54 = vld [vmem:[%s18557_s2 + $0x650] sm:$0xf]  ;;  %v16893_v41 = vld [vmem:[%s18557_s2 + $0x624] sm:$0xf] }
 0x281   : > { %2897 = vmatpush.bf16.msrb.mxu0 %v11874_v2  ;;  %v11899_v2 = vld [vmem:[%s18557_s2 + $0x598] sm:$0xf0]  ;;  %v1617_v7 = vpop.f32.mrf.mxu0  ;;  %v11838_v9 = vor.u32 %v16856_v62, %v11835_v63  ;;  %v12070_v44 = vld [vmem:[%s18557_s2 + $0x6a8] sm:$0xf0] }
 0x282   : > { %2910 = vmatpush.bf16.msrb.mxu1 %v11938_v3  ;;  %2923 = vmatpush.bf16.msrb.mxu2 %v11878_v4  ;;  %v11834_v4 = vor.u32 %v16857_v59, %v11833_v58  ;;  %v16916_v58 = vld [vmem:[%s18557_s2 + $0x6d4] sm:$0xf0]  ;;  %v16899_v59 = vld [vmem:[%s18557_s2 + $0x654] sm:$0xf]  ;;  %v16897_v7 = vld [vmem:[%s18557_s2 + $0x644] sm:$0xf] }
 0x283   : > { %2936 = vmatpush.bf16.msrb.mxu3 %v11942_v8  ;;  %v1654_v0 = vpop.f32.mrf.mxu3  ;;  %v11898_v8 = vor.u32 %v16873_v61, %v11897_v30  ;;  %v12030_v30 = vld [vmem:[%s18557_s2 + $0x658] sm:$0xf0]  ;;  %v1402_v61 = vld [vmem:[#allocation3] sm:$0xff] }
 0x284   : > { %v19279_v3 = vadd.f32 %v1654_v0, %v1641_v60  ;;  %v1630_v13 = vpop.f32.mrf.mxu1  ;;  %v16915_v60 = vld [vmem:[%s18557_s2 + $0x6d4] sm:$0xf]  ;;  %v12033_v0 = vor.u32 %v16899_v59, %v12030_v30  ;;  %v1658_v11 = vadd.f32 %v19266_v52, %v1402_v61  ;;  %v12062_v30 = vld [vmem:[%s18557_s2 + $0x698] sm:$0xf0]  ;;  %v16890_v61 = vld [vmem:[%s18557_s2 + $0x604] sm:$0xf0] }
 0x285   : > { %2898 = vmatpush.bf16.msrb.mxu0 %v11866_v14  ;;  %v11902_v14 = vor.u32 %v16872_v1, %v11899_v2  ;;  %v12020_v1 = vld [vmem:[%s18557_s2 + $0x640] sm:$0xf]  ;;  %v16898_v2 = vld [vmem:[%s18557_s2 + $0x644] sm:$0xf0]  ;;  %v16907_v59 = vld [vmem:[%s18557_s2 + $0x694] sm:$0xf] }
 0x286   : > { %2911 = vmatpush.bf16.msrb.mxu1 %v11930_v15  ;;  %2924 = vmatpush.bf16.msrb.mxu2 %v11870_v16  ;;  %v11827_v15 = vld [vmem:[%s18557_s2 + $0x508] sm:$0xf0]  ;;  %v16870_v16 = vld [vmem:[%s18557_s2 + $0x584] sm:$0xf]  ;;  %v12021_v13 = vor.u32 %v16898_v2, %v12020_v1  ;;  %v16906_v1 = vld [vmem:[%s18557_s2 + $0x684] sm:$0xf0] }
 0x287   : > { %2937 = vmatpush.bf16.msrb.mxu3 %v11934_v20  ;;  %v12108_v20 = vld [vmem:[%s18557_s2 + $0x6f0] sm:$0xf]  ;;  %v11894_v33 = vor.u32 %v16870_v16, %v11891_v17  ;;  %v16889_v2 = vld [vmem:[%s18557_s2 + $0x604] sm:$0xf] }
 0x288   : > { %v1643_v32 = vpop.f32.mrf.mxu2  ;;  %v12109_v37 = vor.u32 %v16920_v22, %v12108_v20  ;;  %v12012_v17 = vld [vmem:[%s18557_s2 + $0x630] sm:$0xf]  ;;  %v16895_v22 = vld [vmem:[%s18557_s2 + $0x634] sm:$0xf] }
 0x289   : > { %2899 = vmatpush.bf16.msrb.mxu0 %v11858_v26  ;;  %v11830_v26 = vor.u32 %v16854_v12, %v11827_v15  ;;  %v1403_v12 = vld [vmem:[#allocation3 + $0x8] sm:$0xff] }
 0x28a   : > { %2912 = vmatpush.bf16.msrb.mxu1 %v11922_v27  ;;  %2925 = vmatpush.bf16.msrb.mxu2 %v11862_v28  ;;  %v16919_v27 = vld [vmem:[%s18557_s2 + $0x6f4] sm:$0xf]  ;;  %v12110_v28 = vld [vmem:[%s18557_s2 + $0x6f8] sm:$0xf0] }
 0x28b   : > { %2938 = vmatpush.bf16.msrb.mxu3 %v11926_v34  ;;  %v12045_v34 = vor.u32 %v16904_v19, %v12044_v18  ;;  %v1656_v36 = vpop.f32.mrf.mxu3  ;;  %v16896_v18 = vld [vmem:[%s18557_s2 + $0x634] sm:$0xf0]  ;;  %v12076_v19 = vld [vmem:[%s18557_s2 + $0x6b0] sm:$0xf] }
 0x28c   : > { %v16894_v36 = vld [vmem:[%s18557_s2 + $0x624] sm:$0xf0] }
 0x28d   : > { %2900 = vmatpush.bf16.msrb.mxu0 %v11850_v40  ;;  %v16902_v40 = vld [vmem:[%s18557_s2 + $0x664] sm:$0xf0]  ;;  %v12005_v45 = vor.u32 %v16894_v36, %v12004_v35  ;;  %v16936_v35 = vld [vmem:[%s18557_s2 + $0x764] sm:$0xf]  ;;  %v12201_v36 = vld [vmem:[%s18557_s2 + $0x768] sm:$0xf0] }
 0x28e   : > { %2913 = vmatpush.bf16.msrb.mxu1 %v11914_v42  ;;  %2926 = vmatpush.bf16.msrb.mxu2 %v11854_v43  ;;  %v12113_v42 = vor.u32 %v16919_v27, %v12110_v28  ;;  %v2701_v43 = vpack.c.bf16 %v2699_v29, %v2699_v29  ;;  %v12037_v50 = vor.u32 %v16902_v40, %v12036_v39  ;;  %v16910_v40 = vld [vmem:[%s18557_s2 + $0x6a4] sm:$0xf0] }
 0x28f   : > { %2939 = vmatpush.bf16.msrb.mxu3 %v11918_v48  ;;  %v16917_v48 = vld [vmem:[%s18557_s2 + $0x6e4] sm:$0xf]  ;;  %v12013_v27 = vor.u32 %v16896_v18, %v12012_v17  ;;  %v1659_v29 = vadd.f32 %v19279_v3, %v1403_v12  ;;  %v12006_v3 = vld [vmem:[%s18557_s2 + $0x628] sm:$0xf0]  ;;  %v12271_v12 = vld [vmem:[%s18557_s2 + $0x7f0] sm:$0xf] }
 0x291   : > { %2901 = vmatpush.bf16.msrb.mxu0 %v11842_v55  ;;  %v16900_v55 = vld [vmem:[%s18557_s2 + $0x654] sm:$0xf0] }
 0x292   : > { %2914 = vmatpush.bf16.msrb.mxu1 %v11906_v56  ;;  %2927 = vmatpush.bf16.msrb.mxu2 %v11846_v57  ;;  %v12092_v56 = vld [vmem:[%s18557_s2 + $0x6d0] sm:$0xf]  ;;  %v12105_v57 = vor.u32 %v16917_v48, %v12102_v49  ;;  %v12029_v62 = vor.u32 %v16900_v55, %v12028_v54  ;;  %v12009_v49 = vor.u32 %v16893_v41, %v12006_v3 }
 0x293   : > { %2940 = vmatpush.bf16.msrb.mxu3 %v11910_v31  ;;  %v12094_v31 = vld [vmem:[%s18557_s2 + $0x6d8] sm:$0xf0]  ;;  %v12093_v63 = vor.u32 %v16916_v58, %v12092_v56  ;;  %v16908_v56 = vld [vmem:[%s18557_s2 + $0x694] sm:$0xf0]  ;;  %v12204_v3 = vor.u32 %v16936_v35, %v12201_v36 }
 0x294   : > { %v12097_v5 = vor.u32 %v16915_v60, %v12094_v31  ;;  %v11998_v58 = vld [vmem:[%s18557_s2 + $0x618] sm:$0xf0]  ;;  %v11988_v31 = vld [vmem:[%s18557_s2 + $0x600] sm:$0xf] }
 0x295   : > { %2902 = vmatpush.bf16.msrb.mxu0 %v11834_v4  ;;  %v12084_v4 = vld [vmem:[%s18557_s2 + $0x6c0] sm:$0xf] }
 0x296   : > { %2915 = vmatpush.bf16.msrb.mxu1 %v11898_v8  ;;  %2928 = vmatpush.bf16.msrb.mxu2 %v11838_v9  ;;  %v12022_v8 = vld [vmem:[%s18557_s2 + $0x648] sm:$0xf0]  ;;  %v16913_v9 = vld [vmem:[%s18557_s2 + $0x6c4] sm:$0xf]  ;;  %v12085_v15 = vor.u32 %v16914_v6, %v12084_v4 }
 0x297   : > { %2941 = vmatpush.bf16.msrb.mxu3 %v11902_v14  ;;  %v12025_v16 = vor.u32 %v16897_v7, %v12022_v8  ;;  %v12089_v52 = vor.u32 %v16913_v9, %v12086_v10  ;;  %v11990_v6 = vld [vmem:[%s18557_s2 + $0x608] sm:$0xf0]  ;;  %v16905_v7 = vld [vmem:[%s18557_s2 + $0x684] sm:$0xf]  ;;  %v12207_v10 = vld [vmem:[%s18557_s2 + $0x770] sm:$0xf] }
 0x298   : > { %v12054_v8 = vld [vmem:[%s18557_s2 + $0x688] sm:$0xf0]  ;;  %v11993_v18 = vor.u32 %v16889_v2, %v11990_v6  ;;  %v12175_v6 = vld [vmem:[%s18557_s2 + $0x730] sm:$0xf] }
 0x299   : > { %2903 = vmatpush.bf16.msrb.mxu0 %v11826_v21  ;;  %v1873_v14 = vpop.f32.mrf.mxu0  ;;  %v16912_v21 = vld [vmem:[%s18557_s2 + $0x6b4] sm:$0xf0] }
 0x29a   : > { %2916 = vmatpush.bf16.msrb.mxu1 %v11890_v25  ;;  %2929 = vmatpush.bf16.msrb.mxu2 %v11830_v26  ;;  %v16911_v25 = vld [vmem:[%s18557_s2 + $0x6b4] sm:$0xf]  ;;  %v12078_v26 = vld [vmem:[%s18557_s2 + $0x6b8] sm:$0xf0]  ;;  %v12077_v32 = vor.u32 %v16912_v21, %v12076_v19  ;;  %v12057_v21 = vor.u32 %v16905_v7, %v12054_v8  ;;  %v16931_v7 = vld [vmem:[%s18557_s2 + $0x734] sm:$0xf0] }
 0x29b   : > { %2942 = vmatpush.bf16.msrb.mxu3 %v11894_v33  ;;  %v12017_v33 = vor.u32 %v16895_v22, %v12014_v23  ;;  %v16954_v19 = vld [vmem:[%s18557_s2 + $0x7f4] sm:$0xf]  ;;  %v12239_v8 = vld [vmem:[%s18557_s2 + $0x7b0] sm:$0xf] }
 0x29c   : > { %2904 = vmatmul.bf16.vlgmr.msrb.gmra.mxu0 %v2701_v43  ;;  %v1886_v20 = vpop.f32.mrf.mxu1  ;;  %v2958_v23 = vld [vmem:[%s2956_s12 + $0x8] sm:$0xff] }
 0x29d   : > { %3154 = vmatpush.bf16.msra.mxu0 %v12045_v34  ;;  %2917 = vmatmul.bf16.vlgmr.msrb.gmra.mxu1 %v2702_v47  ;;  %v1887_v24 = vadd.f32 %v1886_v20, %v1873_v14  ;;  %v16955_v14 = vld [vmem:[%s18557_s2 + $0x7f4] sm:$0xf0]  ;;  %v12273_v20 = vld [vmem:[%s18557_s2 + $0x7f8] sm:$0xf0] }
 0x29e   : > { %3167 = vmatpush.bf16.msra.mxu1 %v12109_v37  ;;  %3180 = vmatpush.bf16.msra.mxu2 %v12049_v38  ;;  %v12068_v37 = vld [vmem:[%s18557_s2 + $0x6a0] sm:$0xf]  ;;  %v12081_v38 = vor.u32 %v16911_v25, %v12078_v26 }
 0x29f   : > { %3193 = vmatpush.bf16.msra.mxu3 %v12113_v42  ;;  %2930 = vmatmul.bf16.vlgmr.msrb.gmra.mxu2 %v2701_v43  ;;  %v19333_v28 = vadd.f32 %v1887_v24, %v1658_v11  ;;  %v16909_v43 = vld [vmem:[%s18557_s2 + $0x6a4] sm:$0xf]  ;;  %v12069_v48 = vor.u32 %v16910_v40, %v12068_v37  ;;  %v16939_v11 = vld [vmem:[%s18557_s2 + $0x774] sm:$0xf0]  ;;  %v12272_v24 = vor.u32 %v16955_v14, %v12271_v12  ;;  %v12199_v26 = vld [vmem:[%s18557_s2 + $0x760] sm:$0xf] }
 0x2a0   : > { %2943 = vmatmul.bf16.vlgmr.msrb.gmra.mxu3 %v2702_v47  ;;  %v1899_v34 = vpop.f32.mrf.mxu2  ;;  %v12073_v55 = vor.u32 %v16909_v43, %v12070_v44  ;;  %v12208_v22 = vor.u32 %v16939_v11, %v12207_v10  ;;  %v2960_v37 = vpack.c.bf16 %v2958_v23, %v2958_v23  ;;  %v16935_v43 = vld [vmem:[%s18557_s2 + $0x754] sm:$0xf0]  ;;  %v12255_v44 = vld [vmem:[%s18557_s2 + $0x7d0] sm:$0xf]  ;;  %v16930_v11 = vld [vmem:[%s18557_s2 + $0x734] sm:$0xf] }
 0x2a1   : > { %3155 = vmatpush.bf16.msra.mxu0 %v12037_v50  ;;  %v1875_v46 = vpop.f32.mrf.mxu0  ;;  %v11996_v50 = vld [vmem:[%s18557_s2 + $0x610] sm:$0xf]  ;;  %v16947_v10 = vld [vmem:[%s18557_s2 + $0x7b4] sm:$0xf0]  ;;  %v12177_v12 = vld [vmem:[%s18557_s2 + $0x738] sm:$0xf0] }
 0x2a2   : > { %3168 = vmatpush.bf16.msra.mxu1 %v12101_v51  ;;  %3181 = vmatpush.bf16.msra.mxu2 %v12041_v53  ;;  %v16892_v51 = vld [vmem:[%s18557_s2 + $0x614] sm:$0xf0]  ;;  %v12060_v53 = vld [vmem:[%s18557_s2 + $0x690] sm:$0xf]  ;;  %v16946_v14 = vld [vmem:[%s18557_s2 + $0x7b4] sm:$0xf] }
 0x2a3   : > { %3194 = vmatpush.bf16.msra.mxu3 %v12105_v57  ;;  %v1912_v39 = vpop.f32.mrf.mxu3  ;;  %v16891_v57 = vld [vmem:[%s18557_s2 + $0x614] sm:$0xf]  ;;  %v11997_v60 = vor.u32 %v16892_v51, %v11996_v50  ;;  %v16951_v46 = vld [vmem:[%s18557_s2 + $0x7d4] sm:$0xf0]  ;;  %v12257_v51 = vld [vmem:[%s18557_s2 + $0x7d8] sm:$0xf0] }
 0x2a4   : > { %v1913_v42 = vadd.f32 %v1912_v39, %v1899_v34  ;;  %v1888_v54 = vpop.f32.mrf.mxu1  ;;  %v16953_v34 = vld [vmem:[%s18557_s2 + $0x7e4] sm:$0xf0]  ;;  %v12265_v39 = vld [vmem:[%s18557_s2 + $0x7e8] sm:$0xf0]  ;;  %v16950_v50 = vld [vmem:[%s18557_s2 + $0x7d4] sm:$0xf] }
 0x2a5   : > { %3156 = vmatpush.bf16.msra.mxu0 %v12029_v62  ;;  %v12061_v62 = vor.u32 %v16908_v56, %v12060_v53  ;;  %v12256_v54 = vor.u32 %v16951_v46, %v12255_v44  ;;  %v12183_v56 = vld [vmem:[%s18557_s2 + $0x740] sm:$0xf]  ;;  %v16928_v23 = vld [vmem:[%s18557_s2 + $0x724] sm:$0xf]  ;;  %v16942_v44 = vld [vmem:[%s18557_s2 + $0x794] sm:$0xf] }
 0x2a6   : > { %3169 = vmatpush.bf16.msra.mxu1 %v12093_v63  ;;  %3182 = vmatpush.bf16.msra.mxu2 %v12033_v0  ;;  %v19347_v47 = vadd.f32 %v1913_v42, %v1659_v29  ;;  %v12001_v63 = vor.u32 %v16891_v57, %v11998_v58  ;;  %v12052_v0 = vld [vmem:[%s18557_s2 + $0x680] sm:$0xf]  ;;  %v12191_v42 = vld [vmem:[%s18557_s2 + $0x750] sm:$0xf]  ;;  %v16933_v57 = vld [vmem:[%s18557_s2 + $0x744] sm:$0xf0] }
 0x2a7   : > { %3195 = vmatpush.bf16.msra.mxu3 %v12097_v5  ;;  %v12065_v5 = vor.u32 %v16907_v59, %v12062_v30  ;;  %v12053_v17 = vor.u32 %v16906_v1, %v12052_v0  ;;  %v12263_v29 = vld [vmem:[%s18557_s2 + $0x7e0] sm:$0xf]  ;;  %v12192_v53 = vor.u32 %v16935_v43, %v12191_v42  ;;  %v12260_v59 = vor.u32 %v16950_v50, %v12257_v51  ;;  %v16949_v30 = vld [vmem:[%s18557_s2 + $0x7c4] sm:$0xf0]  ;;  %v16926_v42 = vld [vmem:[%s18557_s2 + $0x714] sm:$0xf] }
 0x2a8   : > { %v1901_v4 = vpop.f32.mrf.mxu2  ;;  %v12264_v41 = vor.u32 %v16953_v34, %v12263_v29  ;;  %v12247_v58 = vld [vmem:[%s18557_s2 + $0x7c0] sm:$0xf]  ;;  %v12184_v1 = vor.u32 %v16933_v57, %v12183_v56  ;;  %v12161_v43 = vld [vmem:[%s18557_s2 + $0x718] sm:$0xf0]  ;;  %v12153_v56 = vld [vmem:[%s18557_s2 + $0x708] sm:$0xf0] }
 0x2a9   : > { %3157 = vmatpush.bf16.msra.mxu0 %v12021_v13  ;;  %v11989_v13 = vor.u32 %v16890_v61, %v11988_v31  ;;  %v12185_v31 = vld [vmem:[%s18557_s2 + $0x748] sm:$0xf0]  ;;  %v12248_v4 = vor.u32 %v16949_v30, %v12247_v58  ;;  %v12164_v50 = vor.u32 %v16926_v42, %v12161_v43  ;;  %v12215_v51 = vld [vmem:[%s18557_s2 + $0x780] sm:$0xf]  ;;  %v16940_v57 = vld [vmem:[%s18557_s2 + $0x784] sm:$0xf] }
 0x2aa   : > { %3170 = vmatpush.bf16.msra.mxu1 %v12085_v15  ;;  %3183 = vmatpush.bf16.msra.mxu2 %v12025_v16  ;;  %v16938_v15 = vld [vmem:[%s18557_s2 + $0x774] sm:$0xf]  ;;  %v12209_v16 = vld [vmem:[%s18557_s2 + $0x778] sm:$0xf0]  ;;  %v12217_v58 = vld [vmem:[%s18557_s2 + $0x788] sm:$0xf0] }
 0x2ab   : > { %3196 = vmatpush.bf16.msra.mxu3 %v12089_v52  ;;  %v1914_v9 = vpop.f32.mrf.mxu3  ;;  %v2957_v52 = vld [vmem:[%s2956_s12] sm:$0xff]  ;;  %v12212_v25 = vor.u32 %v16938_v15, %v12209_v16  ;;  %v12241_v15 = vld [vmem:[%s18557_s2 + $0x7b8] sm:$0xf0]  ;;  %v12176_v16 = vor.u32 %v16931_v7, %v12175_v6  ;;  %v16968_v42 = vld [vmem:[%s18557_s2 + $0x844] sm:$0xf0]  ;;  %s3988_s12 = scalar_lea.vmem [#allocation2], %s17028_s18 }
 0x2ac   : > { %v12370_v30 = vld [vmem:[%s18557_s2 + $0x870] sm:$0xf]  ;;  %v12436_v6 = vld [vmem:[%s18557_s2 + $0x8f8] sm:$0xf0]  ;;  %v12410_v43 = vld [vmem:[%s18557_s2 + $0x8c0] sm:$0xf] }
 0x2ad   : > { %3158 = vmatpush.bf16.msra.mxu0 %v12013_v27  ;;  %v16937_v27 = vld [vmem:[%s18557_s2 + $0x764] sm:$0xf0]  ;;  %v3215_v7 = vld [vmem:[%s3214_s15] sm:$0xff]  ;;  %s17168_s18 = sshll.u32 %s19943_s14, 4  ;;  %s20247_s14 = sshra.s32 %s17307_s27, 3 }
 0x2ae   : > { %3171 = vmatpush.bf16.msra.mxu1 %v12077_v32  ;;  %3184 = vmatpush.bf16.msra.mxu2 %v12017_v33  ;;  %v12276_v32 = vor.u32 %v16954_v19, %v12273_v20  ;;  %v2959_v33 = vpack.c.bf16 %v2957_v52, %v2957_v52  ;;  %v12200_v40 = vor.u32 %v16937_v27, %v12199_v26  ;;  %v12167_v19 = vld [vmem:[%s18557_s2 + $0x720] sm:$0xf]  ;;  %v16929_v20 = vld [vmem:[%s18557_s2 + $0x724] sm:$0xf0]  ;;  %v16944_v26 = vld [vmem:[%s18557_s2 + $0x7a4] sm:$0xf] }
 0x2af   : > { %3197 = vmatpush.bf16.msra.mxu3 %v12081_v38  ;;  %v16952_v38 = vld [vmem:[%s18557_s2 + $0x7e4] sm:$0xf]  ;;  %v12244_v52 = vor.u32 %v16946_v14, %v12241_v15  ;;  %v12233_v27 = vld [vmem:[%s18557_s2 + $0x7a8] sm:$0xf0]  ;;  %v12362_v14 = vld [vmem:[%s18557_s2 + $0x860] sm:$0xf] }
 0x2b0   : > { %v16972_v15 = vld [vmem:[%s18557_s2 + $0x864] sm:$0xf0]  ;;  %s17447_s27 = sadd.s32 176, %s18951_s29 }
 0x2b1   : > { %3159 = vmatpush.bf16.msra.mxu0 %v12005_v45  ;;  %v12268_v45 = vor.u32 %v16952_v38, %v12265_v39  ;;  %v16927_v38 = vld [vmem:[%s18557_s2 + $0x714] sm:$0xf0]  ;;  %v12223_v39 = vld [vmem:[%s18557_s2 + $0x790] sm:$0xf] }
 0x2b2   : > { %3172 = vmatpush.bf16.msra.mxu1 %v12069_v48  ;;  %3185 = vmatpush.bf16.msra.mxu2 %v12009_v49  ;;  %v16934_v48 = vld [vmem:[%s18557_s2 + $0x754] sm:$0xf]  ;;  %v12193_v49 = vld [vmem:[%s18557_s2 + $0x758] sm:$0xf0] }
 0x2b3   : > { %3198 = vmatpush.bf16.msra.mxu3 %v12073_v55  ;;  %v12196_v55 = vor.u32 %v16934_v48, %v12193_v49  ;;  %v12151_v48 = vld [vmem:[%s18557_s2 + $0x700] sm:$0xf]  ;;  %v16925_v49 = vld [vmem:[%s18557_s2 + $0x704] sm:$0xf0] }
 0x2b5   : > { %3160 = vmatpush.bf16.msra.mxu0 %v11997_v60  ;;  %v16932_v60 = vld [vmem:[%s18557_s2 + $0x744] sm:$0xf] }
 0x2b6   : > { %3173 = vmatpush.bf16.msra.mxu1 %v12061_v62  ;;  %3186 = vmatpush.bf16.msra.mxu2 %v12001_v63  ;;  %v16948_v62 = vld [vmem:[%s18557_s2 + $0x7c4] sm:$0xf]  ;;  %v12249_v63 = vld [vmem:[%s18557_s2 + $0x7c8] sm:$0xf0] }
 0x2b7   : > { %3199 = vmatpush.bf16.msra.mxu3 %v12065_v5  ;;  %v12188_v5 = vor.u32 %v16932_v60, %v12185_v31  ;;  %v12252_v9 = vor.u32 %v16948_v62, %v12249_v63  ;;  %v16974_v60 = vld [vmem:[%s18557_s2 + $0x874] sm:$0xf0]  ;;  %v12434_v31 = vld [vmem:[%s18557_s2 + $0x8f0] sm:$0xf]  ;;  %v12152_v62 = vor.u32 %v16925_v49, %v12151_v48  ;;  %v12348_v48 = vld [vmem:[%s18557_s2 + $0x848] sm:$0xf0] }
 0x2b8   : > { %v16990_v63 = vld [vmem:[%s18557_s2 + $0x8f4] sm:$0xf0] }
 0x2b9   : > { %3161 = vmatpush.bf16.msra.mxu0 %v11989_v13  ;;  %v2131_v61 = vpop.f32.mrf.mxu0 }
 0x2ba   : > { %3174 = vmatpush.bf16.msra.mxu1 %v12053_v17  ;;  %3187 = vmatpush.bf16.msra.mxu2 %v11993_v18  ;;  %v2144_v0 = vpop.f32.mrf.mxu1  ;;  %v12240_v17 = vor.u32 %v16947_v10, %v12239_v8  ;;  %v12180_v18 = vor.u32 %v16930_v11, %v12177_v12  ;;  %v12220_v8 = vor.u32 %v16940_v57, %v12217_v58  ;;  %v3216_v10 = vld [vmem:[%s3214_s15 + $0x8] sm:$0xff]  ;;  %v12338_v57 = vld [vmem:[%s18557_s2 + $0x830] sm:$0xf]  ;;  %s4246_s15 = scalar_lea.vmem [#allocation2], %s17063_s25  ;;  %s17203_s25 = sshll.u32 %s20019_s24, 4 }
 0x2bb   : > { %3200 = vmatpush.bf16.msra.mxu3 %v12057_v21  ;;  %v2145_v2 = vadd.f32 %v2144_v0, %v2131_v61  ;;  %v16973_v0 = vld [vmem:[%s18557_s2 + $0x874] sm:$0xf]  ;;  %v12435_v11 = vor.u32 %v16990_v63, %v12434_v31  ;;  %v16966_v58 = vld [vmem:[%s18557_s2 + $0x834] sm:$0xf0]  ;;  %s20323_s24 = sshra.s32 %s17342_s20, 3  ;;  %s17482_s20 = sadd.s32 184, %s18951_s29 }
 0x2bc   : > { %3162 = vmatmul.bf16.vlgmr.msra.gmra.mxu0 %v2959_v33  ;;  %v16965_v31 = vld [vmem:[%s18557_s2 + $0x834] sm:$0xf] }
 0x2bd   : > { %3412 = vmatpush.bf16.msrb.mxu0 %v12208_v22  ;;  %3175 = vmatmul.bf16.vlgmr.msra.gmra.mxu1 %v2960_v37  ;;  %v19407_v13 = vadd.f32 %v2145_v2, %v19333_v28  ;;  %v12231_v28 = vld [vmem:[%s18557_s2 + $0x7a0] sm:$0xf]  ;;  %v16945_v22 = vld [vmem:[%s18557_s2 + $0x7a4] sm:$0xf0]  ;;  %v16981_v63 = vld [vmem:[%s18557_s2 + $0x8b4] sm:$0xf] }
 0x2be   : > { %3425 = vmatpush.bf16.msrb.mxu1 %v12272_v24  ;;  %3438 = vmatpush.bf16.msrb.mxu2 %v12212_v25  ;;  %v12169_v24 = vld [vmem:[%s18557_s2 + $0x728] sm:$0xf0]  ;;  %v12232_v35 = vor.u32 %v16945_v22, %v12231_v28 }
 0x2bf   : > { %3451 = vmatpush.bf16.msrb.mxu3 %v12276_v32  ;;  %3188 = vmatmul.bf16.vlgmr.msra.gmra.mxu2 %v2959_v33  ;;  %v12168_v33 = vor.u32 %v16929_v20, %v12167_v19  ;;  %v12172_v36 = vor.u32 %v16928_v23, %v12169_v24  ;;  %v16988_v19 = vld [vmem:[%s18557_s2 + $0x8e4] sm:$0xf0]  ;;  %v16971_v20 = vld [vmem:[%s18557_s2 + $0x864] sm:$0xf]  ;;  %v12364_v28 = vld [vmem:[%s18557_s2 + $0x868] sm:$0xf0]  ;;  %v12363_v23 = vor.u32 %v16972_v15, %v12362_v14 }
 0x2c0   : > { %3201 = vmatmul.bf16.vlgmr.msra.gmra.mxu3 %v2960_v37  ;;  %v12159_v37 = vld [vmem:[%s18557_s2 + $0x710] sm:$0xf]  ;;  %v12428_v22 = vld [vmem:[%s18557_s2 + $0x8e8] sm:$0xf0]  ;;  %v16979_v14 = vld [vmem:[%s18557_s2 + $0x8a4] sm:$0xf] }
 0x2c1   : > { %3413 = vmatpush.bf16.msrb.mxu0 %v12200_v40  ;;  %v2133_v29 = vpop.f32.mrf.mxu0  ;;  %v12160_v46 = vor.u32 %v16927_v38, %v12159_v37  ;;  %v12420_v37 = vld [vmem:[%s18557_s2 + $0x8d8] sm:$0xf0]  ;;  %v12396_v15 = vld [vmem:[%s18557_s2 + $0x8a8] sm:$0xf0] }
 0x2c2   : > { %3426 = vmatpush.bf16.msrb.mxu1 %v12264_v41  ;;  %3439 = vmatpush.bf16.msrb.mxu2 %v12204_v3  ;;  %v2157_v21 = vpop.f32.mrf.mxu2  ;;  %v2146_v34 = vpop.f32.mrf.mxu1  ;;  %v12236_v41 = vor.u32 %v16944_v26, %v12233_v27  ;;  %v16943_v3 = vld [vmem:[%s18557_s2 + $0x794] sm:$0xf0]  ;;  %v12354_v26 = vld [vmem:[%s18557_s2 + $0x850] sm:$0xf] }
 0x2c3   : > { %3452 = vmatpush.bf16.msrb.mxu3 %v12268_v45  ;;  %v2170_v25 = vpop.f32.mrf.mxu3  ;;  %v12225_v45 = vld [vmem:[%s18557_s2 + $0x798] sm:$0xf0]  ;;  %v16970_v27 = vld [vmem:[%s18557_s2 + $0x854] sm:$0xf0]  ;;  %v12418_v29 = vld [vmem:[%s18557_s2 + $0x8d0] sm:$0xf] }
 0x2c4   : > { %v2171_v32 = vadd.f32 %v2170_v25, %v2157_v21  ;;  %v16987_v21 = vld [vmem:[%s18557_s2 + $0x8e4] sm:$0xf]  ;;  %v12367_v25 = vor.u32 %v16971_v20, %v12364_v28  ;;  %v16969_v34 = vld [vmem:[%s18557_s2 + $0x854] sm:$0xf]  ;;  %v12355_v38 = vor.u32 %v16970_v27, %v12354_v26  ;;  %v12324_v27 = vld [vmem:[%s18557_s2 + $0x818] sm:$0xf0] }
 0x2c5   : > { %3414 = vmatpush.bf16.msrb.mxu0 %v12192_v53  ;;  %v16941_v53 = vld [vmem:[%s18557_s2 + $0x784] sm:$0xf0]  ;;  %v16961_v26 = vld [vmem:[%s18557_s2 + $0x814] sm:$0xf] }
 0x2c6   : > { %3427 = vmatpush.bf16.msrb.mxu1 %v12256_v54  ;;  %3440 = vmatpush.bf16.msrb.mxu2 %v12196_v55  ;;  %v19426_v40 = vadd.f32 %v2171_v32, %v19347_v47  ;;  %v12224_v47 = vor.u32 %v16943_v3, %v12223_v39  ;;  %v16924_v54 = vld [vmem:[%s18557_s2 + $0x704] sm:$0xf]  ;;  %v12228_v55 = vor.u32 %v16942_v44, %v12225_v45  ;;  %v12346_v3 = vld [vmem:[%s18557_s2 + $0x840] sm:$0xf]  ;;  %v16984_v45 = vld [vmem:[%s18557_s2 + $0x8c4] sm:$0xf0] }
 0x2c7   : > { %3453 = vmatpush.bf16.msrb.mxu3 %v12260_v59  ;;  %v12216_v2 = vor.u32 %v16941_v53, %v12215_v51  ;;  %v12431_v32 = vor.u32 %v16987_v21, %v12428_v22  ;;  %v12347_v53 = vor.u32 %v16968_v42, %v12346_v3  ;;  %v16962_v21 = vld [vmem:[%s18557_s2 + $0x814] sm:$0xf0]  ;;  %v12386_v22 = vld [vmem:[%s18557_s2 + $0x890] sm:$0xf]  ;;  %v12316_v3 = vld [vmem:[%s18557_s2 + $0x808] sm:$0xf0] }
 0x2c8   : > { %v16975_v42 = vld [vmem:[%s18557_s2 + $0x884] sm:$0xf] }
 0x2c9   : > { %3415 = vmatpush.bf16.msrb.mxu0 %v12184_v1  ;;  %v12372_v1 = vld [vmem:[%s18557_s2 + $0x878] sm:$0xf0] }
 0x2ca   : > { %3428 = vmatpush.bf16.msrb.mxu1 %v12248_v4  ;;  %3441 = vmatpush.bf16.msrb.mxu2 %v12188_v5  ;;  %v2159_v59 = vpop.f32.mrf.mxu2  ;;  %v12156_v4 = vor.u32 %v16924_v54, %v12153_v56  ;;  %v16989_v5 = vld [vmem:[%s18557_s2 + $0x8f4] sm:$0xf]  ;;  %v12375_v12 = vor.u32 %v16973_v0, %v12372_v1  ;;  %v12404_v0 = vld [vmem:[%s18557_s2 + $0x8b8] sm:$0xf0]  ;;  %v12339_v1 = vor.u32 %v16966_v58, %v12338_v57 }
 0x2cb   : > { %3454 = vmatpush.bf16.msrb.mxu3 %v12252_v9  ;;  %v2172_v61 = vpop.f32.mrf.mxu3  ;;  %v12371_v9 = vor.u32 %v16974_v60, %v12370_v30  ;;  %v12402_v59 = vld [vmem:[%s18557_s2 + $0x8b0] sm:$0xf]  ;;  %v16982_v60 = vld [vmem:[%s18557_s2 + $0x8b4] sm:$0xf0]  ;;  %v12599_v57 = vld [vmem:[%s18557_s2 + $0x9f8] sm:$0xf0] }
 0x2cc   : > { %v12340_v61 = vld [vmem:[%s18557_s2 + $0x838] sm:$0xf0]  ;;  %v3473_v58 = vld [vmem:[%s3472_s17] sm:$0xff] }
 0x2cd   : > { %3416 = vmatpush.bf16.msrb.mxu0 %v12176_v16  ;;  %v12426_v16 = vld [vmem:[%s18557_s2 + $0x8e0] sm:$0xf] }
 0x2ce   : > { %3429 = vmatpush.bf16.msrb.mxu1 %v12240_v17  ;;  %3442 = vmatpush.bf16.msrb.mxu2 %v12180_v18  ;;  %v12439_v17 = vor.u32 %v16989_v5, %v12436_v6  ;;  %v3217_v18 = vpack.c.bf16 %v3215_v7, %v3215_v7  ;;  %v12427_v24 = vor.u32 %v16988_v19, %v12426_v16  ;;  %v12330_v5 = vld [vmem:[%s18557_s2 + $0x820] sm:$0xf]  ;;  %v16964_v6 = vld [vmem:[%s18557_s2 + $0x824] sm:$0xf0] }
 0x2cf   : > { %3455 = vmatpush.bf16.msrb.mxu3 %v12244_v52  ;;  %v3218_v52 = vpack.c.bf16 %v3216_v10, %v3216_v10  ;;  %v12407_v7 = vor.u32 %v16981_v63, %v12404_v0  ;;  %v16963_v10 = vld [vmem:[%s18557_s2 + $0x824] sm:$0xf]  ;;  %v12525_v63 = vld [vmem:[%s18557_s2 + $0x960] sm:$0xf]  ;;  %v17007_v0 = vld [vmem:[%s18557_s2 + $0x964] sm:$0xf0] }
 0x2d1   : > { %3417 = vmatpush.bf16.msrb.mxu0 %v12168_v33  ;;  %v16986_v33 = vld [vmem:[%s18557_s2 + $0x8d4] sm:$0xf0] }
 0x2d2   : > { %3430 = vmatpush.bf16.msrb.mxu1 %v12232_v35  ;;  %3443 = vmatpush.bf16.msrb.mxu2 %v12172_v36  ;;  %v12356_v35 = vld [vmem:[%s18557_s2 + $0x858] sm:$0xf0]  ;;  %v16985_v36 = vld [vmem:[%s18557_s2 + $0x8d4] sm:$0xf]  ;;  %v12419_v39 = vor.u32 %v16986_v33, %v12418_v29 }
 0x2d3   : > { %3456 = vmatpush.bf16.msrb.mxu3 %v12236_v41  ;;  %v12359_v41 = vor.u32 %v16969_v34, %v12356_v35  ;;  %v12423_v44 = vor.u32 %v16985_v36, %v12420_v37  ;;  %v16977_v29 = vld [vmem:[%s18557_s2 + $0x894] sm:$0xf]  ;;  %v12314_v34 = vld [vmem:[%s18557_s2 + $0x800] sm:$0xf]  ;;  %v16960_v35 = vld [vmem:[%s18557_s2 + $0x804] sm:$0xf0]  ;;  %v12327_v36 = vor.u32 %v16961_v26, %v12324_v27 }
 0x2d4   : > { %v12378_v37 = vld [vmem:[%s18557_s2 + $0x880] sm:$0xf]  ;;  %v17003_v26 = vld [vmem:[%s18557_s2 + $0x944] sm:$0xf0] }
 0x2d5   : > { %3418 = vmatpush.bf16.msrb.mxu0 %v12160_v46  ;;  %v16967_v46 = vld [vmem:[%s18557_s2 + $0x844] sm:$0xf]  ;;  %v12573_v27 = vld [vmem:[%s18557_s2 + $0x9c0] sm:$0xf] }
 0x2d6   : > { %3431 = vmatpush.bf16.msrb.mxu1 %v12224_v47  ;;  %3444 = vmatpush.bf16.msrb.mxu2 %v12164_v50  ;;  %v16983_v47 = vld [vmem:[%s18557_s2 + $0x8c4] sm:$0xf]  ;;  %v12412_v50 = vld [vmem:[%s18557_s2 + $0x8c8] sm:$0xf0]  ;;  %v12351_v56 = vor.u32 %v16967_v46, %v12348_v48  ;;  %v17009_v46 = vld [vmem:[%s18557_s2 + $0x974] sm:$0xf0] }
 0x2d7   : > { %3457 = vmatpush.bf16.msrb.mxu3 %v12228_v55  ;;  %v12411_v55 = vor.u32 %v16984_v45, %v12410_v43  ;;  %v12415_v30 = vor.u32 %v16983_v47, %v12412_v50  ;;  %v12380_v43 = vld [vmem:[%s18557_s2 + $0x888] sm:$0xf0]  ;;  %v12533_v45 = vld [vmem:[%s18557_s2 + $0x970] sm:$0xf]  ;;  %v12315_v47 = vor.u32 %v16960_v35, %v12314_v34  ;;  %v17025_v50 = vld [vmem:[%s18557_s2 + $0x9f4] sm:$0xf0] }
 0x2d8   : > { %v12597_v48 = vld [vmem:[%s18557_s2 + $0x9f0] sm:$0xf]  ;;  %v12511_v34 = vld [vmem:[%s18557_s2 + $0x948] sm:$0xf0] }
 0x2d9   : > { %3419 = vmatpush.bf16.msrb.mxu0 %v12152_v62  ;;  %v2389_v49 = vpop.f32.mrf.mxu0 }
 0x2da   : > { %3432 = vmatpush.bf16.msrb.mxu1 %v12216_v2  ;;  %3445 = vmatpush.bf16.msrb.mxu2 %v12156_v4  ;;  %v2402_v51 = vpop.f32.mrf.mxu1  ;;  %v12403_v2 = vor.u32 %v16982_v60, %v12402_v59  ;;  %v12343_v4 = vor.u32 %v16965_v31, %v12340_v61  ;;  %v12383_v59 = vor.u32 %v16975_v42, %v12380_v43  ;;  %v3474_v60 = vld [vmem:[%s3472_s17 + $0x8] sm:$0xff]  ;;  %v12501_v42 = vld [vmem:[%s18557_s2 + $0x930] sm:$0xf]  ;;  %s4504_s17 = scalar_lea.vmem [#allocation2], %s17098_s1  ;;  %s17238_s1 = sshll.u32 %s20095_s13, 4 }
 0x2db   : > { %3458 = vmatpush.bf16.msrb.mxu3 %v12220_v8  ;;  %v2403_v54 = vadd.f32 %v2402_v51, %v2389_v49  ;;  %v17008_v51 = vld [vmem:[%s18557_s2 + $0x974] sm:$0xf]  ;;  %v12598_v31 = vor.u32 %v17025_v50, %v12597_v48  ;;  %v17001_v43 = vld [vmem:[%s18557_s2 + $0x934] sm:$0xf0]  ;;  %s20399_s13 = sshra.s32 %s17377_s23, 3  ;;  %s17517_s23 = sadd.s32 192, %s18951_s29 }
 0x2dc   : > { %3420 = vmatmul.bf16.vlgmr.msrb.gmra.mxu0 %v3217_v18  ;;  %v17000_v48 = vld [vmem:[%s18557_s2 + $0x934] sm:$0xf] }
 0x2dd   : > { %3670 = vmatpush.bf16.msra.mxu0 %v12371_v9  ;;  %3433 = vmatmul.bf16.vlgmr.msrb.gmra.mxu1 %v3218_v52  ;;  %v19483_v62 = vadd.f32 %v2403_v54, %v19407_v13  ;;  %v12394_v13 = vld [vmem:[%s18557_s2 + $0x8a0] sm:$0xf]  ;;  %v16980_v9 = vld [vmem:[%s18557_s2 + $0x8a4] sm:$0xf0]  ;;  %v17016_v50 = vld [vmem:[%s18557_s2 + $0x9b4] sm:$0xf] }
 0x2de   : > { %3683 = vmatpush.bf16.msra.mxu1 %v12435_v11  ;;  %3696 = vmatpush.bf16.msra.mxu2 %v12375_v12  ;;  %v12332_v11 = vld [vmem:[%s18557_s2 + $0x828] sm:$0xf0]  ;;  %v12395_v20 = vor.u32 %v16980_v9, %v12394_v13 }
 0x2df   : > { %3709 = vmatpush.bf16.msra.mxu3 %v12439_v17  ;;  %3446 = vmatmul.bf16.vlgmr.msrb.gmra.mxu2 %v3217_v18  ;;  %v12331_v18 = vor.u32 %v16964_v6, %v12330_v5  ;;  %v12335_v28 = vor.u32 %v16963_v10, %v12332_v11  ;;  %v17023_v5 = vld [vmem:[%s18557_s2 + $0x9e4] sm:$0xf0]  ;;  %v17006_v6 = vld [vmem:[%s18557_s2 + $0x964] sm:$0xf]  ;;  %v12527_v13 = vld [vmem:[%s18557_s2 + $0x968] sm:$0xf0]  ;;  %v12526_v10 = vor.u32 %v17007_v0, %v12525_v63 }
 0x2e0   : > { %3459 = vmatmul.bf16.vlgmr.msrb.gmra.mxu3 %v3218_v52  ;;  %v12322_v52 = vld [vmem:[%s18557_s2 + $0x810] sm:$0xf]  ;;  %v12591_v9 = vld [vmem:[%s18557_s2 + $0x9e8] sm:$0xf0]  ;;  %v17014_v63 = vld [vmem:[%s18557_s2 + $0x9a4] sm:$0xf] }
 0x2e1   : > { %3671 = vmatpush.bf16.msra.mxu0 %v12363_v23  ;;  %v2391_v16 = vpop.f32.mrf.mxu0  ;;  %v12323_v33 = vor.u32 %v16962_v21, %v12322_v52  ;;  %v12583_v52 = vld [vmem:[%s18557_s2 + $0x9d8] sm:$0xf0]  ;;  %v12559_v0 = vld [vmem:[%s18557_s2 + $0x9a8] sm:$0xf0] }
 0x2e2   : > { %3684 = vmatpush.bf16.msra.mxu1 %v12427_v24  ;;  %3697 = vmatpush.bf16.msra.mxu2 %v12367_v25  ;;  %v2415_v8 = vpop.f32.mrf.mxu2  ;;  %v2404_v19 = vpop.f32.mrf.mxu1  ;;  %v12399_v24 = vor.u32 %v16979_v14, %v12396_v15  ;;  %v16978_v25 = vld [vmem:[%s18557_s2 + $0x894] sm:$0xf0]  ;;  %v12517_v14 = vld [vmem:[%s18557_s2 + $0x950] sm:$0xf] }
 0x2e3   : > { %3710 = vmatpush.bf16.msra.mxu3 %v12431_v32  ;;  %v2428_v12 = vpop.f32.mrf.mxu3  ;;  %v12388_v32 = vld [vmem:[%s18557_s2 + $0x898] sm:$0xf0]  ;;  %v17005_v15 = vld [vmem:[%s18557_s2 + $0x954] sm:$0xf0]  ;;  %v12581_v16 = vld [vmem:[%s18557_s2 + $0x9d0] sm:$0xf] }
 0x2e4   : > { %v2429_v17 = vadd.f32 %v2428_v12, %v2415_v8  ;;  %v17022_v8 = vld [vmem:[%s18557_s2 + $0x9e4] sm:$0xf]  ;;  %v12530_v12 = vor.u32 %v17006_v6, %v12527_v13  ;;  %v17004_v19 = vld [vmem:[%s18557_s2 + $0x954] sm:$0xf]  ;;  %v12518_v21 = vor.u32 %v17005_v15, %v12517_v14  ;;  %v12487_v15 = vld [vmem:[%s18557_s2 + $0x918] sm:$0xf0] }
 0x2e5   : > { %3672 = vmatpush.bf16.msra.mxu0 %v12355_v38  ;;  %v16976_v38 = vld [vmem:[%s18557_s2 + $0x884] sm:$0xf0]  ;;  %v16996_v14 = vld [vmem:[%s18557_s2 + $0x914] sm:$0xf] }
 0x2e6   : > { %3685 = vmatpush.bf16.msra.mxu1 %v12419_v39  ;;  %3698 = vmatpush.bf16.msra.mxu2 %v12359_v41  ;;  %v19502_v23 = vadd.f32 %v2429_v17, %v19426_v40  ;;  %v12387_v40 = vor.u32 %v16978_v25, %v12386_v22  ;;  %v16959_v39 = vld [vmem:[%s18557_s2 + $0x804] sm:$0xf]  ;;  %v12391_v41 = vor.u32 %v16977_v29, %v12388_v32  ;;  %v12509_v25 = vld [vmem:[%s18557_s2 + $0x940] sm:$0xf]  ;;  %v17019_v32 = vld [vmem:[%s18557_s2 + $0x9c4] sm:$0xf0] }
 0x2e7   : > { %3711 = vmatpush.bf16.msra.mxu3 %v12423_v44  ;;  %v12379_v54 = vor.u32 %v16976_v38, %v12378_v37  ;;  %v12594_v17 = vor.u32 %v17022_v8, %v12591_v9  ;;  %v12510_v38 = vor.u32 %v17003_v26, %v12509_v25  ;;  %v16997_v8 = vld [vmem:[%s18557_s2 + $0x914] sm:$0xf0]  ;;  %v12549_v9 = vld [vmem:[%s18557_s2 + $0x990] sm:$0xf]  ;;  %v12479_v25 = vld [vmem:[%s18557_s2 + $0x908] sm:$0xf0] }
 0x2e8   : > { %v17010_v26 = vld [vmem:[%s18557_s2 + $0x984] sm:$0xf] }
 0x2e9   : > { %3673 = vmatpush.bf16.msra.mxu0 %v12347_v53  ;;  %v12535_v53 = vld [vmem:[%s18557_s2 + $0x978] sm:$0xf0] }
 0x2ea   : > { %3686 = vmatpush.bf16.msra.mxu1 %v12411_v55  ;;  %3699 = vmatpush.bf16.msra.mxu2 %v12351_v56  ;;  %v2417_v44 = vpop.f32.mrf.mxu2  ;;  %v12319_v55 = vor.u32 %v16959_v39, %v12316_v3  ;;  %v17024_v56 = vld [vmem:[%s18557_s2 + $0x9f4] sm:$0xf]  ;;  %v12538_v61 = vor.u32 %v17008_v51, %v12535_v53  ;;  %v12567_v51 = vld [vmem:[%s18557_s2 + $0x9b8] sm:$0xf0]  ;;  %v12502_v53 = vor.u32 %v17001_v43, %v12501_v42 }
 0x2eb   : > { %3712 = vmatpush.bf16.msra.mxu3 %v12415_v30  ;;  %v2430_v49 = vpop.f32.mrf.mxu3  ;;  %v12534_v30 = vor.u32 %v17009_v46, %v12533_v45  ;;  %v12565_v44 = vld [vmem:[%s18557_s2 + $0x9b0] sm:$0xf]  ;;  %v17017_v46 = vld [vmem:[%s18557_s2 + $0x9b4] sm:$0xf0]  ;;  %v12762_v42 = vld [vmem:[%s18557_s2 + $0xaf8] sm:$0xf0] }
 0x2ec   : > { %v12503_v49 = vld [vmem:[%s18557_s2 + $0x938] sm:$0xf0]  ;;  %v3731_v43 = vld [vmem:[%s3730_s30] sm:$0xff] }
 0x2ed   : > { %3674 = vmatpush.bf16.msra.mxu0 %v12339_v1  ;;  %v12589_v1 = vld [vmem:[%s18557_s2 + $0x9e0] sm:$0xf] }
 0x2ee   : > { %3687 = vmatpush.bf16.msra.mxu1 %v12403_v2  ;;  %3700 = vmatpush.bf16.msra.mxu2 %v12343_v4  ;;  %v12602_v2 = vor.u32 %v17024_v56, %v12599_v57  ;;  %v3475_v4 = vpack.c.bf16 %v3473_v58, %v3473_v58  ;;  %v12590_v11 = vor.u32 %v17023_v5, %v12589_v1  ;;  %v12493_v56 = vld [vmem:[%s18557_s2 + $0x920] sm:$0xf]  ;;  %v16999_v57 = vld [vmem:[%s18557_s2 + $0x924] sm:$0xf0] }
 0x2ef   : > { %3713 = vmatpush.bf16.msra.mxu3 %v12407_v7  ;;  %v3476_v7 = vpack.c.bf16 %v3474_v60, %v3474_v60  ;;  %v12570_v58 = vor.u32 %v17016_v50, %v12567_v51  ;;  %v16998_v60 = vld [vmem:[%s18557_s2 + $0x924] sm:$0xf]  ;;  %v12688_v50 = vld [vmem:[%s18557_s2 + $0xa60] sm:$0xf]  ;;  %v17042_v51 = vld [vmem:[%s18557_s2 + $0xa64] sm:$0xf0] }
 0x2f1   : > { %3675 = vmatpush.bf16.msra.mxu0 %v12331_v18  ;;  %v17021_v18 = vld [vmem:[%s18557_s2 + $0x9d4] sm:$0xf0] }
 0x2f2   : > { %3688 = vmatpush.bf16.msra.mxu1 %v12395_v20  ;;  %3701 = vmatpush.bf16.msra.mxu2 %v12335_v28  ;;  %v12519_v20 = vld [vmem:[%s18557_s2 + $0x958] sm:$0xf0]  ;;  %v17020_v28 = vld [vmem:[%s18557_s2 + $0x9d4] sm:$0xf]  ;;  %v12582_v22 = vor.u32 %v17021_v18, %v12581_v16 }
 0x2f3   : > { %3714 = vmatpush.bf16.msra.mxu3 %v12399_v24  ;;  %v12522_v24 = vor.u32 %v17004_v19, %v12519_v20  ;;  %v12586_v29 = vor.u32 %v17020_v28, %v12583_v52  ;;  %v17012_v16 = vld [vmem:[%s18557_s2 + $0x994] sm:$0xf]  ;;  %v12477_v19 = vld [vmem:[%s18557_s2 + $0x900] sm:$0xf]  ;;  %v16995_v20 = vld [vmem:[%s18557_s2 + $0x904] sm:$0xf0]  ;;  %v12490_v28 = vor.u32 %v16996_v14, %v12487_v15 }
 0x2f4   : > { %v12541_v52 = vld [vmem:[%s18557_s2 + $0x980] sm:$0xf]  ;;  %v17038_v14 = vld [vmem:[%s18557_s2 + $0xa44] sm:$0xf0] }
 0x2f5   : > { %3676 = vmatpush.bf16.msra.mxu0 %v12323_v33  ;;  %v17002_v33 = vld [vmem:[%s18557_s2 + $0x944] sm:$0xf]  ;;  %v12736_v15 = vld [vmem:[%s18557_s2 + $0xac0] sm:$0xf] }
 0x2f6   : > { %3689 = vmatpush.bf16.msra.mxu1 %v12387_v40  ;;  %3702 = vmatpush.bf16.msra.mxu2 %v12327_v36  ;;  %v17018_v40 = vld [vmem:[%s18557_s2 + $0x9c4] sm:$0xf]  ;;  %v12575_v36 = vld [vmem:[%s18557_s2 + $0x9c8] sm:$0xf0]  ;;  %v12514_v3 = vor.u32 %v17002_v33, %v12511_v34  ;;  %v17044_v33 = vld [vmem:[%s18557_s2 + $0xa74] sm:$0xf0] }
 0x2f7   : > { %3715 = vmatpush.bf16.msra.mxu3 %v12391_v41  ;;  %v12574_v41 = vor.u32 %v17019_v32, %v12573_v27  ;;  %v12578_v45 = vor.u32 %v17018_v40, %v12575_v36  ;;  %v12543_v27 = vld [vmem:[%s18557_s2 + $0x988] sm:$0xf0]  ;;  %v12696_v32 = vld [vmem:[%s18557_s2 + $0xa70] sm:$0xf]  ;;  %v12478_v40 = vor.u32 %v16995_v20, %v12477_v19  ;;  %v17060_v36 = vld [vmem:[%s18557_s2 + $0xaf4] sm:$0xf0] }
 0x2f8   : > { %v12760_v34 = vld [vmem:[%s18557_s2 + $0xaf0] sm:$0xf]  ;;  %v12674_v19 = vld [vmem:[%s18557_s2 + $0xa48] sm:$0xf0] }
 0x2f9   : > { %3677 = vmatpush.bf16.msra.mxu0 %v12315_v47  ;;  %v2647_v35 = vpop.f32.mrf.mxu0 }
 0x2fa   : > { %3690 = vmatpush.bf16.msra.mxu1 %v12379_v54  ;;  %3703 = vmatpush.bf16.msra.mxu2 %v12319_v55  ;;  %v2660_v37 = vpop.f32.mrf.mxu1  ;;  %v12566_v54 = vor.u32 %v17017_v46, %v12565_v44  ;;  %v12506_v55 = vor.u32 %v17000_v48, %v12503_v49  ;;  %v12546_v44 = vor.u32 %v17010_v26, %v12543_v27  ;;  %v3732_v46 = vld [vmem:[%s3730_s30 + $0x8] sm:$0xff]  ;;  %v12664_v26 = vld [vmem:[%s18557_s2 + $0xa30] sm:$0xf]  ;;  %s4762_s30 = scalar_lea.vmem [#allocation2], %s17133_s22  ;;  %s17273_s22 = sshll.u32 %s20171_s19, 4 }
 0x2fb   : > { %3716 = vmatpush.bf16.msra.mxu3 %v12383_v59  ;;  %v2661_v39 = vadd.f32 %v2660_v37, %v2647_v35  ;;  %v17043_v37 = vld [vmem:[%s18557_s2 + $0xa74] sm:$0xf]  ;;  %v12761_v48 = vor.u32 %v17060_v36, %v12760_v34  ;;  %v17036_v27 = vld [vmem:[%s18557_s2 + $0xa34] sm:$0xf0]  ;;  %s20475_s19 = sshra.s32 %s17412_s26, 3  ;;  %s17552_s26 = sadd.s32 200, %s18951_s29 }
 0x2fc   : > { %3678 = vmatmul.bf16.vlgmr.msra.gmra.mxu0 %v3475_v4  ;;  %v17035_v34 = vld [vmem:[%s18557_s2 + $0xa34] sm:$0xf] }
 0x2fd   : > { %3928 = vmatpush.bf16.msrb.mxu0 %v12534_v30  ;;  %3691 = vmatmul.bf16.vlgmr.msra.gmra.mxu1 %v3476_v7  ;;  %v19559_v47 = vadd.f32 %v2661_v39, %v19483_v62  ;;  %v12557_v62 = vld [vmem:[%s18557_s2 + $0x9a0] sm:$0xf]  ;;  %v17015_v30 = vld [vmem:[%s18557_s2 + $0x9a4] sm:$0xf0]  ;;  %v17051_v36 = vld [vmem:[%s18557_s2 + $0xab4] sm:$0xf] }
 0x2fe   : > { %3941 = vmatpush.bf16.msrb.mxu1 %v12598_v31  ;;  %3954 = vmatpush.bf16.msrb.mxu2 %v12538_v61  ;;  %v12495_v31 = vld [vmem:[%s18557_s2 + $0x928] sm:$0xf0]  ;;  %v12558_v6 = vor.u32 %v17015_v30, %v12557_v62 }
 0x2ff   : > { %3967 = vmatpush.bf16.msrb.mxu3 %v12602_v2  ;;  %3704 = vmatmul.bf16.vlgmr.msra.gmra.mxu2 %v3475_v4  ;;  %v12494_v4 = vor.u32 %v16999_v57, %v12493_v56  ;;  %v12498_v13 = vor.u32 %v16998_v60, %v12495_v31  ;;  %v17058_v56 = vld [vmem:[%s18557_s2 + $0xae4] sm:$0xf0]  ;;  %v17041_v57 = vld [vmem:[%s18557_s2 + $0xa64] sm:$0xf]  ;;  %v12690_v62 = vld [vmem:[%s18557_s2 + $0xa68] sm:$0xf0]  ;;  %v12689_v60 = vor.u32 %v17042_v51, %v12688_v50 }
 0x300   : > { %3717 = vmatmul.bf16.vlgmr.msra.gmra.mxu3 %v3476_v7  ;;  %v12485_v7 = vld [vmem:[%s18557_s2 + $0x910] sm:$0xf]  ;;  %v12754_v30 = vld [vmem:[%s18557_s2 + $0xae8] sm:$0xf0]  ;;  %v17049_v50 = vld [vmem:[%s18557_s2 + $0xaa4] sm:$0xf] }
 0x301   : > { %3929 = vmatpush.bf16.msrb.mxu0 %v12526_v10  ;;  %v2649_v1 = vpop.f32.mrf.mxu0  ;;  %v12486_v18 = vor.u32 %v16997_v8, %v12485_v7  ;;  %v12746_v7 = vld [vmem:[%s18557_s2 + $0xad8] sm:$0xf0]  ;;  %v12722_v51 = vld [vmem:[%s18557_s2 + $0xaa8] sm:$0xf0] }
 0x302   : > { %3942 = vmatpush.bf16.msrb.mxu1 %v12590_v11  ;;  %3955 = vmatpush.bf16.msrb.mxu2 %v12530_v12  ;;  %v2673_v59 = vpop.f32.mrf.mxu2  ;;  %v2662_v5 = vpop.f32.mrf.mxu1  ;;  %v12562_v11 = vor.u32 %v17014_v63, %v12559_v0  ;;  %v17013_v12 = vld [vmem:[%s18557_s2 + $0x994] sm:$0xf0]  ;;  %v12680_v63 = vld [vmem:[%s18557_s2 + $0xa50] sm:$0xf] }
 0x303   : > { %3968 = vmatpush.bf16.msrb.mxu3 %v12594_v17  ;;  %v2686_v61 = vpop.f32.mrf.mxu3  ;;  %v12551_v17 = vld [vmem:[%s18557_s2 + $0x998] sm:$0xf0]  ;;  %v17040_v0 = vld [vmem:[%s18557_s2 + $0xa54] sm:$0xf0]  ;;  %v12744_v1 = vld [vmem:[%s18557_s2 + $0xad0] sm:$0xf] }
 0x304   : > { %v2687_v2 = vadd.f32 %v2686_v61, %v2673_v59  ;;  %v17057_v59 = vld [vmem:[%s18557_s2 + $0xae4] sm:$0xf]  ;;  %v12693_v61 = vor.u32 %v17041_v57, %v12690_v62  ;;  %v17039_v5 = vld [vmem:[%s18557_s2 + $0xa54] sm:$0xf]  ;;  %v12681_v8 = vor.u32 %v17040_v0, %v12680_v63  ;;  %v12650_v0 = vld [vmem:[%s18557_s2 + $0xa18] sm:$0xf0] }
 0x305   : > { %3930 = vmatpush.bf16.msrb.mxu0 %v12518_v21  ;;  %v17011_v21 = vld [vmem:[%s18557_s2 + $0x984] sm:$0xf0]  ;;  %v17031_v63 = vld [vmem:[%s18557_s2 + $0xa14] sm:$0xf] }
 0x306   : > { %3943 = vmatpush.bf16.msrb.mxu1 %v12582_v22  ;;  %3956 = vmatpush.bf16.msrb.mxu2 %v12522_v24  ;;  %v19578_v10 = vadd.f32 %v2687_v2, %v19502_v23  ;;  %v12550_v23 = vor.u32 %v17013_v12, %v12549_v9  ;;  %v16994_v22 = vld [vmem:[%s18557_s2 + $0x904] sm:$0xf]  ;;  %v12554_v24 = vor.u32 %v17012_v16, %v12551_v17  ;;  %v12672_v12 = vld [vmem:[%s18557_s2 + $0xa40] sm:$0xf]  ;;  %v17054_v17 = vld [vmem:[%s18557_s2 + $0xac4] sm:$0xf0] }
 0x307   : > { %3969 = vmatpush.bf16.msrb.mxu3 %v12586_v29  ;;  %v12542_v39 = vor.u32 %v17011_v21, %v12541_v52  ;;  %v12757_v2 = vor.u32 %v17057_v59, %v12754_v30  ;;  %v12673_v21 = vor.u32 %v17038_v14, %v12672_v12  ;;  %v17032_v59 = vld [vmem:[%s18557_s2 + $0xa14] sm:$0xf0]  ;;  %v12712_v30 = vld [vmem:[%s18557_s2 + $0xa90] sm:$0xf]  ;;  %v12642_v12 = vld [vmem:[%s18557_s2 + $0xa08] sm:$0xf0] }
 0x308   : > { %v17045_v14 = vld [vmem:[%s18557_s2 + $0xa84] sm:$0xf] }
 0x309   : > { %3931 = vmatpush.bf16.msrb.mxu0 %v12510_v38  ;;  %v12698_v38 = vld [vmem:[%s18557_s2 + $0xa78] sm:$0xf0] }
 0x30a   : > { %3944 = vmatpush.bf16.msrb.mxu1 %v12574_v41  ;;  %3957 = vmatpush.bf16.msrb.mxu2 %v12514_v3  ;;  %v2675_v29 = vpop.f32.mrf.mxu2  ;;  %v12482_v41 = vor.u32 %v16994_v22, %v12479_v25  ;;  %v17059_v3 = vld [vmem:[%s18557_s2 + $0xaf4] sm:$0xf]  ;;  %v12701_v49 = vor.u32 %v17043_v37, %v12698_v38  ;;  %v12730_v37 = vld [vmem:[%s18557_s2 + $0xab8] sm:$0xf0]  ;;  %v12665_v38 = vor.u32 %v17036_v27, %v12664_v26 }
 0x30b   : > { %3970 = vmatpush.bf16.msrb.mxu3 %v12578_v45  ;;  %v2688_v35 = vpop.f32.mrf.mxu3  ;;  %v12697_v45 = vor.u32 %v17044_v33, %v12696_v32  ;;  %v12728_v29 = vld [vmem:[%s18557_s2 + $0xab0] sm:$0xf]  ;;  %v17052_v33 = vld [vmem:[%s18557_s2 + $0xab4] sm:$0xf0]  ;;  %v12925_v26 = vld [vmem:[%s18557_s2 + $0xbf8] sm:$0xf0] }
 0x30c   : > { %v12666_v35 = vld [vmem:[%s18557_s2 + $0xa38] sm:$0xf0]  ;;  %v3989_v27 = vld [vmem:[%s3988_s12] sm:$0xff] }
 0x30d   : > { %3932 = vmatpush.bf16.msrb.mxu0 %v12502_v53  ;;  %v12752_v53 = vld [vmem:[%s18557_s2 + $0xae0] sm:$0xf] }
 0x30e   : > { %3945 = vmatpush.bf16.msrb.mxu1 %v12566_v54  ;;  %3958 = vmatpush.bf16.msrb.mxu2 %v12506_v55  ;;  %v12765_v54 = vor.u32 %v17059_v3, %v12762_v42  ;;  %v3733_v55 = vpack.c.bf16 %v3731_v43, %v3731_v43  ;;  %v12753_v31 = vor.u32 %v17058_v56, %v12752_v53  ;;  %v12656_v3 = vld [vmem:[%s18557_s2 + $0xa20] sm:$0xf]  ;;  %v17034_v42 = vld [vmem:[%s18557_s2 + $0xa24] sm:$0xf0] }
 0x30f   : > { %3971 = vmatpush.bf16.msrb.mxu3 %v12570_v58  ;;  %v3734_v58 = vpack.c.bf16 %v3732_v46, %v3732_v46  ;;  %v12733_v43 = vor.u32 %v17051_v36, %v12730_v37  ;;  %v17033_v46 = vld [vmem:[%s18557_s2 + $0xa24] sm:$0xf]  ;;  %v12851_v36 = vld [vmem:[%s18557_s2 + $0xb60] sm:$0xf]  ;;  %v17077_v37 = vld [vmem:[%s18557_s2 + $0xb64] sm:$0xf0] }
 0x311   : > { %3933 = vmatpush.bf16.msrb.mxu0 %v12494_v4  ;;  %v17056_v4 = vld [vmem:[%s18557_s2 + $0xad4] sm:$0xf0] }
 0x312   : > { %3946 = vmatpush.bf16.msrb.mxu1 %v12558_v6  ;;  %3959 = vmatpush.bf16.msrb.mxu2 %v12498_v13  ;;  %v12682_v6 = vld [vmem:[%s18557_s2 + $0xa58] sm:$0xf0]  ;;  %v17055_v13 = vld [vmem:[%s18557_s2 + $0xad4] sm:$0xf]  ;;  %v12745_v9 = vor.u32 %v17056_v4, %v12744_v1 }
 0x313   : > { %3972 = vmatpush.bf16.msrb.mxu3 %v12562_v11  ;;  %v12685_v11 = vor.u32 %v17039_v5, %v12682_v6  ;;  %v12749_v16 = vor.u32 %v17055_v13, %v12746_v7  ;;  %v17047_v1 = vld [vmem:[%s18557_s2 + $0xa94] sm:$0xf]  ;;  %v12640_v5 = vld [vmem:[%s18557_s2 + $0xa00] sm:$0xf]  ;;  %v17030_v6 = vld [vmem:[%s18557_s2 + $0xa04] sm:$0xf0]  ;;  %v12653_v13 = vor.u32 %v17031_v63, %v12650_v0 }
 0x314   : > { %v12704_v7 = vld [vmem:[%s18557_s2 + $0xa80] sm:$0xf]  ;;  %v17073_v63 = vld [vmem:[%s18557_s2 + $0xb44] sm:$0xf0] }
 0x315   : > { %3934 = vmatpush.bf16.msrb.mxu0 %v12486_v18  ;;  %v17037_v18 = vld [vmem:[%s18557_s2 + $0xa44] sm:$0xf]  ;;  %v12899_v0 = vld [vmem:[%s18557_s2 + $0xbc0] sm:$0xf] }
 0x316   : > { %3947 = vmatpush.bf16.msrb.mxu1 %v12550_v23  ;;  %3960 = vmatpush.bf16.msrb.mxu2 %v12490_v28  ;;  %v17053_v23 = vld [vmem:[%s18557_s2 + $0xac4] sm:$0xf]  ;;  %v12738_v28 = vld [vmem:[%s18557_s2 + $0xac8] sm:$0xf0]  ;;  %v12677_v25 = vor.u32 %v17037_v18, %v12674_v19  ;;  %v17079_v18 = vld [vmem:[%s18557_s2 + $0xb74] sm:$0xf0] }
 0x317   : > { %3973 = vmatpush.bf16.msrb.mxu3 %v12554_v24  ;;  %v12737_v24 = vor.u32 %v17054_v17, %v12736_v15  ;;  %v12741_v32 = vor.u32 %v17053_v23, %v12738_v28  ;;  %v12706_v15 = vld [vmem:[%s18557_s2 + $0xa88] sm:$0xf0]  ;;  %v12859_v17 = vld [vmem:[%s18557_s2 + $0xb70] sm:$0xf]  ;;  %v12641_v23 = vor.u32 %v17030_v6, %v12640_v5  ;;  %v17095_v28 = vld [vmem:[%s18557_s2 + $0xbf4] sm:$0xf0] }
 0x318   : > { %v12923_v19 = vld [vmem:[%s18557_s2 + $0xbf0] sm:$0xf]  ;;  %v12837_v5 = vld [vmem:[%s18557_s2 + $0xb48] sm:$0xf0] }
 0x319   : > { %3935 = vmatpush.bf16.msrb.mxu0 %v12478_v40  ;;  %v2905_v20 = vpop.f32.mrf.mxu0 }
 0x31a   : > { %3948 = vmatpush.bf16.msrb.mxu1 %v12542_v39  ;;  %3961 = vmatpush.bf16.msrb.mxu2 %v12482_v41  ;;  %v2918_v52 = vpop.f32.mrf.mxu1  ;;  %v12729_v39 = vor.u32 %v17052_v33, %v12728_v29  ;;  %v12669_v41 = vor.u32 %v17035_v34, %v12666_v35  ;;  %v12709_v29 = vor.u32 %v17045_v14, %v12706_v15  ;;  %v3990_v33 = vld [vmem:[%s3988_s12 + $0x8] sm:$0xff]  ;;  %v12827_v14 = vld [vmem:[%s18557_s2 + $0xb30] sm:$0xf]  ;;  %s5020_s12 = scalar_lea.vmem [#allocation2], %s17168_s18  ;;  %s17308_s18 = sshll.u32 %s20247_s14, 4 }
 0x31b   : > { %3974 = vmatpush.bf16.msrb.mxu3 %v12546_v44  ;;  %v2919_v22 = vadd.f32 %v2918_v52, %v2905_v20  ;;  %v17078_v52 = vld [vmem:[%s18557_s2 + $0xb74] sm:$0xf]  ;;  %v12924_v34 = vor.u32 %v17095_v28, %v12923_v19  ;;  %v17071_v15 = vld [vmem:[%s18557_s2 + $0xb34] sm:$0xf0]  ;;  %s20551_s14 = sshra.s32 %s17447_s27, 3  ;;  %s17587_s27 = sadd.s32 208, %s18951_s29 }
 0x31c   : > { %3936 = vmatmul.bf16.vlgmr.msrb.gmra.mxu0 %v3733_v55  ;;  %v17070_v19 = vld [vmem:[%s18557_s2 + $0xb34] sm:$0xf] }
 0x31d   : > { %4186 = vmatpush.bf16.msra.mxu0 %v12697_v45  ;;  %3949 = vmatmul.bf16.vlgmr.msrb.gmra.mxu1 %v3734_v58  ;;  %v19635_v40 = vadd.f32 %v2919_v22, %v19559_v47  ;;  %v12720_v47 = vld [vmem:[%s18557_s2 + $0xaa0] sm:$0xf]  ;;  %v17050_v45 = vld [vmem:[%s18557_s2 + $0xaa4] sm:$0xf0]  ;;  %v17086_v28 = vld [vmem:[%s18557_s2 + $0xbb4] sm:$0xf] }
 0x31e   : > { %4199 = vmatpush.bf16.msra.mxu1 %v12761_v48  ;;  %4212 = vmatpush.bf16.msra.mxu2 %v12701_v49  ;;  %v12658_v48 = vld [vmem:[%s18557_s2 + $0xa28] sm:$0xf0]  ;;  %v12721_v57 = vor.u32 %v17050_v45, %v12720_v47 }
 0x31f   : > { %4225 = vmatpush.bf16.msra.mxu3 %v12765_v54  ;;  %3962 = vmatmul.bf16.vlgmr.msrb.gmra.mxu2 %v3733_v55  ;;  %v12657_v55 = vor.u32 %v17034_v42, %v12656_v3  ;;  %v12661_v62 = vor.u32 %v17033_v46, %v12658_v48  ;;  %v17093_v3 = vld [vmem:[%s18557_s2 + $0xbe4] sm:$0xf0]  ;;  %v17076_v42 = vld [vmem:[%s18557_s2 + $0xb64] sm:$0xf]  ;;  %v12853_v47 = vld [vmem:[%s18557_s2 + $0xb68] sm:$0xf0]  ;;  %v12852_v46 = vor.u32 %v17077_v37, %v12851_v36 }
 0x320   : > { %3975 = vmatmul.bf16.vlgmr.msrb.gmra.mxu3 %v3734_v58  ;;  %v12648_v58 = vld [vmem:[%s18557_s2 + $0xa10] sm:$0xf]  ;;  %v12917_v45 = vld [vmem:[%s18557_s2 + $0xbe8] sm:$0xf0]  ;;  %v17084_v36 = vld [vmem:[%s18557_s2 + $0xba4] sm:$0xf] }
 0x321   : > { %4187 = vmatpush.bf16.msra.mxu0 %v12689_v60  ;;  %v2907_v53 = vpop.f32.mrf.mxu0  ;;  %v12649_v4 = vor.u32 %v17032_v59, %v12648_v58  ;;  %v12909_v58 = vld [vmem:[%s18557_s2 + $0xbd8] sm:$0xf0]  ;;  %v12885_v37 = vld [vmem:[%s18557_s2 + $0xba8] sm:$0xf0] }
 0x322   : > { %4200 = vmatpush.bf16.msra.mxu1 %v12753_v31  ;;  %4213 = vmatpush.bf16.msra.mxu2 %v12693_v61  ;;  %v2931_v44 = vpop.f32.mrf.mxu2  ;;  %v2920_v56 = vpop.f32.mrf.mxu1  ;;  %v12725_v31 = vor.u32 %v17049_v50, %v12722_v51  ;;  %v17048_v61 = vld [vmem:[%s18557_s2 + $0xa94] sm:$0xf0]  ;;  %v12843_v50 = vld [vmem:[%s18557_s2 + $0xb50] sm:$0xf] }
 0x323   : > { %4226 = vmatpush.bf16.msra.mxu3 %v12757_v2  ;;  %v2944_v49 = vpop.f32.mrf.mxu3  ;;  %v12714_v2 = vld [vmem:[%s18557_s2 + $0xa98] sm:$0xf0]  ;;  %v17075_v51 = vld [vmem:[%s18557_s2 + $0xb54] sm:$0xf0]  ;;  %v12907_v53 = vld [vmem:[%s18557_s2 + $0xbd0] sm:$0xf] }
 0x324   : > { %v2945_v54 = vadd.f32 %v2944_v49, %v2931_v44  ;;  %v17092_v44 = vld [vmem:[%s18557_s2 + $0xbe4] sm:$0xf]  ;;  %v12856_v49 = vor.u32 %v17076_v42, %v12853_v47  ;;  %v17074_v56 = vld [vmem:[%s18557_s2 + $0xb54] sm:$0xf]  ;;  %v12844_v59 = vor.u32 %v17075_v51, %v12843_v50  ;;  %v12813_v51 = vld [vmem:[%s18557_s2 + $0xb18] sm:$0xf0] }
 0x325   : > { %4188 = vmatpush.bf16.msra.mxu0 %v12681_v8  ;;  %v17046_v8 = vld [vmem:[%s18557_s2 + $0xa84] sm:$0xf0]  ;;  %v17066_v50 = vld [vmem:[%s18557_s2 + $0xb14] sm:$0xf] }
 0x326   : > { %4201 = vmatpush.bf16.msra.mxu1 %v12745_v9  ;;  %4214 = vmatpush.bf16.msra.mxu2 %v12685_v11  ;;  %v19654_v60 = vadd.f32 %v2945_v54, %v19578_v10  ;;  %v12713_v10 = vor.u32 %v17048_v61, %v12712_v30  ;;  %v17029_v9 = vld [vmem:[%s18557_s2 + $0xa04] sm:$0xf]  ;;  %v12717_v11 = vor.u32 %v17047_v1, %v12714_v2  ;;  %v12835_v61 = vld [vmem:[%s18557_s2 + $0xb40] sm:$0xf]  ;;  %v17089_v2 = vld [vmem:[%s18557_s2 + $0xbc4] sm:$0xf0] }
 0x327   : > { %4227 = vmatpush.bf16.msra.mxu3 %v12749_v16  ;;  %v12705_v22 = vor.u32 %v17046_v8, %v12704_v7  ;;  %v12920_v54 = vor.u32 %v17092_v44, %v12917_v45  ;;  %v12836_v8 = vor.u32 %v17073_v63, %v12835_v61  ;;  %v17067_v44 = vld [vmem:[%s18557_s2 + $0xb14] sm:$0xf0]  ;;  %v12875_v45 = vld [vmem:[%s18557_s2 + $0xb90] sm:$0xf]  ;;  %v12805_v61 = vld [vmem:[%s18557_s2 + $0xb08] sm:$0xf0] }
 0x328   : > { %v17080_v63 = vld [vmem:[%s18557_s2 + $0xb84] sm:$0xf] }
 0x329   : > { %4189 = vmatpush.bf16.msra.mxu0 %v12673_v21  ;;  %v12861_v21 = vld [vmem:[%s18557_s2 + $0xb78] sm:$0xf0] }
 0x32a   : > { %4202 = vmatpush.bf16.msra.mxu1 %v12737_v24  ;;  %4215 = vmatpush.bf16.msra.mxu2 %v12677_v25  ;;  %v2933_v16 = vpop.f32.mrf.mxu2  ;;  %v12645_v24 = vor.u32 %v17029_v9, %v12642_v12  ;;  %v17094_v25 = vld [vmem:[%s18557_s2 + $0xbf4] sm:$0xf]  ;;  %v12864_v35 = vor.u32 %v17078_v52, %v12861_v21  ;;  %v12893_v52 = vld [vmem:[%s18557_s2 + $0xbb8] sm:$0xf0]  ;;  %v12828_v21 = vor.u32 %v17071_v15, %v12827_v14 }
 0x32b   : > { %4228 = vmatpush.bf16.msra.mxu3 %v12741_v32  ;;  %v2946_v20 = vpop.f32.mrf.mxu3  ;;  %v12860_v32 = vor.u32 %v17079_v18, %v12859_v17  ;;  %v12891_v16 = vld [vmem:[%s18557_s2 + $0xbb0] sm:$0xf]  ;;  %v17087_v18 = vld [vmem:[%s18557_s2 + $0xbb4] sm:$0xf0]  ;;  %v13088_v14 = vld [vmem:[%s18557_s2 + $0xcf8] sm:$0xf0] }
 0x32c   : > { %v12829_v20 = vld [vmem:[%s18557_s2 + $0xb38] sm:$0xf0]  ;;  %v4247_v15 = vld [vmem:[%s4246_s15] sm:$0xff] }
 0x32d   : > { %4190 = vmatpush.bf16.msra.mxu0 %v12665_v38  ;;  %v12915_v38 = vld [vmem:[%s18557_s2 + $0xbe0] sm:$0xf] }
 0x32e   : > { %4203 = vmatpush.bf16.msra.mxu1 %v12729_v39  ;;  %4216 = vmatpush.bf16.msra.mxu2 %v12669_v41  ;;  %v12928_v39 = vor.u32 %v17094_v25, %v12925_v26  ;;  %v3991_v41 = vpack.c.bf16 %v3989_v27, %v3989_v27  ;;  %v12916_v48 = vor.u32 %v17093_v3, %v12915_v38  ;;  %v12819_v25 = vld [vmem:[%s18557_s2 + $0xb20] sm:$0xf]  ;;  %v17069_v26 = vld [vmem:[%s18557_s2 + $0xb24] sm:$0xf0] }
 0x32f   : > { %4229 = vmatpush.bf16.msra.mxu3 %v12733_v43  ;;  %v3992_v43 = vpack.c.bf16 %v3990_v33, %v3990_v33  ;;  %v12896_v27 = vor.u32 %v17086_v28, %v12893_v52  ;;  %v17068_v33 = vld [vmem:[%s18557_s2 + $0xb24] sm:$0xf]  ;;  %v13014_v28 = vld [vmem:[%s18557_s2 + $0xc60] sm:$0xf]  ;;  %v17112_v52 = vld [vmem:[%s18557_s2 + $0xc64] sm:$0xf0] }
 0x331   : > { %4191 = vmatpush.bf16.msra.mxu0 %v12657_v55  ;;  %v17091_v55 = vld [vmem:[%s18557_s2 + $0xbd4] sm:$0xf0] }
 0x332   : > { %4204 = vmatpush.bf16.msra.mxu1 %v12721_v57  ;;  %4217 = vmatpush.bf16.msra.mxu2 %v12661_v62  ;;  %v12845_v57 = vld [vmem:[%s18557_s2 + $0xb58] sm:$0xf0]  ;;  %v17090_v62 = vld [vmem:[%s18557_s2 + $0xbd4] sm:$0xf]  ;;  %v12908_v30 = vor.u32 %v17091_v55, %v12907_v53 }
 0x333   : > { %4230 = vmatpush.bf16.msra.mxu3 %v12725_v31  ;;  %v12848_v31 = vor.u32 %v17074_v56, %v12845_v57  ;;  %v12912_v1 = vor.u32 %v17090_v62, %v12909_v58  ;;  %v17082_v53 = vld [vmem:[%s18557_s2 + $0xb94] sm:$0xf]  ;;  %v12803_v56 = vld [vmem:[%s18557_s2 + $0xb00] sm:$0xf]  ;;  %v17065_v57 = vld [vmem:[%s18557_s2 + $0xb04] sm:$0xf0]  ;;  %v12816_v62 = vor.u32 %v17066_v50, %v12813_v51 }
 0x334   : > { %v12867_v58 = vld [vmem:[%s18557_s2 + $0xb80] sm:$0xf]  ;;  %v17108_v50 = vld [vmem:[%s18557_s2 + $0xc44] sm:$0xf0] }
 0x335   : > { %4192 = vmatpush.bf16.msra.mxu0 %v12649_v4  ;;  %v17072_v4 = vld [vmem:[%s18557_s2 + $0xb44] sm:$0xf]  ;;  %v13062_v51 = vld [vmem:[%s18557_s2 + $0xcc0] sm:$0xf] }
 0x336   : > { %4205 = vmatpush.bf16.msra.mxu1 %v12713_v10  ;;  %4218 = vmatpush.bf16.msra.mxu2 %v12653_v13  ;;  %v17088_v10 = vld [vmem:[%s18557_s2 + $0xbc4] sm:$0xf]  ;;  %v12901_v13 = vld [vmem:[%s18557_s2 + $0xbc8] sm:$0xf0]  ;;  %v12840_v12 = vor.u32 %v17072_v4, %v12837_v5  ;;  %v17114_v4 = vld [vmem:[%s18557_s2 + $0xc74] sm:$0xf0] }
 0x337   : > { %4231 = vmatpush.bf16.msra.mxu3 %v12717_v11  ;;  %v12900_v11 = vor.u32 %v17089_v2, %v12899_v0  ;;  %v12904_v17 = vor.u32 %v17088_v10, %v12901_v13  ;;  %v12869_v0 = vld [vmem:[%s18557_s2 + $0xb88] sm:$0xf0]  ;;  %v13022_v2 = vld [vmem:[%s18557_s2 + $0xc70] sm:$0xf]  ;;  %v12804_v10 = vor.u32 %v17065_v57, %v12803_v56  ;;  %v17130_v13 = vld [vmem:[%s18557_s2 + $0xcf4] sm:$0xf0] }
 0x338   : > { %v13086_v5 = vld [vmem:[%s18557_s2 + $0xcf0] sm:$0xf]  ;;  %v13000_v56 = vld [vmem:[%s18557_s2 + $0xc48] sm:$0xf0] }
 0x339   : > { %4193 = vmatpush.bf16.msra.mxu0 %v12641_v23  ;;  %v3163_v6 = vpop.f32.mrf.mxu0 }
 0x33a   : > { %4206 = vmatpush.bf16.msra.mxu1 %v12705_v22  ;;  %4219 = vmatpush.bf16.msra.mxu2 %v12645_v24  ;;  %v3176_v7 = vpop.f32.mrf.mxu1  ;;  %v12892_v22 = vor.u32 %v17087_v18, %v12891_v16  ;;  %v12832_v24 = vor.u32 %v17070_v19, %v12829_v20  ;;  %v12872_v16 = vor.u32 %v17080_v63, %v12869_v0  ;;  %v4248_v18 = vld [vmem:[%s4246_s15 + $0x8] sm:$0xff]  ;;  %v12990_v63 = vld [vmem:[%s18557_s2 + $0xc30] sm:$0xf]  ;;  %s5278_s15 = scalar_lea.vmem [#allocation2], %s17203_s25  ;;  %s17343_s25 = sshll.u32 %s20323_s24, 4 }
 0x33b   : > { %4232 = vmatpush.bf16.msra.mxu3 %v12709_v29  ;;  %v3177_v9 = vadd.f32 %v3176_v7, %v3163_v6  ;;  %v17113_v7 = vld [vmem:[%s18557_s2 + $0xc74] sm:$0xf]  ;;  %v13087_v19 = vor.u32 %v17130_v13, %v13086_v5  ;;  %v17106_v0 = vld [vmem:[%s18557_s2 + $0xc34] sm:$0xf0]  ;;  %s20627_s24 = sshra.s32 %s17482_s20, 3  ;;  %s17622_s20 = sadd.s32 216, %s18951_s29 }
 0x33c   : > { %4194 = vmatmul.bf16.vlgmr.msra.gmra.mxu0 %v3991_v41  ;;  %v17105_v5 = vld [vmem:[%s18557_s2 + $0xc34] sm:$0xf] }
 0x33d   : > { %4444 = vmatpush.bf16.msrb.mxu0 %v12860_v32  ;;  %4207 = vmatmul.bf16.vlgmr.msra.gmra.mxu1 %v3992_v43  ;;  %v19711_v23 = vadd.f32 %v3177_v9, %v19635_v40  ;;  %v12883_v40 = vld [vmem:[%s18557_s2 + $0xba0] sm:$0xf]  ;;  %v17085_v32 = vld [vmem:[%s18557_s2 + $0xba4] sm:$0xf0]  ;;  %v17121_v13 = vld [vmem:[%s18557_s2 + $0xcb4] sm:$0xf] }
 0x33e   : > { %4457 = vmatpush.bf16.msrb.mxu1 %v12924_v34  ;;  %4470 = vmatpush.bf16.msrb.mxu2 %v12864_v35  ;;  %v12821_v34 = vld [vmem:[%s18557_s2 + $0xb28] sm:$0xf0]  ;;  %v12884_v42 = vor.u32 %v17085_v32, %v12883_v40 }
 0x33f   : > { %4483 = vmatpush.bf16.msrb.mxu3 %v12928_v39  ;;  %4220 = vmatmul.bf16.vlgmr.msra.gmra.mxu2 %v3991_v41  ;;  %v12820_v41 = vor.u32 %v17069_v26, %v12819_v25  ;;  %v12824_v47 = vor.u32 %v17068_v33, %v12821_v34  ;;  %v17128_v25 = vld [vmem:[%s18557_s2 + $0xce4] sm:$0xf0]  ;;  %v17111_v26 = vld [vmem:[%s18557_s2 + $0xc64] sm:$0xf]  ;;  %v13016_v40 = vld [vmem:[%s18557_s2 + $0xc68] sm:$0xf0]  ;;  %v13015_v33 = vor.u32 %v17112_v52, %v13014_v28 }
 0x340   : > { %4233 = vmatmul.bf16.vlgmr.msra.gmra.mxu3 %v3992_v43  ;;  %v12811_v43 = vld [vmem:[%s18557_s2 + $0xb10] sm:$0xf]  ;;  %v13080_v32 = vld [vmem:[%s18557_s2 + $0xce8] sm:$0xf0]  ;;  %v17119_v28 = vld [vmem:[%s18557_s2 + $0xca4] sm:$0xf] }
 0x341   : > { %4445 = vmatpush.bf16.msrb.mxu0 %v12852_v46  ;;  %v3165_v38 = vpop.f32.mrf.mxu0  ;;  %v12812_v55 = vor.u32 %v17067_v44, %v12811_v43  ;;  %v13072_v43 = vld [vmem:[%s18557_s2 + $0xcd8] sm:$0xf0]  ;;  %v13048_v52 = vld [vmem:[%s18557_s2 + $0xca8] sm:$0xf0] }
 0x342   : > { %4458 = vmatpush.bf16.msrb.mxu1 %v12916_v48  ;;  %4471 = vmatpush.bf16.msrb.mxu2 %v12856_v49  ;;  %v3189_v29 = vpop.f32.mrf.mxu2  ;;  %v3178_v3 = vpop.f32.mrf.mxu1  ;;  %v12888_v48 = vor.u32 %v17084_v36, %v12885_v37  ;;  %v17083_v49 = vld [vmem:[%s18557_s2 + $0xb94] sm:$0xf0]  ;;  %v13006_v36 = vld [vmem:[%s18557_s2 + $0xc50] sm:$0xf] }
 0x343   : > { %4484 = vmatpush.bf16.msrb.mxu3 %v12920_v54  ;;  %v3202_v35 = vpop.f32.mrf.mxu3  ;;  %v12877_v54 = vld [vmem:[%s18557_s2 + $0xb98] sm:$0xf0]  ;;  %v17110_v37 = vld [vmem:[%s18557_s2 + $0xc54] sm:$0xf0]  ;;  %v13070_v38 = vld [vmem:[%s18557_s2 + $0xcd0] sm:$0xf] }
 0x344   : > { %v3203_v39 = vadd.f32 %v3202_v35, %v3189_v29  ;;  %v17127_v29 = vld [vmem:[%s18557_s2 + $0xce4] sm:$0xf]  ;;  %v13019_v35 = vor.u32 %v17111_v26, %v13016_v40  ;;  %v17109_v3 = vld [vmem:[%s18557_s2 + $0xc54] sm:$0xf]  ;;  %v13007_v44 = vor.u32 %v17110_v37, %v13006_v36  ;;  %v12976_v37 = vld [vmem:[%s18557_s2 + $0xc18] sm:$0xf0] }
 0x345   : > { %4446 = vmatpush.bf16.msrb.mxu0 %v12844_v59  ;;  %v17081_v59 = vld [vmem:[%s18557_s2 + $0xb84] sm:$0xf0]  ;;  %v17101_v36 = vld [vmem:[%s18557_s2 + $0xc14] sm:$0xf] }
 0x346   : > { %4459 = vmatpush.bf16.msrb.mxu1 %v12908_v30  ;;  %4472 = vmatpush.bf16.msrb.mxu2 %v12848_v31  ;;  %v19730_v46 = vadd.f32 %v3203_v39, %v19654_v60  ;;  %v12876_v60 = vor.u32 %v17083_v49, %v12875_v45  ;;  %v17064_v30 = vld [vmem:[%s18557_s2 + $0xb04] sm:$0xf]  ;;  %v12880_v31 = vor.u32 %v17082_v53, %v12877_v54  ;;  %v12998_v49 = vld [vmem:[%s18557_s2 + $0xc40] sm:$0xf]  ;;  %v17124_v54 = vld [vmem:[%s18557_s2 + $0xcc4] sm:$0xf0] }
 0x347   : > { %4485 = vmatpush.bf16.msrb.mxu3 %v12912_v1  ;;  %v12868_v9 = vor.u32 %v17081_v59, %v12867_v58  ;;  %v13083_v39 = vor.u32 %v17127_v29, %v13080_v32  ;;  %v12999_v59 = vor.u32 %v17108_v50, %v12998_v49  ;;  %v17102_v29 = vld [vmem:[%s18557_s2 + $0xc14] sm:$0xf0]  ;;  %v13038_v32 = vld [vmem:[%s18557_s2 + $0xc90] sm:$0xf]  ;;  %v12968_v49 = vld [vmem:[%s18557_s2 + $0xc08] sm:$0xf0] }
 0x348   : > { %v17115_v50 = vld [vmem:[%s18557_s2 + $0xc84] sm:$0xf] }
 0x349   : > { %4447 = vmatpush.bf16.msrb.mxu0 %v12836_v8  ;;  %v13024_v8 = vld [vmem:[%s18557_s2 + $0xc78] sm:$0xf0] }
 0x34a   : > { %4460 = vmatpush.bf16.msrb.mxu1 %v12900_v11  ;;  %4473 = vmatpush.bf16.msrb.mxu2 %v12840_v12  ;;  %v3191_v1 = vpop.f32.mrf.mxu2  ;;  %v12808_v11 = vor.u32 %v17064_v30, %v12805_v61  ;;  %v17129_v12 = vld [vmem:[%s18557_s2 + $0xcf4] sm:$0xf]  ;;  %v13027_v20 = vor.u32 %v17113_v7, %v13024_v8  ;;  %v13056_v7 = vld [vmem:[%s18557_s2 + $0xcb8] sm:$0xf0]  ;;  %v12991_v8 = vor.u32 %v17106_v0, %v12990_v63 }
 0x34b   : > { %4486 = vmatpush.bf16.msrb.mxu3 %v12904_v17  ;;  %v3204_v6 = vpop.f32.mrf.mxu3  ;;  %v13023_v17 = vor.u32 %v17114_v4, %v13022_v2  ;;  %v13054_v1 = vld [vmem:[%s18557_s2 + $0xcb0] sm:$0xf]  ;;  %v17122_v4 = vld [vmem:[%s18557_s2 + $0xcb4] sm:$0xf0]  ;;  %v13251_v63 = vld [vmem:[%s18557_s2 + $0xdf8] sm:$0xf0] }
 0x34c   : > { %v12992_v6 = vld [vmem:[%s18557_s2 + $0xc38] sm:$0xf0]  ;;  %v4505_v0 = vld [vmem:[%s4504_s17] sm:$0xff] }
 0x34d   : > { %4448 = vmatpush.bf16.msrb.mxu0 %v12828_v21  ;;  %v13078_v21 = vld [vmem:[%s18557_s2 + $0xce0] sm:$0xf] }
 0x34e   : > { %4461 = vmatpush.bf16.msrb.mxu1 %v12892_v22  ;;  %4474 = vmatpush.bf16.msrb.mxu2 %v12832_v24  ;;  %v13091_v22 = vor.u32 %v17129_v12, %v13088_v14  ;;  %v4249_v24 = vpack.c.bf16 %v4247_v15, %v4247_v15  ;;  %v13079_v34 = vor.u32 %v17128_v25, %v13078_v21  ;;  %v12982_v12 = vld [vmem:[%s18557_s2 + $0xc20] sm:$0xf]  ;;  %v17104_v14 = vld [vmem:[%s18557_s2 + $0xc24] sm:$0xf0] }
 0x34f   : > { %4487 = vmatpush.bf16.msrb.mxu3 %v12896_v27  ;;  %v4250_v27 = vpack.c.bf16 %v4248_v18, %v4248_v18  ;;  %v13059_v15 = vor.u32 %v17121_v13, %v13056_v7  ;;  %v17103_v18 = vld [vmem:[%s18557_s2 + $0xc24] sm:$0xf]  ;;  %v13177_v13 = vld [vmem:[%s18557_s2 + $0xd60] sm:$0xf]  ;;  %v17147_v7 = vld [vmem:[%s18557_s2 + $0xd64] sm:$0xf0] }
 0x351   : > { %4449 = vmatpush.bf16.msrb.mxu0 %v12820_v41  ;;  %v17126_v41 = vld [vmem:[%s18557_s2 + $0xcd4] sm:$0xf0] }
 0x352   : > { %4462 = vmatpush.bf16.msrb.mxu1 %v12884_v42  ;;  %4475 = vmatpush.bf16.msrb.mxu2 %v12824_v47  ;;  %v13008_v42 = vld [vmem:[%s18557_s2 + $0xc58] sm:$0xf0]  ;;  %v17125_v47 = vld [vmem:[%s18557_s2 + $0xcd4] sm:$0xf]  ;;  %v13071_v45 = vor.u32 %v17126_v41, %v13070_v38 }
 0x353   : > { %4488 = vmatpush.bf16.msrb.mxu3 %v12888_v48  ;;  %v13011_v48 = vor.u32 %v17109_v3, %v13008_v42  ;;  %v13075_v53 = vor.u32 %v17125_v47, %v13072_v43  ;;  %v17117_v38 = vld [vmem:[%s18557_s2 + $0xc94] sm:$0xf]  ;;  %v12966_v3 = vld [vmem:[%s18557_s2 + $0xc00] sm:$0xf]  ;;  %v17100_v42 = vld [vmem:[%s18557_s2 + $0xc04] sm:$0xf0]  ;;  %v12979_v47 = vor.u32 %v17101_v36, %v12976_v37 }
 0x354   : > { %v13030_v43 = vld [vmem:[%s18557_s2 + $0xc80] sm:$0xf]  ;;  %v17143_v36 = vld [vmem:[%s18557_s2 + $0xd44] sm:$0xf0] }
 0x355   : > { %4450 = vmatpush.bf16.msrb.mxu0 %v12812_v55  ;;  %v17107_v55 = vld [vmem:[%s18557_s2 + $0xc44] sm:$0xf]  ;;  %v13225_v37 = vld [vmem:[%s18557_s2 + $0xdc0] sm:$0xf] }
 0x356   : > { %4463 = vmatpush.bf16.msrb.mxu1 %v12876_v60  ;;  %4476 = vmatpush.bf16.msrb.mxu2 %v12816_v62  ;;  %v17123_v60 = vld [vmem:[%s18557_s2 + $0xcc4] sm:$0xf]  ;;  %v13064_v62 = vld [vmem:[%s18557_s2 + $0xcc8] sm:$0xf0]  ;;  %v13003_v61 = vor.u32 %v17107_v55, %v13000_v56  ;;  %v17149_v55 = vld [vmem:[%s18557_s2 + $0xd74] sm:$0xf0] }
 0x357   : > { %4489 = vmatpush.bf16.msrb.mxu3 %v12880_v31  ;;  %v13063_v31 = vor.u32 %v17124_v54, %v13062_v51  ;;  %v13067_v2 = vor.u32 %v17123_v60, %v13064_v62  ;;  %v13032_v51 = vld [vmem:[%s18557_s2 + $0xc88] sm:$0xf0]  ;;  %v13185_v54 = vld [vmem:[%s18557_s2 + $0xd70] sm:$0xf]  ;;  %v12967_v60 = vor.u32 %v17100_v42, %v12966_v3  ;;  %v17165_v62 = vld [vmem:[%s18557_s2 + $0xdf4] sm:$0xf0] }
 0x358   : > { %v13249_v56 = vld [vmem:[%s18557_s2 + $0xdf0] sm:$0xf]  ;;  %v13163_v3 = vld [vmem:[%s18557_s2 + $0xd48] sm:$0xf0] }
 0x359   : > { %4451 = vmatpush.bf16.msrb.mxu0 %v12804_v10  ;;  %v3421_v57 = vpop.f32.mrf.mxu0 }
 0x35a   : > { %4464 = vmatpush.bf16.msrb.mxu1 %v12868_v9  ;;  %4477 = vmatpush.bf16.msrb.mxu2 %v12808_v11  ;;  %v3434_v58 = vpop.f32.mrf.mxu1  ;;  %v13055_v9 = vor.u32 %v17122_v4, %v13054_v1  ;;  %v12995_v11 = vor.u32 %v17105_v5, %v12992_v6  ;;  %v13035_v1 = vor.u32 %v17115_v50, %v13032_v51  ;;  %v4506_v4 = vld [vmem:[%s4504_s17 + $0x8] sm:$0xff]  ;;  %v13153_v50 = vld [vmem:[%s18557_s2 + $0xd30] sm:$0xf]  ;;  %s5536_s17 = scalar_lea.vmem [#allocation2], %s17238_s1  ;;  %s17378_s1 = sshll.u32 %s20399_s13, 4 }
 0x35b   : > { %4490 = vmatpush.bf16.msrb.mxu3 %v12872_v16  ;;  %v3435_v30 = vadd.f32 %v3434_v58, %v3421_v57  ;;  %v17148_v58 = vld [vmem:[%s18557_s2 + $0xd74] sm:$0xf]  ;;  %v13250_v5 = vor.u32 %v17165_v62, %v13249_v56  ;;  %v17141_v51 = vld [vmem:[%s18557_s2 + $0xd34] sm:$0xf0]  ;;  %s20703_s13 = sshra.s32 %s17517_s23, 3  ;;  %s17657_s23 = sadd.s32 224, %s18951_s29 }
 0x35c   : > { %4452 = vmatmul.bf16.vlgmr.msrb.gmra.mxu0 %v4249_v24  ;;  %v17140_v56 = vld [vmem:[%s18557_s2 + $0xd34] sm:$0xf] }
 0x35d   : > { %4702 = vmatpush.bf16.msra.mxu0 %v13023_v17  ;;  %4465 = vmatmul.bf16.vlgmr.msrb.gmra.mxu1 %v4250_v27  ;;  %v19787_v10 = vadd.f32 %v3435_v30, %v19711_v23  ;;  %v13046_v23 = vld [vmem:[%s18557_s2 + $0xca0] sm:$0xf]  ;;  %v17120_v17 = vld [vmem:[%s18557_s2 + $0xca4] sm:$0xf0]  ;;  %v17156_v62 = vld [vmem:[%s18557_s2 + $0xdb4] sm:$0xf] }
 0x35e   : > { %4715 = vmatpush.bf16.msra.mxu1 %v13087_v19  ;;  %4728 = vmatpush.bf16.msra.mxu2 %v13027_v20  ;;  %v12984_v19 = vld [vmem:[%s18557_s2 + $0xc28] sm:$0xf0]  ;;  %v13047_v26 = vor.u32 %v17120_v17, %v13046_v23 }
 0x35f   : > { %4741 = vmatpush.bf16.msra.mxu3 %v13091_v22  ;;  %4478 = vmatmul.bf16.vlgmr.msrb.gmra.mxu2 %v4249_v24  ;;  %v12983_v24 = vor.u32 %v17104_v14, %v12982_v12  ;;  %v12987_v40 = vor.u32 %v17103_v18, %v12984_v19  ;;  %v17163_v12 = vld [vmem:[%s18557_s2 + $0xde4] sm:$0xf0]  ;;  %v17146_v14 = vld [vmem:[%s18557_s2 + $0xd64] sm:$0xf]  ;;  %v13179_v23 = vld [vmem:[%s18557_s2 + $0xd68] sm:$0xf0]  ;;  %v13178_v18 = vor.u32 %v17147_v7, %v13177_v13 }
 0x360   : > { %4491 = vmatmul.bf16.vlgmr.msrb.gmra.mxu3 %v4250_v27  ;;  %v12974_v27 = vld [vmem:[%s18557_s2 + $0xc10] sm:$0xf]  ;;  %v13243_v17 = vld [vmem:[%s18557_s2 + $0xde8] sm:$0xf0]  ;;  %v17154_v13 = vld [vmem:[%s18557_s2 + $0xda4] sm:$0xf] }
 0x361   : > { %4703 = vmatpush.bf16.msra.mxu0 %v13015_v33  ;;  %v3423_v21 = vpop.f32.mrf.mxu0  ;;  %v12975_v41 = vor.u32 %v17102_v29, %v12974_v27  ;;  %v13235_v27 = vld [vmem:[%s18557_s2 + $0xdd8] sm:$0xf0]  ;;  %v13211_v7 = vld [vmem:[%s18557_s2 + $0xda8] sm:$0xf0] }
 0x362   : > { %4716 = vmatpush.bf16.msra.mxu1 %v13079_v34  ;;  %4729 = vmatpush.bf16.msra.mxu2 %v13019_v35  ;;  %v3447_v16 = vpop.f32.mrf.mxu2  ;;  %v3436_v25 = vpop.f32.mrf.mxu1  ;;  %v13051_v34 = vor.u32 %v17119_v28, %v13048_v52  ;;  %v17118_v35 = vld [vmem:[%s18557_s2 + $0xc94] sm:$0xf0]  ;;  %v13169_v28 = vld [vmem:[%s18557_s2 + $0xd50] sm:$0xf] }
 0x363   : > { %4742 = vmatpush.bf16.msra.mxu3 %v13083_v39  ;;  %v3460_v20 = vpop.f32.mrf.mxu3  ;;  %v13040_v39 = vld [vmem:[%s18557_s2 + $0xc98] sm:$0xf0]  ;;  %v17145_v52 = vld [vmem:[%s18557_s2 + $0xd54] sm:$0xf0]  ;;  %v13233_v21 = vld [vmem:[%s18557_s2 + $0xdd0] sm:$0xf] }
 0x364   : > { %v3461_v22 = vadd.f32 %v3460_v20, %v3447_v16  ;;  %v17162_v16 = vld [vmem:[%s18557_s2 + $0xde4] sm:$0xf]  ;;  %v13182_v20 = vor.u32 %v17146_v14, %v13179_v23  ;;  %v17144_v25 = vld [vmem:[%s18557_s2 + $0xd54] sm:$0xf]  ;;  %v13170_v29 = vor.u32 %v17145_v52, %v13169_v28  ;;  %v13139_v52 = vld [vmem:[%s18557_s2 + $0xd18] sm:$0xf0] }
 0x365   : > { %4704 = vmatpush.bf16.msra.mxu0 %v13007_v44  ;;  %v17116_v44 = vld [vmem:[%s18557_s2 + $0xc84] sm:$0xf0]  ;;  %v17136_v28 = vld [vmem:[%s18557_s2 + $0xd14] sm:$0xf] }
 0x366   : > { %4717 = vmatpush.bf16.msra.mxu1 %v13071_v45  ;;  %4730 = vmatpush.bf16.msra.mxu2 %v13011_v48  ;;  %v19806_v33 = vadd.f32 %v3461_v22, %v19730_v46  ;;  %v13039_v46 = vor.u32 %v17118_v35, %v13038_v32  ;;  %v17099_v45 = vld [vmem:[%s18557_s2 + $0xc04] sm:$0xf]  ;;  %v13043_v48 = vor.u32 %v17117_v38, %v13040_v39  ;;  %v13161_v35 = vld [vmem:[%s18557_s2 + $0xd40] sm:$0xf]  ;;  %v17159_v39 = vld [vmem:[%s18557_s2 + $0xdc4] sm:$0xf0] }
 0x367   : > { %4743 = vmatpush.bf16.msra.mxu3 %v13075_v53  ;;  %v13031_v30 = vor.u32 %v17116_v44, %v13030_v43  ;;  %v13246_v22 = vor.u32 %v17162_v16, %v13243_v17  ;;  %v13162_v44 = vor.u32 %v17143_v36, %v13161_v35  ;;  %v17137_v16 = vld [vmem:[%s18557_s2 + $0xd14] sm:$0xf0]  ;;  %v13201_v17 = vld [vmem:[%s18557_s2 + $0xd90] sm:$0xf]  ;;  %v13131_v35 = vld [vmem:[%s18557_s2 + $0xd08] sm:$0xf0] }
 0x368   : > { %v17150_v36 = vld [vmem:[%s18557_s2 + $0xd84] sm:$0xf] }
 0x369   : > { %4705 = vmatpush.bf16.msra.mxu0 %v12999_v59  ;;  %v13187_v59 = vld [vmem:[%s18557_s2 + $0xd78] sm:$0xf0] }
 0x36a   : > { %4718 = vmatpush.bf16.msra.mxu1 %v13063_v31  ;;  %4731 = vmatpush.bf16.msra.mxu2 %v13003_v61  ;;  %v3449_v53 = vpop.f32.mrf.mxu2  ;;  %v12971_v31 = vor.u32 %v17099_v45, %v12968_v49  ;;  %v17164_v61 = vld [vmem:[%s18557_s2 + $0xdf4] sm:$0xf]  ;;  %v13190_v6 = vor.u32 %v17148_v58, %v13187_v59  ;;  %v13219_v58 = vld [vmem:[%s18557_s2 + $0xdb8] sm:$0xf0]  ;;  %v13154_v59 = vor.u32 %v17141_v51, %v13153_v50 }
 0x36b   : > { %4744 = vmatpush.bf16.msra.mxu3 %v13067_v2  ;;  %v3462_v57 = vpop.f32.mrf.mxu3  ;;  %v13186_v2 = vor.u32 %v17149_v55, %v13185_v54  ;;  %v13217_v53 = vld [vmem:[%s18557_s2 + $0xdb0] sm:$0xf]  ;;  %v17157_v55 = vld [vmem:[%s18557_s2 + $0xdb4] sm:$0xf0]  ;;  %v13414_v50 = vld [vmem:[%s18557_s2 + $0xef8] sm:$0xf0] }
 0x36c   : > { %v13155_v57 = vld [vmem:[%s18557_s2 + $0xd38] sm:$0xf0]  ;;  %v4763_v51 = vld [vmem:[%s4762_s30] sm:$0xff] }
 0x36d   : > { %4706 = vmatpush.bf16.msra.mxu0 %v12991_v8  ;;  %v13241_v8 = vld [vmem:[%s18557_s2 + $0xde0] sm:$0xf] }
 0x36e   : > { %4719 = vmatpush.bf16.msra.mxu1 %v13055_v9  ;;  %4732 = vmatpush.bf16.msra.mxu2 %v12995_v11  ;;  %v13254_v9 = vor.u32 %v17164_v61, %v13251_v63  ;;  %v4507_v11 = vpack.c.bf16 %v4505_v0, %v4505_v0  ;;  %v13242_v19 = vor.u32 %v17163_v12, %v13241_v8  ;;  %v13145_v61 = vld [vmem:[%s18557_s2 + $0xd20] sm:$0xf]  ;;  %v17139_v63 = vld [vmem:[%s18557_s2 + $0xd24] sm:$0xf0] }
 0x36f   : > { %4745 = vmatpush.bf16.msra.mxu3 %v13059_v15  ;;  %v4508_v15 = vpack.c.bf16 %v4506_v4, %v4506_v4  ;;  %v13222_v0 = vor.u32 %v17156_v62, %v13219_v58  ;;  %v17138_v4 = vld [vmem:[%s18557_s2 + $0xd24] sm:$0xf]  ;;  %v13340_v62 = vld [vmem:[%s18557_s2 + $0xe60] sm:$0xf]  ;;  %v17182_v58 = vld [vmem:[%s18557_s2 + $0xe64] sm:$0xf0] }
 0x371   : > { %4707 = vmatpush.bf16.msra.mxu0 %v12983_v24  ;;  %v17161_v24 = vld [vmem:[%s18557_s2 + $0xdd4] sm:$0xf0] }
 0x372   : > { %4720 = vmatpush.bf16.msra.mxu1 %v13047_v26  ;;  %4733 = vmatpush.bf16.msra.mxu2 %v12987_v40  ;;  %v13171_v26 = vld [vmem:[%s18557_s2 + $0xd58] sm:$0xf0]  ;;  %v17160_v40 = vld [vmem:[%s18557_s2 + $0xdd4] sm:$0xf]  ;;  %v13234_v32 = vor.u32 %v17161_v24, %v13233_v21 }
 0x373   : > { %4746 = vmatpush.bf16.msra.mxu3 %v13051_v34  ;;  %v13174_v34 = vor.u32 %v17144_v25, %v13171_v26  ;;  %v13238_v38 = vor.u32 %v17160_v40, %v13235_v27  ;;  %v17152_v21 = vld [vmem:[%s18557_s2 + $0xd94] sm:$0xf]  ;;  %v13129_v25 = vld [vmem:[%s18557_s2 + $0xd00] sm:$0xf]  ;;  %v17135_v26 = vld [vmem:[%s18557_s2 + $0xd04] sm:$0xf0]  ;;  %v13142_v40 = vor.u32 %v17136_v28, %v13139_v52 }
 0x374   : > { %v13193_v27 = vld [vmem:[%s18557_s2 + $0xd80] sm:$0xf]  ;;  %v17178_v28 = vld [vmem:[%s18557_s2 + $0xe44] sm:$0xf0] }
 0x375   : > { %4708 = vmatpush.bf16.msra.mxu0 %v12975_v41  ;;  %v17142_v41 = vld [vmem:[%s18557_s2 + $0xd44] sm:$0xf]  ;;  %v13388_v52 = vld [vmem:[%s18557_s2 + $0xec0] sm:$0xf] }
 0x376   : > { %4721 = vmatpush.bf16.msra.mxu1 %v13039_v46  ;;  %4734 = vmatpush.bf16.msra.mxu2 %v12979_v47  ;;  %v17158_v46 = vld [vmem:[%s18557_s2 + $0xdc4] sm:$0xf]  ;;  %v13227_v47 = vld [vmem:[%s18557_s2 + $0xdc8] sm:$0xf0]  ;;  %v13166_v49 = vor.u32 %v17142_v41, %v13163_v3  ;;  %v17184_v41 = vld [vmem:[%s18557_s2 + $0xe74] sm:$0xf0] }
 0x377   : > { %4747 = vmatpush.bf16.msra.mxu3 %v13043_v48  ;;  %v13226_v48 = vor.u32 %v17159_v39, %v13225_v37  ;;  %v13230_v54 = vor.u32 %v17158_v46, %v13227_v47  ;;  %v13195_v37 = vld [vmem:[%s18557_s2 + $0xd88] sm:$0xf0]  ;;  %v13348_v39 = vld [vmem:[%s18557_s2 + $0xe70] sm:$0xf]  ;;  %v13130_v46 = vor.u32 %v17135_v26, %v13129_v25  ;;  %v17200_v47 = vld [vmem:[%s18557_s2 + $0xef4] sm:$0xf0] }
 0x378   : > { %v13412_v3 = vld [vmem:[%s18557_s2 + $0xef0] sm:$0xf]  ;;  %v13326_v25 = vld [vmem:[%s18557_s2 + $0xe48] sm:$0xf0] }
 0x379   : > { %4709 = vmatpush.bf16.msra.mxu0 %v12967_v60  ;;  %v3679_v42 = vpop.f32.mrf.mxu0 }
 0x37a   : > { %4722 = vmatpush.bf16.msra.mxu1 %v13031_v30  ;;  %4735 = vmatpush.bf16.msra.mxu2 %v12971_v31  ;;  %v3692_v43 = vpop.f32.mrf.mxu1  ;;  %v13218_v30 = vor.u32 %v17157_v55, %v13217_v53  ;;  %v13158_v31 = vor.u32 %v17140_v56, %v13155_v57  ;;  %v13198_v53 = vor.u32 %v17150_v36, %v13195_v37  ;;  %v4764_v55 = vld [vmem:[%s4762_s30 + $0x8] sm:$0xff]  ;;  %v13316_v36 = vld [vmem:[%s18557_s2 + $0xe30] sm:$0xf]  ;;  %s5794_s30 = scalar_lea.vmem [#allocation2], %s17273_s22  ;;  %s17413_s22 = sshll.u32 %s20475_s19, 4 }
 0x37b   : > { %4748 = vmatpush.bf16.msra.mxu3 %v13035_v1  ;;  %v3693_v45 = vadd.f32 %v3692_v43, %v3679_v42  ;;  %v17183_v43 = vld [vmem:[%s18557_s2 + $0xe74] sm:$0xf]  ;;  %v13413_v56 = vor.u32 %v17200_v47, %v13412_v3  ;;  %v17176_v37 = vld [vmem:[%s18557_s2 + $0xe34] sm:$0xf0]  ;;  %s20779_s19 = sshra.s32 %s17552_s26, 3  ;;  %s17692_s26 = sadd.s32 232, %s18951_s29 }
 0x37c   : > { %4710 = vmatmul.bf16.vlgmr.msra.gmra.mxu0 %v4507_v11  ;;  %v17175_v3 = vld [vmem:[%s18557_s2 + $0xe34] sm:$0xf] }
 0x37d   : > { %4960 = vmatpush.bf16.msrb.mxu0 %v13186_v2  ;;  %4723 = vmatmul.bf16.vlgmr.msra.gmra.mxu1 %v4508_v15  ;;  %v19863_v60 = vadd.f32 %v3693_v45, %v19787_v10  ;;  %v13209_v10 = vld [vmem:[%s18557_s2 + $0xda0] sm:$0xf]  ;;  %v17155_v2 = vld [vmem:[%s18557_s2 + $0xda4] sm:$0xf0]  ;;  %v17191_v47 = vld [vmem:[%s18557_s2 + $0xeb4] sm:$0xf] }
 0x37e   : > { %4973 = vmatpush.bf16.msrb.mxu1 %v13250_v5  ;;  %4986 = vmatpush.bf16.msrb.mxu2 %v13190_v6  ;;  %v13147_v5 = vld [vmem:[%s18557_s2 + $0xd28] sm:$0xf0]  ;;  %v13210_v14 = vor.u32 %v17155_v2, %v13209_v10 }
 0x37f   : > { %4999 = vmatpush.bf16.msrb.mxu3 %v13254_v9  ;;  %4736 = vmatmul.bf16.vlgmr.msra.gmra.mxu2 %v4507_v11  ;;  %v13146_v11 = vor.u32 %v17139_v63, %v13145_v61  ;;  %v13150_v23 = vor.u32 %v17138_v4, %v13147_v5  ;;  %v17198_v61 = vld [vmem:[%s18557_s2 + $0xee4] sm:$0xf0]  ;;  %v17181_v63 = vld [vmem:[%s18557_s2 + $0xe64] sm:$0xf]  ;;  %v13342_v10 = vld [vmem:[%s18557_s2 + $0xe68] sm:$0xf0]  ;;  %v13341_v4 = vor.u32 %v17182_v58, %v13340_v62 }
 0x380   : > { %4749 = vmatmul.bf16.vlgmr.msra.gmra.mxu3 %v4508_v15  ;;  %v13137_v15 = vld [vmem:[%s18557_s2 + $0xd10] sm:$0xf]  ;;  %v13406_v2 = vld [vmem:[%s18557_s2 + $0xee8] sm:$0xf0]  ;;  %v17189_v62 = vld [vmem:[%s18557_s2 + $0xea4] sm:$0xf] }
 0x381   : > { %4961 = vmatpush.bf16.msrb.mxu0 %v13178_v18  ;;  %v3681_v8 = vpop.f32.mrf.mxu0  ;;  %v13138_v24 = vor.u32 %v17137_v16, %v13137_v15  ;;  %v13398_v15 = vld [vmem:[%s18557_s2 + $0xed8] sm:$0xf0]  ;;  %v13374_v58 = vld [vmem:[%s18557_s2 + $0xea8] sm:$0xf0] }
 0x382   : > { %4974 = vmatpush.bf16.msrb.mxu1 %v13242_v19  ;;  %4987 = vmatpush.bf16.msrb.mxu2 %v13182_v20  ;;  %v3705_v1 = vpop.f32.mrf.mxu2  ;;  %v3694_v12 = vpop.f32.mrf.mxu1  ;;  %v13214_v19 = vor.u32 %v17154_v13, %v13211_v7  ;;  %v17153_v20 = vld [vmem:[%s18557_s2 + $0xd94] sm:$0xf0]  ;;  %v13332_v13 = vld [vmem:[%s18557_s2 + $0xe50] sm:$0xf] }
 0x383   : > { %5000 = vmatpush.bf16.msrb.mxu3 %v13246_v22  ;;  %v3718_v6 = vpop.f32.mrf.mxu3  ;;  %v13203_v22 = vld [vmem:[%s18557_s2 + $0xd98] sm:$0xf0]  ;;  %v17180_v7 = vld [vmem:[%s18557_s2 + $0xe54] sm:$0xf0]  ;;  %v13396_v8 = vld [vmem:[%s18557_s2 + $0xed0] sm:$0xf] }
 0x384   : > { %v3719_v9 = vadd.f32 %v3718_v6, %v3705_v1  ;;  %v17197_v1 = vld [vmem:[%s18557_s2 + $0xee4] sm:$0xf]  ;;  %v13345_v6 = vor.u32 %v17181_v63, %v13342_v10  ;;  %v17179_v12 = vld [vmem:[%s18557_s2 + $0xe54] sm:$0xf]  ;;  %v13333_v16 = vor.u32 %v17180_v7, %v13332_v13  ;;  %v13302_v7 = vld [vmem:[%s18557_s2 + $0xe18] sm:$0xf0] }
 0x385   : > { %4962 = vmatpush.bf16.msrb.mxu0 %v13170_v29  ;;  %v17151_v29 = vld [vmem:[%s18557_s2 + $0xd84] sm:$0xf0]  ;;  %v17171_v13 = vld [vmem:[%s18557_s2 + $0xe14] sm:$0xf] }
 0x386   : > { %4975 = vmatpush.bf16.msrb.mxu1 %v13234_v32  ;;  %4988 = vmatpush.bf16.msrb.mxu2 %v13174_v34  ;;  %v19882_v18 = vadd.f32 %v3719_v9, %v19806_v33  ;;  %v13202_v33 = vor.u32 %v17153_v20, %v13201_v17  ;;  %v17134_v32 = vld [vmem:[%s18557_s2 + $0xd04] sm:$0xf]  ;;  %v13206_v34 = vor.u32 %v17152_v21, %v13203_v22  ;;  %v13324_v20 = vld [vmem:[%s18557_s2 + $0xe40] sm:$0xf]  ;;  %v17194_v22 = vld [vmem:[%s18557_s2 + $0xec4] sm:$0xf0] }
 0x387   : > { %5001 = vmatpush.bf16.msrb.mxu3 %v13238_v38  ;;  %v13194_v45 = vor.u32 %v17151_v29, %v13193_v27  ;;  %v13409_v9 = vor.u32 %v17197_v1, %v13406_v2  ;;  %v13325_v29 = vor.u32 %v17178_v28, %v13324_v20  ;;  %v17172_v1 = vld [vmem:[%s18557_s2 + $0xe14] sm:$0xf0]  ;;  %v13364_v2 = vld [vmem:[%s18557_s2 + $0xe90] sm:$0xf]  ;;  %v13294_v20 = vld [vmem:[%s18557_s2 + $0xe08] sm:$0xf0] }
 0x388   : > { %v17185_v28 = vld [vmem:[%s18557_s2 + $0xe84] sm:$0xf] }
 0x389   : > { %4963 = vmatpush.bf16.msrb.mxu0 %v13162_v44  ;;  %v13350_v44 = vld [vmem:[%s18557_s2 + $0xe78] sm:$0xf0] }
 0x38a   : > { %4976 = vmatpush.bf16.msrb.mxu1 %v13226_v48  ;;  %4989 = vmatpush.bf16.msrb.mxu2 %v13166_v49  ;;  %v3707_v38 = vpop.f32.mrf.mxu2  ;;  %v13134_v48 = vor.u32 %v17134_v32, %v13131_v35  ;;  %v17199_v49 = vld [vmem:[%s18557_s2 + $0xef4] sm:$0xf]  ;;  %v13353_v57 = vor.u32 %v17183_v43, %v13350_v44  ;;  %v13382_v43 = vld [vmem:[%s18557_s2 + $0xeb8] sm:$0xf0]  ;;  %v13317_v44 = vor.u32 %v17176_v37, %v13316_v36 }
 0x38b   : > { %5002 = vmatpush.bf16.msrb.mxu3 %v13230_v54  ;;  %v3720_v42 = vpop.f32.mrf.mxu3  ;;  %v13349_v54 = vor.u32 %v17184_v41, %v13348_v39  ;;  %v13380_v38 = vld [vmem:[%s18557_s2 + $0xeb0] sm:$0xf]  ;;  %v17192_v41 = vld [vmem:[%s18557_s2 + $0xeb4] sm:$0xf0]  ;;  %v13577_v36 = vld [vmem:[%s18557_s2 + $0xff8] sm:$0xf0] }
 0x38c   : > { %v13318_v42 = vld [vmem:[%s18557_s2 + $0xe38] sm:$0xf0]  ;;  %v5021_v37 = vld [vmem:[%s5020_s12] sm:$0xff] }
 0x38d   : > { %4964 = vmatpush.bf16.msrb.mxu0 %v13154_v59  ;;  %v13404_v59 = vld [vmem:[%s18557_s2 + $0xee0] sm:$0xf] }
 0x38e   : > { %4977 = vmatpush.bf16.msrb.mxu1 %v13218_v30  ;;  %4990 = vmatpush.bf16.msrb.mxu2 %v13158_v31  ;;  %v13417_v30 = vor.u32 %v17199_v49, %v13414_v50  ;;  %v4765_v31 = vpack.c.bf16 %v4763_v51, %v4763_v51  ;;  %v13405_v5 = vor.u32 %v17198_v61, %v13404_v59  ;;  %v13308_v49 = vld [vmem:[%s18557_s2 + $0xe20] sm:$0xf]  ;;  %v17174_v50 = vld [vmem:[%s18557_s2 + $0xe24] sm:$0xf0] }
 0x38f   : > { %5003 = vmatpush.bf16.msrb.mxu3 %v13222_v0  ;;  %v4766_v0 = vpack.c.bf16 %v4764_v55, %v4764_v55  ;;  %v13385_v51 = vor.u32 %v17191_v47, %v13382_v43  ;;  %v17173_v55 = vld [vmem:[%s18557_s2 + $0xe24] sm:$0xf]  ;;  %v13503_v47 = vld [vmem:[%s18557_s2 + $0xf60] sm:$0xf]  ;;  %v17217_v43 = vld [vmem:[%s18557_s2 + $0xf64] sm:$0xf0] }
 0x391   : > { %4965 = vmatpush.bf16.msrb.mxu0 %v13146_v11  ;;  %v17196_v11 = vld [vmem:[%s18557_s2 + $0xed4] sm:$0xf0] }
 0x392   : > { %4978 = vmatpush.bf16.msrb.mxu1 %v13210_v14  ;;  %4991 = vmatpush.bf16.msrb.mxu2 %v13150_v23  ;;  %v13334_v14 = vld [vmem:[%s18557_s2 + $0xe58] sm:$0xf0]  ;;  %v17195_v23 = vld [vmem:[%s18557_s2 + $0xed4] sm:$0xf]  ;;  %v13397_v17 = vor.u32 %v17196_v11, %v13396_v8 }
 0x393   : > { %5004 = vmatpush.bf16.msrb.mxu3 %v13214_v19  ;;  %v13337_v19 = vor.u32 %v17179_v12, %v13334_v14  ;;  %v13401_v21 = vor.u32 %v17195_v23, %v13398_v15  ;;  %v17187_v8 = vld [vmem:[%s18557_s2 + $0xe94] sm:$0xf]  ;;  %v13292_v12 = vld [vmem:[%s18557_s2 + $0xe00] sm:$0xf]  ;;  %v17170_v14 = vld [vmem:[%s18557_s2 + $0xe04] sm:$0xf0]  ;;  %v13305_v23 = vor.u32 %v17171_v13, %v13302_v7 }
 0x394   : > { %v13356_v15 = vld [vmem:[%s18557_s2 + $0xe80] sm:$0xf]  ;;  %v17213_v13 = vld [vmem:[%s18557_s2 + $0xf44] sm:$0xf0] }
 0x395   : > { %4966 = vmatpush.bf16.msrb.mxu0 %v13138_v24  ;;  %v17177_v24 = vld [vmem:[%s18557_s2 + $0xe44] sm:$0xf]  ;;  %v13551_v7 = vld [vmem:[%s18557_s2 + $0xfc0] sm:$0xf] }
 0x396   : > { %4979 = vmatpush.bf16.msrb.mxu1 %v13202_v33  ;;  %4992 = vmatpush.bf16.msrb.mxu2 %v13142_v40  ;;  %v17193_v33 = vld [vmem:[%s18557_s2 + $0xec4] sm:$0xf]  ;;  %v13390_v40 = vld [vmem:[%s18557_s2 + $0xec8] sm:$0xf0]  ;;  %v13329_v35 = vor.u32 %v17177_v24, %v13326_v25  ;;  %v17219_v24 = vld [vmem:[%s18557_s2 + $0xf74] sm:$0xf0] }
 0x397   : > { %5005 = vmatpush.bf16.msrb.mxu3 %v13206_v34  ;;  %v13389_v34 = vor.u32 %v17194_v22, %v13388_v52  ;;  %v13393_v39 = vor.u32 %v17193_v33, %v13390_v40  ;;  %v13358_v52 = vld [vmem:[%s18557_s2 + $0xe88] sm:$0xf0]  ;;  %v13511_v22 = vld [vmem:[%s18557_s2 + $0xf70] sm:$0xf]  ;;  %v13293_v33 = vor.u32 %v17170_v14, %v13292_v12  ;;  %v17235_v40 = vld [vmem:[%s18557_s2 + $0xff4] sm:$0xf0] }
 0x398   : > { %v13575_v25 = vld [vmem:[%s18557_s2 + $0xff0] sm:$0xf]  ;;  %v13489_v12 = vld [vmem:[%s18557_s2 + $0xf48] sm:$0xf0] }
 0x399   : > { %4967 = vmatpush.bf16.msrb.mxu0 %v13130_v46  ;;  %v3937_v26 = vpop.f32.mrf.mxu0 }
 0x39a   : > { %4980 = vmatpush.bf16.msrb.mxu1 %v13194_v45  ;;  %4993 = vmatpush.bf16.msrb.mxu2 %v13134_v48  ;;  %v3950_v27 = vpop.f32.mrf.mxu1  ;;  %v13381_v45 = vor.u32 %v17192_v41, %v13380_v38  ;;  %v13321_v48 = vor.u32 %v17175_v3, %v13318_v42  ;;  %v13361_v38 = vor.u32 %v17185_v28, %v13358_v52  ;;  %v5022_v41 = vld [vmem:[%s5020_s12 + $0x8] sm:$0xff]  ;;  %v13479_v28 = vld [vmem:[%s18557_s2 + $0xf30] sm:$0xf]  ;;  %s6052_s12 = scalar_lea.vmem [#allocation2], %s17308_s18  ;;  %s17448_s18 = sshll.u32 %s20551_s14, 4 }
 0x39b   : > { %5006 = vmatpush.bf16.msrb.mxu3 %v13198_v53  ;;  %v3951_v32 = vadd.f32 %v3950_v27, %v3937_v26  ;;  %v17218_v27 = vld [vmem:[%s18557_s2 + $0xf74] sm:$0xf]  ;;  %v13576_v3 = vor.u32 %v17235_v40, %v13575_v25  ;;  %v17211_v52 = vld [vmem:[%s18557_s2 + $0xf34] sm:$0xf0]  ;;  %s20855_s14 = sshra.s32 %s17587_s27, 3  ;;  %s17727_s27 = sadd.s32 240, %s18951_s29 }
 0x39c   : > { %4968 = vmatmul.bf16.vlgmr.msrb.gmra.mxu0 %v4765_v31  ;;  %v17210_v25 = vld [vmem:[%s18557_s2 + $0xf34] sm:$0xf] }
 0x39d   : > { %5218 = vmatpush.bf16.msra.mxu0 %v13349_v54  ;;  %4981 = vmatmul.bf16.vlgmr.msrb.gmra.mxu1 %v4766_v0  ;;  %v19939_v46 = vadd.f32 %v3951_v32, %v19863_v60  ;;  %v13372_v60 = vld [vmem:[%s18557_s2 + $0xea0] sm:$0xf]  ;;  %v17190_v54 = vld [vmem:[%s18557_s2 + $0xea4] sm:$0xf0]  ;;  %v17226_v40 = vld [vmem:[%s18557_s2 + $0xfb4] sm:$0xf] }
 0x39e   : > { %5231 = vmatpush.bf16.msra.mxu1 %v13413_v56  ;;  %5244 = vmatpush.bf16.msra.mxu2 %v13353_v57  ;;  %v13310_v56 = vld [vmem:[%s18557_s2 + $0xe28] sm:$0xf0]  ;;  %v13373_v63 = vor.u32 %v17190_v54, %v13372_v60 }
 0x39f   : > { %5257 = vmatpush.bf16.msra.mxu3 %v13417_v30  ;;  %4994 = vmatmul.bf16.vlgmr.msrb.gmra.mxu2 %v4765_v31  ;;  %v13309_v31 = vor.u32 %v17174_v50, %v13308_v49  ;;  %v13313_v10 = vor.u32 %v17173_v55, %v13310_v56  ;;  %v17233_v49 = vld [vmem:[%s18557_s2 + $0xfe4] sm:$0xf0]  ;;  %v17216_v50 = vld [vmem:[%s18557_s2 + $0xf64] sm:$0xf]  ;;  %v13505_v60 = vld [vmem:[%s18557_s2 + $0xf68] sm:$0xf0]  ;;  %v13504_v55 = vor.u32 %v17217_v43, %v13503_v47 }
 0x3a0   : > { %5007 = vmatmul.bf16.vlgmr.msrb.gmra.mxu3 %v4766_v0  ;;  %v13300_v0 = vld [vmem:[%s18557_s2 + $0xe10] sm:$0xf]  ;;  %v13569_v54 = vld [vmem:[%s18557_s2 + $0xfe8] sm:$0xf0]  ;;  %v17224_v47 = vld [vmem:[%s18557_s2 + $0xfa4] sm:$0xf] }
 0x3a1   : > { %5219 = vmatpush.bf16.msra.mxu0 %v13341_v4  ;;  %v3939_v59 = vpop.f32.mrf.mxu0  ;;  %v13301_v11 = vor.u32 %v17172_v1, %v13300_v0  ;;  %v13561_v0 = vld [vmem:[%s18557_s2 + $0xfd8] sm:$0xf0]  ;;  %v13537_v43 = vld [vmem:[%s18557_s2 + $0xfa8] sm:$0xf0] }
 0x3a2   : > { %5232 = vmatpush.bf16.msra.mxu1 %v13405_v5  ;;  %5245 = vmatpush.bf16.msra.mxu2 %v13345_v6  ;;  %v3963_v53 = vpop.f32.mrf.mxu2  ;;  %v3952_v61 = vpop.f32.mrf.mxu1  ;;  %v13377_v5 = vor.u32 %v17189_v62, %v13374_v58  ;;  %v17188_v6 = vld [vmem:[%s18557_s2 + $0xe94] sm:$0xf0]  ;;  %v13495_v62 = vld [vmem:[%s18557_s2 + $0xf50] sm:$0xf] }
 0x3a3   : > { %5258 = vmatpush.bf16.msra.mxu3 %v13409_v9  ;;  %v3976_v57 = vpop.f32.mrf.mxu3  ;;  %v13366_v9 = vld [vmem:[%s18557_s2 + $0xe98] sm:$0xf0]  ;;  %v17215_v58 = vld [vmem:[%s18557_s2 + $0xf54] sm:$0xf0]  ;;  %v13559_v59 = vld [vmem:[%s18557_s2 + $0xfd0] sm:$0xf] }
 0x3a4   : > { %v3977_v30 = vadd.f32 %v3976_v57, %v3963_v53  ;;  %v17232_v53 = vld [vmem:[%s18557_s2 + $0xfe4] sm:$0xf]  ;;  %v13508_v57 = vor.u32 %v17216_v50, %v13505_v60  ;;  %v17214_v61 = vld [vmem:[%s18557_s2 + $0xf54] sm:$0xf]  ;;  %v13496_v1 = vor.u32 %v17215_v58, %v13495_v62  ;;  %v13465_v58 = vld [vmem:[%s18557_s2 + $0xf18] sm:$0xf0] }
 0x3a5   : > { %5220 = vmatpush.bf16.msra.mxu0 %v13333_v16  ;;  %v17186_v16 = vld [vmem:[%s18557_s2 + $0xe84] sm:$0xf0]  ;;  %v17206_v62 = vld [vmem:[%s18557_s2 + $0xf14] sm:$0xf] }
 0x3a6   : > { %5233 = vmatpush.bf16.msra.mxu1 %v13397_v17  ;;  %5246 = vmatpush.bf16.msra.mxu2 %v13337_v19  ;;  %v19958_v4 = vadd.f32 %v3977_v30, %v19882_v18  ;;  %v13365_v18 = vor.u32 %v17188_v6, %v13364_v2  ;;  %v17169_v17 = vld [vmem:[%s18557_s2 + $0xe04] sm:$0xf]  ;;  %v13369_v19 = vor.u32 %v17187_v8, %v13366_v9  ;;  %v13487_v6 = vld [vmem:[%s18557_s2 + $0xf40] sm:$0xf]  ;;  %v17229_v9 = vld [vmem:[%s18557_s2 + $0xfc4] sm:$0xf0] }
 0x3a7   : > { %5259 = vmatpush.bf16.msra.mxu3 %v13401_v21  ;;  %v13357_v32 = vor.u32 %v17186_v16, %v13356_v15  ;;  %v13572_v30 = vor.u32 %v17232_v53, %v13569_v54  ;;  %v13488_v16 = vor.u32 %v17213_v13, %v13487_v6  ;;  %v17207_v53 = vld [vmem:[%s18557_s2 + $0xf14] sm:$0xf0]  ;;  %v13527_v54 = vld [vmem:[%s18557_s2 + $0xf90] sm:$0xf]  ;;  %v13457_v6 = vld [vmem:[%s18557_s2 + $0xf08] sm:$0xf0] }
 0x3a8   : > { %v17220_v13 = vld [vmem:[%s18557_s2 + $0xf84] sm:$0xf] }
 0x3a9   : > { %5221 = vmatpush.bf16.msra.mxu0 %v13325_v29  ;;  %v13513_v29 = vld [vmem:[%s18557_s2 + $0xf78] sm:$0xf0] }
 0x3aa   : > { %5234 = vmatpush.bf16.msra.mxu1 %v13389_v34  ;;  %5247 = vmatpush.bf16.msra.mxu2 %v13329_v35  ;;  %v3965_v21 = vpop.f32.mrf.mxu2  ;;  %v13297_v34 = vor.u32 %v17169_v17, %v13294_v20  ;;  %v17234_v35 = vld [vmem:[%s18557_s2 + $0xff4] sm:$0xf]  ;;  %v13516_v42 = vor.u32 %v17218_v27, %v13513_v29  ;;  %v13545_v27 = vld [vmem:[%s18557_s2 + $0xfb8] sm:$0xf0]  ;;  %v13480_v29 = vor.u32 %v17211_v52, %v13479_v28 }
 0x3ab   : > { %5260 = vmatpush.bf16.msra.mxu3 %v13393_v39  ;;  %v3978_v26 = vpop.f32.mrf.mxu3  ;;  %v13512_v39 = vor.u32 %v17219_v24, %v13511_v22  ;;  %v13543_v21 = vld [vmem:[%s18557_s2 + $0xfb0] sm:$0xf]  ;;  %v17227_v24 = vld [vmem:[%s18557_s2 + $0xfb4] sm:$0xf0]  ;;  %v13740_v28 = vld [vmem:[%s18557_s2 + $0x10f8] sm:$0xf0] }
 0x3ac   : > { %v13481_v26 = vld [vmem:[%s18557_s2 + $0xf38] sm:$0xf0]  ;;  %v5279_v52 = vld [vmem:[%s5278_s15] sm:$0xff] }
 0x3ad   : > { %5222 = vmatpush.bf16.msra.mxu0 %v13317_v44  ;;  %v13567_v44 = vld [vmem:[%s18557_s2 + $0xfe0] sm:$0xf] }
 0x3ae   : > { %5235 = vmatpush.bf16.msra.mxu1 %v13381_v45  ;;  %5248 = vmatpush.bf16.msra.mxu2 %v13321_v48  ;;  %v13580_v45 = vor.u32 %v17234_v35, %v13577_v36  ;;  %v5023_v48 = vpack.c.bf16 %v5021_v37, %v5021_v37  ;;  %v13568_v56 = vor.u32 %v17233_v49, %v13567_v44  ;;  %v13471_v35 = vld [vmem:[%s18557_s2 + $0xf20] sm:$0xf]  ;;  %v17209_v36 = vld [vmem:[%s18557_s2 + $0xf24] sm:$0xf0] }
 0x3af   : > { %5261 = vmatpush.bf16.msra.mxu3 %v13385_v51  ;;  %v5024_v51 = vpack.c.bf16 %v5022_v41, %v5022_v41  ;;  %v13548_v37 = vor.u32 %v17226_v40, %v13545_v27  ;;  %v17208_v41 = vld [vmem:[%s18557_s2 + $0xf24] sm:$0xf]  ;;  %v13666_v40 = vld [vmem:[%s18557_s2 + $0x1060] sm:$0xf]  ;;  %v17252_v27 = vld [vmem:[%s18557_s2 + $0x1064] sm:$0xf0] }
 0x3b1   : > { %5223 = vmatpush.bf16.msra.mxu0 %v13309_v31  ;;  %v17231_v31 = vld [vmem:[%s18557_s2 + $0xfd4] sm:$0xf0] }
 0x3b2   : > { %5236 = vmatpush.bf16.msra.mxu1 %v13373_v63  ;;  %5249 = vmatpush.bf16.msra.mxu2 %v13313_v10  ;;  %v13497_v63 = vld [vmem:[%s18557_s2 + $0xf58] sm:$0xf0]  ;;  %v17230_v10 = vld [vmem:[%s18557_s2 + $0xfd4] sm:$0xf]  ;;  %v13560_v2 = vor.u32 %v17231_v31, %v13559_v59 }
 0x3b3   : > { %5262 = vmatpush.bf16.msra.mxu3 %v13377_v5  ;;  %v13500_v5 = vor.u32 %v17214_v61, %v13497_v63  ;;  %v13564_v8 = vor.u32 %v17230_v10, %v13561_v0  ;;  %v17222_v59 = vld [vmem:[%s18557_s2 + $0xf94] sm:$0xf]  ;;  %v13455_v61 = vld [vmem:[%s18557_s2 + $0xf00] sm:$0xf]  ;;  %v17205_v63 = vld [vmem:[%s18557_s2 + $0xf04] sm:$0xf0]  ;;  %v13468_v10 = vor.u32 %v17206_v62, %v13465_v58 }
 0x3b4   : > { %v13519_v0 = vld [vmem:[%s18557_s2 + $0xf80] sm:$0xf]  ;;  %v17248_v62 = vld [vmem:[%s18557_s2 + $0x1044] sm:$0xf0] }
 0x3b5   : > { %5224 = vmatpush.bf16.msra.mxu0 %v13301_v11  ;;  %v17212_v11 = vld [vmem:[%s18557_s2 + $0xf44] sm:$0xf]  ;;  %v13714_v58 = vld [vmem:[%s18557_s2 + $0x10c0] sm:$0xf] }
 0x3b6   : > { %5237 = vmatpush.bf16.msra.mxu1 %v13365_v18  ;;  %5250 = vmatpush.bf16.msra.mxu2 %v13305_v23  ;;  %v17228_v18 = vld [vmem:[%s18557_s2 + $0xfc4] sm:$0xf]  ;;  %v13553_v23 = vld [vmem:[%s18557_s2 + $0xfc8] sm:$0xf0]  ;;  %v13492_v20 = vor.u32 %v17212_v11, %v13489_v12  ;;  %v17254_v11 = vld [vmem:[%s18557_s2 + $0x1074] sm:$0xf0] }
 0x3b7   : > { %5263 = vmatpush.bf16.msra.mxu3 %v13369_v19  ;;  %v13552_v19 = vor.u32 %v17229_v9, %v13551_v7  ;;  %v13556_v22 = vor.u32 %v17228_v18, %v13553_v23  ;;  %v13521_v7 = vld [vmem:[%s18557_s2 + $0xf88] sm:$0xf0]  ;;  %v13674_v9 = vld [vmem:[%s18557_s2 + $0x1070] sm:$0xf]  ;;  %v13456_v18 = vor.u32 %v17205_v63, %v13455_v61  ;;  %v17270_v23 = vld [vmem:[%s18557_s2 + $0x10f4] sm:$0xf0] }
 0x3b8   : > { %v13738_v12 = vld [vmem:[%s18557_s2 + $0x10f0] sm:$0xf]  ;;  %v13652_v61 = vld [vmem:[%s18557_s2 + $0x1048] sm:$0xf0] }
 0x3b9   : > { %5225 = vmatpush.bf16.msra.mxu0 %v13293_v33  ;;  %v4195_v14 = vpop.f32.mrf.mxu0 }
 0x3ba   : > { %5238 = vmatpush.bf16.msra.mxu1 %v13357_v32  ;;  %5251 = vmatpush.bf16.msra.mxu2 %v13297_v34  ;;  %v4208_v15 = vpop.f32.mrf.mxu1  ;;  %v13544_v32 = vor.u32 %v17227_v24, %v13543_v21  ;;  %v13484_v34 = vor.u32 %v17210_v25, %v13481_v26  ;;  %v13524_v21 = vor.u32 %v17220_v13, %v13521_v7  ;;  %v5280_v24 = vld [vmem:[%s5278_s15 + $0x8] sm:$0xff]  ;;  %v13642_v13 = vld [vmem:[%s18557_s2 + $0x1030] sm:$0xf]  ;;  %s6310_s15 = scalar_lea.vmem [#allocation2], %s17343_s25  ;;  %s17483_s25 = sshll.u32 %s20627_s24, 4 }
 0x3bb   : > { %5264 = vmatpush.bf16.msra.mxu3 %v13361_v38  ;;  %v4209_v17 = vadd.f32 %v4208_v15, %v4195_v14  ;;  %v17253_v15 = vld [vmem:[%s18557_s2 + $0x1074] sm:$0xf]  ;;  %v13739_v25 = vor.u32 %v17270_v23, %v13738_v12  ;;  %v17246_v7 = vld [vmem:[%s18557_s2 + $0x1034] sm:$0xf0]  ;;  %s20931_s24 = sshra.s32 %s17622_s20, 3  ;;  %s17762_s20 = sadd.s32 248, %s18951_s29 }
 0x3bc   : > { %5226 = vmatmul.bf16.vlgmr.msra.gmra.mxu0 %v5023_v48  ;;  %v17245_v12 = vld [vmem:[%s18557_s2 + $0x1034] sm:$0xf]  ;;  %s21235_s29 = sshra.s32 %s17762_s20, 3 }
 0x3bd   : > { %5476 = vmatpush.bf16.msrb.mxu0 %v13512_v39  ;;  %5239 = vmatmul.bf16.vlgmr.msra.gmra.mxu1 %v5024_v51  ;;  %v20015_v33 = vadd.f32 %v4209_v17, %v19939_v46  ;;  %v13535_v46 = vld [vmem:[%s18557_s2 + $0xfa0] sm:$0xf]  ;;  %v17225_v39 = vld [vmem:[%s18557_s2 + $0xfa4] sm:$0xf0]  ;;  %v17261_v23 = vld [vmem:[%s18557_s2 + $0x10b4] sm:$0xf] }
 0x3be   : > { %5489 = vmatpush.bf16.msrb.mxu1 %v13576_v3  ;;  %5502 = vmatpush.bf16.msrb.mxu2 %v13516_v42  ;;  %v13473_v3 = vld [vmem:[%s18557_s2 + $0xf28] sm:$0xf0]  ;;  %v13536_v50 = vor.u32 %v17225_v39, %v13535_v46 }
 0x3bf   : > { %5515 = vmatpush.bf16.msrb.mxu3 %v13580_v45  ;;  %5252 = vmatmul.bf16.vlgmr.msra.gmra.mxu2 %v5023_v48  ;;  %v13472_v48 = vor.u32 %v17209_v36, %v13471_v35  ;;  %v13476_v60 = vor.u32 %v17208_v41, %v13473_v3  ;;  %v17268_v35 = vld [vmem:[%s18557_s2 + $0x10e4] sm:$0xf0]  ;;  %v17251_v36 = vld [vmem:[%s18557_s2 + $0x1064] sm:$0xf]  ;;  %v13668_v46 = vld [vmem:[%s18557_s2 + $0x1068] sm:$0xf0]  ;;  %v13667_v41 = vor.u32 %v17252_v27, %v13666_v40 }
 0x3c0   : > { %5265 = vmatmul.bf16.vlgmr.msra.gmra.mxu3 %v5024_v51  ;;  %v13463_v51 = vld [vmem:[%s18557_s2 + $0xf10] sm:$0xf]  ;;  %v13732_v39 = vld [vmem:[%s18557_s2 + $0x10e8] sm:$0xf0]  ;;  %v17259_v40 = vld [vmem:[%s18557_s2 + $0x10a4] sm:$0xf] }
 0x3c1   : > { %5477 = vmatpush.bf16.msrb.mxu0 %v13504_v55  ;;  %v4197_v44 = vpop.f32.mrf.mxu0  ;;  %v13464_v31 = vor.u32 %v17207_v53, %v13463_v51  ;;  %v13724_v51 = vld [vmem:[%s18557_s2 + $0x10d8] sm:$0xf0]  ;;  %v13700_v27 = vld [vmem:[%s18557_s2 + $0x10a8] sm:$0xf0] }
 0x3c2   : > { %5490 = vmatpush.bf16.msrb.mxu1 %v13568_v56  ;;  %5503 = vmatpush.bf16.msrb.mxu2 %v13508_v57  ;;  %v4221_v38 = vpop.f32.mrf.mxu2  ;;  %v4210_v49 = vpop.f32.mrf.mxu1  ;;  %v13540_v56 = vor.u32 %v17224_v47, %v13537_v43  ;;  %v17223_v57 = vld [vmem:[%s18557_s2 + $0xf94] sm:$0xf0]  ;;  %v13658_v47 = vld [vmem:[%s18557_s2 + $0x1050] sm:$0xf] }
 0x3c3   : > { %5516 = vmatpush.bf16.msrb.mxu3 %v13572_v30  ;;  %v4234_v42 = vpop.f32.mrf.mxu3  ;;  %v13529_v30 = vld [vmem:[%s18557_s2 + $0xf98] sm:$0xf0]  ;;  %v17250_v43 = vld [vmem:[%s18557_s2 + $0x1054] sm:$0xf0]  ;;  %v13722_v44 = vld [vmem:[%s18557_s2 + $0x10d0] sm:$0xf] }
 0x3c4   : > { %v4235_v45 = vadd.f32 %v4234_v42, %v4221_v38  ;;  %v17267_v38 = vld [vmem:[%s18557_s2 + $0x10e4] sm:$0xf]  ;;  %v13671_v42 = vor.u32 %v17251_v36, %v13668_v46  ;;  %v17249_v49 = vld [vmem:[%s18557_s2 + $0x1054] sm:$0xf]  ;;  %v13659_v53 = vor.u32 %v17250_v43, %v13658_v47  ;;  %v13628_v43 = vld [vmem:[%s18557_s2 + $0x1018] sm:$0xf0] }
 0x3c5   : > { %5478 = vmatpush.bf16.msrb.mxu0 %v13496_v1  ;;  %v17221_v1 = vld [vmem:[%s18557_s2 + $0xf84] sm:$0xf0]  ;;  %v17241_v47 = vld [vmem:[%s18557_s2 + $0x1014] sm:$0xf] }
 0x3c6   : > { %5491 = vmatpush.bf16.msrb.mxu1 %v13560_v2  ;;  %5504 = vmatpush.bf16.msrb.mxu2 %v13500_v5  ;;  %v20034_v55 = vadd.f32 %v4235_v45, %v19958_v4  ;;  %v13528_v4 = vor.u32 %v17223_v57, %v13527_v54  ;;  %v17204_v2 = vld [vmem:[%s18557_s2 + $0xf04] sm:$0xf]  ;;  %v13532_v5 = vor.u32 %v17222_v59, %v13529_v30  ;;  %v13650_v57 = vld [vmem:[%s18557_s2 + $0x1040] sm:$0xf]  ;;  %v17264_v30 = vld [vmem:[%s18557_s2 + $0x10c4] sm:$0xf0] }
 0x3c7   : > { %5517 = vmatpush.bf16.msrb.mxu3 %v13564_v8  ;;  %v13520_v17 = vor.u32 %v17221_v1, %v13519_v0  ;;  %v13735_v45 = vor.u32 %v17267_v38, %v13732_v39  ;;  %v13651_v1 = vor.u32 %v17248_v62, %v13650_v57  ;;  %v17242_v38 = vld [vmem:[%s18557_s2 + $0x1014] sm:$0xf0]  ;;  %v13690_v39 = vld [vmem:[%s18557_s2 + $0x1090] sm:$0xf]  ;;  %v13620_v57 = vld [vmem:[%s18557_s2 + $0x1008] sm:$0xf0] }
 0x3c8   : > { %v17255_v62 = vld [vmem:[%s18557_s2 + $0x1084] sm:$0xf] }
 0x3c9   : > { %5479 = vmatpush.bf16.msrb.mxu0 %v13488_v16  ;;  %v13676_v16 = vld [vmem:[%s18557_s2 + $0x1078] sm:$0xf0] }
 0x3ca   : > { %5492 = vmatpush.bf16.msrb.mxu1 %v13552_v19  ;;  %5505 = vmatpush.bf16.msrb.mxu2 %v13492_v20  ;;  %v4223_v8 = vpop.f32.mrf.mxu2  ;;  %v13460_v19 = vor.u32 %v17204_v2, %v13457_v6  ;;  %v17269_v20 = vld [vmem:[%s18557_s2 + $0x10f4] sm:$0xf]  ;;  %v13679_v26 = vor.u32 %v17253_v15, %v13676_v16  ;;  %v13708_v15 = vld [vmem:[%s18557_s2 + $0x10b8] sm:$0xf0]  ;;  %v13643_v16 = vor.u32 %v17246_v7, %v13642_v13 }
 0x3cb   : > { %5518 = vmatpush.bf16.msrb.mxu3 %v13556_v22  ;;  %v4236_v14 = vpop.f32.mrf.mxu3  ;;  %v13675_v22 = vor.u32 %v17254_v11, %v13674_v9  ;;  %v13706_v8 = vld [vmem:[%s18557_s2 + $0x10b0] sm:$0xf]  ;;  %v17262_v11 = vld [vmem:[%s18557_s2 + $0x10b4] sm:$0xf0]  ;;  %v13903_v13 = vld [vmem:[%s18557_s2 + $0x11f8] sm:$0xf0] }
 0x3cc   : > { %v13644_v14 = vld [vmem:[%s18557_s2 + $0x1038] sm:$0xf0]  ;;  %v5537_v7 = vld [vmem:[%s5536_s17] sm:$0xff] }
 0x3cd   : > { %5480 = vmatpush.bf16.msrb.mxu0 %v13480_v29  ;;  %v13730_v29 = vld [vmem:[%s18557_s2 + $0x10e0] sm:$0xf] }
 0x3ce   : > { %5493 = vmatpush.bf16.msrb.mxu1 %v13544_v32  ;;  %5506 = vmatpush.bf16.msrb.mxu2 %v13484_v34  ;;  %v13743_v32 = vor.u32 %v17269_v20, %v13740_v28  ;;  %v5281_v34 = vpack.c.bf16 %v5279_v52, %v5279_v52  ;;  %v13731_v3 = vor.u32 %v17268_v35, %v13730_v29  ;;  %v13634_v20 = vld [vmem:[%s18557_s2 + $0x1020] sm:$0xf]  ;;  %v17244_v28 = vld [vmem:[%s18557_s2 + $0x1024] sm:$0xf0] }
 0x3cf   : > { %5519 = vmatpush.bf16.msrb.mxu3 %v13548_v37  ;;  %v5282_v37 = vpack.c.bf16 %v5280_v24, %v5280_v24  ;;  %v13711_v52 = vor.u32 %v17261_v23, %v13708_v15  ;;  %v17243_v24 = vld [vmem:[%s18557_s2 + $0x1024] sm:$0xf]  ;;  %v13829_v23 = vld [vmem:[%s18557_s2 + $0x1160] sm:$0xf]  ;;  %v17287_v15 = vld [vmem:[%s18557_s2 + $0x1164] sm:$0xf0] }
 0x3d1   : > { %5481 = vmatpush.bf16.msrb.mxu0 %v13472_v48  ;;  %v17266_v48 = vld [vmem:[%s18557_s2 + $0x10d4] sm:$0xf0] }
 0x3d2   : > { %5494 = vmatpush.bf16.msrb.mxu1 %v13536_v50  ;;  %5507 = vmatpush.bf16.msrb.mxu2 %v13476_v60  ;;  %v13660_v50 = vld [vmem:[%s18557_s2 + $0x1058] sm:$0xf0]  ;;  %v17265_v60 = vld [vmem:[%s18557_s2 + $0x10d4] sm:$0xf]  ;;  %v13723_v54 = vor.u32 %v17266_v48, %v13722_v44 }
 0x3d3   : > { %5520 = vmatpush.bf16.msrb.mxu3 %v13540_v56  ;;  %v13663_v56 = vor.u32 %v17249_v49, %v13660_v50  ;;  %v13727_v59 = vor.u32 %v17265_v60, %v13724_v51  ;;  %v17257_v44 = vld [vmem:[%s18557_s2 + $0x1094] sm:$0xf]  ;;  %v13618_v49 = vld [vmem:[%s18557_s2 + $0x1000] sm:$0xf]  ;;  %v17240_v50 = vld [vmem:[%s18557_s2 + $0x1004] sm:$0xf0]  ;;  %v13631_v60 = vor.u32 %v17241_v47, %v13628_v43 }
 0x3d4   : > { %v13682_v51 = vld [vmem:[%s18557_s2 + $0x1080] sm:$0xf]  ;;  %v17283_v47 = vld [vmem:[%s18557_s2 + $0x1144] sm:$0xf0] }
 0x3d5   : > { %5482 = vmatpush.bf16.msrb.mxu0 %v13464_v31  ;;  %v17247_v31 = vld [vmem:[%s18557_s2 + $0x1044] sm:$0xf]  ;;  %v13877_v43 = vld [vmem:[%s18557_s2 + $0x11c0] sm:$0xf] }
 0x3d6   : > { %5495 = vmatpush.bf16.msrb.mxu1 %v13528_v4  ;;  %5508 = vmatpush.bf16.msrb.mxu2 %v13468_v10  ;;  %v17263_v4 = vld [vmem:[%s18557_s2 + $0x10c4] sm:$0xf]  ;;  %v13716_v10 = vld [vmem:[%s18557_s2 + $0x10c8] sm:$0xf0]  ;;  %v13655_v6 = vor.u32 %v17247_v31, %v13652_v61  ;;  %v17289_v31 = vld [vmem:[%s18557_s2 + $0x1174] sm:$0xf0] }
 0x3d7   : > { %5521 = vmatpush.bf16.msrb.mxu3 %v13532_v5  ;;  %v13715_v5 = vor.u32 %v17264_v30, %v13714_v58  ;;  %v13719_v9 = vor.u32 %v17263_v4, %v13716_v10  ;;  %v13684_v58 = vld [vmem:[%s18557_s2 + $0x1088] sm:$0xf0]  ;;  %v13837_v30 = vld [vmem:[%s18557_s2 + $0x1170] sm:$0xf]  ;;  %v13619_v4 = vor.u32 %v17240_v50, %v13618_v49  ;;  %v17305_v10 = vld [vmem:[%s18557_s2 + $0x11f4] sm:$0xf0] }
 0x3d8   : > { %v13901_v61 = vld [vmem:[%s18557_s2 + $0x11f0] sm:$0xf]  ;;  %v13815_v49 = vld [vmem:[%s18557_s2 + $0x1148] sm:$0xf0] }
 0x3d9   : > { %5483 = vmatpush.bf16.msrb.mxu0 %v13456_v18  ;;  %v4453_v63 = vpop.f32.mrf.mxu0 }
 0x3da   : > { %5496 = vmatpush.bf16.msrb.mxu1 %v13520_v17  ;;  %5509 = vmatpush.bf16.msrb.mxu2 %v13460_v19  ;;  %v4466_v0 = vpop.f32.mrf.mxu1  ;;  %v13707_v17 = vor.u32 %v17262_v11, %v13706_v8  ;;  %v13647_v19 = vor.u32 %v17245_v12, %v13644_v14  ;;  %v13687_v8 = vor.u32 %v17255_v62, %v13684_v58  ;;  %v5538_v11 = vld [vmem:[%s5536_s17 + $0x8] sm:$0xff]  ;;  %v13805_v62 = vld [vmem:[%s18557_s2 + $0x1130] sm:$0xf]  ;;  %s6568_s17 = scalar_lea.vmem [#allocation2], %s17378_s1  ;;  %s17518_s1 = sshll.u32 %s20703_s13, 4 }
 0x3db   : > { %5522 = vmatpush.bf16.msrb.mxu3 %v13524_v21  ;;  %v4467_v2 = vadd.f32 %v4466_v0, %v4453_v63  ;;  %v17288_v0 = vld [vmem:[%s18557_s2 + $0x1174] sm:$0xf]  ;;  %v13902_v12 = vor.u32 %v17305_v10, %v13901_v61  ;;  %v17281_v58 = vld [vmem:[%s18557_s2 + $0x1134] sm:$0xf0]  ;;  %s21007_s13 = sshra.s32 %s17657_s23, 3 }
 0x3dc   : > { %5484 = vmatmul.bf16.vlgmr.msrb.gmra.mxu0 %v5281_v34  ;;  %v17280_v61 = vld [vmem:[%s18557_s2 + $0x1134] sm:$0xf] }
 0x3dd   : > { %5734 = vmatpush.bf16.msra.mxu0 %v13675_v22  ;;  %5497 = vmatmul.bf16.vlgmr.msrb.gmra.mxu1 %v5282_v37  ;;  %v20091_v18 = vadd.f32 %v4467_v2, %v20015_v33  ;;  %v13698_v33 = vld [vmem:[%s18557_s2 + $0x10a0] sm:$0xf]  ;;  %v17260_v22 = vld [vmem:[%s18557_s2 + $0x10a4] sm:$0xf0]  ;;  %v17296_v10 = vld [vmem:[%s18557_s2 + $0x11b4] sm:$0xf] }
 0x3de   : > { %5747 = vmatpush.bf16.msra.mxu1 %v13739_v25  ;;  %5760 = vmatpush.bf16.msra.mxu2 %v13679_v26  ;;  %v13636_v25 = vld [vmem:[%s18557_s2 + $0x1028] sm:$0xf0]  ;;  %v13699_v36 = vor.u32 %v17260_v22, %v13698_v33 }
 0x3df   : > { %5773 = vmatpush.bf16.msra.mxu3 %v13743_v32  ;;  %5510 = vmatmul.bf16.vlgmr.msrb.gmra.mxu2 %v5281_v34  ;;  %v13635_v34 = vor.u32 %v17244_v28, %v13634_v20  ;;  %v13639_v46 = vor.u32 %v17243_v24, %v13636_v25  ;;  %v17303_v20 = vld [vmem:[%s18557_s2 + $0x11e4] sm:$0xf0]  ;;  %v17286_v28 = vld [vmem:[%s18557_s2 + $0x1164] sm:$0xf]  ;;  %v13831_v33 = vld [vmem:[%s18557_s2 + $0x1168] sm:$0xf0]  ;;  %v13830_v24 = vor.u32 %v17287_v15, %v13829_v23 }
 0x3e0   : > { %5523 = vmatmul.bf16.vlgmr.msrb.gmra.mxu3 %v5282_v37  ;;  %v13626_v37 = vld [vmem:[%s18557_s2 + $0x1010] sm:$0xf]  ;;  %v13895_v22 = vld [vmem:[%s18557_s2 + $0x11e8] sm:$0xf0]  ;;  %v17294_v23 = vld [vmem:[%s18557_s2 + $0x11a4] sm:$0xf] }
 0x3e1   : > { %5735 = vmatpush.bf16.msra.mxu0 %v13667_v41  ;;  %v4455_v29 = vpop.f32.mrf.mxu0  ;;  %v13627_v48 = vor.u32 %v17242_v38, %v13626_v37  ;;  %v13887_v37 = vld [vmem:[%s18557_s2 + $0x11d8] sm:$0xf0]  ;;  %v13863_v15 = vld [vmem:[%s18557_s2 + $0x11a8] sm:$0xf0] }
 0x3e2   : > { %5748 = vmatpush.bf16.msra.mxu1 %v13731_v3  ;;  %5761 = vmatpush.bf16.msra.mxu2 %v13671_v42  ;;  %v4479_v21 = vpop.f32.mrf.mxu2  ;;  %v4468_v35 = vpop.f32.mrf.mxu1  ;;  %v13703_v3 = vor.u32 %v17259_v40, %v13700_v27  ;;  %v17258_v42 = vld [vmem:[%s18557_s2 + $0x1094] sm:$0xf0]  ;;  %v13821_v40 = vld [vmem:[%s18557_s2 + $0x1150] sm:$0xf] }
 0x3e3   : > { %5774 = vmatpush.bf16.msra.mxu3 %v13735_v45  ;;  %v4492_v26 = vpop.f32.mrf.mxu3  ;;  %v13692_v45 = vld [vmem:[%s18557_s2 + $0x1098] sm:$0xf0]  ;;  %v17285_v27 = vld [vmem:[%s18557_s2 + $0x1154] sm:$0xf0]  ;;  %v13885_v29 = vld [vmem:[%s18557_s2 + $0x11d0] sm:$0xf] }
 0x3e4   : > { %v4493_v32 = vadd.f32 %v4492_v26, %v4479_v21  ;;  %v17302_v21 = vld [vmem:[%s18557_s2 + $0x11e4] sm:$0xf]  ;;  %v13834_v26 = vor.u32 %v17286_v28, %v13831_v33  ;;  %v17284_v35 = vld [vmem:[%s18557_s2 + $0x1154] sm:$0xf]  ;;  %v13822_v38 = vor.u32 %v17285_v27, %v13821_v40  ;;  %v13791_v27 = vld [vmem:[%s18557_s2 + $0x1118] sm:$0xf0] }
 0x3e5   : > { %5736 = vmatpush.bf16.msra.mxu0 %v13659_v53  ;;  %v17256_v53 = vld [vmem:[%s18557_s2 + $0x1084] sm:$0xf0]  ;;  %v17276_v40 = vld [vmem:[%s18557_s2 + $0x1114] sm:$0xf] }
 0x3e6   : > { %5749 = vmatpush.bf16.msra.mxu1 %v13723_v54  ;;  %5762 = vmatpush.bf16.msra.mxu2 %v13663_v56  ;;  %v20110_v41 = vadd.f32 %v4493_v32, %v20034_v55  ;;  %v13691_v55 = vor.u32 %v17258_v42, %v13690_v39  ;;  %v17239_v54 = vld [vmem:[%s18557_s2 + $0x1004] sm:$0xf]  ;;  %v13695_v56 = vor.u32 %v17257_v44, %v13692_v45  ;;  %v13813_v42 = vld [vmem:[%s18557_s2 + $0x1140] sm:$0xf]  ;;  %v17299_v45 = vld [vmem:[%s18557_s2 + $0x11c4] sm:$0xf0] }
 0x3e7   : > { %5775 = vmatpush.bf16.msra.mxu3 %v13727_v59  ;;  %v13683_v2 = vor.u32 %v17256_v53, %v13682_v51  ;;  %v13898_v32 = vor.u32 %v17302_v21, %v13895_v22  ;;  %v13814_v53 = vor.u32 %v17283_v47, %v13813_v42  ;;  %v17277_v21 = vld [vmem:[%s18557_s2 + $0x1114] sm:$0xf0]  ;;  %v13853_v22 = vld [vmem:[%s18557_s2 + $0x1190] sm:$0xf]  ;;  %v13783_v42 = vld [vmem:[%s18557_s2 + $0x1108] sm:$0xf0] }
 0x3e8   : > { %v17290_v47 = vld [vmem:[%s18557_s2 + $0x1184] sm:$0xf] }
 0x3e9   : > { %5737 = vmatpush.bf16.msra.mxu0 %v13651_v1  ;;  %v13839_v1 = vld [vmem:[%s18557_s2 + $0x1178] sm:$0xf0] }
 0x3ea   : > { %5750 = vmatpush.bf16.msra.mxu1 %v13715_v5  ;;  %5763 = vmatpush.bf16.msra.mxu2 %v13655_v6  ;;  %v4481_v59 = vpop.f32.mrf.mxu2  ;;  %v13623_v5 = vor.u32 %v17239_v54, %v13620_v57  ;;  %v17304_v6 = vld [vmem:[%s18557_s2 + $0x11f4] sm:$0xf]  ;;  %v13842_v14 = vor.u32 %v17288_v0, %v13839_v1  ;;  %v13871_v0 = vld [vmem:[%s18557_s2 + $0x11b8] sm:$0xf0]  ;;  %v13806_v1 = vor.u32 %v17281_v58, %v13805_v62 }
 0x3eb   : > { %5776 = vmatpush.bf16.msra.mxu3 %v13719_v9  ;;  %v4494_v63 = vpop.f32.mrf.mxu3  ;;  %v13838_v9 = vor.u32 %v17289_v31, %v13837_v30  ;;  %v13869_v59 = vld [vmem:[%s18557_s2 + $0x11b0] sm:$0xf]  ;;  %v17297_v31 = vld [vmem:[%s18557_s2 + $0x11b4] sm:$0xf0]  ;;  %v14066_v62 = vld [vmem:[%s18557_s2 + $0x12f8] sm:$0xf0] }
 0x3ec   : > { %v13807_v63 = vld [vmem:[%s18557_s2 + $0x1138] sm:$0xf0]  ;;  %v5795_v58 = vld [vmem:[%s5794_s30] sm:$0xff] }
 0x3ed   : > { %5738 = vmatpush.bf16.msra.mxu0 %v13643_v16  ;;  %v13893_v16 = vld [vmem:[%s18557_s2 + $0x11e0] sm:$0xf] }
 0x3ee   : > { %5751 = vmatpush.bf16.msra.mxu1 %v13707_v17  ;;  %5764 = vmatpush.bf16.msra.mxu2 %v13647_v19  ;;  %v13906_v17 = vor.u32 %v17304_v6, %v13903_v13  ;;  %v5539_v19 = vpack.c.bf16 %v5537_v7, %v5537_v7  ;;  %v13894_v25 = vor.u32 %v17303_v20, %v13893_v16  ;;  %v13797_v6 = vld [vmem:[%s18557_s2 + $0x1120] sm:$0xf]  ;;  %v17279_v13 = vld [vmem:[%s18557_s2 + $0x1124] sm:$0xf0] }
 0x3ef   : > { %5777 = vmatpush.bf16.msra.mxu3 %v13711_v52  ;;  %v5540_v52 = vpack.c.bf16 %v5538_v11, %v5538_v11  ;;  %v13874_v7 = vor.u32 %v17296_v10, %v13871_v0  ;;  %v17278_v11 = vld [vmem:[%s18557_s2 + $0x1124] sm:$0xf]  ;;  %v13992_v10 = vld [vmem:[%s18557_s2 + $0x1260] sm:$0xf]  ;;  %v17322_v0 = vld [vmem:[%s18557_s2 + $0x1264] sm:$0xf0] }
 0x3f1   : > { %5739 = vmatpush.bf16.msra.mxu0 %v13635_v34  ;;  %v17301_v34 = vld [vmem:[%s18557_s2 + $0x11d4] sm:$0xf0] }
 0x3f2   : > { %5752 = vmatpush.bf16.msra.mxu1 %v13699_v36  ;;  %5765 = vmatpush.bf16.msra.mxu2 %v13639_v46  ;;  %v13823_v36 = vld [vmem:[%s18557_s2 + $0x1158] sm:$0xf0]  ;;  %v17300_v46 = vld [vmem:[%s18557_s2 + $0x11d4] sm:$0xf]  ;;  %v13886_v39 = vor.u32 %v17301_v34, %v13885_v29 }
 0x3f3   : > { %5778 = vmatpush.bf16.msra.mxu3 %v13703_v3  ;;  %v13826_v3 = vor.u32 %v17284_v35, %v13823_v36  ;;  %v13890_v44 = vor.u32 %v17300_v46, %v13887_v37  ;;  %v17292_v29 = vld [vmem:[%s18557_s2 + $0x1194] sm:$0xf]  ;;  %v13781_v35 = vld [vmem:[%s18557_s2 + $0x1100] sm:$0xf]  ;;  %v17275_v36 = vld [vmem:[%s18557_s2 + $0x1104] sm:$0xf0]  ;;  %v13794_v46 = vor.u32 %v17276_v40, %v13791_v27 }
 0x3f4   : > { %v13845_v37 = vld [vmem:[%s18557_s2 + $0x1180] sm:$0xf]  ;;  %v17318_v40 = vld [vmem:[%s18557_s2 + $0x1244] sm:$0xf0] }
 0x3f5   : > { %5740 = vmatpush.bf16.msra.mxu0 %v13627_v48  ;;  %v17282_v48 = vld [vmem:[%s18557_s2 + $0x1144] sm:$0xf]  ;;  %v14040_v27 = vld [vmem:[%s18557_s2 + $0x12c0] sm:$0xf] }
 0x3f6   : > { %5753 = vmatpush.bf16.msra.mxu1 %v13691_v55  ;;  %5766 = vmatpush.bf16.msra.mxu2 %v13631_v60  ;;  %v17298_v55 = vld [vmem:[%s18557_s2 + $0x11c4] sm:$0xf]  ;;  %v13879_v60 = vld [vmem:[%s18557_s2 + $0x11c8] sm:$0xf0]  ;;  %v13818_v57 = vor.u32 %v17282_v48, %v13815_v49  ;;  %v17324_v48 = vld [vmem:[%s18557_s2 + $0x1274] sm:$0xf0] }
 0x3f7   : > { %5779 = vmatpush.bf16.msra.mxu3 %v13695_v56  ;;  %v13878_v56 = vor.u32 %v17299_v45, %v13877_v43  ;;  %v13882_v30 = vor.u32 %v17298_v55, %v13879_v60  ;;  %v13847_v43 = vld [vmem:[%s18557_s2 + $0x1188] sm:$0xf0]  ;;  %v14000_v45 = vld [vmem:[%s18557_s2 + $0x1270] sm:$0xf]  ;;  %v13782_v55 = vor.u32 %v17275_v36, %v13781_v35  ;;  %v17340_v60 = vld [vmem:[%s18557_s2 + $0x12f4] sm:$0xf0] }
 0x3f8   : > { %v14064_v49 = vld [vmem:[%s18557_s2 + $0x12f0] sm:$0xf]  ;;  %v13978_v35 = vld [vmem:[%s18557_s2 + $0x1248] sm:$0xf0] }
 0x3f9   : > { %5741 = vmatpush.bf16.msra.mxu0 %v13619_v4  ;;  %v4711_v50 = vpop.f32.mrf.mxu0 }
 0x3fa   : > { %5754 = vmatpush.bf16.msra.mxu1 %v13683_v2  ;;  %5767 = vmatpush.bf16.msra.mxu2 %v13623_v5  ;;  %v4724_v51 = vpop.f32.mrf.mxu1  ;;  %v13870_v2 = vor.u32 %v17297_v31, %v13869_v59  ;;  %v13810_v5 = vor.u32 %v17280_v61, %v13807_v63  ;;  %v13850_v59 = vor.u32 %v17290_v47, %v13847_v43  ;;  %v5796_v31 = vld [vmem:[%s5794_s30 + $0x8] sm:$0xff]  ;;  %v13968_v47 = vld [vmem:[%s18557_s2 + $0x1230] sm:$0xf]  ;;  %s6826_s30 = scalar_lea.vmem [#allocation2], %s17413_s22  ;;  %s17553_s22 = sshll.u32 %s20779_s19, 4 }
 0x3fb   : > { %5780 = vmatpush.bf16.msra.mxu3 %v13687_v8  ;;  %v4725_v54 = vadd.f32 %v4724_v51, %v4711_v50  ;;  %v17323_v51 = vld [vmem:[%s18557_s2 + $0x1274] sm:$0xf]  ;;  %v14065_v61 = vor.u32 %v17340_v60, %v14064_v49  ;;  %v17316_v43 = vld [vmem:[%s18557_s2 + $0x1234] sm:$0xf0]  ;;  %s21083_s19 = sshra.s32 %s17692_s26, 3 }
 0x3fc   : > { %5742 = vmatmul.bf16.vlgmr.msra.gmra.mxu0 %v5539_v19  ;;  %v17315_v49 = vld [vmem:[%s18557_s2 + $0x1234] sm:$0xf] }
 0x3fd   : > { %5992 = vmatpush.bf16.msrb.mxu0 %v13838_v9  ;;  %5755 = vmatmul.bf16.vlgmr.msra.gmra.mxu1 %v5540_v52  ;;  %v20167_v4 = vadd.f32 %v4725_v54, %v20091_v18  ;;  %v13861_v18 = vld [vmem:[%s18557_s2 + $0x11a0] sm:$0xf]  ;;  %v17295_v9 = vld [vmem:[%s18557_s2 + $0x11a4] sm:$0xf0]  ;;  %v17331_v60 = vld [vmem:[%s18557_s2 + $0x12b4] sm:$0xf] }
 0x3fe   : > { %6005 = vmatpush.bf16.msrb.mxu1 %v13902_v12  ;;  %6018 = vmatpush.bf16.msrb.mxu2 %v13842_v14  ;;  %v13799_v12 = vld [vmem:[%s18557_s2 + $0x1128] sm:$0xf0]  ;;  %v13862_v28 = vor.u32 %v17295_v9, %v13861_v18 }
 0x3ff   : > { %6031 = vmatpush.bf16.msrb.mxu3 %v13906_v17  ;;  %5768 = vmatmul.bf16.vlgmr.msra.gmra.mxu2 %v5539_v19  ;;  %v13798_v19 = vor.u32 %v17279_v13, %v13797_v6  ;;  %v13802_v33 = vor.u32 %v17278_v11, %v13799_v12  ;;  %v17338_v6 = vld [vmem:[%s18557_s2 + $0x12e4] sm:$0xf0]  ;;  %v17321_v13 = vld [vmem:[%s18557_s2 + $0x1264] sm:$0xf]  ;;  %v13994_v18 = vld [vmem:[%s18557_s2 + $0x1268] sm:$0xf0]  ;;  %v13993_v11 = vor.u32 %v17322_v0, %v13992_v10 }
 0x400   : > { %5781 = vmatmul.bf16.vlgmr.msra.gmra.mxu3 %v5540_v52  ;;  %v13789_v52 = vld [vmem:[%s18557_s2 + $0x1110] sm:$0xf]  ;;  %v14058_v9 = vld [vmem:[%s18557_s2 + $0x12e8] sm:$0xf0]  ;;  %v17329_v10 = vld [vmem:[%s18557_s2 + $0x12a4] sm:$0xf] }
 0x401   : > { %5993 = vmatpush.bf16.msrb.mxu0 %v13830_v24  ;;  %v4713_v16 = vpop.f32.mrf.mxu0  ;;  %v13790_v34 = vor.u32 %v17277_v21, %v13789_v52  ;;  %v14050_v52 = vld [vmem:[%s18557_s2 + $0x12d8] sm:$0xf0]  ;;  %v14026_v0 = vld [vmem:[%s18557_s2 + $0x12a8] sm:$0xf0] }
 0x402   : > { %6006 = vmatpush.bf16.msrb.mxu1 %v13894_v25  ;;  %6019 = vmatpush.bf16.msrb.mxu2 %v13834_v26  ;;  %v4737_v8 = vpop.f32.mrf.mxu2  ;;  %v4726_v20 = vpop.f32.mrf.mxu1  ;;  %v13866_v25 = vor.u32 %v17294_v23, %v13863_v15  ;;  %v17293_v26 = vld [vmem:[%s18557_s2 + $0x1194] sm:$0xf0]  ;;  %v13984_v23 = vld [vmem:[%s18557_s2 + $0x1250] sm:$0xf] }
 0x403   : > { %6032 = vmatpush.bf16.msrb.mxu3 %v13898_v32  ;;  %v4750_v14 = vpop.f32.mrf.mxu3  ;;  %v13855_v32 = vld [vmem:[%s18557_s2 + $0x1198] sm:$0xf0]  ;;  %v17320_v15 = vld [vmem:[%s18557_s2 + $0x1254] sm:$0xf0]  ;;  %v14048_v16 = vld [vmem:[%s18557_s2 + $0x12d0] sm:$0xf] }
 0x404   : > { %v4751_v17 = vadd.f32 %v4750_v14, %v4737_v8  ;;  %v17337_v8 = vld [vmem:[%s18557_s2 + $0x12e4] sm:$0xf]  ;;  %v13997_v14 = vor.u32 %v17321_v13, %v13994_v18  ;;  %v17319_v20 = vld [vmem:[%s18557_s2 + $0x1254] sm:$0xf]  ;;  %v13985_v21 = vor.u32 %v17320_v15, %v13984_v23  ;;  %v13954_v15 = vld [vmem:[%s18557_s2 + $0x1218] sm:$0xf0] }
 0x405   : > { %5994 = vmatpush.bf16.msrb.mxu0 %v13822_v38  ;;  %v17291_v38 = vld [vmem:[%s18557_s2 + $0x1184] sm:$0xf0]  ;;  %v17311_v23 = vld [vmem:[%s18557_s2 + $0x1214] sm:$0xf] }
 0x406   : > { %6007 = vmatpush.bf16.msrb.mxu1 %v13886_v39  ;;  %6020 = vmatpush.bf16.msrb.mxu2 %v13826_v3  ;;  %v20186_v24 = vadd.f32 %v4751_v17, %v20110_v41  ;;  %v13854_v41 = vor.u32 %v17293_v26, %v13853_v22  ;;  %v17274_v39 = vld [vmem:[%s18557_s2 + $0x1104] sm:$0xf]  ;;  %v13858_v3 = vor.u32 %v17292_v29, %v13855_v32  ;;  %v13976_v26 = vld [vmem:[%s18557_s2 + $0x1240] sm:$0xf]  ;;  %v17334_v32 = vld [vmem:[%s18557_s2 + $0x12c4] sm:$0xf0] }
 0x407   : > { %6033 = vmatpush.bf16.msrb.mxu3 %v13890_v44  ;;  %v13846_v54 = vor.u32 %v17291_v38, %v13845_v37  ;;  %v14061_v17 = vor.u32 %v17337_v8, %v14058_v9  ;;  %v13977_v38 = vor.u32 %v17318_v40, %v13976_v26  ;;  %v17312_v8 = vld [vmem:[%s18557_s2 + $0x1214] sm:$0xf0]  ;;  %v14016_v9 = vld [vmem:[%s18557_s2 + $0x1290] sm:$0xf]  ;;  %v13946_v26 = vld [vmem:[%s18557_s2 + $0x1208] sm:$0xf0] }
 0x408   : > { %v17325_v40 = vld [vmem:[%s18557_s2 + $0x1284] sm:$0xf] }
 0x409   : > { %5995 = vmatpush.bf16.msrb.mxu0 %v13814_v53  ;;  %v14002_v53 = vld [vmem:[%s18557_s2 + $0x1278] sm:$0xf0] }
 0x40a   : > { %6008 = vmatpush.bf16.msrb.mxu1 %v13878_v56  ;;  %6021 = vmatpush.bf16.msrb.mxu2 %v13818_v57  ;;  %v4739_v44 = vpop.f32.mrf.mxu2  ;;  %v13786_v56 = vor.u32 %v17274_v39, %v13783_v42  ;;  %v17339_v57 = vld [vmem:[%s18557_s2 + $0x12f4] sm:$0xf]  ;;  %v14005_v63 = vor.u32 %v17323_v51, %v14002_v53  ;;  %v14034_v51 = vld [vmem:[%s18557_s2 + $0x12b8] sm:$0xf0]  ;;  %v13969_v53 = vor.u32 %v17316_v43, %v13968_v47 }
 0x40b   : > { %6034 = vmatpush.bf16.msrb.mxu3 %v13882_v30  ;;  %v4752_v50 = vpop.f32.mrf.mxu3  ;;  %v14001_v30 = vor.u32 %v17324_v48, %v14000_v45  ;;  %v14032_v44 = vld [vmem:[%s18557_s2 + $0x12b0] sm:$0xf]  ;;  %v17332_v48 = vld [vmem:[%s18557_s2 + $0x12b4] sm:$0xf0]  ;;  %v14229_v47 = vld [vmem:[%s18557_s2 + $0x13f8] sm:$0xf0] }
 0x40c   : > { %v13970_v50 = vld [vmem:[%s18557_s2 + $0x1238] sm:$0xf0]  ;;  %v6053_v43 = vld [vmem:[%s6052_s12] sm:$0xff] }
 0x40d   : > { %5996 = vmatpush.bf16.msrb.mxu0 %v13806_v1  ;;  %v14056_v1 = vld [vmem:[%s18557_s2 + $0x12e0] sm:$0xf] }
 0x40e   : > { %6009 = vmatpush.bf16.msrb.mxu1 %v13870_v2  ;;  %6022 = vmatpush.bf16.msrb.mxu2 %v13810_v5  ;;  %v14069_v2 = vor.u32 %v17339_v57, %v14066_v62  ;;  %v5797_v5 = vpack.c.bf16 %v5795_v58, %v5795_v58  ;;  %v14057_v12 = vor.u32 %v17338_v6, %v14056_v1  ;;  %v13960_v57 = vld [vmem:[%s18557_s2 + $0x1220] sm:$0xf]  ;;  %v17314_v62 = vld [vmem:[%s18557_s2 + $0x1224] sm:$0xf0] }
 0x40f   : > { %6035 = vmatpush.bf16.msrb.mxu3 %v13874_v7  ;;  %v5798_v7 = vpack.c.bf16 %v5796_v31, %v5796_v31  ;;  %v14037_v58 = vor.u32 %v17331_v60, %v14034_v51  ;;  %v17313_v31 = vld [vmem:[%s18557_s2 + $0x1224] sm:$0xf]  ;;  %v14155_v60 = vld [vmem:[%s18557_s2 + $0x1360] sm:$0xf]  ;;  %v17357_v51 = vld [vmem:[%s18557_s2 + $0x1364] sm:$0xf0] }
 0x411   : > { %5997 = vmatpush.bf16.msrb.mxu0 %v13798_v19  ;;  %v17336_v19 = vld [vmem:[%s18557_s2 + $0x12d4] sm:$0xf0] }
 0x412   : > { %6010 = vmatpush.bf16.msrb.mxu1 %v13862_v28  ;;  %6023 = vmatpush.bf16.msrb.mxu2 %v13802_v33  ;;  %v13986_v28 = vld [vmem:[%s18557_s2 + $0x1258] sm:$0xf0]  ;;  %v17335_v33 = vld [vmem:[%s18557_s2 + $0x12d4] sm:$0xf]  ;;  %v14049_v22 = vor.u32 %v17336_v19, %v14048_v16 }
 0x413   : > { %6036 = vmatpush.bf16.msrb.mxu3 %v13866_v25  ;;  %v13989_v25 = vor.u32 %v17319_v20, %v13986_v28  ;;  %v14053_v29 = vor.u32 %v17335_v33, %v14050_v52  ;;  %v17327_v16 = vld [vmem:[%s18557_s2 + $0x1294] sm:$0xf]  ;;  %v13944_v20 = vld [vmem:[%s18557_s2 + $0x1200] sm:$0xf]  ;;  %v17310_v28 = vld [vmem:[%s18557_s2 + $0x1204] sm:$0xf0]  ;;  %v13957_v33 = vor.u32 %v17311_v23, %v13954_v15 }
 0x414   : > { %v14008_v52 = vld [vmem:[%s18557_s2 + $0x1280] sm:$0xf]  ;;  %v17353_v23 = vld [vmem:[%s18557_s2 + $0x1344] sm:$0xf0] }
 0x415   : > { %5998 = vmatpush.bf16.msrb.mxu0 %v13790_v34  ;;  %v17317_v34 = vld [vmem:[%s18557_s2 + $0x1244] sm:$0xf]  ;;  %v14203_v15 = vld [vmem:[%s18557_s2 + $0x13c0] sm:$0xf] }
 0x416   : > { %6011 = vmatpush.bf16.msrb.mxu1 %v13854_v41  ;;  %6024 = vmatpush.bf16.msrb.mxu2 %v13794_v46  ;;  %v17333_v41 = vld [vmem:[%s18557_s2 + $0x12c4] sm:$0xf]  ;;  %v14042_v46 = vld [vmem:[%s18557_s2 + $0x12c8] sm:$0xf0]  ;;  %v13981_v42 = vor.u32 %v17317_v34, %v13978_v35  ;;  %v17359_v34 = vld [vmem:[%s18557_s2 + $0x1374] sm:$0xf0] }
 0x417   : > { %6037 = vmatpush.bf16.msrb.mxu3 %v13858_v3  ;;  %v14041_v3 = vor.u32 %v17334_v32, %v14040_v27  ;;  %v14045_v45 = vor.u32 %v17333_v41, %v14042_v46  ;;  %v14010_v27 = vld [vmem:[%s18557_s2 + $0x1288] sm:$0xf0]  ;;  %v14163_v32 = vld [vmem:[%s18557_s2 + $0x1370] sm:$0xf]  ;;  %v13945_v41 = vor.u32 %v17310_v28, %v13944_v20  ;;  %v17375_v46 = vld [vmem:[%s18557_s2 + $0x13f4] sm:$0xf0] }
 0x418   : > { %v14227_v35 = vld [vmem:[%s18557_s2 + $0x13f0] sm:$0xf]  ;;  %v14141_v20 = vld [vmem:[%s18557_s2 + $0x1348] sm:$0xf0] }
 0x419   : > { %5999 = vmatpush.bf16.msrb.mxu0 %v13782_v55  ;;  %v4969_v36 = vpop.f32.mrf.mxu0 }
 0x41a   : > { %6012 = vmatpush.bf16.msrb.mxu1 %v13846_v54  ;;  %6025 = vmatpush.bf16.msrb.mxu2 %v13786_v56  ;;  %v4982_v37 = vpop.f32.mrf.mxu1  ;;  %v14033_v54 = vor.u32 %v17332_v48, %v14032_v44  ;;  %v13973_v56 = vor.u32 %v17315_v49, %v13970_v50  ;;  %v14013_v44 = vor.u32 %v17325_v40, %v14010_v27  ;;  %v6054_v48 = vld [vmem:[%s6052_s12 + $0x8] sm:$0xff]  ;;  %v14131_v40 = vld [vmem:[%s18557_s2 + $0x1330] sm:$0xf]  ;;  %s7084_s12 = scalar_lea.vmem [#allocation2], %s17448_s18  ;;  %s17588_s18 = sshll.u32 %s20855_s14, 4 }
 0x41b   : > { %6038 = vmatpush.bf16.msrb.mxu3 %v13850_v59  ;;  %v4983_v39 = vadd.f32 %v4982_v37, %v4969_v36  ;;  %v17358_v37 = vld [vmem:[%s18557_s2 + $0x1374] sm:$0xf]  ;;  %v14228_v49 = vor.u32 %v17375_v46, %v14227_v35  ;;  %v17351_v27 = vld [vmem:[%s18557_s2 + $0x1334] sm:$0xf0]  ;;  %s21159_s14 = sshra.s32 %s17727_s27, 3 }
 0x41c   : > { %6000 = vmatmul.bf16.vlgmr.msrb.gmra.mxu0 %v5797_v5  ;;  %v17350_v35 = vld [vmem:[%s18557_s2 + $0x1334] sm:$0xf] }
 0x41d   : > { %6250 = vmatpush.bf16.msra.mxu0 %v14001_v30  ;;  %6013 = vmatmul.bf16.vlgmr.msrb.gmra.mxu1 %v5798_v7  ;;  %v20243_v55 = vadd.f32 %v4983_v39, %v20167_v4  ;;  %v14024_v4 = vld [vmem:[%s18557_s2 + $0x12a0] sm:$0xf]  ;;  %v17330_v30 = vld [vmem:[%s18557_s2 + $0x12a4] sm:$0xf0]  ;;  %v17366_v46 = vld [vmem:[%s18557_s2 + $0x13b4] sm:$0xf] }
 0x41e   : > { %6263 = vmatpush.bf16.msra.mxu1 %v14065_v61  ;;  %6276 = vmatpush.bf16.msra.mxu2 %v14005_v63  ;;  %v13962_v61 = vld [vmem:[%s18557_s2 + $0x1228] sm:$0xf0]  ;;  %v14025_v13 = vor.u32 %v17330_v30, %v14024_v4 }
 0x41f   : > { %6289 = vmatpush.bf16.msra.mxu3 %v14069_v2  ;;  %6026 = vmatmul.bf16.vlgmr.msrb.gmra.mxu2 %v5797_v5  ;;  %v13961_v5 = vor.u32 %v17314_v62, %v13960_v57  ;;  %v13965_v18 = vor.u32 %v17313_v31, %v13962_v61  ;;  %v17373_v57 = vld [vmem:[%s18557_s2 + $0x13e4] sm:$0xf0]  ;;  %v17356_v62 = vld [vmem:[%s18557_s2 + $0x1364] sm:$0xf]  ;;  %v14157_v4 = vld [vmem:[%s18557_s2 + $0x1368] sm:$0xf0]  ;;  %v14156_v31 = vor.u32 %v17357_v51, %v14155_v60 }
 0x420   : > { %6039 = vmatmul.bf16.vlgmr.msrb.gmra.mxu3 %v5798_v7  ;;  %v13952_v7 = vld [vmem:[%s18557_s2 + $0x1210] sm:$0xf]  ;;  %v14221_v30 = vld [vmem:[%s18557_s2 + $0x13e8] sm:$0xf0]  ;;  %v17364_v60 = vld [vmem:[%s18557_s2 + $0x13a4] sm:$0xf] }
 0x421   : > { %6251 = vmatpush.bf16.msra.mxu0 %v13993_v11  ;;  %v4971_v1 = vpop.f32.mrf.mxu0  ;;  %v13953_v19 = vor.u32 %v17312_v8, %v13952_v7  ;;  %v14213_v7 = vld [vmem:[%s18557_s2 + $0x13d8] sm:$0xf0]  ;;  %v14189_v51 = vld [vmem:[%s18557_s2 + $0x13a8] sm:$0xf0] }
 0x422   : > { %6264 = vmatpush.bf16.msra.mxu1 %v14057_v12  ;;  %6277 = vmatpush.bf16.msra.mxu2 %v13997_v14  ;;  %v4995_v59 = vpop.f32.mrf.mxu2  ;;  %v4984_v6 = vpop.f32.mrf.mxu1  ;;  %v14029_v12 = vor.u32 %v17329_v10, %v14026_v0  ;;  %v17328_v14 = vld [vmem:[%s18557_s2 + $0x1294] sm:$0xf0]  ;;  %v14147_v10 = vld [vmem:[%s18557_s2 + $0x1350] sm:$0xf] }
 0x423   : > { %6290 = vmatpush.bf16.msra.mxu3 %v14061_v17  ;;  %v5008_v63 = vpop.f32.mrf.mxu3  ;;  %v14018_v17 = vld [vmem:[%s18557_s2 + $0x1298] sm:$0xf0]  ;;  %v17355_v0 = vld [vmem:[%s18557_s2 + $0x1354] sm:$0xf0]  ;;  %v14211_v1 = vld [vmem:[%s18557_s2 + $0x13d0] sm:$0xf] }
 0x424   : > { %v5009_v2 = vadd.f32 %v5008_v63, %v4995_v59  ;;  %v17372_v59 = vld [vmem:[%s18557_s2 + $0x13e4] sm:$0xf]  ;;  %v14160_v63 = vor.u32 %v17356_v62, %v14157_v4  ;;  %v17354_v6 = vld [vmem:[%s18557_s2 + $0x1354] sm:$0xf]  ;;  %v14148_v8 = vor.u32 %v17355_v0, %v14147_v10  ;;  %v14117_v0 = vld [vmem:[%s18557_s2 + $0x1318] sm:$0xf0] }
 0x425   : > { %6252 = vmatpush.bf16.msra.mxu0 %v13985_v21  ;;  %v17326_v21 = vld [vmem:[%s18557_s2 + $0x1284] sm:$0xf0]  ;;  %v17346_v10 = vld [vmem:[%s18557_s2 + $0x1314] sm:$0xf] }
 0x426   : > { %6265 = vmatpush.bf16.msra.mxu1 %v14049_v22  ;;  %6278 = vmatpush.bf16.msra.mxu2 %v13989_v25  ;;  %v20262_v11 = vadd.f32 %v5009_v2, %v20186_v24  ;;  %v14017_v24 = vor.u32 %v17328_v14, %v14016_v9  ;;  %v17309_v22 = vld [vmem:[%s18557_s2 + $0x1204] sm:$0xf]  ;;  %v14021_v25 = vor.u32 %v17327_v16, %v14018_v17  ;;  %v14139_v14 = vld [vmem:[%s18557_s2 + $0x1340] sm:$0xf]  ;;  %v17369_v17 = vld [vmem:[%s18557_s2 + $0x13c4] sm:$0xf0] }
 0x427   : > { %6291 = vmatpush.bf16.msra.mxu3 %v14053_v29  ;;  %v14009_v39 = vor.u32 %v17326_v21, %v14008_v52  ;;  %v14224_v2 = vor.u32 %v17372_v59, %v14221_v30  ;;  %v14140_v21 = vor.u32 %v17353_v23, %v14139_v14  ;;  %v17347_v59 = vld [vmem:[%s18557_s2 + $0x1314] sm:$0xf0]  ;;  %v14179_v30 = vld [vmem:[%s18557_s2 + $0x1390] sm:$0xf]  ;;  %v14109_v14 = vld [vmem:[%s18557_s2 + $0x1308] sm:$0xf0] }
 0x428   : > { %v17360_v23 = vld [vmem:[%s18557_s2 + $0x1384] sm:$0xf] }
 0x429   : > { %6253 = vmatpush.bf16.msra.mxu0 %v13977_v38  ;;  %v14165_v38 = vld [vmem:[%s18557_s2 + $0x1378] sm:$0xf0] }
 0x42a   : > { %6266 = vmatpush.bf16.msra.mxu1 %v14041_v3  ;;  %6279 = vmatpush.bf16.msra.mxu2 %v13981_v42  ;;  %v4997_v29 = vpop.f32.mrf.mxu2  ;;  %v13949_v3 = vor.u32 %v17309_v22, %v13946_v26  ;;  %v17374_v42 = vld [vmem:[%s18557_s2 + $0x13f4] sm:$0xf]  ;;  %v14168_v50 = vor.u32 %v17358_v37, %v14165_v38  ;;  %v14197_v37 = vld [vmem:[%s18557_s2 + $0x13b8] sm:$0xf0]  ;;  %v14132_v38 = vor.u32 %v17351_v27, %v14131_v40 }
 0x42b   : > { %6292 = vmatpush.bf16.msra.mxu3 %v14045_v45  ;;  %v5010_v36 = vpop.f32.mrf.mxu3  ;;  %v14164_v45 = vor.u32 %v17359_v34, %v14163_v32  ;;  %v14195_v29 = vld [vmem:[%s18557_s2 + $0x13b0] sm:$0xf]  ;;  %v17367_v34 = vld [vmem:[%s18557_s2 + $0x13b4] sm:$0xf0]  ;;  %v14392_v40 = vld [vmem:[%s18557_s2 + $0x14f8] sm:$0xf0] }
 0x42c   : > { %v14133_v36 = vld [vmem:[%s18557_s2 + $0x1338] sm:$0xf0]  ;;  %v6311_v27 = vld [vmem:[%s6310_s15] sm:$0xff] }
 0x42d   : > { %6254 = vmatpush.bf16.msra.mxu0 %v13969_v53  ;;  %v14219_v53 = vld [vmem:[%s18557_s2 + $0x13e0] sm:$0xf] }
 0x42e   : > { %6267 = vmatpush.bf16.msra.mxu1 %v14033_v54  ;;  %6280 = vmatpush.bf16.msra.mxu2 %v13973_v56  ;;  %v14232_v54 = vor.u32 %v17374_v42, %v14229_v47  ;;  %v6055_v56 = vpack.c.bf16 %v6053_v43, %v6053_v43  ;;  %v14220_v61 = vor.u32 %v17373_v57, %v14219_v53  ;;  %v14123_v42 = vld [vmem:[%s18557_s2 + $0x1320] sm:$0xf]  ;;  %v17349_v47 = vld [vmem:[%s18557_s2 + $0x1324] sm:$0xf0] }
 0x42f   : > { %6293 = vmatpush.bf16.msra.mxu3 %v14037_v58  ;;  %v6056_v58 = vpack.c.bf16 %v6054_v48, %v6054_v48  ;;  %v14200_v43 = vor.u32 %v17366_v46, %v14197_v37  ;;  %v17348_v48 = vld [vmem:[%s18557_s2 + $0x1324] sm:$0xf]  ;;  %v14318_v46 = vld [vmem:[%s18557_s2 + $0x1460] sm:$0xf]  ;;  %v17392_v37 = vld [vmem:[%s18557_s2 + $0x1464] sm:$0xf0] }
 0x431   : > { %6255 = vmatpush.bf16.msra.mxu0 %v13961_v5  ;;  %v17371_v5 = vld [vmem:[%s18557_s2 + $0x13d4] sm:$0xf0] }
 0x432   : > { %6268 = vmatpush.bf16.msra.mxu1 %v14025_v13  ;;  %6281 = vmatpush.bf16.msra.mxu2 %v13965_v18  ;;  %v14149_v13 = vld [vmem:[%s18557_s2 + $0x1358] sm:$0xf0]  ;;  %v17370_v18 = vld [vmem:[%s18557_s2 + $0x13d4] sm:$0xf]  ;;  %v14212_v9 = vor.u32 %v17371_v5, %v14211_v1 }
 0x433   : > { %6294 = vmatpush.bf16.msra.mxu3 %v14029_v12  ;;  %v14152_v12 = vor.u32 %v17354_v6, %v14149_v13  ;;  %v14216_v16 = vor.u32 %v17370_v18, %v14213_v7  ;;  %v17362_v1 = vld [vmem:[%s18557_s2 + $0x1394] sm:$0xf]  ;;  %v14107_v6 = vld [vmem:[%s18557_s2 + $0x1300] sm:$0xf]  ;;  %v17345_v13 = vld [vmem:[%s18557_s2 + $0x1304] sm:$0xf0]  ;;  %v14120_v18 = vor.u32 %v17346_v10, %v14117_v0 }
 0x434   : > { %v14171_v7 = vld [vmem:[%s18557_s2 + $0x1380] sm:$0xf]  ;;  %v17388_v10 = vld [vmem:[%s18557_s2 + $0x1444] sm:$0xf0] }
 0x435   : > { %6256 = vmatpush.bf16.msra.mxu0 %v13953_v19  ;;  %v17352_v19 = vld [vmem:[%s18557_s2 + $0x1344] sm:$0xf]  ;;  %v14366_v0 = vld [vmem:[%s18557_s2 + $0x14c0] sm:$0xf] }
 0x436   : > { %6269 = vmatpush.bf16.msra.mxu1 %v14017_v24  ;;  %6282 = vmatpush.bf16.msra.mxu2 %v13957_v33  ;;  %v17368_v24 = vld [vmem:[%s18557_s2 + $0x13c4] sm:$0xf]  ;;  %v14205_v33 = vld [vmem:[%s18557_s2 + $0x13c8] sm:$0xf0]  ;;  %v14144_v26 = vor.u32 %v17352_v19, %v14141_v20  ;;  %v17394_v19 = vld [vmem:[%s18557_s2 + $0x1474] sm:$0xf0] }
 0x437   : > { %6295 = vmatpush.bf16.msra.mxu3 %v14021_v25  ;;  %v14204_v25 = vor.u32 %v17369_v17, %v14203_v15  ;;  %v14208_v32 = vor.u32 %v17368_v24, %v14205_v33  ;;  %v14173_v15 = vld [vmem:[%s18557_s2 + $0x1388] sm:$0xf0]  ;;  %v14326_v17 = vld [vmem:[%s18557_s2 + $0x1470] sm:$0xf]  ;;  %v14108_v24 = vor.u32 %v17345_v13, %v14107_v6  ;;  %v17410_v33 = vld [vmem:[%s18557_s2 + $0x14f4] sm:$0xf0] }
 0x438   : > { %v14390_v20 = vld [vmem:[%s18557_s2 + $0x14f0] sm:$0xf]  ;;  %v14304_v6 = vld [vmem:[%s18557_s2 + $0x1448] sm:$0xf0] }
 0x439   : > { %6257 = vmatpush.bf16.msra.mxu0 %v13945_v41  ;;  %v5227_v28 = vpop.f32.mrf.mxu0 }
 0x43a   : > { %6270 = vmatpush.bf16.msra.mxu1 %v14009_v39  ;;  %6283 = vmatpush.bf16.msra.mxu2 %v13949_v3  ;;  %v5240_v52 = vpop.f32.mrf.mxu1  ;;  %v14196_v39 = vor.u32 %v17367_v34, %v14195_v29  ;;  %v14136_v3 = vor.u32 %v17350_v35, %v14133_v36  ;;  %v14176_v29 = vor.u32 %v17360_v23, %v14173_v15  ;;  %v6312_v34 = vld [vmem:[%s6310_s15 + $0x8] sm:$0xff]  ;;  %v14294_v23 = vld [vmem:[%s18557_s2 + $0x1430] sm:$0xf]  ;;  %s7342_s15 = scalar_lea.vmem [#allocation2], %s17483_s25  ;;  %s17623_s25 = sshll.u32 %s20931_s24, 4 }
 0x43b   : > { %6296 = vmatpush.bf16.msra.mxu3 %v14013_v44  ;;  %v5241_v22 = vadd.f32 %v5240_v52, %v5227_v28  ;;  %v17393_v52 = vld [vmem:[%s18557_s2 + $0x1474] sm:$0xf]  ;;  %v14391_v35 = vor.u32 %v17410_v33, %v14390_v20  ;;  %v17386_v15 = vld [vmem:[%s18557_s2 + $0x1434] sm:$0xf0]  ;;  %s17763_s24 = sshll.u32 %s21235_s29, 4 }
 0x43c   : > { %6258 = vmatmul.bf16.vlgmr.msra.gmra.mxu0 %v6055_v56  ;;  %v17385_v20 = vld [vmem:[%s18557_s2 + $0x1434] sm:$0xf] }
 0x43d   : > { %6508 = vmatpush.bf16.msrb.mxu0 %v14164_v45  ;;  %6271 = vmatmul.bf16.vlgmr.msra.gmra.mxu1 %v6056_v58  ;;  %v20319_v41 = vadd.f32 %v5241_v22, %v20243_v55  ;;  %v14187_v55 = vld [vmem:[%s18557_s2 + $0x13a0] sm:$0xf]  ;;  %v17365_v45 = vld [vmem:[%s18557_s2 + $0x13a4] sm:$0xf0]  ;;  %v17401_v33 = vld [vmem:[%s18557_s2 + $0x14b4] sm:$0xf] }
 0x43e   : > { %6521 = vmatpush.bf16.msrb.mxu1 %v14228_v49  ;;  %6534 = vmatpush.bf16.msrb.mxu2 %v14168_v50  ;;  %v14125_v49 = vld [vmem:[%s18557_s2 + $0x1328] sm:$0xf0]  ;;  %v14188_v62 = vor.u32 %v17365_v45, %v14187_v55 }
 0x43f   : > { %6547 = vmatpush.bf16.msrb.mxu3 %v14232_v54  ;;  %6284 = vmatmul.bf16.vlgmr.msra.gmra.mxu2 %v6055_v56  ;;  %v14124_v56 = vor.u32 %v17349_v47, %v14123_v42  ;;  %v14128_v4 = vor.u32 %v17348_v48, %v14125_v49  ;;  %v17408_v42 = vld [vmem:[%s18557_s2 + $0x14e4] sm:$0xf0]  ;;  %v17391_v47 = vld [vmem:[%s18557_s2 + $0x1464] sm:$0xf]  ;;  %v14320_v55 = vld [vmem:[%s18557_s2 + $0x1468] sm:$0xf0]  ;;  %v14319_v48 = vor.u32 %v17392_v37, %v14318_v46 }
 0x440   : > { %6297 = vmatmul.bf16.vlgmr.msra.gmra.mxu3 %v6056_v58  ;;  %v14115_v58 = vld [vmem:[%s18557_s2 + $0x1310] sm:$0xf]  ;;  %v14384_v45 = vld [vmem:[%s18557_s2 + $0x14e8] sm:$0xf0]  ;;  %v17399_v46 = vld [vmem:[%s18557_s2 + $0x14a4] sm:$0xf] }
 0x441   : > { %6509 = vmatpush.bf16.msrb.mxu0 %v14156_v31  ;;  %v5229_v53 = vpop.f32.mrf.mxu0  ;;  %v14116_v5 = vor.u32 %v17347_v59, %v14115_v58  ;;  %v14376_v58 = vld [vmem:[%s18557_s2 + $0x14d8] sm:$0xf0]  ;;  %v14352_v37 = vld [vmem:[%s18557_s2 + $0x14a8] sm:$0xf0] }
 0x442   : > { %6522 = vmatpush.bf16.msrb.mxu1 %v14220_v61  ;;  %6535 = vmatpush.bf16.msrb.mxu2 %v14160_v63  ;;  %v5253_v44 = vpop.f32.mrf.mxu2  ;;  %v5242_v57 = vpop.f32.mrf.mxu1  ;;  %v14192_v61 = vor.u32 %v17364_v60, %v14189_v51  ;;  %v17363_v63 = vld [vmem:[%s18557_s2 + $0x1394] sm:$0xf0]  ;;  %v14310_v60 = vld [vmem:[%s18557_s2 + $0x1450] sm:$0xf] }
 0x443   : > { %6548 = vmatpush.bf16.msrb.mxu3 %v14224_v2  ;;  %v5266_v50 = vpop.f32.mrf.mxu3  ;;  %v14181_v2 = vld [vmem:[%s18557_s2 + $0x1398] sm:$0xf0]  ;;  %v17390_v51 = vld [vmem:[%s18557_s2 + $0x1454] sm:$0xf0]  ;;  %v14374_v53 = vld [vmem:[%s18557_s2 + $0x14d0] sm:$0xf] }
 0x444   : > { %v5267_v54 = vadd.f32 %v5266_v50, %v5253_v44  ;;  %v17407_v44 = vld [vmem:[%s18557_s2 + $0x14e4] sm:$0xf]  ;;  %v14323_v50 = vor.u32 %v17391_v47, %v14320_v55  ;;  %v17389_v57 = vld [vmem:[%s18557_s2 + $0x1454] sm:$0xf]  ;;  %v14311_v59 = vor.u32 %v17390_v51, %v14310_v60  ;;  %v14280_v51 = vld [vmem:[%s18557_s2 + $0x1418] sm:$0xf0] }
 0x445   : > { %6510 = vmatpush.bf16.msrb.mxu0 %v14148_v8  ;;  %v17361_v8 = vld [vmem:[%s18557_s2 + $0x1384] sm:$0xf0]  ;;  %v17381_v60 = vld [vmem:[%s18557_s2 + $0x1414] sm:$0xf] }
 0x446   : > { %6523 = vmatpush.bf16.msrb.mxu1 %v14212_v9  ;;  %6536 = vmatpush.bf16.msrb.mxu2 %v14152_v12  ;;  %v20338_v31 = vadd.f32 %v5267_v54, %v20262_v11  ;;  %v14180_v11 = vor.u32 %v17363_v63, %v14179_v30  ;;  %v17344_v9 = vld [vmem:[%s18557_s2 + $0x1304] sm:$0xf]  ;;  %v14184_v12 = vor.u32 %v17362_v1, %v14181_v2  ;;  %v14302_v63 = vld [vmem:[%s18557_s2 + $0x1440] sm:$0xf]  ;;  %v17404_v2 = vld [vmem:[%s18557_s2 + $0x14c4] sm:$0xf0] }
 0x447   : > { %6549 = vmatpush.bf16.msrb.mxu3 %v14216_v16  ;;  %v14172_v22 = vor.u32 %v17361_v8, %v14171_v7  ;;  %v14387_v54 = vor.u32 %v17407_v44, %v14384_v45  ;;  %v14303_v8 = vor.u32 %v17388_v10, %v14302_v63  ;;  %v17382_v44 = vld [vmem:[%s18557_s2 + $0x1414] sm:$0xf0]  ;;  %v14342_v45 = vld [vmem:[%s18557_s2 + $0x1490] sm:$0xf]  ;;  %v14272_v63 = vld [vmem:[%s18557_s2 + $0x1408] sm:$0xf0] }
 0x448   : > { %v17395_v10 = vld [vmem:[%s18557_s2 + $0x1484] sm:$0xf] }
 0x449   : > { %6511 = vmatpush.bf16.msrb.mxu0 %v14140_v21  ;;  %v14328_v21 = vld [vmem:[%s18557_s2 + $0x1478] sm:$0xf0] }
 0x44a   : > { %6524 = vmatpush.bf16.msrb.mxu1 %v14204_v25  ;;  %6537 = vmatpush.bf16.msrb.mxu2 %v14144_v26  ;;  %v5255_v16 = vpop.f32.mrf.mxu2  ;;  %v14112_v25 = vor.u32 %v17344_v9, %v14109_v14  ;;  %v17409_v26 = vld [vmem:[%s18557_s2 + $0x14f4] sm:$0xf]  ;;  %v14331_v36 = vor.u32 %v17393_v52, %v14328_v21  ;;  %v14360_v52 = vld [vmem:[%s18557_s2 + $0x14b8] sm:$0xf0]  ;;  %v14295_v21 = vor.u32 %v17386_v15, %v14294_v23 }
 0x44b   : > { %6550 = vmatpush.bf16.msrb.mxu3 %v14208_v32  ;;  %v5268_v28 = vpop.f32.mrf.mxu3  ;;  %v14327_v32 = vor.u32 %v17394_v19, %v14326_v17  ;;  %v14358_v16 = vld [vmem:[%s18557_s2 + $0x14b0] sm:$0xf]  ;;  %v17402_v19 = vld [vmem:[%s18557_s2 + $0x14b4] sm:$0xf0]  ;;  %v14555_v23 = vld [vmem:[%s18557_s2 + $0x15f8] sm:$0xf0] }
 0x44c   : > { %v14296_v28 = vld [vmem:[%s18557_s2 + $0x1438] sm:$0xf0]  ;;  %v6569_v15 = vld [vmem:[%s6568_s17] sm:$0xff] }
 0x44d   : > { %6512 = vmatpush.bf16.msrb.mxu0 %v14132_v38  ;;  %v14382_v38 = vld [vmem:[%s18557_s2 + $0x14e0] sm:$0xf] }
 0x44e   : > { %6525 = vmatpush.bf16.msrb.mxu1 %v14196_v39  ;;  %6538 = vmatpush.bf16.msrb.mxu2 %v14136_v3  ;;  %v14395_v39 = vor.u32 %v17409_v26, %v14392_v40  ;;  %v6313_v3 = vpack.c.bf16 %v6311_v27, %v6311_v27  ;;  %v14383_v49 = vor.u32 %v17408_v42, %v14382_v38  ;;  %v14286_v26 = vld [vmem:[%s18557_s2 + $0x1420] sm:$0xf]  ;;  %v17384_v40 = vld [vmem:[%s18557_s2 + $0x1424] sm:$0xf0] }
 0x44f   : > { %6551 = vmatpush.bf16.msrb.mxu3 %v14200_v43  ;;  %v6314_v43 = vpack.c.bf16 %v6312_v34, %v6312_v34  ;;  %v14363_v27 = vor.u32 %v17401_v33, %v14360_v52  ;;  %v17383_v34 = vld [vmem:[%s18557_s2 + $0x1424] sm:$0xf]  ;;  %v14481_v33 = vld [vmem:[%s18557_s2 + $0x1560] sm:$0xf]  ;;  %v17427_v52 = vld [vmem:[%s18557_s2 + $0x1564] sm:$0xf0] }
 0x451   : > { %6513 = vmatpush.bf16.msrb.mxu0 %v14124_v56  ;;  %v17406_v56 = vld [vmem:[%s18557_s2 + $0x14d4] sm:$0xf0] }
 0x452   : > { %6526 = vmatpush.bf16.msrb.mxu1 %v14188_v62  ;;  %6539 = vmatpush.bf16.msrb.mxu2 %v14128_v4  ;;  %v14312_v62 = vld [vmem:[%s18557_s2 + $0x1458] sm:$0xf0]  ;;  %v17405_v4 = vld [vmem:[%s18557_s2 + $0x14d4] sm:$0xf]  ;;  %v14375_v30 = vor.u32 %v17406_v56, %v14374_v53 }
 0x453   : > { %6552 = vmatpush.bf16.msrb.mxu3 %v14192_v61  ;;  %v14315_v61 = vor.u32 %v17389_v57, %v14312_v62  ;;  %v14379_v1 = vor.u32 %v17405_v4, %v14376_v58  ;;  %v17397_v53 = vld [vmem:[%s18557_s2 + $0x1494] sm:$0xf]  ;;  %v14270_v57 = vld [vmem:[%s18557_s2 + $0x1400] sm:$0xf]  ;;  %v17380_v62 = vld [vmem:[%s18557_s2 + $0x1404] sm:$0xf0]  ;;  %v14283_v4 = vor.u32 %v17381_v60, %v14280_v51 }
 0x454   : > { %v14334_v58 = vld [vmem:[%s18557_s2 + $0x1480] sm:$0xf]  ;;  %v17423_v60 = vld [vmem:[%s18557_s2 + $0x1544] sm:$0xf0] }
 0x455   : > { %6514 = vmatpush.bf16.msrb.mxu0 %v14116_v5  ;;  %v17387_v5 = vld [vmem:[%s18557_s2 + $0x1444] sm:$0xf]  ;;  %v14529_v51 = vld [vmem:[%s18557_s2 + $0x15c0] sm:$0xf] }
 0x456   : > { %6527 = vmatpush.bf16.msrb.mxu1 %v14180_v11  ;;  %6540 = vmatpush.bf16.msrb.mxu2 %v14120_v18  ;;  %v17403_v11 = vld [vmem:[%s18557_s2 + $0x14c4] sm:$0xf]  ;;  %v14368_v18 = vld [vmem:[%s18557_s2 + $0x14c8] sm:$0xf0]  ;;  %v14307_v14 = vor.u32 %v17387_v5, %v14304_v6  ;;  %v17429_v5 = vld [vmem:[%s18557_s2 + $0x1574] sm:$0xf0] }
 0x457   : > { %6553 = vmatpush.bf16.msrb.mxu3 %v14184_v12  ;;  %v14367_v12 = vor.u32 %v17404_v2, %v14366_v0  ;;  %v14371_v17 = vor.u32 %v17403_v11, %v14368_v18  ;;  %v14336_v0 = vld [vmem:[%s18557_s2 + $0x1488] sm:$0xf0]  ;;  %v14489_v2 = vld [vmem:[%s18557_s2 + $0x1570] sm:$0xf]  ;;  %v14271_v11 = vor.u32 %v17380_v62, %v14270_v57  ;;  %v17445_v18 = vld [vmem:[%s18557_s2 + $0x15f4] sm:$0xf0] }
 0x458   : > { %v14553_v6 = vld [vmem:[%s18557_s2 + $0x15f0] sm:$0xf]  ;;  %v14467_v57 = vld [vmem:[%s18557_s2 + $0x1548] sm:$0xf0] }
 0x459   : > { %6515 = vmatpush.bf16.msrb.mxu0 %v14108_v24  ;;  %v5485_v13 = vpop.f32.mrf.mxu0 }
 0x45a   : > { %6528 = vmatpush.bf16.msrb.mxu1 %v14172_v22  ;;  %6541 = vmatpush.bf16.msrb.mxu2 %v14112_v25  ;;  %v5498_v7 = vpop.f32.mrf.mxu1  ;;  %v14359_v22 = vor.u32 %v17402_v19, %v14358_v16  ;;  %v14299_v25 = vor.u32 %v17385_v20, %v14296_v28  ;;  %v14339_v16 = vor.u32 %v17395_v10, %v14336_v0  ;;  %v6570_v19 = vld [vmem:[%s6568_s17 + $0x8] sm:$0xff]  ;;  %v14457_v10 = vld [vmem:[%s18557_s2 + $0x1530] sm:$0xf]  ;;  %s7600_s17 = scalar_lea.vmem [#allocation2], %s17518_s1  ;;  %s17658_s1 = sshll.u32 %s21007_s13, 4 }
 0x45b   : > { %6554 = vmatpush.bf16.msrb.mxu3 %v14176_v29  ;;  %v5499_v9 = vadd.f32 %v5498_v7, %v5485_v13  ;;  %v17428_v7 = vld [vmem:[%s18557_s2 + $0x1574] sm:$0xf]  ;;  %v14554_v20 = vor.u32 %v17445_v18, %v14553_v6  ;;  %v17421_v0 = vld [vmem:[%s18557_s2 + $0x1534] sm:$0xf0] }
 0x45c   : > { %6516 = vmatmul.bf16.vlgmr.msrb.gmra.mxu0 %v6313_v3  ;;  %v17420_v6 = vld [vmem:[%s18557_s2 + $0x1534] sm:$0xf] }
 0x45d   : > { %6766 = vmatpush.bf16.msra.mxu0 %v14327_v32  ;;  %6529 = vmatmul.bf16.vlgmr.msrb.gmra.mxu1 %v6314_v43  ;;  %v20395_v24 = vadd.f32 %v5499_v9, %v20319_v41  ;;  %v14350_v41 = vld [vmem:[%s18557_s2 + $0x14a0] sm:$0xf]  ;;  %v17400_v32 = vld [vmem:[%s18557_s2 + $0x14a4] sm:$0xf0]  ;;  %v17436_v18 = vld [vmem:[%s18557_s2 + $0x15b4] sm:$0xf] }
 0x45e   : > { %6779 = vmatpush.bf16.msra.mxu1 %v14391_v35  ;;  %6792 = vmatpush.bf16.msra.mxu2 %v14331_v36  ;;  %v14288_v35 = vld [vmem:[%s18557_s2 + $0x1428] sm:$0xf0]  ;;  %v14351_v47 = vor.u32 %v17400_v32, %v14350_v41 }
 0x45f   : > { %6805 = vmatpush.bf16.msra.mxu3 %v14395_v39  ;;  %6542 = vmatmul.bf16.vlgmr.msrb.gmra.mxu2 %v6313_v3  ;;  %v14287_v3 = vor.u32 %v17384_v40, %v14286_v26  ;;  %v14291_v55 = vor.u32 %v17383_v34, %v14288_v35  ;;  %v17443_v26 = vld [vmem:[%s18557_s2 + $0x15e4] sm:$0xf0]  ;;  %v17426_v40 = vld [vmem:[%s18557_s2 + $0x1564] sm:$0xf]  ;;  %v14483_v41 = vld [vmem:[%s18557_s2 + $0x1568] sm:$0xf0]  ;;  %v14482_v34 = vor.u32 %v17427_v52, %v14481_v33 }
 0x460   : > { %6555 = vmatmul.bf16.vlgmr.msrb.gmra.mxu3 %v6314_v43  ;;  %v14278_v43 = vld [vmem:[%s18557_s2 + $0x1410] sm:$0xf]  ;;  %v14547_v32 = vld [vmem:[%s18557_s2 + $0x15e8] sm:$0xf0]  ;;  %v17434_v33 = vld [vmem:[%s18557_s2 + $0x15a4] sm:$0xf] }
 0x461   : > { %6767 = vmatpush.bf16.msra.mxu0 %v14319_v48  ;;  %v5487_v38 = vpop.f32.mrf.mxu0  ;;  %v14279_v56 = vor.u32 %v17382_v44, %v14278_v43  ;;  %v14539_v43 = vld [vmem:[%s18557_s2 + $0x15d8] sm:$0xf0]  ;;  %v14515_v52 = vld [vmem:[%s18557_s2 + $0x15a8] sm:$0xf0] }
 0x462   : > { %6780 = vmatpush.bf16.msra.mxu1 %v14383_v49  ;;  %6793 = vmatpush.bf16.msra.mxu2 %v14323_v50  ;;  %v5511_v29 = vpop.f32.mrf.mxu2  ;;  %v5500_v42 = vpop.f32.mrf.mxu1  ;;  %v14355_v49 = vor.u32 %v17399_v46, %v14352_v37  ;;  %v17398_v50 = vld [vmem:[%s18557_s2 + $0x1494] sm:$0xf0]  ;;  %v14473_v46 = vld [vmem:[%s18557_s2 + $0x1550] sm:$0xf] }
 0x463   : > { %6806 = vmatpush.bf16.msra.mxu3 %v14387_v54  ;;  %v5524_v36 = vpop.f32.mrf.mxu3  ;;  %v14344_v54 = vld [vmem:[%s18557_s2 + $0x1498] sm:$0xf0]  ;;  %v17425_v37 = vld [vmem:[%s18557_s2 + $0x1554] sm:$0xf0]  ;;  %v14537_v38 = vld [vmem:[%s18557_s2 + $0x15d0] sm:$0xf] }
 0x464   : > { %v5525_v39 = vadd.f32 %v5524_v36, %v5511_v29  ;;  %v17442_v29 = vld [vmem:[%s18557_s2 + $0x15e4] sm:$0xf]  ;;  %v14486_v36 = vor.u32 %v17426_v40, %v14483_v41  ;;  %v17424_v42 = vld [vmem:[%s18557_s2 + $0x1554] sm:$0xf]  ;;  %v14474_v44 = vor.u32 %v17425_v37, %v14473_v46  ;;  %v14443_v37 = vld [vmem:[%s18557_s2 + $0x1518] sm:$0xf0] }
 0x465   : > { %6768 = vmatpush.bf16.msra.mxu0 %v14311_v59  ;;  %v17396_v59 = vld [vmem:[%s18557_s2 + $0x1484] sm:$0xf0]  ;;  %v17416_v46 = vld [vmem:[%s18557_s2 + $0x1514] sm:$0xf] }
 0x466   : > { %6781 = vmatpush.bf16.msra.mxu1 %v14375_v30  ;;  %6794 = vmatpush.bf16.msra.mxu2 %v14315_v61  ;;  %v20414_v48 = vadd.f32 %v5525_v39, %v20338_v31  ;;  %v14343_v31 = vor.u32 %v17398_v50, %v14342_v45  ;;  %v17379_v30 = vld [vmem:[%s18557_s2 + $0x1404] sm:$0xf]  ;;  %v14347_v61 = vor.u32 %v17397_v53, %v14344_v54  ;;  %v14465_v50 = vld [vmem:[%s18557_s2 + $0x1540] sm:$0xf]  ;;  %v17439_v54 = vld [vmem:[%s18557_s2 + $0x15c4] sm:$0xf0] }
 0x467   : > { %6807 = vmatpush.bf16.msra.mxu3 %v14379_v1  ;;  %v14335_v9 = vor.u32 %v17396_v59, %v14334_v58  ;;  %v14550_v39 = vor.u32 %v17442_v29, %v14547_v32  ;;  %v14466_v59 = vor.u32 %v17423_v60, %v14465_v50  ;;  %v17417_v29 = vld [vmem:[%s18557_s2 + $0x1514] sm:$0xf0]  ;;  %v14505_v32 = vld [vmem:[%s18557_s2 + $0x1590] sm:$0xf]  ;;  %v14435_v50 = vld [vmem:[%s18557_s2 + $0x1508] sm:$0xf0] }
 0x468   : > { %v17430_v60 = vld [vmem:[%s18557_s2 + $0x1584] sm:$0xf] }
 0x469   : > { %6769 = vmatpush.bf16.msra.mxu0 %v14303_v8  ;;  %v14491_v8 = vld [vmem:[%s18557_s2 + $0x1578] sm:$0xf0] }
 0x46a   : > { %6782 = vmatpush.bf16.msra.mxu1 %v14367_v12  ;;  %6795 = vmatpush.bf16.msra.mxu2 %v14307_v14  ;;  %v5513_v1 = vpop.f32.mrf.mxu2  ;;  %v14275_v12 = vor.u32 %v17379_v30, %v14272_v63  ;;  %v17444_v14 = vld [vmem:[%s18557_s2 + $0x15f4] sm:$0xf]  ;;  %v14494_v28 = vor.u32 %v17428_v7, %v14491_v8  ;;  %v14523_v7 = vld [vmem:[%s18557_s2 + $0x15b8] sm:$0xf0]  ;;  %v14458_v8 = vor.u32 %v17421_v0, %v14457_v10 }
 0x46b   : > { %6808 = vmatpush.bf16.msra.mxu3 %v14371_v17  ;;  %v5526_v13 = vpop.f32.mrf.mxu3  ;;  %v14490_v17 = vor.u32 %v17429_v5, %v14489_v2  ;;  %v14521_v1 = vld [vmem:[%s18557_s2 + $0x15b0] sm:$0xf]  ;;  %v17437_v5 = vld [vmem:[%s18557_s2 + $0x15b4] sm:$0xf0]  ;;  %v14718_v10 = vld [vmem:[%s18557_s2 + $0x16f8] sm:$0xf0] }
 0x46c   : > { %v14459_v13 = vld [vmem:[%s18557_s2 + $0x1538] sm:$0xf0]  ;;  %v6827_v0 = vld [vmem:[%s6826_s30] sm:$0xff] }
 0x46d   : > { %6770 = vmatpush.bf16.msra.mxu0 %v14295_v21  ;;  %v14545_v21 = vld [vmem:[%s18557_s2 + $0x15e0] sm:$0xf] }
 0x46e   : > { %6783 = vmatpush.bf16.msra.mxu1 %v14359_v22  ;;  %6796 = vmatpush.bf16.msra.mxu2 %v14299_v25  ;;  %v14558_v22 = vor.u32 %v17444_v14, %v14555_v23  ;;  %v6571_v25 = vpack.c.bf16 %v6569_v15, %v6569_v15  ;;  %v14546_v35 = vor.u32 %v17443_v26, %v14545_v21  ;;  %v14449_v14 = vld [vmem:[%s18557_s2 + $0x1520] sm:$0xf]  ;;  %v17419_v23 = vld [vmem:[%s18557_s2 + $0x1524] sm:$0xf0] }
 0x46f   : > { %6809 = vmatpush.bf16.msra.mxu3 %v14363_v27  ;;  %v6572_v27 = vpack.c.bf16 %v6570_v19, %v6570_v19  ;;  %v14526_v15 = vor.u32 %v17436_v18, %v14523_v7  ;;  %v17418_v19 = vld [vmem:[%s18557_s2 + $0x1524] sm:$0xf]  ;;  %v14644_v18 = vld [vmem:[%s18557_s2 + $0x1660] sm:$0xf]  ;;  %v17462_v7 = vld [vmem:[%s18557_s2 + $0x1664] sm:$0xf0] }
 0x471   : > { %6771 = vmatpush.bf16.msra.mxu0 %v14287_v3  ;;  %v17441_v3 = vld [vmem:[%s18557_s2 + $0x15d4] sm:$0xf0] }
 0x472   : > { %6784 = vmatpush.bf16.msra.mxu1 %v14351_v47  ;;  %6797 = vmatpush.bf16.msra.mxu2 %v14291_v55  ;;  %v14475_v47 = vld [vmem:[%s18557_s2 + $0x1558] sm:$0xf0]  ;;  %v17440_v55 = vld [vmem:[%s18557_s2 + $0x15d4] sm:$0xf]  ;;  %v14538_v45 = vor.u32 %v17441_v3, %v14537_v38 }
 0x473   : > { %6810 = vmatpush.bf16.msra.mxu3 %v14355_v49  ;;  %v14478_v49 = vor.u32 %v17424_v42, %v14475_v47  ;;  %v14542_v53 = vor.u32 %v17440_v55, %v14539_v43  ;;  %v17432_v38 = vld [vmem:[%s18557_s2 + $0x1594] sm:$0xf]  ;;  %v14433_v42 = vld [vmem:[%s18557_s2 + $0x1500] sm:$0xf]  ;;  %v17415_v47 = vld [vmem:[%s18557_s2 + $0x1504] sm:$0xf0]  ;;  %v14446_v55 = vor.u32 %v17416_v46, %v14443_v37 }
 0x474   : > { %v14497_v43 = vld [vmem:[%s18557_s2 + $0x1580] sm:$0xf]  ;;  %v17458_v46 = vld [vmem:[%s18557_s2 + $0x1644] sm:$0xf0] }
 0x475   : > { %6772 = vmatpush.bf16.msra.mxu0 %v14279_v56  ;;  %v17422_v56 = vld [vmem:[%s18557_s2 + $0x1544] sm:$0xf]  ;;  %v14692_v37 = vld [vmem:[%s18557_s2 + $0x16c0] sm:$0xf] }
 0x476   : > { %6785 = vmatpush.bf16.msra.mxu1 %v14343_v31  ;;  %6798 = vmatpush.bf16.msra.mxu2 %v14283_v4  ;;  %v17438_v31 = vld [vmem:[%s18557_s2 + $0x15c4] sm:$0xf]  ;;  %v14531_v4 = vld [vmem:[%s18557_s2 + $0x15c8] sm:$0xf0]  ;;  %v14470_v63 = vor.u32 %v17422_v56, %v14467_v57  ;;  %v17464_v56 = vld [vmem:[%s18557_s2 + $0x1674] sm:$0xf0] }
 0x477   : > { %6811 = vmatpush.bf16.msra.mxu3 %v14347_v61  ;;  %v14530_v61 = vor.u32 %v17439_v54, %v14529_v51  ;;  %v14534_v2 = vor.u32 %v17438_v31, %v14531_v4  ;;  %v14499_v51 = vld [vmem:[%s18557_s2 + $0x1588] sm:$0xf0]  ;;  %v14652_v54 = vld [vmem:[%s18557_s2 + $0x1670] sm:$0xf]  ;;  %v14434_v31 = vor.u32 %v17415_v47, %v14433_v42  ;;  %v17480_v4 = vld [vmem:[%s18557_s2 + $0x16f4] sm:$0xf0] }
 0x478   : > { %v14716_v57 = vld [vmem:[%s18557_s2 + $0x16f0] sm:$0xf]  ;;  %v14630_v42 = vld [vmem:[%s18557_s2 + $0x1648] sm:$0xf0] }
 0x479   : > { %6773 = vmatpush.bf16.msra.mxu0 %v14271_v11  ;;  %v5743_v62 = vpop.f32.mrf.mxu0 }
 0x47a   : > { %6786 = vmatpush.bf16.msra.mxu1 %v14335_v9  ;;  %6799 = vmatpush.bf16.msra.mxu2 %v14275_v12  ;;  %v5756_v58 = vpop.f32.mrf.mxu1  ;;  %v14522_v9 = vor.u32 %v17437_v5, %v14521_v1  ;;  %v14462_v12 = vor.u32 %v17420_v6, %v14459_v13  ;;  %v14502_v1 = vor.u32 %v17430_v60, %v14499_v51  ;;  %v6828_v5 = vld [vmem:[%s6826_s30 + $0x8] sm:$0xff]  ;;  %v14620_v60 = vld [vmem:[%s18557_s2 + $0x1630] sm:$0xf]  ;;  %s7858_s30 = scalar_lea.vmem [#allocation2], %s17553_s22  ;;  %s17693_s22 = sshll.u32 %s21083_s19, 4 }
 0x47b   : > { %6812 = vmatpush.bf16.msra.mxu3 %v14339_v16  ;;  %v5757_v30 = vadd.f32 %v5756_v58, %v5743_v62  ;;  %v17463_v58 = vld [vmem:[%s18557_s2 + $0x1674] sm:$0xf]  ;;  %v14717_v6 = vor.u32 %v17480_v4, %v14716_v57  ;;  %v17456_v51 = vld [vmem:[%s18557_s2 + $0x1634] sm:$0xf0] }
 0x47c   : > { %6774 = vmatmul.bf16.vlgmr.msra.gmra.mxu0 %v6571_v25  ;;  %v17455_v57 = vld [vmem:[%s18557_s2 + $0x1634] sm:$0xf] }
 0x47d   : > { %7024 = vmatpush.bf16.msrb.mxu0 %v14490_v17  ;;  %6787 = vmatmul.bf16.vlgmr.msra.gmra.mxu1 %v6572_v27  ;;  %v20471_v11 = vadd.f32 %v5757_v30, %v20395_v24  ;;  %v14513_v24 = vld [vmem:[%s18557_s2 + $0x15a0] sm:$0xf]  ;;  %v17435_v17 = vld [vmem:[%s18557_s2 + $0x15a4] sm:$0xf0]  ;;  %v17471_v4 = vld [vmem:[%s18557_s2 + $0x16b4] sm:$0xf] }
 0x47e   : > { %7037 = vmatpush.bf16.msrb.mxu1 %v14554_v20  ;;  %7050 = vmatpush.bf16.msrb.mxu2 %v14494_v28  ;;  %v14451_v20 = vld [vmem:[%s18557_s2 + $0x1528] sm:$0xf0]  ;;  %v14514_v40 = vor.u32 %v17435_v17, %v14513_v24 }
 0x47f   : > { %7063 = vmatpush.bf16.msrb.mxu3 %v14558_v22  ;;  %6800 = vmatmul.bf16.vlgmr.msra.gmra.mxu2 %v6571_v25  ;;  %v14450_v25 = vor.u32 %v17419_v23, %v14449_v14  ;;  %v14454_v41 = vor.u32 %v17418_v19, %v14451_v20  ;;  %v17478_v14 = vld [vmem:[%s18557_s2 + $0x16e4] sm:$0xf0]  ;;  %v17461_v23 = vld [vmem:[%s18557_s2 + $0x1664] sm:$0xf]  ;;  %v14646_v24 = vld [vmem:[%s18557_s2 + $0x1668] sm:$0xf0]  ;;  %v14645_v19 = vor.u32 %v17462_v7, %v14644_v18 }
 0x480   : > { %6813 = vmatmul.bf16.vlgmr.msra.gmra.mxu3 %v6572_v27  ;;  %v14441_v27 = vld [vmem:[%s18557_s2 + $0x1510] sm:$0xf]  ;;  %v14710_v17 = vld [vmem:[%s18557_s2 + $0x16e8] sm:$0xf0]  ;;  %v17469_v18 = vld [vmem:[%s18557_s2 + $0x16a4] sm:$0xf] }
 0x481   : > { %7025 = vmatpush.bf16.msrb.mxu0 %v14482_v34  ;;  %v5745_v21 = vpop.f32.mrf.mxu0  ;;  %v14442_v3 = vor.u32 %v17417_v29, %v14441_v27  ;;  %v14702_v27 = vld [vmem:[%s18557_s2 + $0x16d8] sm:$0xf0]  ;;  %v14678_v7 = vld [vmem:[%s18557_s2 + $0x16a8] sm:$0xf0] }
 0x482   : > { %7038 = vmatpush.bf16.msrb.mxu1 %v14546_v35  ;;  %7051 = vmatpush.bf16.msrb.mxu2 %v14486_v36  ;;  %v5769_v16 = vpop.f32.mrf.mxu2  ;;  %v5758_v26 = vpop.f32.mrf.mxu1  ;;  %v14518_v35 = vor.u32 %v17434_v33, %v14515_v52  ;;  %v17433_v36 = vld [vmem:[%s18557_s2 + $0x1594] sm:$0xf0]  ;;  %v14636_v33 = vld [vmem:[%s18557_s2 + $0x1650] sm:$0xf] }
 0x483   : > { %7064 = vmatpush.bf16.msrb.mxu3 %v14550_v39  ;;  %v5782_v28 = vpop.f32.mrf.mxu3  ;;  %v14507_v39 = vld [vmem:[%s18557_s2 + $0x1598] sm:$0xf0]  ;;  %v17460_v52 = vld [vmem:[%s18557_s2 + $0x1654] sm:$0xf0]  ;;  %v14700_v21 = vld [vmem:[%s18557_s2 + $0x16d0] sm:$0xf] }
 0x484   : > { %v5783_v22 = vadd.f32 %v5782_v28, %v5769_v16  ;;  %v17477_v16 = vld [vmem:[%s18557_s2 + $0x16e4] sm:$0xf]  ;;  %v14649_v28 = vor.u32 %v17461_v23, %v14646_v24  ;;  %v17459_v26 = vld [vmem:[%s18557_s2 + $0x1654] sm:$0xf]  ;;  %v14637_v29 = vor.u32 %v17460_v52, %v14636_v33  ;;  %v14606_v52 = vld [vmem:[%s18557_s2 + $0x1618] sm:$0xf0] }
 0x485   : > { %7026 = vmatpush.bf16.msrb.mxu0 %v14474_v44  ;;  %v17431_v44 = vld [vmem:[%s18557_s2 + $0x1584] sm:$0xf0]  ;;  %v17451_v33 = vld [vmem:[%s18557_s2 + $0x1614] sm:$0xf] }
 0x486   : > { %7039 = vmatpush.bf16.msrb.mxu1 %v14538_v45  ;;  %7052 = vmatpush.bf16.msrb.mxu2 %v14478_v49  ;;  %v20490_v34 = vadd.f32 %v5783_v22, %v20414_v48  ;;  %v14506_v48 = vor.u32 %v17433_v36, %v14505_v32  ;;  %v17414_v45 = vld [vmem:[%s18557_s2 + $0x1504] sm:$0xf]  ;;  %v14510_v49 = vor.u32 %v17432_v38, %v14507_v39  ;;  %v14628_v36 = vld [vmem:[%s18557_s2 + $0x1640] sm:$0xf]  ;;  %v17474_v39 = vld [vmem:[%s18557_s2 + $0x16c4] sm:$0xf0] }
 0x487   : > { %7065 = vmatpush.bf16.msrb.mxu3 %v14542_v53  ;;  %v14498_v30 = vor.u32 %v17431_v44, %v14497_v43  ;;  %v14713_v22 = vor.u32 %v17477_v16, %v14710_v17  ;;  %v14629_v44 = vor.u32 %v17458_v46, %v14628_v36  ;;  %v17452_v16 = vld [vmem:[%s18557_s2 + $0x1614] sm:$0xf0]  ;;  %v14668_v17 = vld [vmem:[%s18557_s2 + $0x1690] sm:$0xf]  ;;  %v14598_v36 = vld [vmem:[%s18557_s2 + $0x1608] sm:$0xf0] }
 0x488   : > { %v17465_v46 = vld [vmem:[%s18557_s2 + $0x1684] sm:$0xf] }
 0x489   : > { %7027 = vmatpush.bf16.msrb.mxu0 %v14466_v59  ;;  %v14654_v59 = vld [vmem:[%s18557_s2 + $0x1678] sm:$0xf0] }
 0x48a   : > { %7040 = vmatpush.bf16.msrb.mxu1 %v14530_v61  ;;  %7053 = vmatpush.bf16.msrb.mxu2 %v14470_v63  ;;  %v5771_v53 = vpop.f32.mrf.mxu2  ;;  %v14438_v61 = vor.u32 %v17414_v45, %v14435_v50  ;;  %v17479_v63 = vld [vmem:[%s18557_s2 + $0x16f4] sm:$0xf]  ;;  %v14657_v13 = vor.u32 %v17463_v58, %v14654_v59  ;;  %v14686_v58 = vld [vmem:[%s18557_s2 + $0x16b8] sm:$0xf0]  ;;  %v14621_v59 = vor.u32 %v17456_v51, %v14620_v60 }
 0x48b   : > { %7066 = vmatpush.bf16.msrb.mxu3 %v14534_v2  ;;  %v5784_v62 = vpop.f32.mrf.mxu3  ;;  %v14653_v2 = vor.u32 %v17464_v56, %v14652_v54  ;;  %v14684_v53 = vld [vmem:[%s18557_s2 + $0x16b0] sm:$0xf]  ;;  %v17472_v56 = vld [vmem:[%s18557_s2 + $0x16b4] sm:$0xf0]  ;;  %v14881_v60 = vld [vmem:[%s18557_s2 + $0x17f8] sm:$0xf0] }
 0x48c   : > { %v14622_v62 = vld [vmem:[%s18557_s2 + $0x1638] sm:$0xf0]  ;;  %v7085_v51 = vld [vmem:[%s7084_s12] sm:$0xff] }
 0x48d   : > { %7028 = vmatpush.bf16.msrb.mxu0 %v14458_v8  ;;  %v14708_v8 = vld [vmem:[%s18557_s2 + $0x16e0] sm:$0xf] }
 0x48e   : > { %7041 = vmatpush.bf16.msrb.mxu1 %v14522_v9  ;;  %7054 = vmatpush.bf16.msrb.mxu2 %v14462_v12  ;;  %v14721_v9 = vor.u32 %v17479_v63, %v14718_v10  ;;  %v6829_v12 = vpack.c.bf16 %v6827_v0, %v6827_v0  ;;  %v14709_v20 = vor.u32 %v17478_v14, %v14708_v8  ;;  %v14612_v63 = vld [vmem:[%s18557_s2 + $0x1620] sm:$0xf]  ;;  %v17454_v10 = vld [vmem:[%s18557_s2 + $0x1624] sm:$0xf0] }
 0x48f   : > { %7067 = vmatpush.bf16.msrb.mxu3 %v14526_v15  ;;  %v6830_v15 = vpack.c.bf16 %v6828_v5, %v6828_v5  ;;  %v14689_v0 = vor.u32 %v17471_v4, %v14686_v58  ;;  %v17453_v5 = vld [vmem:[%s18557_s2 + $0x1624] sm:$0xf]  ;;  %v14807_v4 = vld [vmem:[%s18557_s2 + $0x1760] sm:$0xf]  ;;  %v17497_v58 = vld [vmem:[%s18557_s2 + $0x1764] sm:$0xf0] }
 0x491   : > { %7029 = vmatpush.bf16.msrb.mxu0 %v14450_v25  ;;  %v17476_v25 = vld [vmem:[%s18557_s2 + $0x16d4] sm:$0xf0] }
 0x492   : > { %7042 = vmatpush.bf16.msrb.mxu1 %v14514_v40  ;;  %7055 = vmatpush.bf16.msrb.mxu2 %v14454_v41  ;;  %v14638_v40 = vld [vmem:[%s18557_s2 + $0x1658] sm:$0xf0]  ;;  %v17475_v41 = vld [vmem:[%s18557_s2 + $0x16d4] sm:$0xf]  ;;  %v14701_v32 = vor.u32 %v17476_v25, %v14700_v21 }
 0x493   : > { %7068 = vmatpush.bf16.msrb.mxu3 %v14518_v35  ;;  %v14641_v35 = vor.u32 %v17459_v26, %v14638_v40  ;;  %v14705_v38 = vor.u32 %v17475_v41, %v14702_v27  ;;  %v17467_v21 = vld [vmem:[%s18557_s2 + $0x1694] sm:$0xf]  ;;  %v14596_v26 = vld [vmem:[%s18557_s2 + $0x1600] sm:$0xf]  ;;  %v17450_v40 = vld [vmem:[%s18557_s2 + $0x1604] sm:$0xf0]  ;;  %v14609_v41 = vor.u32 %v17451_v33, %v14606_v52 }
 0x494   : > { %v14660_v27 = vld [vmem:[%s18557_s2 + $0x1680] sm:$0xf]  ;;  %v17493_v33 = vld [vmem:[%s18557_s2 + $0x1744] sm:$0xf0] }
 0x495   : > { %7030 = vmatpush.bf16.msrb.mxu0 %v14442_v3  ;;  %v17457_v3 = vld [vmem:[%s18557_s2 + $0x1644] sm:$0xf]  ;;  %v14855_v52 = vld [vmem:[%s18557_s2 + $0x17c0] sm:$0xf] }
 0x496   : > { %7043 = vmatpush.bf16.msrb.mxu1 %v14506_v48  ;;  %7056 = vmatpush.bf16.msrb.mxu2 %v14446_v55  ;;  %v17473_v48 = vld [vmem:[%s18557_s2 + $0x16c4] sm:$0xf]  ;;  %v14694_v55 = vld [vmem:[%s18557_s2 + $0x16c8] sm:$0xf0]  ;;  %v14633_v50 = vor.u32 %v17457_v3, %v14630_v42  ;;  %v17499_v3 = vld [vmem:[%s18557_s2 + $0x1774] sm:$0xf0] }
 0x497   : > { %7069 = vmatpush.bf16.msrb.mxu3 %v14510_v49  ;;  %v14693_v49 = vor.u32 %v17474_v39, %v14692_v37  ;;  %v14697_v54 = vor.u32 %v17473_v48, %v14694_v55  ;;  %v14662_v37 = vld [vmem:[%s18557_s2 + $0x1688] sm:$0xf0]  ;;  %v14815_v39 = vld [vmem:[%s18557_s2 + $0x1770] sm:$0xf]  ;;  %v14597_v48 = vor.u32 %v17450_v40, %v14596_v26  ;;  %v17515_v55 = vld [vmem:[%s18557_s2 + $0x17f4] sm:$0xf0] }
 0x498   : > { %v14879_v42 = vld [vmem:[%s18557_s2 + $0x17f0] sm:$0xf]  ;;  %v14793_v26 = vld [vmem:[%s18557_s2 + $0x1748] sm:$0xf0] }
 0x499   : > { %7031 = vmatpush.bf16.msrb.mxu0 %v14434_v31  ;;  %v6001_v47 = vpop.f32.mrf.mxu0 }
 0x49a   : > { %7044 = vmatpush.bf16.msrb.mxu1 %v14498_v30  ;;  %7057 = vmatpush.bf16.msrb.mxu2 %v14438_v61  ;;  %v6014_v43 = vpop.f32.mrf.mxu1  ;;  %v14685_v30 = vor.u32 %v17472_v56, %v14684_v53  ;;  %v14625_v61 = vor.u32 %v17455_v57, %v14622_v62  ;;  %v14665_v53 = vor.u32 %v17465_v46, %v14662_v37  ;;  %v7086_v56 = vld [vmem:[%s7084_s12 + $0x8] sm:$0xff]  ;;  %v14783_v46 = vld [vmem:[%s18557_s2 + $0x1730] sm:$0xf]  ;;  %s8116_s12 = scalar_lea.vmem [#allocation2], %s17588_s18  ;;  %s17728_s18 = sshll.u32 %s21159_s14, 4 }
 0x49b   : > { %7070 = vmatpush.bf16.msrb.mxu3 %v14502_v1  ;;  %v6015_v45 = vadd.f32 %v6014_v43, %v6001_v47  ;;  %v17498_v43 = vld [vmem:[%s18557_s2 + $0x1774] sm:$0xf]  ;;  %v14880_v57 = vor.u32 %v17515_v55, %v14879_v42  ;;  %v17491_v37 = vld [vmem:[%s18557_s2 + $0x1734] sm:$0xf0] }
 0x49c   : > { %7032 = vmatmul.bf16.vlgmr.msrb.gmra.mxu0 %v6829_v12  ;;  %v17490_v42 = vld [vmem:[%s18557_s2 + $0x1734] sm:$0xf] }
 0x49d   : > { %7282 = vmatpush.bf16.msra.mxu0 %v14653_v2  ;;  %7045 = vmatmul.bf16.vlgmr.msrb.gmra.mxu1 %v6830_v15  ;;  %v20547_v31 = vadd.f32 %v6015_v45, %v20471_v11  ;;  %v14676_v11 = vld [vmem:[%s18557_s2 + $0x16a0] sm:$0xf]  ;;  %v17470_v2 = vld [vmem:[%s18557_s2 + $0x16a4] sm:$0xf0]  ;;  %v17506_v55 = vld [vmem:[%s18557_s2 + $0x17b4] sm:$0xf] }
 0x49e   : > { %7295 = vmatpush.bf16.msra.mxu1 %v14717_v6  ;;  %7308 = vmatpush.bf16.msra.mxu2 %v14657_v13  ;;  %v14614_v6 = vld [vmem:[%s18557_s2 + $0x1628] sm:$0xf0]  ;;  %v14677_v23 = vor.u32 %v17470_v2, %v14676_v11 }
 0x49f   : > { %7321 = vmatpush.bf16.msra.mxu3 %v14721_v9  ;;  %7058 = vmatmul.bf16.vlgmr.msrb.gmra.mxu2 %v6829_v12  ;;  %v14613_v12 = vor.u32 %v17454_v10, %v14612_v63  ;;  %v14617_v24 = vor.u32 %v17453_v5, %v14614_v6  ;;  %v17513_v63 = vld [vmem:[%s18557_s2 + $0x17e4] sm:$0xf0]  ;;  %v17496_v10 = vld [vmem:[%s18557_s2 + $0x1764] sm:$0xf]  ;;  %v14809_v11 = vld [vmem:[%s18557_s2 + $0x1768] sm:$0xf0]  ;;  %v14808_v5 = vor.u32 %v17497_v58, %v14807_v4 }
 0x4a0   : > { %7071 = vmatmul.bf16.vlgmr.msrb.gmra.mxu3 %v6830_v15  ;;  %v14604_v15 = vld [vmem:[%s18557_s2 + $0x1610] sm:$0xf]  ;;  %v14873_v2 = vld [vmem:[%s18557_s2 + $0x17e8] sm:$0xf0]  ;;  %v17504_v4 = vld [vmem:[%s18557_s2 + $0x17a4] sm:$0xf] }
 0x4a1   : > { %7283 = vmatpush.bf16.msra.mxu0 %v14645_v19  ;;  %v6003_v8 = vpop.f32.mrf.mxu0  ;;  %v14605_v25 = vor.u32 %v17452_v16, %v14604_v15  ;;  %v14865_v15 = vld [vmem:[%s18557_s2 + $0x17d8] sm:$0xf0]  ;;  %v14841_v58 = vld [vmem:[%s18557_s2 + $0x17a8] sm:$0xf0] }
 0x4a2   : > { %7296 = vmatpush.bf16.msra.mxu1 %v14709_v20  ;;  %7309 = vmatpush.bf16.msra.mxu2 %v14649_v28  ;;  %v6027_v1 = vpop.f32.mrf.mxu2  ;;  %v6016_v14 = vpop.f32.mrf.mxu1  ;;  %v14681_v20 = vor.u32 %v17469_v18, %v14678_v7  ;;  %v17468_v28 = vld [vmem:[%s18557_s2 + $0x1694] sm:$0xf0]  ;;  %v14799_v18 = vld [vmem:[%s18557_s2 + $0x1750] sm:$0xf] }
 0x4a3   : > { %7322 = vmatpush.bf16.msra.mxu3 %v14713_v22  ;;  %v6040_v13 = vpop.f32.mrf.mxu3  ;;  %v14670_v22 = vld [vmem:[%s18557_s2 + $0x1698] sm:$0xf0]  ;;  %v17495_v7 = vld [vmem:[%s18557_s2 + $0x1754] sm:$0xf0]  ;;  %v14863_v8 = vld [vmem:[%s18557_s2 + $0x17d0] sm:$0xf] }
 0x4a4   : > { %v6041_v9 = vadd.f32 %v6040_v13, %v6027_v1  ;;  %v17512_v1 = vld [vmem:[%s18557_s2 + $0x17e4] sm:$0xf]  ;;  %v14812_v13 = vor.u32 %v17496_v10, %v14809_v11  ;;  %v17494_v14 = vld [vmem:[%s18557_s2 + $0x1754] sm:$0xf]  ;;  %v14800_v16 = vor.u32 %v17495_v7, %v14799_v18  ;;  %v14769_v7 = vld [vmem:[%s18557_s2 + $0x1718] sm:$0xf0] }
 0x4a5   : > { %7284 = vmatpush.bf16.msra.mxu0 %v14637_v29  ;;  %v17466_v29 = vld [vmem:[%s18557_s2 + $0x1684] sm:$0xf0]  ;;  %v17486_v18 = vld [vmem:[%s18557_s2 + $0x1714] sm:$0xf] }
 0x4a6   : > { %7297 = vmatpush.bf16.msra.mxu1 %v14701_v32  ;;  %7310 = vmatpush.bf16.msra.mxu2 %v14641_v35  ;;  %v20566_v19 = vadd.f32 %v6041_v9, %v20490_v34  ;;  %v14669_v34 = vor.u32 %v17468_v28, %v14668_v17  ;;  %v17449_v32 = vld [vmem:[%s18557_s2 + $0x1604] sm:$0xf]  ;;  %v14673_v35 = vor.u32 %v17467_v21, %v14670_v22  ;;  %v14791_v28 = vld [vmem:[%s18557_s2 + $0x1740] sm:$0xf]  ;;  %v17509_v22 = vld [vmem:[%s18557_s2 + $0x17c4] sm:$0xf0] }
 0x4a7   : > { %7323 = vmatpush.bf16.msra.mxu3 %v14705_v38  ;;  %v14661_v45 = vor.u32 %v17466_v29, %v14660_v27  ;;  %v14876_v9 = vor.u32 %v17512_v1, %v14873_v2  ;;  %v14792_v29 = vor.u32 %v17493_v33, %v14791_v28  ;;  %v17487_v1 = vld [vmem:[%s18557_s2 + $0x1714] sm:$0xf0]  ;;  %v14831_v2 = vld [vmem:[%s18557_s2 + $0x1790] sm:$0xf]  ;;  %v14761_v28 = vld [vmem:[%s18557_s2 + $0x1708] sm:$0xf0] }
 0x4a8   : > { %v17500_v33 = vld [vmem:[%s18557_s2 + $0x1784] sm:$0xf] }
 0x4a9   : > { %7285 = vmatpush.bf16.msra.mxu0 %v14629_v44  ;;  %v14817_v44 = vld [vmem:[%s18557_s2 + $0x1778] sm:$0xf0] }
 0x4aa   : > { %7298 = vmatpush.bf16.msra.mxu1 %v14693_v49  ;;  %7311 = vmatpush.bf16.msra.mxu2 %v14633_v50  ;;  %v6029_v38 = vpop.f32.mrf.mxu2  ;;  %v14601_v49 = vor.u32 %v17449_v32, %v14598_v36  ;;  %v17514_v50 = vld [vmem:[%s18557_s2 + $0x17f4] sm:$0xf]  ;;  %v14820_v62 = vor.u32 %v17498_v43, %v14817_v44  ;;  %v14849_v43 = vld [vmem:[%s18557_s2 + $0x17b8] sm:$0xf0]  ;;  %v14784_v44 = vor.u32 %v17491_v37, %v14783_v46 }
 0x4ab   : > { %7324 = vmatpush.bf16.msra.mxu3 %v14697_v54  ;;  %v6042_v47 = vpop.f32.mrf.mxu3  ;;  %v14816_v54 = vor.u32 %v17499_v3, %v14815_v39  ;;  %v14847_v38 = vld [vmem:[%s18557_s2 + $0x17b0] sm:$0xf]  ;;  %v17507_v3 = vld [vmem:[%s18557_s2 + $0x17b4] sm:$0xf0]  ;;  %v15044_v46 = vld [vmem:[%s18557_s2 + $0x18f8] sm:$0xf0] }
 0x4ac   : > { %v14785_v47 = vld [vmem:[%s18557_s2 + $0x1738] sm:$0xf0]  ;;  %v7343_v37 = vld [vmem:[%s7342_s15] sm:$0xff] }
 0x4ad   : > { %7286 = vmatpush.bf16.msra.mxu0 %v14621_v59  ;;  %v14871_v59 = vld [vmem:[%s18557_s2 + $0x17e0] sm:$0xf] }
 0x4ae   : > { %7299 = vmatpush.bf16.msra.mxu1 %v14685_v30  ;;  %7312 = vmatpush.bf16.msra.mxu2 %v14625_v61  ;;  %v14884_v30 = vor.u32 %v17514_v50, %v14881_v60  ;;  %v7087_v61 = vpack.c.bf16 %v7085_v51, %v7085_v51  ;;  %v14872_v6 = vor.u32 %v17513_v63, %v14871_v59  ;;  %v14775_v50 = vld [vmem:[%s18557_s2 + $0x1720] sm:$0xf]  ;;  %v17489_v60 = vld [vmem:[%s18557_s2 + $0x1724] sm:$0xf0] }
 0x4af   : > { %7325 = vmatpush.bf16.msra.mxu3 %v14689_v0  ;;  %v7088_v0 = vpack.c.bf16 %v7086_v56, %v7086_v56  ;;  %v14852_v51 = vor.u32 %v17506_v55, %v14849_v43  ;;  %v17488_v56 = vld [vmem:[%s18557_s2 + $0x1724] sm:$0xf]  ;;  %v14970_v55 = vld [vmem:[%s18557_s2 + $0x1860] sm:$0xf]  ;;  %v17532_v43 = vld [vmem:[%s18557_s2 + $0x1864] sm:$0xf0] }
 0x4b1   : > { %7287 = vmatpush.bf16.msra.mxu0 %v14613_v12  ;;  %v17511_v12 = vld [vmem:[%s18557_s2 + $0x17d4] sm:$0xf0] }
 0x4b2   : > { %7300 = vmatpush.bf16.msra.mxu1 %v14677_v23  ;;  %7313 = vmatpush.bf16.msra.mxu2 %v14617_v24  ;;  %v14801_v23 = vld [vmem:[%s18557_s2 + $0x1758] sm:$0xf0]  ;;  %v17510_v24 = vld [vmem:[%s18557_s2 + $0x17d4] sm:$0xf]  ;;  %v14864_v17 = vor.u32 %v17511_v12, %v14863_v8 }
 0x4b3   : > { %7326 = vmatpush.bf16.msra.mxu3 %v14681_v20  ;;  %v14804_v20 = vor.u32 %v17494_v14, %v14801_v23  ;;  %v14868_v21 = vor.u32 %v17510_v24, %v14865_v15  ;;  %v17502_v8 = vld [vmem:[%s18557_s2 + $0x1794] sm:$0xf]  ;;  %v14759_v14 = vld [vmem:[%s18557_s2 + $0x1700] sm:$0xf]  ;;  %v17485_v23 = vld [vmem:[%s18557_s2 + $0x1704] sm:$0xf0]  ;;  %v14772_v24 = vor.u32 %v17486_v18, %v14769_v7 }
 0x4b4   : > { %v14823_v15 = vld [vmem:[%s18557_s2 + $0x1780] sm:$0xf]  ;;  %v17528_v18 = vld [vmem:[%s18557_s2 + $0x1844] sm:$0xf0] }
 0x4b5   : > { %7288 = vmatpush.bf16.msra.mxu0 %v14605_v25  ;;  %v17492_v25 = vld [vmem:[%s18557_s2 + $0x1744] sm:$0xf]  ;;  %v15018_v7 = vld [vmem:[%s18557_s2 + $0x18c0] sm:$0xf] }
 0x4b6   : > { %7301 = vmatpush.bf16.msra.mxu1 %v14669_v34  ;;  %7314 = vmatpush.bf16.msra.mxu2 %v14609_v41  ;;  %v17508_v34 = vld [vmem:[%s18557_s2 + $0x17c4] sm:$0xf]  ;;  %v14857_v41 = vld [vmem:[%s18557_s2 + $0x17c8] sm:$0xf0]  ;;  %v14796_v36 = vor.u32 %v17492_v25, %v14793_v26  ;;  %v17534_v25 = vld [vmem:[%s18557_s2 + $0x1874] sm:$0xf0] }
 0x4b7   : > { %7327 = vmatpush.bf16.msra.mxu3 %v14673_v35  ;;  %v14856_v35 = vor.u32 %v17509_v22, %v14855_v52  ;;  %v14860_v39 = vor.u32 %v17508_v34, %v14857_v41  ;;  %v14825_v52 = vld [vmem:[%s18557_s2 + $0x1788] sm:$0xf0]  ;;  %v14978_v22 = vld [vmem:[%s18557_s2 + $0x1870] sm:$0xf]  ;;  %v14760_v34 = vor.u32 %v17485_v23, %v14759_v14  ;;  %v17550_v41 = vld [vmem:[%s18557_s2 + $0x18f4] sm:$0xf0] }
 0x4b8   : > { %v15042_v26 = vld [vmem:[%s18557_s2 + $0x18f0] sm:$0xf]  ;;  %v14956_v14 = vld [vmem:[%s18557_s2 + $0x1848] sm:$0xf0] }
 0x4b9   : > { %7289 = vmatpush.bf16.msra.mxu0 %v14597_v48  ;;  %v6259_v40 = vpop.f32.mrf.mxu0 }
 0x4ba   : > { %7302 = vmatpush.bf16.msra.mxu1 %v14661_v45  ;;  %7315 = vmatpush.bf16.msra.mxu2 %v14601_v49  ;;  %v6272_v27 = vpop.f32.mrf.mxu1  ;;  %v14848_v45 = vor.u32 %v17507_v3, %v14847_v38  ;;  %v14788_v49 = vor.u32 %v17490_v42, %v14785_v47  ;;  %v14828_v38 = vor.u32 %v17500_v33, %v14825_v52  ;;  %v7344_v3 = vld [vmem:[%s7342_s15 + $0x8] sm:$0xff]  ;;  %v14946_v33 = vld [vmem:[%s18557_s2 + $0x1830] sm:$0xf]  ;;  %s8374_s15 = scalar_lea.vmem [#allocation2], %s17623_s25  ;;  %s9406_s25 = scalar_lea.vmem [#allocation2], %s17763_s24 }
 0x4bb   : > { %7328 = vmatpush.bf16.msra.mxu3 %v14665_v53  ;;  %v6273_v32 = vadd.f32 %v6272_v27, %v6259_v40  ;;  %v17533_v27 = vld [vmem:[%s18557_s2 + $0x1874] sm:$0xf]  ;;  %v15043_v42 = vor.u32 %v17550_v41, %v15042_v26  ;;  %v17526_v52 = vld [vmem:[%s18557_s2 + $0x1834] sm:$0xf0] }
 0x4bc   : > { %7290 = vmatmul.bf16.vlgmr.msra.gmra.mxu0 %v7087_v61  ;;  %v17525_v26 = vld [vmem:[%s18557_s2 + $0x1834] sm:$0xf] }
 0x4bd   : > { %7540 = vmatpush.bf16.msrb.mxu0 %v14816_v54  ;;  %7303 = vmatmul.bf16.vlgmr.msra.gmra.mxu1 %v7088_v0  ;;  %v20623_v48 = vadd.f32 %v6273_v32, %v20547_v31  ;;  %v14839_v31 = vld [vmem:[%s18557_s2 + $0x17a0] sm:$0xf]  ;;  %v17505_v54 = vld [vmem:[%s18557_s2 + $0x17a4] sm:$0xf0]  ;;  %v17541_v41 = vld [vmem:[%s18557_s2 + $0x18b4] sm:$0xf] }
 0x4be   : > { %7553 = vmatpush.bf16.msrb.mxu1 %v14880_v57  ;;  %7566 = vmatpush.bf16.msrb.mxu2 %v14820_v62  ;;  %v14777_v57 = vld [vmem:[%s18557_s2 + $0x1728] sm:$0xf0]  ;;  %v14840_v10 = vor.u32 %v17505_v54, %v14839_v31 }
 0x4bf   : > { %7579 = vmatpush.bf16.msrb.mxu3 %v14884_v30  ;;  %7316 = vmatmul.bf16.vlgmr.msra.gmra.mxu2 %v7087_v61  ;;  %v14776_v61 = vor.u32 %v17489_v60, %v14775_v50  ;;  %v14780_v11 = vor.u32 %v17488_v56, %v14777_v57  ;;  %v17548_v50 = vld [vmem:[%s18557_s2 + $0x18e4] sm:$0xf0]  ;;  %v17531_v60 = vld [vmem:[%s18557_s2 + $0x1864] sm:$0xf]  ;;  %v14972_v31 = vld [vmem:[%s18557_s2 + $0x1868] sm:$0xf0]  ;;  %v14971_v56 = vor.u32 %v17532_v43, %v14970_v55 }
 0x4c0   : > { %7329 = vmatmul.bf16.vlgmr.msra.gmra.mxu3 %v7088_v0  ;;  %v14767_v0 = vld [vmem:[%s18557_s2 + $0x1710] sm:$0xf]  ;;  %v15036_v54 = vld [vmem:[%s18557_s2 + $0x18e8] sm:$0xf0]  ;;  %v17539_v55 = vld [vmem:[%s18557_s2 + $0x18a4] sm:$0xf] }
 0x4c1   : > { %7541 = vmatpush.bf16.msrb.mxu0 %v14808_v5  ;;  %v6261_v59 = vpop.f32.mrf.mxu0  ;;  %v14768_v12 = vor.u32 %v17487_v1, %v14767_v0  ;;  %v15028_v0 = vld [vmem:[%s18557_s2 + $0x18d8] sm:$0xf0]  ;;  %v15004_v43 = vld [vmem:[%s18557_s2 + $0x18a8] sm:$0xf0] }
 0x4c2   : > { %7554 = vmatpush.bf16.msrb.mxu1 %v14872_v6  ;;  %7567 = vmatpush.bf16.msrb.mxu2 %v14812_v13  ;;  %v6285_v53 = vpop.f32.mrf.mxu2  ;;  %v6274_v63 = vpop.f32.mrf.mxu1  ;;  %v14844_v6 = vor.u32 %v17504_v4, %v14841_v58  ;;  %v17503_v13 = vld [vmem:[%s18557_s2 + $0x1794] sm:$0xf0]  ;;  %v14962_v4 = vld [vmem:[%s18557_s2 + $0x1850] sm:$0xf] }
 0x4c3   : > { %7580 = vmatpush.bf16.msrb.mxu3 %v14876_v9  ;;  %v6298_v62 = vpop.f32.mrf.mxu3  ;;  %v14833_v9 = vld [vmem:[%s18557_s2 + $0x1798] sm:$0xf0]  ;;  %v17530_v58 = vld [vmem:[%s18557_s2 + $0x1854] sm:$0xf0]  ;;  %v15026_v59 = vld [vmem:[%s18557_s2 + $0x18d0] sm:$0xf] }
 0x4c4   : > { %v6299_v30 = vadd.f32 %v6298_v62, %v6285_v53  ;;  %v17547_v53 = vld [vmem:[%s18557_s2 + $0x18e4] sm:$0xf]  ;;  %v14975_v62 = vor.u32 %v17531_v60, %v14972_v31  ;;  %v17529_v63 = vld [vmem:[%s18557_s2 + $0x1854] sm:$0xf]  ;;  %v14963_v1 = vor.u32 %v17530_v58, %v14962_v4  ;;  %v14932_v58 = vld [vmem:[%s18557_s2 + $0x1818] sm:$0xf0] }
 0x4c5   : > { %7542 = vmatpush.bf16.msrb.mxu0 %v14800_v16  ;;  %v17501_v16 = vld [vmem:[%s18557_s2 + $0x1784] sm:$0xf0]  ;;  %v17521_v4 = vld [vmem:[%s18557_s2 + $0x1814] sm:$0xf] }
 0x4c6   : > { %7555 = vmatpush.bf16.msrb.mxu1 %v14864_v17  ;;  %7568 = vmatpush.bf16.msrb.mxu2 %v14804_v20  ;;  %v20642_v5 = vadd.f32 %v6299_v30, %v20566_v19  ;;  %v14832_v19 = vor.u32 %v17503_v13, %v14831_v2  ;;  %v17484_v17 = vld [vmem:[%s18557_s2 + $0x1704] sm:$0xf]  ;;  %v14836_v20 = vor.u32 %v17502_v8, %v14833_v9  ;;  %v14954_v13 = vld [vmem:[%s18557_s2 + $0x1840] sm:$0xf]  ;;  %v17544_v9 = vld [vmem:[%s18557_s2 + $0x18c4] sm:$0xf0] }
 0x4c7   : > { %7581 = vmatpush.bf16.msrb.mxu3 %v14868_v21  ;;  %v14824_v32 = vor.u32 %v17501_v16, %v14823_v15  ;;  %v15039_v30 = vor.u32 %v17547_v53, %v15036_v54  ;;  %v14955_v16 = vor.u32 %v17528_v18, %v14954_v13  ;;  %v17522_v53 = vld [vmem:[%s18557_s2 + $0x1814] sm:$0xf0]  ;;  %v14994_v54 = vld [vmem:[%s18557_s2 + $0x1890] sm:$0xf]  ;;  %v14924_v13 = vld [vmem:[%s18557_s2 + $0x1808] sm:$0xf0] }
 0x4c8   : > { %v17535_v18 = vld [vmem:[%s18557_s2 + $0x1884] sm:$0xf] }
 0x4c9   : > { %7543 = vmatpush.bf16.msrb.mxu0 %v14792_v29  ;;  %v14980_v29 = vld [vmem:[%s18557_s2 + $0x1878] sm:$0xf0] }
 0x4ca   : > { %7556 = vmatpush.bf16.msrb.mxu1 %v14856_v35  ;;  %7569 = vmatpush.bf16.msrb.mxu2 %v14796_v36  ;;  %v6287_v21 = vpop.f32.mrf.mxu2  ;;  %v14764_v35 = vor.u32 %v17484_v17, %v14761_v28  ;;  %v17549_v36 = vld [vmem:[%s18557_s2 + $0x18f4] sm:$0xf]  ;;  %v14983_v47 = vor.u32 %v17533_v27, %v14980_v29  ;;  %v15012_v27 = vld [vmem:[%s18557_s2 + $0x18b8] sm:$0xf0]  ;;  %v14947_v29 = vor.u32 %v17526_v52, %v14946_v33 }
 0x4cb   : > { %7582 = vmatpush.bf16.msrb.mxu3 %v14860_v39  ;;  %v6300_v40 = vpop.f32.mrf.mxu3  ;;  %v14979_v39 = vor.u32 %v17534_v25, %v14978_v22  ;;  %v15010_v21 = vld [vmem:[%s18557_s2 + $0x18b0] sm:$0xf]  ;;  %v17542_v25 = vld [vmem:[%s18557_s2 + $0x18b4] sm:$0xf0]  ;;  %v15207_v33 = vld [vmem:[%s18557_s2 + $0x19f8] sm:$0xf0] }
 0x4cc   : > { %v14948_v40 = vld [vmem:[%s18557_s2 + $0x1838] sm:$0xf0]  ;;  %v7601_v52 = vld [vmem:[%s7600_s17] sm:$0xff] }
 0x4cd   : > { %7544 = vmatpush.bf16.msrb.mxu0 %v14784_v44  ;;  %v15034_v44 = vld [vmem:[%s18557_s2 + $0x18e0] sm:$0xf] }
 0x4ce   : > { %7557 = vmatpush.bf16.msrb.mxu1 %v14848_v45  ;;  %7570 = vmatpush.bf16.msrb.mxu2 %v14788_v49  ;;  %v15047_v45 = vor.u32 %v17549_v36, %v15044_v46  ;;  %v7345_v49 = vpack.c.bf16 %v7343_v37, %v7343_v37  ;;  %v15035_v57 = vor.u32 %v17548_v50, %v15034_v44  ;;  %v14938_v36 = vld [vmem:[%s18557_s2 + $0x1820] sm:$0xf]  ;;  %v17524_v46 = vld [vmem:[%s18557_s2 + $0x1824] sm:$0xf0] }
 0x4cf   : > { %7583 = vmatpush.bf16.msrb.mxu3 %v14852_v51  ;;  %v7346_v51 = vpack.c.bf16 %v7344_v3, %v7344_v3  ;;  %v15015_v37 = vor.u32 %v17541_v41, %v15012_v27  ;;  %v17523_v3 = vld [vmem:[%s18557_s2 + $0x1824] sm:$0xf]  ;;  %v15133_v41 = vld [vmem:[%s18557_s2 + $0x1960] sm:$0xf]  ;;  %v17567_v27 = vld [vmem:[%s18557_s2 + $0x1964] sm:$0xf0] }
 0x4d1   : > { %7545 = vmatpush.bf16.msrb.mxu0 %v14776_v61  ;;  %v17546_v61 = vld [vmem:[%s18557_s2 + $0x18d4] sm:$0xf0] }
 0x4d2   : > { %7558 = vmatpush.bf16.msrb.mxu1 %v14840_v10  ;;  %7571 = vmatpush.bf16.msrb.mxu2 %v14780_v11  ;;  %v14964_v10 = vld [vmem:[%s18557_s2 + $0x1858] sm:$0xf0]  ;;  %v17545_v11 = vld [vmem:[%s18557_s2 + $0x18d4] sm:$0xf]  ;;  %v15027_v2 = vor.u32 %v17546_v61, %v15026_v59 }
 0x4d3   : > { %7584 = vmatpush.bf16.msrb.mxu3 %v14844_v6  ;;  %v14967_v6 = vor.u32 %v17529_v63, %v14964_v10  ;;  %v15031_v8 = vor.u32 %v17545_v11, %v15028_v0  ;;  %v17537_v59 = vld [vmem:[%s18557_s2 + $0x1894] sm:$0xf]  ;;  %v14922_v63 = vld [vmem:[%s18557_s2 + $0x1800] sm:$0xf]  ;;  %v17520_v10 = vld [vmem:[%s18557_s2 + $0x1804] sm:$0xf0]  ;;  %v14935_v11 = vor.u32 %v17521_v4, %v14932_v58 }
 0x4d4   : > { %v14986_v0 = vld [vmem:[%s18557_s2 + $0x1880] sm:$0xf]  ;;  %v17563_v4 = vld [vmem:[%s18557_s2 + $0x1944] sm:$0xf0] }
 0x4d5   : > { %7546 = vmatpush.bf16.msrb.mxu0 %v14768_v12  ;;  %v17527_v12 = vld [vmem:[%s18557_s2 + $0x1844] sm:$0xf]  ;;  %v15181_v58 = vld [vmem:[%s18557_s2 + $0x19c0] sm:$0xf] }
 0x4d6   : > { %7559 = vmatpush.bf16.msrb.mxu1 %v14832_v19  ;;  %7572 = vmatpush.bf16.msrb.mxu2 %v14772_v24  ;;  %v17543_v19 = vld [vmem:[%s18557_s2 + $0x18c4] sm:$0xf]  ;;  %v15020_v24 = vld [vmem:[%s18557_s2 + $0x18c8] sm:$0xf0]  ;;  %v14959_v28 = vor.u32 %v17527_v12, %v14956_v14  ;;  %v17569_v12 = vld [vmem:[%s18557_s2 + $0x1974] sm:$0xf0] }
 0x4d7   : > { %7585 = vmatpush.bf16.msrb.mxu3 %v14836_v20  ;;  %v15019_v20 = vor.u32 %v17544_v9, %v15018_v7  ;;  %v15023_v22 = vor.u32 %v17543_v19, %v15020_v24  ;;  %v14988_v7 = vld [vmem:[%s18557_s2 + $0x1888] sm:$0xf0]  ;;  %v15141_v9 = vld [vmem:[%s18557_s2 + $0x1970] sm:$0xf]  ;;  %v14923_v19 = vor.u32 %v17520_v10, %v14922_v63  ;;  %v17585_v24 = vld [vmem:[%s18557_s2 + $0x19f4] sm:$0xf0] }
 0x4d8   : > { %v15205_v14 = vld [vmem:[%s18557_s2 + $0x19f0] sm:$0xf]  ;;  %v15119_v63 = vld [vmem:[%s18557_s2 + $0x1948] sm:$0xf0] }
 0x4d9   : > { %7547 = vmatpush.bf16.msrb.mxu0 %v14760_v34  ;;  %v6517_v23 = vpop.f32.mrf.mxu0 }
 0x4da   : > { %7560 = vmatpush.bf16.msrb.mxu1 %v14824_v32  ;;  %7573 = vmatpush.bf16.msrb.mxu2 %v14764_v35  ;;  %v6530_v15 = vpop.f32.mrf.mxu1  ;;  %v15011_v32 = vor.u32 %v17542_v25, %v15010_v21  ;;  %v14951_v35 = vor.u32 %v17525_v26, %v14948_v40  ;;  %v14991_v21 = vor.u32 %v17535_v18, %v14988_v7  ;;  %v7602_v25 = vld [vmem:[%s7600_s17 + $0x8] sm:$0xff]  ;;  %v15109_v18 = vld [vmem:[%s18557_s2 + $0x1930] sm:$0xf]  ;;  %s8632_s17 = scalar_lea.vmem [#allocation2], %s17658_s1 }
 0x4db   : > { %7586 = vmatpush.bf16.msrb.mxu3 %v14828_v38  ;;  %v6531_v17 = vadd.f32 %v6530_v15, %v6517_v23  ;;  %v17568_v15 = vld [vmem:[%s18557_s2 + $0x1974] sm:$0xf]  ;;  %v15206_v26 = vor.u32 %v17585_v24, %v15205_v14  ;;  %v17561_v7 = vld [vmem:[%s18557_s2 + $0x1934] sm:$0xf0] }
 0x4dc   : > { %7548 = vmatmul.bf16.vlgmr.msrb.gmra.mxu0 %v7345_v49  ;;  %v17560_v14 = vld [vmem:[%s18557_s2 + $0x1934] sm:$0xf] }
 0x4dd   : > { %7798 = vmatpush.bf16.msra.mxu0 %v14979_v39  ;;  %7561 = vmatmul.bf16.vlgmr.msrb.gmra.mxu1 %v7346_v51  ;;  %v20699_v34 = vadd.f32 %v6531_v17, %v20623_v48  ;;  %v15002_v48 = vld [vmem:[%s18557_s2 + $0x18a0] sm:$0xf]  ;;  %v17540_v39 = vld [vmem:[%s18557_s2 + $0x18a4] sm:$0xf0]  ;;  %v17576_v24 = vld [vmem:[%s18557_s2 + $0x19b4] sm:$0xf] }
 0x4de   : > { %7811 = vmatpush.bf16.msra.mxu1 %v15043_v42  ;;  %7824 = vmatpush.bf16.msra.mxu2 %v14983_v47  ;;  %v14940_v42 = vld [vmem:[%s18557_s2 + $0x1828] sm:$0xf0]  ;;  %v15003_v60 = vor.u32 %v17540_v39, %v15002_v48 }
 0x4df   : > { %7837 = vmatpush.bf16.msra.mxu3 %v15047_v45  ;;  %7574 = vmatmul.bf16.vlgmr.msrb.gmra.mxu2 %v7345_v49  ;;  %v14939_v49 = vor.u32 %v17524_v46, %v14938_v36  ;;  %v14943_v31 = vor.u32 %v17523_v3, %v14940_v42  ;;  %v17583_v36 = vld [vmem:[%s18557_s2 + $0x19e4] sm:$0xf0]  ;;  %v17566_v46 = vld [vmem:[%s18557_s2 + $0x1964] sm:$0xf]  ;;  %v15135_v48 = vld [vmem:[%s18557_s2 + $0x1968] sm:$0xf0]  ;;  %v15134_v3 = vor.u32 %v17567_v27, %v15133_v41 }
 0x4e0   : > { %7587 = vmatmul.bf16.vlgmr.msrb.gmra.mxu3 %v7346_v51  ;;  %v14930_v51 = vld [vmem:[%s18557_s2 + $0x1810] sm:$0xf]  ;;  %v15199_v39 = vld [vmem:[%s18557_s2 + $0x19e8] sm:$0xf0]  ;;  %v17574_v41 = vld [vmem:[%s18557_s2 + $0x19a4] sm:$0xf] }
 0x4e1   : > { %7799 = vmatpush.bf16.msra.mxu0 %v14971_v56  ;;  %v6519_v44 = vpop.f32.mrf.mxu0  ;;  %v14931_v61 = vor.u32 %v17522_v53, %v14930_v51  ;;  %v15191_v51 = vld [vmem:[%s18557_s2 + $0x19d8] sm:$0xf0]  ;;  %v15167_v27 = vld [vmem:[%s18557_s2 + $0x19a8] sm:$0xf0] }
 0x4e2   : > { %7812 = vmatpush.bf16.msra.mxu1 %v15035_v57  ;;  %7825 = vmatpush.bf16.msra.mxu2 %v14975_v62  ;;  %v6543_v38 = vpop.f32.mrf.mxu2  ;;  %v6532_v50 = vpop.f32.mrf.mxu1  ;;  %v15007_v57 = vor.u32 %v17539_v55, %v15004_v43  ;;  %v17538_v62 = vld [vmem:[%s18557_s2 + $0x1894] sm:$0xf0]  ;;  %v15125_v55 = vld [vmem:[%s18557_s2 + $0x1950] sm:$0xf] }
 0x4e3   : > { %7838 = vmatpush.bf16.msra.mxu3 %v15039_v30  ;;  %v6556_v47 = vpop.f32.mrf.mxu3  ;;  %v14996_v30 = vld [vmem:[%s18557_s2 + $0x1898] sm:$0xf0]  ;;  %v17565_v43 = vld [vmem:[%s18557_s2 + $0x1954] sm:$0xf0]  ;;  %v15189_v44 = vld [vmem:[%s18557_s2 + $0x19d0] sm:$0xf] }
 0x4e4   : > { %v6557_v45 = vadd.f32 %v6556_v47, %v6543_v38  ;;  %v17582_v38 = vld [vmem:[%s18557_s2 + $0x19e4] sm:$0xf]  ;;  %v15138_v47 = vor.u32 %v17566_v46, %v15135_v48  ;;  %v17564_v50 = vld [vmem:[%s18557_s2 + $0x1954] sm:$0xf]  ;;  %v15126_v53 = vor.u32 %v17565_v43, %v15125_v55  ;;  %v15095_v43 = vld [vmem:[%s18557_s2 + $0x1918] sm:$0xf0] }
 0x4e5   : > { %7800 = vmatpush.bf16.msra.mxu0 %v14963_v1  ;;  %v17536_v1 = vld [vmem:[%s18557_s2 + $0x1884] sm:$0xf0]  ;;  %v17556_v55 = vld [vmem:[%s18557_s2 + $0x1914] sm:$0xf] }
 0x4e6   : > { %7813 = vmatpush.bf16.msra.mxu1 %v15027_v2  ;;  %7826 = vmatpush.bf16.msra.mxu2 %v14967_v6  ;;  %v20718_v56 = vadd.f32 %v6557_v45, %v20642_v5  ;;  %v14995_v5 = vor.u32 %v17538_v62, %v14994_v54  ;;  %v17519_v2 = vld [vmem:[%s18557_s2 + $0x1804] sm:$0xf]  ;;  %v14999_v6 = vor.u32 %v17537_v59, %v14996_v30  ;;  %v15117_v62 = vld [vmem:[%s18557_s2 + $0x1940] sm:$0xf]  ;;  %v17579_v30 = vld [vmem:[%s18557_s2 + $0x19c4] sm:$0xf0] }
 0x4e7   : > { %7839 = vmatpush.bf16.msra.mxu3 %v15031_v8  ;;  %v14987_v17 = vor.u32 %v17536_v1, %v14986_v0  ;;  %v15202_v45 = vor.u32 %v17582_v38, %v15199_v39  ;;  %v15118_v1 = vor.u32 %v17563_v4, %v15117_v62  ;;  %v17557_v38 = vld [vmem:[%s18557_s2 + $0x1914] sm:$0xf0]  ;;  %v15157_v39 = vld [vmem:[%s18557_s2 + $0x1990] sm:$0xf]  ;;  %v15087_v62 = vld [vmem:[%s18557_s2 + $0x1908] sm:$0xf0] }
 0x4e8   : > { %v17570_v4 = vld [vmem:[%s18557_s2 + $0x1984] sm:$0xf] }
 0x4e9   : > { %7801 = vmatpush.bf16.msra.mxu0 %v14955_v16  ;;  %v15143_v16 = vld [vmem:[%s18557_s2 + $0x1978] sm:$0xf0] }
 0x4ea   : > { %7814 = vmatpush.bf16.msra.mxu1 %v15019_v20  ;;  %7827 = vmatpush.bf16.msra.mxu2 %v14959_v28  ;;  %v6545_v8 = vpop.f32.mrf.mxu2  ;;  %v14927_v20 = vor.u32 %v17519_v2, %v14924_v13  ;;  %v17584_v28 = vld [vmem:[%s18557_s2 + $0x19f4] sm:$0xf]  ;;  %v15146_v40 = vor.u32 %v17568_v15, %v15143_v16  ;;  %v15175_v15 = vld [vmem:[%s18557_s2 + $0x19b8] sm:$0xf0]  ;;  %v15110_v16 = vor.u32 %v17561_v7, %v15109_v18 }
 0x4eb   : > { %7840 = vmatpush.bf16.msra.mxu3 %v15023_v22  ;;  %v6558_v23 = vpop.f32.mrf.mxu3  ;;  %v15142_v22 = vor.u32 %v17569_v12, %v15141_v9  ;;  %v15173_v8 = vld [vmem:[%s18557_s2 + $0x19b0] sm:$0xf]  ;;  %v17577_v12 = vld [vmem:[%s18557_s2 + $0x19b4] sm:$0xf0]  ;;  %v15370_v18 = vld [vmem:[%s18557_s2 + $0x1af8] sm:$0xf0] }
 0x4ec   : > { %v15111_v23 = vld [vmem:[%s18557_s2 + $0x1938] sm:$0xf0]  ;;  %v7859_v7 = vld [vmem:[%s7858_s30] sm:$0xff] }
 0x4ed   : > { %7802 = vmatpush.bf16.msra.mxu0 %v14947_v29  ;;  %v15197_v29 = vld [vmem:[%s18557_s2 + $0x19e0] sm:$0xf] }
 0x4ee   : > { %7815 = vmatpush.bf16.msra.mxu1 %v15011_v32  ;;  %7828 = vmatpush.bf16.msra.mxu2 %v14951_v35  ;;  %v15210_v32 = vor.u32 %v17584_v28, %v15207_v33  ;;  %v7603_v35 = vpack.c.bf16 %v7601_v52, %v7601_v52  ;;  %v15198_v42 = vor.u32 %v17583_v36, %v15197_v29  ;;  %v15101_v28 = vld [vmem:[%s18557_s2 + $0x1920] sm:$0xf]  ;;  %v17559_v33 = vld [vmem:[%s18557_s2 + $0x1924] sm:$0xf0] }
 0x4ef   : > { %7841 = vmatpush.bf16.msra.mxu3 %v15015_v37  ;;  %v7604_v37 = vpack.c.bf16 %v7602_v25, %v7602_v25  ;;  %v15178_v52 = vor.u32 %v17576_v24, %v15175_v15  ;;  %v17558_v25 = vld [vmem:[%s18557_s2 + $0x1924] sm:$0xf]  ;;  %v15296_v24 = vld [vmem:[%s18557_s2 + $0x1a60] sm:$0xf]  ;;  %v17602_v15 = vld [vmem:[%s18557_s2 + $0x1a64] sm:$0xf0] }
 0x4f1   : > { %7803 = vmatpush.bf16.msra.mxu0 %v14939_v49  ;;  %v17581_v49 = vld [vmem:[%s18557_s2 + $0x19d4] sm:$0xf0] }
 0x4f2   : > { %7816 = vmatpush.bf16.msra.mxu1 %v15003_v60  ;;  %7829 = vmatpush.bf16.msra.mxu2 %v14943_v31  ;;  %v15127_v60 = vld [vmem:[%s18557_s2 + $0x1958] sm:$0xf0]  ;;  %v17580_v31 = vld [vmem:[%s18557_s2 + $0x19d4] sm:$0xf]  ;;  %v15190_v54 = vor.u32 %v17581_v49, %v15189_v44 }
 0x4f3   : > { %7842 = vmatpush.bf16.msra.mxu3 %v15007_v57  ;;  %v15130_v57 = vor.u32 %v17564_v50, %v15127_v60  ;;  %v15194_v59 = vor.u32 %v17580_v31, %v15191_v51  ;;  %v17572_v44 = vld [vmem:[%s18557_s2 + $0x1994] sm:$0xf]  ;;  %v15085_v50 = vld [vmem:[%s18557_s2 + $0x1900] sm:$0xf]  ;;  %v17555_v60 = vld [vmem:[%s18557_s2 + $0x1904] sm:$0xf0]  ;;  %v15098_v31 = vor.u32 %v17556_v55, %v15095_v43 }
 0x4f4   : > { %v15149_v51 = vld [vmem:[%s18557_s2 + $0x1980] sm:$0xf]  ;;  %v17598_v55 = vld [vmem:[%s18557_s2 + $0x1a44] sm:$0xf0] }
 0x4f5   : > { %7804 = vmatpush.bf16.msra.mxu0 %v14931_v61  ;;  %v17562_v61 = vld [vmem:[%s18557_s2 + $0x1944] sm:$0xf]  ;;  %v15344_v43 = vld [vmem:[%s18557_s2 + $0x1ac0] sm:$0xf] }
 0x4f6   : > { %7817 = vmatpush.bf16.msra.mxu1 %v14995_v5  ;;  %7830 = vmatpush.bf16.msra.mxu2 %v14935_v11  ;;  %v17578_v5 = vld [vmem:[%s18557_s2 + $0x19c4] sm:$0xf]  ;;  %v15183_v11 = vld [vmem:[%s18557_s2 + $0x19c8] sm:$0xf0]  ;;  %v15122_v13 = vor.u32 %v17562_v61, %v15119_v63  ;;  %v17604_v61 = vld [vmem:[%s18557_s2 + $0x1a74] sm:$0xf0] }
 0x4f7   : > { %7843 = vmatpush.bf16.msra.mxu3 %v14999_v6  ;;  %v15182_v6 = vor.u32 %v17579_v30, %v15181_v58  ;;  %v15186_v9 = vor.u32 %v17578_v5, %v15183_v11  ;;  %v15151_v58 = vld [vmem:[%s18557_s2 + $0x1988] sm:$0xf0]  ;;  %v15304_v30 = vld [vmem:[%s18557_s2 + $0x1a70] sm:$0xf]  ;;  %v15086_v5 = vor.u32 %v17555_v60, %v15085_v50  ;;  %v17620_v11 = vld [vmem:[%s18557_s2 + $0x1af4] sm:$0xf0] }
 0x4f8   : > { %v15368_v63 = vld [vmem:[%s18557_s2 + $0x1af0] sm:$0xf]  ;;  %v15282_v50 = vld [vmem:[%s18557_s2 + $0x1a48] sm:$0xf0] }
 0x4f9   : > { %7805 = vmatpush.bf16.msra.mxu0 %v14923_v19  ;;  %v6775_v10 = vpop.f32.mrf.mxu0 }
 0x4fa   : > { %7818 = vmatpush.bf16.msra.mxu1 %v14987_v17  ;;  %7831 = vmatpush.bf16.msra.mxu2 %v14927_v20  ;;  %v6788_v0 = vpop.f32.mrf.mxu1  ;;  %v15174_v17 = vor.u32 %v17577_v12, %v15173_v8  ;;  %v15114_v20 = vor.u32 %v17560_v14, %v15111_v23  ;;  %v15154_v8 = vor.u32 %v17570_v4, %v15151_v58  ;;  %v7860_v12 = vld [vmem:[%s7858_s30 + $0x8] sm:$0xff]  ;;  %v15272_v4 = vld [vmem:[%s18557_s2 + $0x1a30] sm:$0xf]  ;;  %s8890_s30 = scalar_lea.vmem [#allocation2], %s17693_s22 }
 0x4fb   : > { %7844 = vmatpush.bf16.msra.mxu3 %v14991_v21  ;;  %v6789_v2 = vadd.f32 %v6788_v0, %v6775_v10  ;;  %v17603_v0 = vld [vmem:[%s18557_s2 + $0x1a74] sm:$0xf]  ;;  %v15369_v14 = vor.u32 %v17620_v11, %v15368_v63  ;;  %v17596_v58 = vld [vmem:[%s18557_s2 + $0x1a34] sm:$0xf0] }
 0x4fc   : > { %7806 = vmatmul.bf16.vlgmr.msra.gmra.mxu0 %v7603_v35  ;;  %v17595_v63 = vld [vmem:[%s18557_s2 + $0x1a34] sm:$0xf] }
 0x4fd   : > { %8056 = vmatpush.bf16.msrb.mxu0 %v15142_v22  ;;  %7819 = vmatmul.bf16.vlgmr.msra.gmra.mxu1 %v7604_v37  ;;  %v20775_v19 = vadd.f32 %v6789_v2, %v20699_v34  ;;  %v15165_v34 = vld [vmem:[%s18557_s2 + $0x19a0] sm:$0xf]  ;;  %v17575_v22 = vld [vmem:[%s18557_s2 + $0x19a4] sm:$0xf0]  ;;  %v17611_v11 = vld [vmem:[%s18557_s2 + $0x1ab4] sm:$0xf] }
 0x4fe   : > { %8069 = vmatpush.bf16.msrb.mxu1 %v15206_v26  ;;  %8082 = vmatpush.bf16.msrb.mxu2 %v15146_v40  ;;  %v15103_v26 = vld [vmem:[%s18557_s2 + $0x1928] sm:$0xf0]  ;;  %v15166_v46 = vor.u32 %v17575_v22, %v15165_v34 }
 0x4ff   : > { %8095 = vmatpush.bf16.msrb.mxu3 %v15210_v32  ;;  %7832 = vmatmul.bf16.vlgmr.msra.gmra.mxu2 %v7603_v35  ;;  %v15102_v35 = vor.u32 %v17559_v33, %v15101_v28  ;;  %v15106_v48 = vor.u32 %v17558_v25, %v15103_v26  ;;  %v17618_v28 = vld [vmem:[%s18557_s2 + $0x1ae4] sm:$0xf0]  ;;  %v17601_v33 = vld [vmem:[%s18557_s2 + $0x1a64] sm:$0xf]  ;;  %v15298_v34 = vld [vmem:[%s18557_s2 + $0x1a68] sm:$0xf0]  ;;  %v15297_v25 = vor.u32 %v17602_v15, %v15296_v24 }
 0x500   : > { %7845 = vmatmul.bf16.vlgmr.msra.gmra.mxu3 %v7604_v37  ;;  %v15093_v37 = vld [vmem:[%s18557_s2 + $0x1910] sm:$0xf]  ;;  %v15362_v22 = vld [vmem:[%s18557_s2 + $0x1ae8] sm:$0xf0]  ;;  %v17609_v24 = vld [vmem:[%s18557_s2 + $0x1aa4] sm:$0xf] }
 0x501   : > { %8057 = vmatpush.bf16.msrb.mxu0 %v15134_v3  ;;  %v6777_v29 = vpop.f32.mrf.mxu0  ;;  %v15094_v49 = vor.u32 %v17557_v38, %v15093_v37  ;;  %v15354_v37 = vld [vmem:[%s18557_s2 + $0x1ad8] sm:$0xf0]  ;;  %v15330_v15 = vld [vmem:[%s18557_s2 + $0x1aa8] sm:$0xf0] }
 0x502   : > { %8070 = vmatpush.bf16.msrb.mxu1 %v15198_v42  ;;  %8083 = vmatpush.bf16.msrb.mxu2 %v15138_v47  ;;  %v6801_v21 = vpop.f32.mrf.mxu2  ;;  %v6790_v36 = vpop.f32.mrf.mxu1  ;;  %v15170_v42 = vor.u32 %v17574_v41, %v15167_v27  ;;  %v17573_v47 = vld [vmem:[%s18557_s2 + $0x1994] sm:$0xf0]  ;;  %v15288_v41 = vld [vmem:[%s18557_s2 + $0x1a50] sm:$0xf] }
 0x503   : > { %8096 = vmatpush.bf16.msrb.mxu3 %v15202_v45  ;;  %v6814_v40 = vpop.f32.mrf.mxu3  ;;  %v15159_v45 = vld [vmem:[%s18557_s2 + $0x1998] sm:$0xf0]  ;;  %v17600_v27 = vld [vmem:[%s18557_s2 + $0x1a54] sm:$0xf0]  ;;  %v15352_v29 = vld [vmem:[%s18557_s2 + $0x1ad0] sm:$0xf] }
 0x504   : > { %v6815_v32 = vadd.f32 %v6814_v40, %v6801_v21  ;;  %v17617_v21 = vld [vmem:[%s18557_s2 + $0x1ae4] sm:$0xf]  ;;  %v15301_v40 = vor.u32 %v17601_v33, %v15298_v34  ;;  %v17599_v36 = vld [vmem:[%s18557_s2 + $0x1a54] sm:$0xf]  ;;  %v15289_v38 = vor.u32 %v17600_v27, %v15288_v41  ;;  %v15258_v27 = vld [vmem:[%s18557_s2 + $0x1a18] sm:$0xf0] }
 0x505   : > { %8058 = vmatpush.bf16.msrb.mxu0 %v15126_v53  ;;  %v17571_v53 = vld [vmem:[%s18557_s2 + $0x1984] sm:$0xf0]  ;;  %v17591_v41 = vld [vmem:[%s18557_s2 + $0x1a14] sm:$0xf] }
 0x506   : > { %8071 = vmatpush.bf16.msrb.mxu1 %v15190_v54  ;;  %8084 = vmatpush.bf16.msrb.mxu2 %v15130_v57  ;;  %v20794_v3 = vadd.f32 %v6815_v32, %v20718_v56  ;;  %v15158_v56 = vor.u32 %v17573_v47, %v15157_v39  ;;  %v17554_v54 = vld [vmem:[%s18557_s2 + $0x1904] sm:$0xf]  ;;  %v15162_v57 = vor.u32 %v17572_v44, %v15159_v45  ;;  %v15280_v47 = vld [vmem:[%s18557_s2 + $0x1a40] sm:$0xf]  ;;  %v17614_v45 = vld [vmem:[%s18557_s2 + $0x1ac4] sm:$0xf0] }
 0x507   : > { %8097 = vmatpush.bf16.msrb.mxu3 %v15194_v59  ;;  %v15150_v2 = vor.u32 %v17571_v53, %v15149_v51  ;;  %v15365_v32 = vor.u32 %v17617_v21, %v15362_v22  ;;  %v15281_v53 = vor.u32 %v17598_v55, %v15280_v47  ;;  %v17592_v21 = vld [vmem:[%s18557_s2 + $0x1a14] sm:$0xf0]  ;;  %v15320_v22 = vld [vmem:[%s18557_s2 + $0x1a90] sm:$0xf]  ;;  %v15250_v47 = vld [vmem:[%s18557_s2 + $0x1a08] sm:$0xf0] }
 0x508   : > { %v17605_v55 = vld [vmem:[%s18557_s2 + $0x1a84] sm:$0xf] }
 0x509   : > { %8059 = vmatpush.bf16.msrb.mxu0 %v15118_v1  ;;  %v15306_v1 = vld [vmem:[%s18557_s2 + $0x1a78] sm:$0xf0] }
 0x50a   : > { %8072 = vmatpush.bf16.msrb.mxu1 %v15182_v6  ;;  %8085 = vmatpush.bf16.msrb.mxu2 %v15122_v13  ;;  %v6803_v59 = vpop.f32.mrf.mxu2  ;;  %v15090_v6 = vor.u32 %v17554_v54, %v15087_v62  ;;  %v17619_v13 = vld [vmem:[%s18557_s2 + $0x1af4] sm:$0xf]  ;;  %v15309_v23 = vor.u32 %v17603_v0, %v15306_v1  ;;  %v15338_v0 = vld [vmem:[%s18557_s2 + $0x1ab8] sm:$0xf0]  ;;  %v15273_v1 = vor.u32 %v17596_v58, %v15272_v4 }
 0x50b   : > { %8098 = vmatpush.bf16.msrb.mxu3 %v15186_v9  ;;  %v6816_v10 = vpop.f32.mrf.mxu3  ;;  %v15305_v9 = vor.u32 %v17604_v61, %v15304_v30  ;;  %v15336_v59 = vld [vmem:[%s18557_s2 + $0x1ab0] sm:$0xf]  ;;  %v17612_v61 = vld [vmem:[%s18557_s2 + $0x1ab4] sm:$0xf0]  ;;  %v15533_v4 = vld [vmem:[%s18557_s2 + $0x1bf8] sm:$0xf0] }
 0x50c   : > { %v15274_v10 = vld [vmem:[%s18557_s2 + $0x1a38] sm:$0xf0]  ;;  %v8117_v58 = vld [vmem:[%s8116_s12] sm:$0xff] }
 0x50d   : > { %8060 = vmatpush.bf16.msrb.mxu0 %v15110_v16  ;;  %v15360_v16 = vld [vmem:[%s18557_s2 + $0x1ae0] sm:$0xf] }
 0x50e   : > { %8073 = vmatpush.bf16.msrb.mxu1 %v15174_v17  ;;  %8086 = vmatpush.bf16.msrb.mxu2 %v15114_v20  ;;  %v15373_v17 = vor.u32 %v17619_v13, %v15370_v18  ;;  %v7861_v20 = vpack.c.bf16 %v7859_v7, %v7859_v7  ;;  %v15361_v26 = vor.u32 %v17618_v28, %v15360_v16  ;;  %v15264_v13 = vld [vmem:[%s18557_s2 + $0x1a20] sm:$0xf]  ;;  %v17594_v18 = vld [vmem:[%s18557_s2 + $0x1a24] sm:$0xf0] }
 0x50f   : > { %8099 = vmatpush.bf16.msrb.mxu3 %v15178_v52  ;;  %v7862_v52 = vpack.c.bf16 %v7860_v12, %v7860_v12  ;;  %v15341_v7 = vor.u32 %v17611_v11, %v15338_v0  ;;  %v17593_v12 = vld [vmem:[%s18557_s2 + $0x1a24] sm:$0xf]  ;;  %v15459_v11 = vld [vmem:[%s18557_s2 + $0x1b60] sm:$0xf]  ;;  %v17637_v0 = vld [vmem:[%s18557_s2 + $0x1b64] sm:$0xf0] }
 0x511   : > { %8061 = vmatpush.bf16.msrb.mxu0 %v15102_v35  ;;  %v17616_v35 = vld [vmem:[%s18557_s2 + $0x1ad4] sm:$0xf0] }
 0x512   : > { %8074 = vmatpush.bf16.msrb.mxu1 %v15166_v46  ;;  %8087 = vmatpush.bf16.msrb.mxu2 %v15106_v48  ;;  %v15290_v46 = vld [vmem:[%s18557_s2 + $0x1a58] sm:$0xf0]  ;;  %v17615_v48 = vld [vmem:[%s18557_s2 + $0x1ad4] sm:$0xf]  ;;  %v15353_v39 = vor.u32 %v17616_v35, %v15352_v29 }
 0x513   : > { %8100 = vmatpush.bf16.msrb.mxu3 %v15170_v42  ;;  %v15293_v42 = vor.u32 %v17599_v36, %v15290_v46  ;;  %v15357_v44 = vor.u32 %v17615_v48, %v15354_v37  ;;  %v17607_v29 = vld [vmem:[%s18557_s2 + $0x1a94] sm:$0xf]  ;;  %v15248_v36 = vld [vmem:[%s18557_s2 + $0x1a00] sm:$0xf]  ;;  %v17590_v46 = vld [vmem:[%s18557_s2 + $0x1a04] sm:$0xf0]  ;;  %v15261_v48 = vor.u32 %v17591_v41, %v15258_v27 }
 0x514   : > { %v15312_v37 = vld [vmem:[%s18557_s2 + $0x1a80] sm:$0xf]  ;;  %v17633_v41 = vld [vmem:[%s18557_s2 + $0x1b44] sm:$0xf0] }
 0x515   : > { %8062 = vmatpush.bf16.msrb.mxu0 %v15094_v49  ;;  %v17597_v49 = vld [vmem:[%s18557_s2 + $0x1a44] sm:$0xf]  ;;  %v15507_v27 = vld [vmem:[%s18557_s2 + $0x1bc0] sm:$0xf] }
 0x516   : > { %8075 = vmatpush.bf16.msrb.mxu1 %v15158_v56  ;;  %8088 = vmatpush.bf16.msrb.mxu2 %v15098_v31  ;;  %v17613_v56 = vld [vmem:[%s18557_s2 + $0x1ac4] sm:$0xf]  ;;  %v15346_v31 = vld [vmem:[%s18557_s2 + $0x1ac8] sm:$0xf0]  ;;  %v15285_v62 = vor.u32 %v17597_v49, %v15282_v50  ;;  %v17639_v49 = vld [vmem:[%s18557_s2 + $0x1b74] sm:$0xf0] }
 0x517   : > { %8101 = vmatpush.bf16.msrb.mxu3 %v15162_v57  ;;  %v15345_v57 = vor.u32 %v17614_v45, %v15344_v43  ;;  %v15349_v30 = vor.u32 %v17613_v56, %v15346_v31  ;;  %v15314_v43 = vld [vmem:[%s18557_s2 + $0x1a88] sm:$0xf0]  ;;  %v15467_v45 = vld [vmem:[%s18557_s2 + $0x1b70] sm:$0xf]  ;;  %v15249_v56 = vor.u32 %v17590_v46, %v15248_v36  ;;  %v17655_v31 = vld [vmem:[%s18557_s2 + $0x1bf4] sm:$0xf0] }
 0x518   : > { %v15531_v50 = vld [vmem:[%s18557_s2 + $0x1bf0] sm:$0xf]  ;;  %v15445_v36 = vld [vmem:[%s18557_s2 + $0x1b48] sm:$0xf0] }
 0x519   : > { %8063 = vmatpush.bf16.msrb.mxu0 %v15086_v5  ;;  %v7033_v60 = vpop.f32.mrf.mxu0 }
 0x51a   : > { %8076 = vmatpush.bf16.msrb.mxu1 %v15150_v2  ;;  %8089 = vmatpush.bf16.msrb.mxu2 %v15090_v6  ;;  %v7046_v51 = vpop.f32.mrf.mxu1  ;;  %v15337_v2 = vor.u32 %v17612_v61, %v15336_v59  ;;  %v15277_v6 = vor.u32 %v17595_v63, %v15274_v10  ;;  %v15317_v59 = vor.u32 %v17605_v55, %v15314_v43  ;;  %v8118_v61 = vld [vmem:[%s8116_s12 + $0x8] sm:$0xff]  ;;  %v15435_v55 = vld [vmem:[%s18557_s2 + $0x1b30] sm:$0xf]  ;;  %s9148_s12 = scalar_lea.vmem [#allocation2], %s17728_s18 }
 0x51b   : > { %8102 = vmatpush.bf16.msrb.mxu3 %v15154_v8  ;;  %v7047_v54 = vadd.f32 %v7046_v51, %v7033_v60  ;;  %v17638_v51 = vld [vmem:[%s18557_s2 + $0x1b74] sm:$0xf]  ;;  %v15532_v63 = vor.u32 %v17655_v31, %v15531_v50  ;;  %v17631_v43 = vld [vmem:[%s18557_s2 + $0x1b34] sm:$0xf0] }
 0x51c   : > { %8064 = vmatmul.bf16.vlgmr.msrb.gmra.mxu0 %v7861_v20  ;;  %v17630_v50 = vld [vmem:[%s18557_s2 + $0x1b34] sm:$0xf] }
 0x51d   : > { %8314 = vmatpush.bf16.msra.mxu0 %v15305_v9  ;;  %8077 = vmatmul.bf16.vlgmr.msrb.gmra.mxu1 %v7862_v52  ;;  %v20851_v5 = vadd.f32 %v7047_v54, %v20775_v19  ;;  %v15328_v19 = vld [vmem:[%s18557_s2 + $0x1aa0] sm:$0xf]  ;;  %v17610_v9 = vld [vmem:[%s18557_s2 + $0x1aa4] sm:$0xf0]  ;;  %v17646_v31 = vld [vmem:[%s18557_s2 + $0x1bb4] sm:$0xf] }
 0x51e   : > { %8327 = vmatpush.bf16.msra.mxu1 %v15369_v14  ;;  %8340 = vmatpush.bf16.msra.mxu2 %v15309_v23  ;;  %v15266_v14 = vld [vmem:[%s18557_s2 + $0x1a28] sm:$0xf0]  ;;  %v15329_v33 = vor.u32 %v17610_v9, %v15328_v19 }
 0x51f   : > { %8353 = vmatpush.bf16.msra.mxu3 %v15373_v17  ;;  %8090 = vmatmul.bf16.vlgmr.msrb.gmra.mxu2 %v7861_v20  ;;  %v15265_v20 = vor.u32 %v17594_v18, %v15264_v13  ;;  %v15269_v34 = vor.u32 %v17593_v12, %v15266_v14  ;;  %v17653_v13 = vld [vmem:[%s18557_s2 + $0x1be4] sm:$0xf0]  ;;  %v17636_v18 = vld [vmem:[%s18557_s2 + $0x1b64] sm:$0xf]  ;;  %v15461_v19 = vld [vmem:[%s18557_s2 + $0x1b68] sm:$0xf0]  ;;  %v15460_v12 = vor.u32 %v17637_v0, %v15459_v11 }
 0x520   : > { %8103 = vmatmul.bf16.vlgmr.msrb.gmra.mxu3 %v7862_v52  ;;  %v15256_v52 = vld [vmem:[%s18557_s2 + $0x1a10] sm:$0xf]  ;;  %v15525_v9 = vld [vmem:[%s18557_s2 + $0x1be8] sm:$0xf0]  ;;  %v17644_v11 = vld [vmem:[%s18557_s2 + $0x1ba4] sm:$0xf] }
 0x521   : > { %8315 = vmatpush.bf16.msra.mxu0 %v15297_v25  ;;  %v7035_v16 = vpop.f32.mrf.mxu0  ;;  %v15257_v35 = vor.u32 %v17592_v21, %v15256_v52  ;;  %v15517_v52 = vld [vmem:[%s18557_s2 + $0x1bd8] sm:$0xf0]  ;;  %v15493_v0 = vld [vmem:[%s18557_s2 + $0x1ba8] sm:$0xf0] }
 0x522   : > { %8328 = vmatpush.bf16.msra.mxu1 %v15361_v26  ;;  %8341 = vmatpush.bf16.msra.mxu2 %v15301_v40  ;;  %v7059_v8 = vpop.f32.mrf.mxu2  ;;  %v7048_v28 = vpop.f32.mrf.mxu1  ;;  %v15333_v26 = vor.u32 %v17609_v24, %v15330_v15  ;;  %v17608_v40 = vld [vmem:[%s18557_s2 + $0x1a94] sm:$0xf0]  ;;  %v15451_v24 = vld [vmem:[%s18557_s2 + $0x1b50] sm:$0xf] }
 0x523   : > { %8354 = vmatpush.bf16.msra.mxu3 %v15365_v32  ;;  %v7072_v23 = vpop.f32.mrf.mxu3  ;;  %v15322_v32 = vld [vmem:[%s18557_s2 + $0x1a98] sm:$0xf0]  ;;  %v17635_v15 = vld [vmem:[%s18557_s2 + $0x1b54] sm:$0xf0]  ;;  %v15515_v16 = vld [vmem:[%s18557_s2 + $0x1bd0] sm:$0xf] }
 0x524   : > { %v7073_v17 = vadd.f32 %v7072_v23, %v7059_v8  ;;  %v17652_v8 = vld [vmem:[%s18557_s2 + $0x1be4] sm:$0xf]  ;;  %v15464_v23 = vor.u32 %v17636_v18, %v15461_v19  ;;  %v17634_v28 = vld [vmem:[%s18557_s2 + $0x1b54] sm:$0xf]  ;;  %v15452_v21 = vor.u32 %v17635_v15, %v15451_v24  ;;  %v15421_v15 = vld [vmem:[%s18557_s2 + $0x1b18] sm:$0xf0] }
 0x525   : > { %8316 = vmatpush.bf16.msra.mxu0 %v15289_v38  ;;  %v17606_v38 = vld [vmem:[%s18557_s2 + $0x1a84] sm:$0xf0]  ;;  %v17626_v24 = vld [vmem:[%s18557_s2 + $0x1b14] sm:$0xf] }
 0x526   : > { %8329 = vmatpush.bf16.msra.mxu1 %v15353_v39  ;;  %8342 = vmatpush.bf16.msra.mxu2 %v15293_v42  ;;  %v20870_v25 = vadd.f32 %v7073_v17, %v20794_v3  ;;  %v15321_v3 = vor.u32 %v17608_v40, %v15320_v22  ;;  %v17589_v39 = vld [vmem:[%s18557_s2 + $0x1a04] sm:$0xf]  ;;  %v15325_v42 = vor.u32 %v17607_v29, %v15322_v32  ;;  %v15443_v40 = vld [vmem:[%s18557_s2 + $0x1b40] sm:$0xf]  ;;  %v17649_v32 = vld [vmem:[%s18557_s2 + $0x1bc4] sm:$0xf0] }
 0x527   : > { %8355 = vmatpush.bf16.msra.mxu3 %v15357_v44  ;;  %v15313_v54 = vor.u32 %v17606_v38, %v15312_v37  ;;  %v15528_v17 = vor.u32 %v17652_v8, %v15525_v9  ;;  %v15444_v38 = vor.u32 %v17633_v41, %v15443_v40  ;;  %v17627_v8 = vld [vmem:[%s18557_s2 + $0x1b14] sm:$0xf0]  ;;  %v15483_v9 = vld [vmem:[%s18557_s2 + $0x1b90] sm:$0xf]  ;;  %v15413_v40 = vld [vmem:[%s18557_s2 + $0x1b08] sm:$0xf0] }
 0x528   : > { %v17640_v41 = vld [vmem:[%s18557_s2 + $0x1b84] sm:$0xf] }
 0x529   : > { %8317 = vmatpush.bf16.msra.mxu0 %v15281_v53  ;;  %v15469_v53 = vld [vmem:[%s18557_s2 + $0x1b78] sm:$0xf0] }
 0x52a   : > { %8330 = vmatpush.bf16.msra.mxu1 %v15345_v57  ;;  %8343 = vmatpush.bf16.msra.mxu2 %v15285_v62  ;;  %v7061_v44 = vpop.f32.mrf.mxu2  ;;  %v15253_v57 = vor.u32 %v17589_v39, %v15250_v47  ;;  %v17654_v62 = vld [vmem:[%s18557_s2 + $0x1bf4] sm:$0xf]  ;;  %v15472_v10 = vor.u32 %v17638_v51, %v15469_v53  ;;  %v15501_v51 = vld [vmem:[%s18557_s2 + $0x1bb8] sm:$0xf0]  ;;  %v15436_v53 = vor.u32 %v17631_v43, %v15435_v55 }
 0x52b   : > { %8356 = vmatpush.bf16.msra.mxu3 %v15349_v30  ;;  %v7074_v60 = vpop.f32.mrf.mxu3  ;;  %v15468_v30 = vor.u32 %v17639_v49, %v15467_v45  ;;  %v15499_v44 = vld [vmem:[%s18557_s2 + $0x1bb0] sm:$0xf]  ;;  %v17647_v49 = vld [vmem:[%s18557_s2 + $0x1bb4] sm:$0xf0]  ;;  %v15696_v55 = vld [vmem:[%s18557_s2 + $0x1cf8] sm:$0xf0] }
 0x52c   : > { %v15437_v60 = vld [vmem:[%s18557_s2 + $0x1b38] sm:$0xf0]  ;;  %v8375_v43 = vld [vmem:[%s8374_s15] sm:$0xff] }
 0x52d   : > { %8318 = vmatpush.bf16.msra.mxu0 %v15273_v1  ;;  %v15523_v1 = vld [vmem:[%s18557_s2 + $0x1be0] sm:$0xf] }
 0x52e   : > { %8331 = vmatpush.bf16.msra.mxu1 %v15337_v2  ;;  %8344 = vmatpush.bf16.msra.mxu2 %v15277_v6  ;;  %v15536_v2 = vor.u32 %v17654_v62, %v15533_v4  ;;  %v8119_v6 = vpack.c.bf16 %v8117_v58, %v8117_v58  ;;  %v15524_v14 = vor.u32 %v17653_v13, %v15523_v1  ;;  %v15427_v62 = vld [vmem:[%s18557_s2 + $0x1b20] sm:$0xf]  ;;  %v17629_v4 = vld [vmem:[%s18557_s2 + $0x1b24] sm:$0xf0] }
 0x52f   : > { %8357 = vmatpush.bf16.msra.mxu3 %v15341_v7  ;;  %v8120_v7 = vpack.c.bf16 %v8118_v61, %v8118_v61  ;;  %v15504_v58 = vor.u32 %v17646_v31, %v15501_v51  ;;  %v17628_v61 = vld [vmem:[%s18557_s2 + $0x1b24] sm:$0xf]  ;;  %v15622_v31 = vld [vmem:[%s18557_s2 + $0x1c60] sm:$0xf]  ;;  %v17672_v51 = vld [vmem:[%s18557_s2 + $0x1c64] sm:$0xf0] }
 0x531   : > { %8319 = vmatpush.bf16.msra.mxu0 %v15265_v20  ;;  %v17651_v20 = vld [vmem:[%s18557_s2 + $0x1bd4] sm:$0xf0] }
 0x532   : > { %8332 = vmatpush.bf16.msra.mxu1 %v15329_v33  ;;  %8345 = vmatpush.bf16.msra.mxu2 %v15269_v34  ;;  %v15453_v33 = vld [vmem:[%s18557_s2 + $0x1b58] sm:$0xf0]  ;;  %v17650_v34 = vld [vmem:[%s18557_s2 + $0x1bd4] sm:$0xf]  ;;  %v15516_v22 = vor.u32 %v17651_v20, %v15515_v16 }
 0x533   : > { %8358 = vmatpush.bf16.msra.mxu3 %v15333_v26  ;;  %v15456_v26 = vor.u32 %v17634_v28, %v15453_v33  ;;  %v15520_v29 = vor.u32 %v17650_v34, %v15517_v52  ;;  %v17642_v16 = vld [vmem:[%s18557_s2 + $0x1b94] sm:$0xf]  ;;  %v15411_v28 = vld [vmem:[%s18557_s2 + $0x1b00] sm:$0xf]  ;;  %v17625_v33 = vld [vmem:[%s18557_s2 + $0x1b04] sm:$0xf0]  ;;  %v15424_v34 = vor.u32 %v17626_v24, %v15421_v15 }
 0x534   : > { %v15475_v52 = vld [vmem:[%s18557_s2 + $0x1b80] sm:$0xf]  ;;  %v17668_v24 = vld [vmem:[%s18557_s2 + $0x1c44] sm:$0xf0] }
 0x535   : > { %8320 = vmatpush.bf16.msra.mxu0 %v15257_v35  ;;  %v17632_v35 = vld [vmem:[%s18557_s2 + $0x1b44] sm:$0xf]  ;;  %v15670_v15 = vld [vmem:[%s18557_s2 + $0x1cc0] sm:$0xf] }
 0x536   : > { %8333 = vmatpush.bf16.msra.mxu1 %v15321_v3  ;;  %8346 = vmatpush.bf16.msra.mxu2 %v15261_v48  ;;  %v17648_v3 = vld [vmem:[%s18557_s2 + $0x1bc4] sm:$0xf]  ;;  %v15509_v48 = vld [vmem:[%s18557_s2 + $0x1bc8] sm:$0xf0]  ;;  %v15448_v47 = vor.u32 %v17632_v35, %v15445_v36  ;;  %v17674_v35 = vld [vmem:[%s18557_s2 + $0x1c74] sm:$0xf0] }
 0x537   : > { %8359 = vmatpush.bf16.msra.mxu3 %v15325_v42  ;;  %v15508_v42 = vor.u32 %v17649_v32, %v15507_v27  ;;  %v15512_v45 = vor.u32 %v17648_v3, %v15509_v48  ;;  %v15477_v27 = vld [vmem:[%s18557_s2 + $0x1b88] sm:$0xf0]  ;;  %v15630_v32 = vld [vmem:[%s18557_s2 + $0x1c70] sm:$0xf]  ;;  %v15412_v3 = vor.u32 %v17625_v33, %v15411_v28  ;;  %v17690_v48 = vld [vmem:[%s18557_s2 + $0x1cf4] sm:$0xf0] }
 0x538   : > { %v15694_v36 = vld [vmem:[%s18557_s2 + $0x1cf0] sm:$0xf]  ;;  %v15608_v28 = vld [vmem:[%s18557_s2 + $0x1c48] sm:$0xf0] }
 0x539   : > { %8321 = vmatpush.bf16.msra.mxu0 %v15249_v56  ;;  %v7291_v46 = vpop.f32.mrf.mxu0 }
 0x53a   : > { %8334 = vmatpush.bf16.msra.mxu1 %v15313_v54  ;;  %8347 = vmatpush.bf16.msra.mxu2 %v15253_v57  ;;  %v7304_v37 = vpop.f32.mrf.mxu1  ;;  %v15500_v54 = vor.u32 %v17647_v49, %v15499_v44  ;;  %v15440_v57 = vor.u32 %v17630_v50, %v15437_v60  ;;  %v15480_v44 = vor.u32 %v17640_v41, %v15477_v27  ;;  %v8376_v49 = vld [vmem:[%s8374_s15 + $0x8] sm:$0xff]  ;;  %v15598_v41 = vld [vmem:[%s18557_s2 + $0x1c30] sm:$0xf] }
 0x53b   : > { %8360 = vmatpush.bf16.msra.mxu3 %v15317_v59  ;;  %v7305_v39 = vadd.f32 %v7304_v37, %v7291_v46  ;;  %v17673_v37 = vld [vmem:[%s18557_s2 + $0x1c74] sm:$0xf]  ;;  %v15695_v50 = vor.u32 %v17690_v48, %v15694_v36  ;;  %v17666_v27 = vld [vmem:[%s18557_s2 + $0x1c34] sm:$0xf0] }
 0x53c   : > { %8322 = vmatmul.bf16.vlgmr.msra.gmra.mxu0 %v8119_v6  ;;  %v17665_v36 = vld [vmem:[%s18557_s2 + $0x1c34] sm:$0xf] }
 0x53d   : > { %8572 = vmatpush.bf16.msrb.mxu0 %v15468_v30  ;;  %8335 = vmatmul.bf16.vlgmr.msra.gmra.mxu1 %v8120_v7  ;;  %v20927_v56 = vadd.f32 %v7305_v39, %v20851_v5  ;;  %v15491_v5 = vld [vmem:[%s18557_s2 + $0x1ba0] sm:$0xf]  ;;  %v17645_v30 = vld [vmem:[%s18557_s2 + $0x1ba4] sm:$0xf0]  ;;  %v17681_v48 = vld [vmem:[%s18557_s2 + $0x1cb4] sm:$0xf] }
 0x53e   : > { %8585 = vmatpush.bf16.msrb.mxu1 %v15532_v63  ;;  %8598 = vmatpush.bf16.msrb.mxu2 %v15472_v10  ;;  %v15429_v63 = vld [vmem:[%s18557_s2 + $0x1b28] sm:$0xf0]  ;;  %v15492_v18 = vor.u32 %v17645_v30, %v15491_v5 }
 0x53f   : > { %8611 = vmatpush.bf16.msrb.mxu3 %v15536_v2  ;;  %8348 = vmatmul.bf16.vlgmr.msra.gmra.mxu2 %v8119_v6  ;;  %v15428_v6 = vor.u32 %v17629_v4, %v15427_v62  ;;  %v15432_v19 = vor.u32 %v17628_v61, %v15429_v63  ;;  %v17688_v62 = vld [vmem:[%s18557_s2 + $0x1ce4] sm:$0xf0]  ;;  %v17671_v4 = vld [vmem:[%s18557_s2 + $0x1c64] sm:$0xf]  ;;  %v15624_v5 = vld [vmem:[%s18557_s2 + $0x1c68] sm:$0xf0]  ;;  %v15623_v61 = vor.u32 %v17672_v51, %v15622_v31 }
 0x540   : > { %8361 = vmatmul.bf16.vlgmr.msra.gmra.mxu3 %v8120_v7  ;;  %v15419_v7 = vld [vmem:[%s18557_s2 + $0x1b10] sm:$0xf]  ;;  %v15688_v30 = vld [vmem:[%s18557_s2 + $0x1ce8] sm:$0xf0]  ;;  %v17679_v31 = vld [vmem:[%s18557_s2 + $0x1ca4] sm:$0xf] }
 0x541   : > { %8573 = vmatpush.bf16.msrb.mxu0 %v15460_v12  ;;  %v7293_v1 = vpop.f32.mrf.mxu0  ;;  %v15420_v20 = vor.u32 %v17627_v8, %v15419_v7  ;;  %v15680_v7 = vld [vmem:[%s18557_s2 + $0x1cd8] sm:$0xf0]  ;;  %v15656_v51 = vld [vmem:[%s18557_s2 + $0x1ca8] sm:$0xf0] }
 0x542   : > { %8586 = vmatpush.bf16.msrb.mxu1 %v15524_v14  ;;  %8599 = vmatpush.bf16.msrb.mxu2 %v15464_v23  ;;  %v7317_v59 = vpop.f32.mrf.mxu2  ;;  %v7306_v13 = vpop.f32.mrf.mxu1  ;;  %v15496_v14 = vor.u32 %v17644_v11, %v15493_v0  ;;  %v17643_v23 = vld [vmem:[%s18557_s2 + $0x1b94] sm:$0xf0]  ;;  %v15614_v11 = vld [vmem:[%s18557_s2 + $0x1c50] sm:$0xf] }
 0x543   : > { %8612 = vmatpush.bf16.msrb.mxu3 %v15528_v17  ;;  %v7330_v10 = vpop.f32.mrf.mxu3  ;;  %v15485_v17 = vld [vmem:[%s18557_s2 + $0x1b98] sm:$0xf0]  ;;  %v17670_v0 = vld [vmem:[%s18557_s2 + $0x1c54] sm:$0xf0]  ;;  %v15678_v1 = vld [vmem:[%s18557_s2 + $0x1cd0] sm:$0xf] }
 0x544   : > { %v7331_v2 = vadd.f32 %v7330_v10, %v7317_v59  ;;  %v17687_v59 = vld [vmem:[%s18557_s2 + $0x1ce4] sm:$0xf]  ;;  %v15627_v10 = vor.u32 %v17671_v4, %v15624_v5  ;;  %v17669_v13 = vld [vmem:[%s18557_s2 + $0x1c54] sm:$0xf]  ;;  %v15615_v8 = vor.u32 %v17670_v0, %v15614_v11  ;;  %v15584_v0 = vld [vmem:[%s18557_s2 + $0x1c18] sm:$0xf0] }
 0x545   : > { %8574 = vmatpush.bf16.msrb.mxu0 %v15452_v21  ;;  %v17641_v21 = vld [vmem:[%s18557_s2 + $0x1b84] sm:$0xf0]  ;;  %v17661_v11 = vld [vmem:[%s18557_s2 + $0x1c14] sm:$0xf] }
 0x546   : > { %8587 = vmatpush.bf16.msrb.mxu1 %v15516_v22  ;;  %8600 = vmatpush.bf16.msrb.mxu2 %v15456_v26  ;;  %v20946_v12 = vadd.f32 %v7331_v2, %v20870_v25  ;;  %v15484_v25 = vor.u32 %v17643_v23, %v15483_v9  ;;  %v17624_v22 = vld [vmem:[%s18557_s2 + $0x1b04] sm:$0xf]  ;;  %v15488_v26 = vor.u32 %v17642_v16, %v15485_v17  ;;  %v15606_v23 = vld [vmem:[%s18557_s2 + $0x1c40] sm:$0xf]  ;;  %v17684_v17 = vld [vmem:[%s18557_s2 + $0x1cc4] sm:$0xf0] }
 0x547   : > { %8613 = vmatpush.bf16.msrb.mxu3 %v15520_v29  ;;  %v15476_v39 = vor.u32 %v17641_v21, %v15475_v52  ;;  %v15691_v2 = vor.u32 %v17687_v59, %v15688_v30  ;;  %v15607_v21 = vor.u32 %v17668_v24, %v15606_v23  ;;  %v17662_v59 = vld [vmem:[%s18557_s2 + $0x1c14] sm:$0xf0]  ;;  %v15646_v30 = vld [vmem:[%s18557_s2 + $0x1c90] sm:$0xf]  ;;  %v15576_v23 = vld [vmem:[%s18557_s2 + $0x1c08] sm:$0xf0] }
 0x548   : > { %v17675_v24 = vld [vmem:[%s18557_s2 + $0x1c84] sm:$0xf] }
 0x549   : > { %8575 = vmatpush.bf16.msrb.mxu0 %v15444_v38  ;;  %v15632_v38 = vld [vmem:[%s18557_s2 + $0x1c78] sm:$0xf0] }
 0x54a   : > { %8588 = vmatpush.bf16.msrb.mxu1 %v15508_v42  ;;  %8601 = vmatpush.bf16.msrb.mxu2 %v15448_v47  ;;  %v7319_v29 = vpop.f32.mrf.mxu2  ;;  %v15416_v42 = vor.u32 %v17624_v22, %v15413_v40  ;;  %v17689_v47 = vld [vmem:[%s18557_s2 + $0x1cf4] sm:$0xf]  ;;  %v15635_v60 = vor.u32 %v17673_v37, %v15632_v38  ;;  %v15664_v37 = vld [vmem:[%s18557_s2 + $0x1cb8] sm:$0xf0]  ;;  %v15599_v38 = vor.u32 %v17666_v27, %v15598_v41 }
 0x54b   : > { %8614 = vmatpush.bf16.msrb.mxu3 %v15512_v45  ;;  %v7332_v46 = vpop.f32.mrf.mxu3  ;;  %v15631_v45 = vor.u32 %v17674_v35, %v15630_v32  ;;  %v15662_v29 = vld [vmem:[%s18557_s2 + $0x1cb0] sm:$0xf]  ;;  %v17682_v35 = vld [vmem:[%s18557_s2 + $0x1cb4] sm:$0xf0]  ;;  %v15859_v41 = vld [vmem:[%s18557_s2 + $0x1df8] sm:$0xf0] }
 0x54c   : > { %v15600_v46 = vld [vmem:[%s18557_s2 + $0x1c38] sm:$0xf0]  ;;  %v8633_v27 = vld [vmem:[%s8632_s17] sm:$0xff] }
 0x54d   : > { %8576 = vmatpush.bf16.msrb.mxu0 %v15436_v53  ;;  %v15686_v53 = vld [vmem:[%s18557_s2 + $0x1ce0] sm:$0xf] }
 0x54e   : > { %8589 = vmatpush.bf16.msrb.mxu1 %v15500_v54  ;;  %8602 = vmatpush.bf16.msrb.mxu2 %v15440_v57  ;;  %v15699_v54 = vor.u32 %v17689_v47, %v15696_v55  ;;  %v8377_v57 = vpack.c.bf16 %v8375_v43, %v8375_v43  ;;  %v15687_v63 = vor.u32 %v17688_v62, %v15686_v53  ;;  %v15590_v47 = vld [vmem:[%s18557_s2 + $0x1c20] sm:$0xf]  ;;  %v17664_v55 = vld [vmem:[%s18557_s2 + $0x1c24] sm:$0xf0] }
 0x54f   : > { %8615 = vmatpush.bf16.msrb.mxu3 %v15504_v58  ;;  %v8378_v58 = vpack.c.bf16 %v8376_v49, %v8376_v49  ;;  %v15667_v43 = vor.u32 %v17681_v48, %v15664_v37  ;;  %v17663_v49 = vld [vmem:[%s18557_s2 + $0x1c24] sm:$0xf]  ;;  %v15785_v48 = vld [vmem:[%s18557_s2 + $0x1d60] sm:$0xf]  ;;  %v17707_v37 = vld [vmem:[%s18557_s2 + $0x1d64] sm:$0xf0] }
 0x551   : > { %8577 = vmatpush.bf16.msrb.mxu0 %v15428_v6  ;;  %v17686_v6 = vld [vmem:[%s18557_s2 + $0x1cd4] sm:$0xf0] }
 0x552   : > { %8590 = vmatpush.bf16.msrb.mxu1 %v15492_v18  ;;  %8603 = vmatpush.bf16.msrb.mxu2 %v15432_v19  ;;  %v15616_v18 = vld [vmem:[%s18557_s2 + $0x1c58] sm:$0xf0]  ;;  %v17685_v19 = vld [vmem:[%s18557_s2 + $0x1cd4] sm:$0xf]  ;;  %v15679_v9 = vor.u32 %v17686_v6, %v15678_v1 }
 0x553   : > { %8616 = vmatpush.bf16.msrb.mxu3 %v15496_v14  ;;  %v15619_v14 = vor.u32 %v17669_v13, %v15616_v18  ;;  %v15683_v16 = vor.u32 %v17685_v19, %v15680_v7  ;;  %v17677_v1 = vld [vmem:[%s18557_s2 + $0x1c94] sm:$0xf]  ;;  %v15574_v13 = vld [vmem:[%s18557_s2 + $0x1c00] sm:$0xf]  ;;  %v17660_v18 = vld [vmem:[%s18557_s2 + $0x1c04] sm:$0xf0]  ;;  %v15587_v19 = vor.u32 %v17661_v11, %v15584_v0 }
 0x554   : > { %v15638_v7 = vld [vmem:[%s18557_s2 + $0x1c80] sm:$0xf]  ;;  %v17703_v11 = vld [vmem:[%s18557_s2 + $0x1d44] sm:$0xf0] }
 0x555   : > { %8578 = vmatpush.bf16.msrb.mxu0 %v15420_v20  ;;  %v17667_v20 = vld [vmem:[%s18557_s2 + $0x1c44] sm:$0xf]  ;;  %v15833_v0 = vld [vmem:[%s18557_s2 + $0x1dc0] sm:$0xf] }
 0x556   : > { %8591 = vmatpush.bf16.msrb.mxu1 %v15484_v25  ;;  %8604 = vmatpush.bf16.msrb.mxu2 %v15424_v34  ;;  %v17683_v25 = vld [vmem:[%s18557_s2 + $0x1cc4] sm:$0xf]  ;;  %v15672_v34 = vld [vmem:[%s18557_s2 + $0x1cc8] sm:$0xf0]  ;;  %v15611_v40 = vor.u32 %v17667_v20, %v15608_v28  ;;  %v17709_v20 = vld [vmem:[%s18557_s2 + $0x1d74] sm:$0xf0] }
 0x557   : > { %8617 = vmatpush.bf16.msrb.mxu3 %v15488_v26  ;;  %v15671_v26 = vor.u32 %v17684_v17, %v15670_v15  ;;  %v15675_v32 = vor.u32 %v17683_v25, %v15672_v34  ;;  %v15640_v15 = vld [vmem:[%s18557_s2 + $0x1c88] sm:$0xf0]  ;;  %v15793_v17 = vld [vmem:[%s18557_s2 + $0x1d70] sm:$0xf]  ;;  %v15575_v25 = vor.u32 %v17660_v18, %v15574_v13  ;;  %v17725_v34 = vld [vmem:[%s18557_s2 + $0x1df4] sm:$0xf0] }
 0x558   : > { %v15857_v28 = vld [vmem:[%s18557_s2 + $0x1df0] sm:$0xf]  ;;  %v15771_v13 = vld [vmem:[%s18557_s2 + $0x1d48] sm:$0xf0] }
 0x559   : > { %8579 = vmatpush.bf16.msrb.mxu0 %v15412_v3  ;;  %v7549_v33 = vpop.f32.mrf.mxu0 }
 0x55a   : > { %8592 = vmatpush.bf16.msrb.mxu1 %v15476_v39  ;;  %8605 = vmatpush.bf16.msrb.mxu2 %v15416_v42  ;;  %v7562_v52 = vpop.f32.mrf.mxu1  ;;  %v15663_v39 = vor.u32 %v17682_v35, %v15662_v29  ;;  %v15603_v42 = vor.u32 %v17665_v36, %v15600_v46  ;;  %v15643_v29 = vor.u32 %v17675_v24, %v15640_v15  ;;  %v8634_v35 = vld [vmem:[%s8632_s17 + $0x8] sm:$0xff]  ;;  %v15761_v24 = vld [vmem:[%s18557_s2 + $0x1d30] sm:$0xf] }
 0x55b   : > { %8618 = vmatpush.bf16.msrb.mxu3 %v15480_v44  ;;  %v7563_v22 = vadd.f32 %v7562_v52, %v7549_v33  ;;  %v17708_v52 = vld [vmem:[%s18557_s2 + $0x1d74] sm:$0xf]  ;;  %v15858_v36 = vor.u32 %v17725_v34, %v15857_v28  ;;  %v17701_v15 = vld [vmem:[%s18557_s2 + $0x1d34] sm:$0xf0] }
 0x55c   : > { %8580 = vmatmul.bf16.vlgmr.msrb.gmra.mxu0 %v8377_v57  ;;  %v17700_v28 = vld [vmem:[%s18557_s2 + $0x1d34] sm:$0xf] }
 0x55d   : > { %8830 = vmatpush.bf16.msra.mxu0 %v15631_v45  ;;  %8593 = vmatmul.bf16.vlgmr.msrb.gmra.mxu1 %v8378_v58  ;;  %v21003_v3 = vadd.f32 %v7563_v22, %v20927_v56  ;;  %v15654_v56 = vld [vmem:[%s18557_s2 + $0x1ca0] sm:$0xf]  ;;  %v17680_v45 = vld [vmem:[%s18557_s2 + $0x1ca4] sm:$0xf0]  ;;  %v17716_v34 = vld [vmem:[%s18557_s2 + $0x1db4] sm:$0xf] }
 0x55e   : > { %8843 = vmatpush.bf16.msra.mxu1 %v15695_v50  ;;  %8856 = vmatpush.bf16.msra.mxu2 %v15635_v60  ;;  %v15592_v50 = vld [vmem:[%s18557_s2 + $0x1c28] sm:$0xf0]  ;;  %v15655_v4 = vor.u32 %v17680_v45, %v15654_v56 }
 0x55f   : > { %8869 = vmatpush.bf16.msra.mxu3 %v15699_v54  ;;  %8606 = vmatmul.bf16.vlgmr.msrb.gmra.mxu2 %v8377_v57  ;;  %v15591_v57 = vor.u32 %v17664_v55, %v15590_v47  ;;  %v15595_v5 = vor.u32 %v17663_v49, %v15592_v50  ;;  %v17723_v47 = vld [vmem:[%s18557_s2 + $0x1de4] sm:$0xf0]  ;;  %v17706_v55 = vld [vmem:[%s18557_s2 + $0x1d64] sm:$0xf]  ;;  %v15787_v56 = vld [vmem:[%s18557_s2 + $0x1d68] sm:$0xf0]  ;;  %v15786_v49 = vor.u32 %v17707_v37, %v15785_v48 }
 0x560   : > { %8619 = vmatmul.bf16.vlgmr.msrb.gmra.mxu3 %v8378_v58  ;;  %v15582_v58 = vld [vmem:[%s18557_s2 + $0x1c10] sm:$0xf]  ;;  %v15851_v45 = vld [vmem:[%s18557_s2 + $0x1de8] sm:$0xf0]  ;;  %v17714_v48 = vld [vmem:[%s18557_s2 + $0x1da4] sm:$0xf] }
 0x561   : > { %8831 = vmatpush.bf16.msra.mxu0 %v15623_v61  ;;  %v7551_v53 = vpop.f32.mrf.mxu0  ;;  %v15583_v6 = vor.u32 %v17662_v59, %v15582_v58  ;;  %v15843_v58 = vld [vmem:[%s18557_s2 + $0x1dd8] sm:$0xf0]  ;;  %v15819_v37 = vld [vmem:[%s18557_s2 + $0x1da8] sm:$0xf0] }
 0x562   : > { %8844 = vmatpush.bf16.msra.mxu1 %v15687_v63  ;;  %8857 = vmatpush.bf16.msra.mxu2 %v15627_v10  ;;  %v7575_v44 = vpop.f32.mrf.mxu2  ;;  %v7564_v62 = vpop.f32.mrf.mxu1  ;;  %v15659_v63 = vor.u32 %v17679_v31, %v15656_v51  ;;  %v17678_v10 = vld [vmem:[%s18557_s2 + $0x1c94] sm:$0xf0]  ;;  %v15777_v31 = vld [vmem:[%s18557_s2 + $0x1d50] sm:$0xf] }
 0x563   : > { %8870 = vmatpush.bf16.msra.mxu3 %v15691_v2  ;;  %v7588_v60 = vpop.f32.mrf.mxu3  ;;  %v15648_v2 = vld [vmem:[%s18557_s2 + $0x1c98] sm:$0xf0]  ;;  %v17705_v51 = vld [vmem:[%s18557_s2 + $0x1d54] sm:$0xf0]  ;;  %v15841_v53 = vld [vmem:[%s18557_s2 + $0x1dd0] sm:$0xf] }
 0x564   : > { %v7589_v54 = vadd.f32 %v7588_v60, %v7575_v44  ;;  %v17722_v44 = vld [vmem:[%s18557_s2 + $0x1de4] sm:$0xf]  ;;  %v15790_v60 = vor.u32 %v17706_v55, %v15787_v56  ;;  %v17704_v62 = vld [vmem:[%s18557_s2 + $0x1d54] sm:$0xf]  ;;  %v15778_v59 = vor.u32 %v17705_v51, %v15777_v31  ;;  %v15747_v51 = vld [vmem:[%s18557_s2 + $0x1d18] sm:$0xf0] }
 0x565   : > { %8832 = vmatpush.bf16.msra.mxu0 %v15615_v8  ;;  %v17676_v8 = vld [vmem:[%s18557_s2 + $0x1c84] sm:$0xf0]  ;;  %v17696_v31 = vld [vmem:[%s18557_s2 + $0x1d14] sm:$0xf] }
 0x566   : > { %8845 = vmatpush.bf16.msra.mxu1 %v15679_v9  ;;  %8858 = vmatpush.bf16.msra.mxu2 %v15619_v14  ;;  %v21022_v61 = vadd.f32 %v7589_v54, %v20946_v12  ;;  %v15647_v12 = vor.u32 %v17678_v10, %v15646_v30  ;;  %v17659_v9 = vld [vmem:[%s18557_s2 + $0x1c04] sm:$0xf]  ;;  %v15651_v14 = vor.u32 %v17677_v1, %v15648_v2  ;;  %v15769_v10 = vld [vmem:[%s18557_s2 + $0x1d40] sm:$0xf]  ;;  %v17719_v2 = vld [vmem:[%s18557_s2 + $0x1dc4] sm:$0xf0] }
 0x567   : > { %8871 = vmatpush.bf16.msra.mxu3 %v15683_v16  ;;  %v15639_v22 = vor.u32 %v17676_v8, %v15638_v7  ;;  %v15854_v54 = vor.u32 %v17722_v44, %v15851_v45  ;;  %v15770_v8 = vor.u32 %v17703_v11, %v15769_v10  ;;  %v17697_v44 = vld [vmem:[%s18557_s2 + $0x1d14] sm:$0xf0]  ;;  %v15809_v45 = vld [vmem:[%s18557_s2 + $0x1d90] sm:$0xf]  ;;  %v15739_v10 = vld [vmem:[%s18557_s2 + $0x1d08] sm:$0xf0] }
 0x568   : > { %v17710_v11 = vld [vmem:[%s18557_s2 + $0x1d84] sm:$0xf] }
 0x569   : > { %8833 = vmatpush.bf16.msra.mxu0 %v15607_v21  ;;  %v15795_v21 = vld [vmem:[%s18557_s2 + $0x1d78] sm:$0xf0] }
 0x56a   : > { %8846 = vmatpush.bf16.msra.mxu1 %v15671_v26  ;;  %8859 = vmatpush.bf16.msra.mxu2 %v15611_v40  ;;  %v7577_v16 = vpop.f32.mrf.mxu2  ;;  %v15579_v26 = vor.u32 %v17659_v9, %v15576_v23  ;;  %v17724_v40 = vld [vmem:[%s18557_s2 + $0x1df4] sm:$0xf]  ;;  %v15798_v46 = vor.u32 %v17708_v52, %v15795_v21  ;;  %v15827_v52 = vld [vmem:[%s18557_s2 + $0x1db8] sm:$0xf0]  ;;  %v15762_v21 = vor.u32 %v17701_v15, %v15761_v24 }
 0x56b   : > { %8872 = vmatpush.bf16.msra.mxu3 %v15675_v32  ;;  %v7590_v33 = vpop.f32.mrf.mxu3  ;;  %v15794_v32 = vor.u32 %v17709_v20, %v15793_v17  ;;  %v15825_v16 = vld [vmem:[%s18557_s2 + $0x1db0] sm:$0xf]  ;;  %v17717_v20 = vld [vmem:[%s18557_s2 + $0x1db4] sm:$0xf0]  ;;  %v16022_v24 = vld [vmem:[%s18557_s2 + $0x1ef8] sm:$0xf0] }
 0x56c   : > { %v15763_v33 = vld [vmem:[%s18557_s2 + $0x1d38] sm:$0xf0]  ;;  %v8891_v15 = vld [vmem:[%s8890_s30] sm:$0xff] }
 0x56d   : > { %8834 = vmatpush.bf16.msra.mxu0 %v15599_v38  ;;  %v15849_v38 = vld [vmem:[%s18557_s2 + $0x1de0] sm:$0xf] }
 0x56e   : > { %8847 = vmatpush.bf16.msra.mxu1 %v15663_v39  ;;  %8860 = vmatpush.bf16.msra.mxu2 %v15603_v42  ;;  %v15862_v39 = vor.u32 %v17724_v40, %v15859_v41  ;;  %v8635_v42 = vpack.c.bf16 %v8633_v27, %v8633_v27  ;;  %v15850_v50 = vor.u32 %v17723_v47, %v15849_v38  ;;  %v15753_v40 = vld [vmem:[%s18557_s2 + $0x1d20] sm:$0xf]  ;;  %v17699_v41 = vld [vmem:[%s18557_s2 + $0x1d24] sm:$0xf0] }
 0x56f   : > { %8873 = vmatpush.bf16.msra.mxu3 %v15667_v43  ;;  %v8636_v43 = vpack.c.bf16 %v8634_v35, %v8634_v35  ;;  %v15830_v27 = vor.u32 %v17716_v34, %v15827_v52  ;;  %v17698_v35 = vld [vmem:[%s18557_s2 + $0x1d24] sm:$0xf]  ;;  %v15948_v34 = vld [vmem:[%s18557_s2 + $0x1e60] sm:$0xf]  ;;  %v17742_v52 = vld [vmem:[%s18557_s2 + $0x1e64] sm:$0xf0] }
 0x571   : > { %8835 = vmatpush.bf16.msra.mxu0 %v15591_v57  ;;  %v17721_v57 = vld [vmem:[%s18557_s2 + $0x1dd4] sm:$0xf0] }
 0x572   : > { %8848 = vmatpush.bf16.msra.mxu1 %v15655_v4  ;;  %8861 = vmatpush.bf16.msra.mxu2 %v15595_v5  ;;  %v15779_v4 = vld [vmem:[%s18557_s2 + $0x1d58] sm:$0xf0]  ;;  %v17720_v5 = vld [vmem:[%s18557_s2 + $0x1dd4] sm:$0xf]  ;;  %v15842_v30 = vor.u32 %v17721_v57, %v15841_v53 }
 0x573   : > { %8874 = vmatpush.bf16.msra.mxu3 %v15659_v63  ;;  %v15782_v63 = vor.u32 %v17704_v62, %v15779_v4  ;;  %v15846_v1 = vor.u32 %v17720_v5, %v15843_v58  ;;  %v17712_v53 = vld [vmem:[%s18557_s2 + $0x1d94] sm:$0xf]  ;;  %v15737_v62 = vld [vmem:[%s18557_s2 + $0x1d00] sm:$0xf]  ;;  %v17695_v4 = vld [vmem:[%s18557_s2 + $0x1d04] sm:$0xf0]  ;;  %v15750_v5 = vor.u32 %v17696_v31, %v15747_v51 }
 0x574   : > { %v15801_v58 = vld [vmem:[%s18557_s2 + $0x1d80] sm:$0xf]  ;;  %v17738_v31 = vld [vmem:[%s18557_s2 + $0x1e44] sm:$0xf0] }
 0x575   : > { %8836 = vmatpush.bf16.msra.mxu0 %v15583_v6  ;;  %v17702_v6 = vld [vmem:[%s18557_s2 + $0x1d44] sm:$0xf]  ;;  %v15996_v51 = vld [vmem:[%s18557_s2 + $0x1ec0] sm:$0xf] }
 0x576   : > { %8849 = vmatpush.bf16.msra.mxu1 %v15647_v12  ;;  %8862 = vmatpush.bf16.msra.mxu2 %v15587_v19  ;;  %v17718_v12 = vld [vmem:[%s18557_s2 + $0x1dc4] sm:$0xf]  ;;  %v15835_v19 = vld [vmem:[%s18557_s2 + $0x1dc8] sm:$0xf0]  ;;  %v15774_v23 = vor.u32 %v17702_v6, %v15771_v13  ;;  %v17744_v6 = vld [vmem:[%s18557_s2 + $0x1e74] sm:$0xf0] }
 0x577   : > { %8875 = vmatpush.bf16.msra.mxu3 %v15651_v14  ;;  %v15834_v14 = vor.u32 %v17719_v2, %v15833_v0  ;;  %v15838_v17 = vor.u32 %v17718_v12, %v15835_v19  ;;  %v15803_v0 = vld [vmem:[%s18557_s2 + $0x1d88] sm:$0xf0]  ;;  %v15956_v2 = vld [vmem:[%s18557_s2 + $0x1e70] sm:$0xf]  ;;  %v15738_v12 = vor.u32 %v17695_v4, %v15737_v62  ;;  %v17760_v19 = vld [vmem:[%s18557_s2 + $0x1ef4] sm:$0xf0] }
 0x578   : > { %v16020_v13 = vld [vmem:[%s18557_s2 + $0x1ef0] sm:$0xf]  ;;  %v15934_v62 = vld [vmem:[%s18557_s2 + $0x1e48] sm:$0xf0] }
 0x579   : > { %8837 = vmatpush.bf16.msra.mxu0 %v15575_v25  ;;  %v7807_v18 = vpop.f32.mrf.mxu0 }
 0x57a   : > { %8850 = vmatpush.bf16.msra.mxu1 %v15639_v22  ;;  %8863 = vmatpush.bf16.msra.mxu2 %v15579_v26  ;;  %v7820_v7 = vpop.f32.mrf.mxu1  ;;  %v15826_v22 = vor.u32 %v17717_v20, %v15825_v16  ;;  %v15766_v26 = vor.u32 %v17700_v28, %v15763_v33  ;;  %v15806_v16 = vor.u32 %v17710_v11, %v15803_v0  ;;  %v8892_v20 = vld [vmem:[%s8890_s30 + $0x8] sm:$0xff]  ;;  %v15924_v11 = vld [vmem:[%s18557_s2 + $0x1e30] sm:$0xf] }
 0x57b   : > { %8876 = vmatpush.bf16.msra.mxu3 %v15643_v29  ;;  %v7821_v9 = vadd.f32 %v7820_v7, %v7807_v18  ;;  %v17743_v7 = vld [vmem:[%s18557_s2 + $0x1e74] sm:$0xf]  ;;  %v16021_v28 = vor.u32 %v17760_v19, %v16020_v13  ;;  %v17736_v0 = vld [vmem:[%s18557_s2 + $0x1e34] sm:$0xf0] }
 0x57c   : > { %8838 = vmatmul.bf16.vlgmr.msra.gmra.mxu0 %v8635_v42  ;;  %v17735_v13 = vld [vmem:[%s18557_s2 + $0x1e34] sm:$0xf] }
 0x57d   : > { %9088 = vmatpush.bf16.msrb.mxu0 %v15794_v32  ;;  %8851 = vmatmul.bf16.vlgmr.msra.gmra.mxu1 %v8636_v43  ;;  %v21079_v25 = vadd.f32 %v7821_v9, %v21003_v3  ;;  %v15817_v3 = vld [vmem:[%s18557_s2 + $0x1da0] sm:$0xf]  ;;  %v17715_v32 = vld [vmem:[%s18557_s2 + $0x1da4] sm:$0xf0]  ;;  %v17751_v19 = vld [vmem:[%s18557_s2 + $0x1eb4] sm:$0xf] }
 0x57e   : > { %9101 = vmatpush.bf16.msrb.mxu1 %v15858_v36  ;;  %9114 = vmatpush.bf16.msrb.mxu2 %v15798_v46  ;;  %v15755_v36 = vld [vmem:[%s18557_s2 + $0x1d28] sm:$0xf0]  ;;  %v15818_v55 = vor.u32 %v17715_v32, %v15817_v3 }
 0x57f   : > { %9127 = vmatpush.bf16.msrb.mxu3 %v15862_v39  ;;  %8864 = vmatmul.bf16.vlgmr.msra.gmra.mxu2 %v8635_v42  ;;  %v15754_v42 = vor.u32 %v17699_v41, %v15753_v40  ;;  %v15758_v56 = vor.u32 %v17698_v35, %v15755_v36  ;;  %v17758_v40 = vld [vmem:[%s18557_s2 + $0x1ee4] sm:$0xf0]  ;;  %v17741_v41 = vld [vmem:[%s18557_s2 + $0x1e64] sm:$0xf]  ;;  %v15950_v3 = vld [vmem:[%s18557_s2 + $0x1e68] sm:$0xf0]  ;;  %v15949_v35 = vor.u32 %v17742_v52, %v15948_v34 }
 0x580   : > { %8877 = vmatmul.bf16.vlgmr.msra.gmra.mxu3 %v8636_v43  ;;  %v15745_v43 = vld [vmem:[%s18557_s2 + $0x1d10] sm:$0xf]  ;;  %v16014_v32 = vld [vmem:[%s18557_s2 + $0x1ee8] sm:$0xf0]  ;;  %v17749_v34 = vld [vmem:[%s18557_s2 + $0x1ea4] sm:$0xf] }
 0x581   : > { %9089 = vmatpush.bf16.msrb.mxu0 %v15786_v49  ;;  %v7809_v38 = vpop.f32.mrf.mxu0  ;;  %v15746_v57 = vor.u32 %v17697_v44, %v15745_v43  ;;  %v16006_v43 = vld [vmem:[%s18557_s2 + $0x1ed8] sm:$0xf0]  ;;  %v15982_v52 = vld [vmem:[%s18557_s2 + $0x1ea8] sm:$0xf0] }
 0x582   : > { %9102 = vmatpush.bf16.msrb.mxu1 %v15850_v50  ;;  %9115 = vmatpush.bf16.msrb.mxu2 %v15790_v60  ;;  %v7833_v29 = vpop.f32.mrf.mxu2  ;;  %v7822_v47 = vpop.f32.mrf.mxu1  ;;  %v15822_v50 = vor.u32 %v17714_v48, %v15819_v37  ;;  %v17713_v60 = vld [vmem:[%s18557_s2 + $0x1d94] sm:$0xf0]  ;;  %v15940_v48 = vld [vmem:[%s18557_s2 + $0x1e50] sm:$0xf] }
 0x583   : > { %9128 = vmatpush.bf16.msrb.mxu3 %v15854_v54  ;;  %v7846_v46 = vpop.f32.mrf.mxu3  ;;  %v15811_v54 = vld [vmem:[%s18557_s2 + $0x1d98] sm:$0xf0]  ;;  %v17740_v37 = vld [vmem:[%s18557_s2 + $0x1e54] sm:$0xf0]  ;;  %v16004_v38 = vld [vmem:[%s18557_s2 + $0x1ed0] sm:$0xf] }
 0x584   : > { %v7847_v39 = vadd.f32 %v7846_v46, %v7833_v29  ;;  %v17757_v29 = vld [vmem:[%s18557_s2 + $0x1ee4] sm:$0xf]  ;;  %v15953_v46 = vor.u32 %v17741_v41, %v15950_v3  ;;  %v17739_v47 = vld [vmem:[%s18557_s2 + $0x1e54] sm:$0xf]  ;;  %v15941_v44 = vor.u32 %v17740_v37, %v15940_v48  ;;  %v15910_v37 = vld [vmem:[%s18557_s2 + $0x1e18] sm:$0xf0] }
 0x585   : > { %9090 = vmatpush.bf16.msrb.mxu0 %v15778_v59  ;;  %v17711_v59 = vld [vmem:[%s18557_s2 + $0x1d84] sm:$0xf0]  ;;  %v17731_v48 = vld [vmem:[%s18557_s2 + $0x1e14] sm:$0xf] }
 0x586   : > { %9103 = vmatpush.bf16.msrb.mxu1 %v15842_v30  ;;  %9116 = vmatpush.bf16.msrb.mxu2 %v15782_v63  ;;  %v21098_v49 = vadd.f32 %v7847_v39, %v21022_v61  ;;  %v15810_v61 = vor.u32 %v17713_v60, %v15809_v45  ;;  %v17694_v30 = vld [vmem:[%s18557_s2 + $0x1d04] sm:$0xf]  ;;  %v15814_v63 = vor.u32 %v17712_v53, %v15811_v54  ;;  %v15932_v60 = vld [vmem:[%s18557_s2 + $0x1e40] sm:$0xf]  ;;  %v17754_v54 = vld [vmem:[%s18557_s2 + $0x1ec4] sm:$0xf0] }
 0x587   : > { %9129 = vmatpush.bf16.msrb.mxu3 %v15846_v1  ;;  %v15802_v9 = vor.u32 %v17711_v59, %v15801_v58  ;;  %v16017_v39 = vor.u32 %v17757_v29, %v16014_v32  ;;  %v15933_v59 = vor.u32 %v17738_v31, %v15932_v60  ;;  %v17732_v29 = vld [vmem:[%s18557_s2 + $0x1e14] sm:$0xf0]  ;;  %v15972_v32 = vld [vmem:[%s18557_s2 + $0x1e90] sm:$0xf]  ;;  %v15902_v60 = vld [vmem:[%s18557_s2 + $0x1e08] sm:$0xf0] }
 0x588   : > { %v17745_v31 = vld [vmem:[%s18557_s2 + $0x1e84] sm:$0xf] }
 0x589   : > { %9091 = vmatpush.bf16.msrb.mxu0 %v15770_v8  ;;  %v15958_v8 = vld [vmem:[%s18557_s2 + $0x1e78] sm:$0xf0] }
 0x58a   : > { %9104 = vmatpush.bf16.msrb.mxu1 %v15834_v14  ;;  %9117 = vmatpush.bf16.msrb.mxu2 %v15774_v23  ;;  %v7835_v1 = vpop.f32.mrf.mxu2  ;;  %v15742_v14 = vor.u32 %v17694_v30, %v15739_v10  ;;  %v17759_v23 = vld [vmem:[%s18557_s2 + $0x1ef4] sm:$0xf]  ;;  %v15961_v33 = vor.u32 %v17743_v7, %v15958_v8  ;;  %v15990_v7 = vld [vmem:[%s18557_s2 + $0x1eb8] sm:$0xf0]  ;;  %v15925_v8 = vor.u32 %v17736_v0, %v15924_v11 }
 0x58b   : > { %9130 = vmatpush.bf16.msrb.mxu3 %v15838_v17  ;;  %v7848_v18 = vpop.f32.mrf.mxu3  ;;  %v15957_v17 = vor.u32 %v17744_v6, %v15956_v2  ;;  %v15988_v1 = vld [vmem:[%s18557_s2 + $0x1eb0] sm:$0xf]  ;;  %v17752_v6 = vld [vmem:[%s18557_s2 + $0x1eb4] sm:$0xf0]  ;;  %v16185_v11 = vld [vmem:[%s18557_s2 + $0x1ff8] sm:$0xf0] }
 0x58c   : > { %v15926_v18 = vld [vmem:[%s18557_s2 + $0x1e38] sm:$0xf0]  ;;  %v9149_v0 = vld [vmem:[%s9148_s12] sm:$0xff] }
 0x58d   : > { %9092 = vmatpush.bf16.msrb.mxu0 %v15762_v21  ;;  %v16012_v21 = vld [vmem:[%s18557_s2 + $0x1ee0] sm:$0xf] }
 0x58e   : > { %9105 = vmatpush.bf16.msrb.mxu1 %v15826_v22  ;;  %9118 = vmatpush.bf16.msrb.mxu2 %v15766_v26  ;;  %v16025_v22 = vor.u32 %v17759_v23, %v16022_v24  ;;  %v8893_v26 = vpack.c.bf16 %v8891_v15, %v8891_v15  ;;  %v16013_v36 = vor.u32 %v17758_v40, %v16012_v21  ;;  %v15916_v23 = vld [vmem:[%s18557_s2 + $0x1e20] sm:$0xf]  ;;  %v17734_v24 = vld [vmem:[%s18557_s2 + $0x1e24] sm:$0xf0] }
 0x58f   : > { %9131 = vmatpush.bf16.msrb.mxu3 %v15830_v27  ;;  %v8894_v27 = vpack.c.bf16 %v8892_v20, %v8892_v20  ;;  %v15993_v15 = vor.u32 %v17751_v19, %v15990_v7  ;;  %v17733_v20 = vld [vmem:[%s18557_s2 + $0x1e24] sm:$0xf]  ;;  %v16111_v19 = vld [vmem:[%s18557_s2 + $0x1f60] sm:$0xf]  ;;  %v17777_v7 = vld [vmem:[%s18557_s2 + $0x1f64] sm:$0xf0] }
 0x591   : > { %9093 = vmatpush.bf16.msrb.mxu0 %v15754_v42  ;;  %v17756_v42 = vld [vmem:[%s18557_s2 + $0x1ed4] sm:$0xf0] }
 0x592   : > { %9106 = vmatpush.bf16.msrb.mxu1 %v15818_v55  ;;  %9119 = vmatpush.bf16.msrb.mxu2 %v15758_v56  ;;  %v15942_v55 = vld [vmem:[%s18557_s2 + $0x1e58] sm:$0xf0]  ;;  %v17755_v56 = vld [vmem:[%s18557_s2 + $0x1ed4] sm:$0xf]  ;;  %v16005_v45 = vor.u32 %v17756_v42, %v16004_v38 }
 0x593   : > { %9132 = vmatpush.bf16.msrb.mxu3 %v15822_v50  ;;  %v15945_v50 = vor.u32 %v17739_v47, %v15942_v55  ;;  %v16009_v53 = vor.u32 %v17755_v56, %v16006_v43  ;;  %v17747_v38 = vld [vmem:[%s18557_s2 + $0x1e94] sm:$0xf]  ;;  %v15900_v47 = vld [vmem:[%s18557_s2 + $0x1e00] sm:$0xf]  ;;  %v17730_v55 = vld [vmem:[%s18557_s2 + $0x1e04] sm:$0xf0]  ;;  %v15913_v56 = vor.u32 %v17731_v48, %v15910_v37 }
 0x594   : > { %v15964_v43 = vld [vmem:[%s18557_s2 + $0x1e80] sm:$0xf]  ;;  %v17773_v48 = vld [vmem:[%s18557_s2 + $0x1f44] sm:$0xf0] }
 0x595   : > { %9094 = vmatpush.bf16.msrb.mxu0 %v15746_v57  ;;  %v17737_v57 = vld [vmem:[%s18557_s2 + $0x1e44] sm:$0xf]  ;;  %v16159_v37 = vld [vmem:[%s18557_s2 + $0x1fc0] sm:$0xf] }
 0x596   : > { %9107 = vmatpush.bf16.msrb.mxu1 %v15810_v61  ;;  %9120 = vmatpush.bf16.msrb.mxu2 %v15750_v5  ;;  %v17753_v61 = vld [vmem:[%s18557_s2 + $0x1ec4] sm:$0xf]  ;;  %v15998_v5 = vld [vmem:[%s18557_s2 + $0x1ec8] sm:$0xf0]  ;;  %v15937_v10 = vor.u32 %v17737_v57, %v15934_v62  ;;  %v17779_v57 = vld [vmem:[%s18557_s2 + $0x1f74] sm:$0xf0] }
 0x597   : > { %9133 = vmatpush.bf16.msrb.mxu3 %v15814_v63  ;;  %v15997_v63 = vor.u32 %v17754_v54, %v15996_v51  ;;  %v16001_v2 = vor.u32 %v17753_v61, %v15998_v5  ;;  %v15966_v51 = vld [vmem:[%s18557_s2 + $0x1e88] sm:$0xf0]  ;;  %v16119_v54 = vld [vmem:[%s18557_s2 + $0x1f70] sm:$0xf]  ;;  %v15901_v61 = vor.u32 %v17730_v55, %v15900_v47  ;;  %v17795_v5 = vld [vmem:[%s18557_s2 + $0x1ff4] sm:$0xf0] }
 0x598   : > { %v16183_v62 = vld [vmem:[%s18557_s2 + $0x1ff0] sm:$0xf]  ;;  %v16097_v47 = vld [vmem:[%s18557_s2 + $0x1f48] sm:$0xf0] }
 0x599   : > { %9095 = vmatpush.bf16.msrb.mxu0 %v15738_v12  ;;  %v8065_v4 = vpop.f32.mrf.mxu0 }
 0x59a   : > { %9108 = vmatpush.bf16.msrb.mxu1 %v15802_v9  ;;  %9121 = vmatpush.bf16.msrb.mxu2 %v15742_v14  ;;  %v8078_v58 = vpop.f32.mrf.mxu1  ;;  %v15989_v9 = vor.u32 %v17752_v6, %v15988_v1  ;;  %v15929_v14 = vor.u32 %v17735_v13, %v15926_v18  ;;  %v15969_v1 = vor.u32 %v17745_v31, %v15966_v51  ;;  %v9150_v6 = vld [vmem:[%s9148_s12 + $0x8] sm:$0xff]  ;;  %v16087_v31 = vld [vmem:[%s18557_s2 + $0x1f30] sm:$0xf] }
 0x59b   : > { %9134 = vmatpush.bf16.msrb.mxu3 %v15806_v16  ;;  %v8079_v30 = vadd.f32 %v8078_v58, %v8065_v4  ;;  %v17778_v58 = vld [vmem:[%s18557_s2 + $0x1f74] sm:$0xf]  ;;  %v16184_v13 = vor.u32 %v17795_v5, %v16183_v62  ;;  %v17771_v51 = vld [vmem:[%s18557_s2 + $0x1f34] sm:$0xf0] }
 0x59c   : > { %9096 = vmatmul.bf16.vlgmr.msrb.gmra.mxu0 %v8893_v26  ;;  %v17770_v62 = vld [vmem:[%s18557_s2 + $0x1f34] sm:$0xf] }
 0x59d   : > { %9346 = vmatpush.bf16.msra.mxu0 %v15957_v17  ;;  %9109 = vmatmul.bf16.vlgmr.msrb.gmra.mxu1 %v8894_v27  ;;  %v21155_v12 = vadd.f32 %v8079_v30, %v21079_v25  ;;  %v15980_v25 = vld [vmem:[%s18557_s2 + $0x1ea0] sm:$0xf]  ;;  %v17750_v17 = vld [vmem:[%s18557_s2 + $0x1ea4] sm:$0xf0]  ;;  %v17786_v5 = vld [vmem:[%s18557_s2 + $0x1fb4] sm:$0xf] }
 0x59e   : > { %9359 = vmatpush.bf16.msra.mxu1 %v16021_v28  ;;  %9372 = vmatpush.bf16.msra.mxu2 %v15961_v33  ;;  %v15918_v28 = vld [vmem:[%s18557_s2 + $0x1e28] sm:$0xf0]  ;;  %v15981_v41 = vor.u32 %v17750_v17, %v15980_v25 }
 0x59f   : > { %9385 = vmatpush.bf16.msra.mxu3 %v16025_v22  ;;  %9122 = vmatmul.bf16.vlgmr.msrb.gmra.mxu2 %v8893_v26  ;;  %v15917_v26 = vor.u32 %v17734_v24, %v15916_v23  ;;  %v15921_v3 = vor.u32 %v17733_v20, %v15918_v28  ;;  %v17793_v23 = vld [vmem:[%s18557_s2 + $0x1fe4] sm:$0xf0]  ;;  %v17776_v24 = vld [vmem:[%s18557_s2 + $0x1f64] sm:$0xf]  ;;  %v16113_v25 = vld [vmem:[%s18557_s2 + $0x1f68] sm:$0xf0]  ;;  %v16112_v20 = vor.u32 %v17777_v7, %v16111_v19 }
 0x5a0   : > { %9135 = vmatmul.bf16.vlgmr.msrb.gmra.mxu3 %v8894_v27  ;;  %v15908_v27 = vld [vmem:[%s18557_s2 + $0x1e10] sm:$0xf]  ;;  %v16177_v17 = vld [vmem:[%s18557_s2 + $0x1fe8] sm:$0xf0]  ;;  %v17784_v19 = vld [vmem:[%s18557_s2 + $0x1fa4] sm:$0xf] }
 0x5a1   : > { %9347 = vmatpush.bf16.msra.mxu0 %v15949_v35  ;;  %v8067_v21 = vpop.f32.mrf.mxu0  ;;  %v15909_v42 = vor.u32 %v17732_v29, %v15908_v27  ;;  %v16169_v27 = vld [vmem:[%s18557_s2 + $0x1fd8] sm:$0xf0]  ;;  %v16145_v7 = vld [vmem:[%s18557_s2 + $0x1fa8] sm:$0xf0] }
 0x5a2   : > { %9360 = vmatpush.bf16.msra.mxu1 %v16013_v36  ;;  %9373 = vmatpush.bf16.msra.mxu2 %v15953_v46  ;;  %v8091_v16 = vpop.f32.mrf.mxu2  ;;  %v8080_v40 = vpop.f32.mrf.mxu1  ;;  %v15985_v36 = vor.u32 %v17749_v34, %v15982_v52  ;;  %v17748_v46 = vld [vmem:[%s18557_s2 + $0x1e94] sm:$0xf0]  ;;  %v16103_v34 = vld [vmem:[%s18557_s2 + $0x1f50] sm:$0xf] }
 0x5a3   : > { %9386 = vmatpush.bf16.msra.mxu3 %v16017_v39  ;;  %v8104_v33 = vpop.f32.mrf.mxu3  ;;  %v15974_v39 = vld [vmem:[%s18557_s2 + $0x1e98] sm:$0xf0]  ;;  %v17775_v52 = vld [vmem:[%s18557_s2 + $0x1f54] sm:$0xf0]  ;;  %v16167_v21 = vld [vmem:[%s18557_s2 + $0x1fd0] sm:$0xf] }
 0x5a4   : > { %v8105_v22 = vadd.f32 %v8104_v33, %v8091_v16  ;;  %v17792_v16 = vld [vmem:[%s18557_s2 + $0x1fe4] sm:$0xf]  ;;  %v16116_v33 = vor.u32 %v17776_v24, %v16113_v25  ;;  %v17774_v40 = vld [vmem:[%s18557_s2 + $0x1f54] sm:$0xf]  ;;  %v16104_v29 = vor.u32 %v17775_v52, %v16103_v34  ;;  %v16073_v52 = vld [vmem:[%s18557_s2 + $0x1f18] sm:$0xf0] }
 0x5a5   : > { %9348 = vmatpush.bf16.msra.mxu0 %v15941_v44  ;;  %v17746_v44 = vld [vmem:[%s18557_s2 + $0x1e84] sm:$0xf0]  ;;  %v17766_v34 = vld [vmem:[%s18557_s2 + $0x1f14] sm:$0xf] }
 0x5a6   : > { %9361 = vmatpush.bf16.msra.mxu1 %v16005_v45  ;;  %9374 = vmatpush.bf16.msra.mxu2 %v15945_v50  ;;  %v21174_v35 = vadd.f32 %v8105_v22, %v21098_v49  ;;  %v15973_v49 = vor.u32 %v17748_v46, %v15972_v32  ;;  %v17729_v45 = vld [vmem:[%s18557_s2 + $0x1e04] sm:$0xf]  ;;  %v15977_v50 = vor.u32 %v17747_v38, %v15974_v39  ;;  %v16095_v46 = vld [vmem:[%s18557_s2 + $0x1f40] sm:$0xf]  ;;  %v17789_v39 = vld [vmem:[%s18557_s2 + $0x1fc4] sm:$0xf0] }
 0x5a7   : > { %9387 = vmatpush.bf16.msra.mxu3 %v16009_v53  ;;  %v15965_v30 = vor.u32 %v17746_v44, %v15964_v43  ;;  %v16180_v22 = vor.u32 %v17792_v16, %v16177_v17  ;;  %v16096_v44 = vor.u32 %v17773_v48, %v16095_v46  ;;  %v17767_v16 = vld [vmem:[%s18557_s2 + $0x1f14] sm:$0xf0]  ;;  %v16135_v17 = vld [vmem:[%s18557_s2 + $0x1f90] sm:$0xf]  ;;  %v16065_v46 = vld [vmem:[%s18557_s2 + $0x1f08] sm:$0xf0] }
 0x5a9   : > { %9349 = vmatpush.bf16.msra.mxu0 %v15933_v59  ;;  %v16121_v59 = vld [vmem:[%s18557_s2 + $0x1f78] sm:$0xf0] }
 0x5aa   : > { %9362 = vmatpush.bf16.msra.mxu1 %v15997_v63  ;;  %9375 = vmatpush.bf16.msra.mxu2 %v15937_v10  ;;  %v8093_v53 = vpop.f32.mrf.mxu2  ;;  %v15905_v63 = vor.u32 %v17729_v45, %v15902_v60  ;;  %v17794_v10 = vld [vmem:[%s18557_s2 + $0x1ff4] sm:$0xf]  ;;  %v16124_v18 = vor.u32 %v17778_v58, %v16121_v59  ;;  %v16153_v58 = vld [vmem:[%s18557_s2 + $0x1fb8] sm:$0xf0]  ;;  %v16088_v59 = vor.u32 %v17771_v51, %v16087_v31 }
 0x5ab   : > { %9388 = vmatpush.bf16.msra.mxu3 %v16001_v2  ;;  %v8106_v4 = vpop.f32.mrf.mxu3  ;;  %v16120_v2 = vor.u32 %v17779_v57, %v16119_v54  ;;  %v16151_v53 = vld [vmem:[%s18557_s2 + $0x1fb0] sm:$0xf]  ;;  %v17787_v57 = vld [vmem:[%s18557_s2 + $0x1fb4] sm:$0xf0] }
 0x5ac   : > { %v16089_v4 = vld [vmem:[%s18557_s2 + $0x1f38] sm:$0xf0] }
 0x5ad   : > { %9350 = vmatpush.bf16.msra.mxu0 %v15925_v8  ;;  %v16175_v8 = vld [vmem:[%s18557_s2 + $0x1fe0] sm:$0xf] }
 0x5ae   : > { %9363 = vmatpush.bf16.msra.mxu1 %v15989_v9  ;;  %9376 = vmatpush.bf16.msra.mxu2 %v15929_v14  ;;  %v16188_v9 = vor.u32 %v17794_v10, %v16185_v11  ;;  %v9151_v14 = vpack.c.bf16 %v9149_v0, %v9149_v0  ;;  %v16176_v28 = vor.u32 %v17793_v23, %v16175_v8  ;;  %v16079_v10 = vld [vmem:[%s18557_s2 + $0x1f20] sm:$0xf]  ;;  %v17769_v11 = vld [vmem:[%s18557_s2 + $0x1f24] sm:$0xf0] }
 0x5af   : > { %9389 = vmatpush.bf16.msra.mxu3 %v15993_v15  ;;  %v9152_v15 = vpack.c.bf16 %v9150_v6, %v9150_v6  ;;  %v16156_v0 = vor.u32 %v17786_v5, %v16153_v58  ;;  %v17768_v6 = vld [vmem:[%s18557_s2 + $0x1f24] sm:$0xf] }
 0x5b1   : > { %9351 = vmatpush.bf16.msra.mxu0 %v15917_v26  ;;  %v17791_v26 = vld [vmem:[%s18557_s2 + $0x1fd4] sm:$0xf0] }
 0x5b2   : > { %9364 = vmatpush.bf16.msra.mxu1 %v15981_v41  ;;  %9377 = vmatpush.bf16.msra.mxu2 %v15921_v3  ;;  %v16105_v41 = vld [vmem:[%s18557_s2 + $0x1f58] sm:$0xf0]  ;;  %v17790_v3 = vld [vmem:[%s18557_s2 + $0x1fd4] sm:$0xf]  ;;  %v16168_v32 = vor.u32 %v17791_v26, %v16167_v21 }
 0x5b3   : > { %9390 = vmatpush.bf16.msra.mxu3 %v15985_v36  ;;  %v16108_v36 = vor.u32 %v17774_v40, %v16105_v41  ;;  %v16172_v38 = vor.u32 %v17790_v3, %v16169_v27  ;;  %v17782_v21 = vld [vmem:[%s18557_s2 + $0x1f94] sm:$0xf]  ;;  %v16076_v41 = vor.u32 %v17766_v34, %v16073_v52  ;;  %v16063_v3 = vld [vmem:[%s18557_s2 + $0x1f00] sm:$0xf] }
 0x5b4   : > { %v16127_v27 = vld [vmem:[%s18557_s2 + $0x1f80] sm:$0xf] }
 0x5b5   : > { %9352 = vmatpush.bf16.msra.mxu0 %v15909_v42  ;;  %v17772_v42 = vld [vmem:[%s18557_s2 + $0x1f44] sm:$0xf] }
 0x5b6   : > { %9365 = vmatpush.bf16.msra.mxu1 %v15973_v49  ;;  %9378 = vmatpush.bf16.msra.mxu2 %v15913_v56  ;;  %v17788_v49 = vld [vmem:[%s18557_s2 + $0x1fc4] sm:$0xf]  ;;  %v16161_v56 = vld [vmem:[%s18557_s2 + $0x1fc8] sm:$0xf0]  ;;  %v16100_v60 = vor.u32 %v17772_v42, %v16097_v47 }
 0x5b7   : > { %9391 = vmatpush.bf16.msra.mxu3 %v15977_v50  ;;  %v16160_v50 = vor.u32 %v17789_v39, %v16159_v37  ;;  %v16164_v54 = vor.u32 %v17788_v49, %v16161_v56  ;;  %v17780_v37 = vld [vmem:[%s18557_s2 + $0x1f84] sm:$0xf]  ;;  %v9407_v47 = vld [vmem:[%s9406_s25] sm:$0xff]  ;;  %v9408_v56 = vld [vmem:[%s9406_s25 + $0x8] sm:$0xff] }
 0x5b9   : > { %9353 = vmatpush.bf16.msra.mxu0 %v15901_v61  ;;  %v8323_v55 = vpop.f32.mrf.mxu0 }
 0x5ba   : > { %9366 = vmatpush.bf16.msra.mxu1 %v15965_v30  ;;  %9379 = vmatpush.bf16.msra.mxu2 %v15905_v63  ;;  %v8336_v43 = vpop.f32.mrf.mxu1  ;;  %v16152_v30 = vor.u32 %v17787_v57, %v16151_v53  ;;  %v16092_v63 = vor.u32 %v17770_v62, %v16089_v4 }
 0x5bb   : > { %9392 = vmatpush.bf16.msra.mxu3 %v15969_v1  ;;  %v8337_v45 = vadd.f32 %v8336_v43, %v8323_v55 }
 0x5bc   : > { %9354 = vmatmul.bf16.vlgmr.msra.gmra.mxu0 %v9151_v14 }
 0x5bd   : > { %9604 = vmatpush.bf16.msrb.mxu0 %v16120_v2  ;;  %9367 = vmatmul.bf16.vlgmr.msra.gmra.mxu1 %v9152_v15  ;;  %v21231_v61 = vadd.f32 %v8337_v45, %v21155_v12  ;;  %v16143_v12 = vld [vmem:[%s18557_s2 + $0x1fa0] sm:$0xf]  ;;  %v17785_v2 = vld [vmem:[%s18557_s2 + $0x1fa4] sm:$0xf0]  ;;  %v9410_v45 = vpack.c.bf16 %v9408_v56, %v9408_v56 }
 0x5be   : > { %9617 = vmatpush.bf16.msrb.mxu1 %v16184_v13  ;;  %9630 = vmatpush.bf16.msrb.mxu2 %v16124_v18  ;;  %v16081_v13 = vld [vmem:[%s18557_s2 + $0x1f28] sm:$0xf0]  ;;  %v16144_v24 = vor.u32 %v17785_v2, %v16143_v12 }
 0x5bf   : > { %9643 = vmatpush.bf16.msrb.mxu3 %v16188_v9  ;;  %9380 = vmatmul.bf16.vlgmr.msra.gmra.mxu2 %v9151_v14  ;;  %v16080_v14 = vor.u32 %v17769_v11, %v16079_v10  ;;  %v16084_v25 = vor.u32 %v17768_v6, %v16081_v13 }
 0x5c0   : > { %9393 = vmatmul.bf16.vlgmr.msra.gmra.mxu3 %v9152_v15  ;;  %v16071_v15 = vld [vmem:[%s18557_s2 + $0x1f10] sm:$0xf] }
 0x5c1   : > { %9605 = vmatpush.bf16.msrb.mxu0 %v16112_v20  ;;  %v8325_v8 = vpop.f32.mrf.mxu0  ;;  %v16072_v26 = vor.u32 %v17767_v16, %v16071_v15 }
 0x5c2   : > { %9618 = vmatpush.bf16.msrb.mxu1 %v16176_v28  ;;  %9631 = vmatpush.bf16.msrb.mxu2 %v16116_v33  ;;  %v8349_v1 = vpop.f32.mrf.mxu2  ;;  %v8338_v23 = vpop.f32.mrf.mxu1  ;;  %v16148_v28 = vor.u32 %v17784_v19, %v16145_v7  ;;  %v17783_v33 = vld [vmem:[%s18557_s2 + $0x1f94] sm:$0xf0] }
 0x5c3   : > { %9644 = vmatpush.bf16.msrb.mxu3 %v16180_v22  ;;  %v8362_v18 = vpop.f32.mrf.mxu3  ;;  %v16137_v22 = vld [vmem:[%s18557_s2 + $0x1f98] sm:$0xf0]  ;;  %v16136_v40 = vor.u32 %v17783_v33, %v16135_v17 }
 0x5c4   : > { %v8363_v9 = vadd.f32 %v8362_v18, %v8349_v1 }
 0x5c5   : > { %9606 = vmatpush.bf16.msrb.mxu0 %v16104_v29  ;;  %v16140_v29 = vor.u32 %v17782_v21, %v16137_v22 }
 0x5c6   : > { %9619 = vmatpush.bf16.msrb.mxu1 %v16168_v32  ;;  %9632 = vmatpush.bf16.msrb.mxu2 %v16108_v36  ;;  %v8367_v20 = vadd.f32 %v8363_v9, %v21174_v35  ;;  %v17765_v35 = vld [vmem:[%s18557_s2 + $0x1f04] sm:$0xf0]  ;;  %v17764_v36 = vld [vmem:[%s18557_s2 + $0x1f04] sm:$0xf] }
 0x5c7   : > { %9645 = vmatpush.bf16.msrb.mxu3 %v16172_v38  ;;  %v17781_v32 = vld [vmem:[%s18557_s2 + $0x1f84] sm:$0xf0]  ;;  %v16129_v38 = vld [vmem:[%s18557_s2 + $0x1f88] sm:$0xf0]  ;;  %v16064_v42 = vor.u32 %v17765_v35, %v16063_v3  ;;  %v16068_v49 = vor.u32 %v17764_v36, %v16065_v46 }
 0x5c8   : > { %v16128_v55 = vor.u32 %v17781_v32, %v16127_v27  ;;  %v16132_v43 = vor.u32 %v17780_v37, %v16129_v38 }
 0x5c9   : > { %9607 = vmatpush.bf16.msrb.mxu0 %v16096_v44  ;;  %v9409_v44 = vpack.c.bf16 %v9407_v47, %v9407_v47 }
 0x5ca   : > { %9620 = vmatpush.bf16.msrb.mxu1 %v16160_v50  ;;  %9633 = vmatpush.bf16.msrb.mxu2 %v16100_v60  ;;  %v8351_v48 = vpop.f32.mrf.mxu2 }
 0x5cb   : > { %9646 = vmatpush.bf16.msrb.mxu3 %v16164_v54  ;;  %v8364_v39 = vpop.f32.mrf.mxu3 }
 0x5cd   : > { %9608 = vmatpush.bf16.msrb.mxu0 %v16088_v59 }
 0x5ce   : > { %9621 = vmatpush.bf16.msrb.mxu1 %v16152_v30  ;;  %9634 = vmatpush.bf16.msrb.mxu2 %v16092_v63 }
 0x5cf   : > { %9647 = vmatpush.bf16.msrb.mxu3 %v16156_v0 }
 0x5d1   : > { %9609 = vmatpush.bf16.msrb.mxu0 %v16080_v14 }
 0x5d2   : > { %9622 = vmatpush.bf16.msrb.mxu1 %v16144_v24  ;;  %9635 = vmatpush.bf16.msrb.mxu2 %v16084_v25 }
 0x5d3   : > { %9648 = vmatpush.bf16.msrb.mxu3 %v16148_v28 }
 0x5d5   : > { %9610 = vmatpush.bf16.msrb.mxu0 %v16072_v26 }
 0x5d6   : > { %9623 = vmatpush.bf16.msrb.mxu1 %v16136_v40  ;;  %9636 = vmatpush.bf16.msrb.mxu2 %v16076_v41 }
 0x5d7   : > { %9649 = vmatpush.bf16.msrb.mxu3 %v16140_v29 }
 0x5d9   : > { %9611 = vmatpush.bf16.msrb.mxu0 %v16064_v42  ;;  %v8581_v50 = vpop.f32.mrf.mxu0 }
 0x5da   : > { %9624 = vmatpush.bf16.msrb.mxu1 %v16128_v55  ;;  %9637 = vmatpush.bf16.msrb.mxu2 %v16068_v49  ;;  %v8594_v60 = vpop.f32.mrf.mxu1 }
 0x5db   : > { %9650 = vmatpush.bf16.msrb.mxu3 %v16132_v43  ;;  %v8595_v31 = vadd.f32 %v8594_v60, %v8581_v50 }
 0x5dc   : > { %9612 = vmatmul.bf16.vlgmr.msrb.gmra.mxu0 %v9409_v44 }
 0x5dd   : > { %9625 = vmatmul.bf16.vlgmr.msrb.gmra.mxu1 %v9410_v45  ;;  %9638 = vmatmul.bf16.vlgmr.msrb.gmra.mxu2 %v9409_v44  ;;  %v8624_v51 = vadd.f32 %v8595_v31, %v21231_v61 }
 0x5de   : > { %9651 = vmatmul.bf16.vlgmr.msrb.gmra.mxu3 %v9410_v45 }
 0x5e1   : > { %v8583_v57 = vpop.f32.mrf.mxu0 }
 0x5e2   : > { %v8607_v53 = vpop.f32.mrf.mxu2  ;;  %v8596_v4 = vpop.f32.mrf.mxu1 }
 0x5e3   : > { %v8620_v54 = vpop.f32.mrf.mxu3 }
 0x5e4   : > { %v8621_v62 = vadd.f32 %v8620_v54, %v8607_v53 }
 0x5e6   : > { %v8625_v5 = vadd.f32 %v8621_v62, %v8367_v20 }
 0x5ea   : > { %v8609_v58 = vpop.f32.mrf.mxu2 }
 0x5eb   : > { %v8622_v59 = vpop.f32.mrf.mxu3 }
 0x5f9   : > { %v8839_v30 = vpop.f32.mrf.mxu0 }
 0x5fa   : > { %v8852_v63 = vpop.f32.mrf.mxu1 }
 0x5fb   : > { %v8853_v10 = vadd.f32 %v8852_v63, %v8839_v30 }
 0x5fd   : > { %v8882_v11 = vadd.f32 %v8853_v10, %v8624_v51 }
 0x601   : > { %v8841_v1 = vpop.f32.mrf.mxu0 }
 0x602   : > { %v8865_v12 = vpop.f32.mrf.mxu2  ;;  %v8854_v6 = vpop.f32.mrf.mxu1 }
 0x603   : > { %v8878_v0 = vpop.f32.mrf.mxu3 }
 0x604   : > { %v8879_v2 = vadd.f32 %v8878_v0, %v8865_v12 }
 0x606   : > { %v8883_v13 = vadd.f32 %v8879_v2, %v8625_v5 }
 0x60a   : > { %v8867_v18 = vpop.f32.mrf.mxu2 }
 0x60b   : > { %v8880_v61 = vpop.f32.mrf.mxu3 }
 0x619   : > { %v9097_v19 = vpop.f32.mrf.mxu0 }
 0x61a   : > { %v9110_v7 = vpop.f32.mrf.mxu1 }
 0x61b   : > { %v9111_v21 = vadd.f32 %v9110_v7, %v9097_v19 }
 0x61d   : > { %v9140_v26 = vadd.f32 %v9111_v21, %v8882_v11 }
 0x621   : > { %v9099_v14 = vpop.f32.mrf.mxu0 }
 0x622   : > { %v9123_v8 = vpop.f32.mrf.mxu2  ;;  %v9112_v23 = vpop.f32.mrf.mxu1 }
 0x623   : > { %v9136_v9 = vpop.f32.mrf.mxu3 }
 0x624   : > { %v9137_v27 = vadd.f32 %v9136_v9, %v9123_v8 }
 0x626   : > { %v9141_v36 = vadd.f32 %v9137_v27, %v8883_v13 }
 0x62a   : > { %v9125_v24 = vpop.f32.mrf.mxu2 }
 0x62b   : > { %v9138_v25 = vpop.f32.mrf.mxu3 }
 0x639   : > { %v9355_v15 = vpop.f32.mrf.mxu0 }
 0x63a   : > { %v9368_v16 = vpop.f32.mrf.mxu1 }
 0x63b   : > { %v9369_v22 = vadd.f32 %v9368_v16, %v9355_v15 }
 0x63d   : > { %v9398_v3 = vadd.f32 %v9369_v22, %v9140_v26 }
 0x641   : > { %v9357_v28 = vpop.f32.mrf.mxu0 }
 0x642   : > { %v9381_v17 = vpop.f32.mrf.mxu2  ;;  %v9370_v33 = vpop.f32.mrf.mxu1 }
 0x643   : > { %v9394_v20 = vpop.f32.mrf.mxu3 }
 0x644   : > { %v9395_v32 = vadd.f32 %v9394_v20, %v9381_v17 }
 0x646   : > { %v9399_v38 = vadd.f32 %v9395_v32, %v9141_v36 }
 0x64a   : > { %v9383_v34 = vpop.f32.mrf.mxu2 }
 0x64b   : > { %v9396_v52 = vpop.f32.mrf.mxu3 }
 0x659   : > { %v9613_v40 = vpop.f32.mrf.mxu0 }
 0x65a   : > { %v9626_v41 = vpop.f32.mrf.mxu1 }
 0x65b   : > { %v9627_v35 = vadd.f32 %v9626_v41, %v9613_v40 }
 0x65d   : > { %v9656_v29 = vadd.f32 %v9627_v35, %v9398_v3 }
 0x65f   : > { %9658 = vst [vmem:[#allocation3] sm:$0xff] %v9656_v29 }
 0x660   : > { %v9639_v46 = vpop.f32.mrf.mxu2 }
 0x661   : > { %v9652_v48 = vpop.f32.mrf.mxu3  ;;  %v9615_v37 = vpop.f32.mrf.mxu0 }
 0x662   : > { %v9653_v39 = vadd.f32 %v9652_v48, %v9639_v46  ;;  %v9628_v42 = vpop.f32.mrf.mxu1 }
 0x664   : > { %v9657_v47 = vadd.f32 %v9653_v39, %v9399_v38 }
 0x665   : > { %9663 = sbr.rel (%p16189_p1) target bundleno = 2229 (0x8b5), region = 96 }
 0x666   : > { %9659 = vst [vmem:[#allocation3 + $0x8] sm:$0xff] %v9657_v47 }
 0x668   : > { %v9641_v55 = vpop.f32.mrf.mxu2 }
 0x669   : > { %v9654_v49 = vpop.f32.mrf.mxu3 }
 0x66a   : > { %v16248_v56 = vld [vmem:[#allocation10 + $0x70] sm:$0xf]  ;;  %v17811_v43 = vld [vmem:[#allocation10 + $0x74] sm:$0xf0]  ;;  %v17810_v60 = vld [vmem:[#allocation10 + $0x74] sm:$0xf] }
 0x66b   : > { %v16312_v44 = vld [vmem:[#allocation10 + $0xf0] sm:$0xf]  ;;  %v16249_v45 = vor.u32 %v17811_v43, %v16248_v56  ;;  %v17827_v50 = vld [vmem:[#allocation10 + $0xf4] sm:$0xf0]  ;;  %v16250_v31 = vld [vmem:[#allocation10 + $0x78] sm:$0xf0] }
 0x66c   : > { %v16313_v51 = vor.u32 %v17827_v50, %v16312_v44  ;;  %v16253_v53 = vor.u32 %v17810_v60, %v16250_v31  ;;  %v17826_v54 = vld [vmem:[#allocation10 + $0xf4] sm:$0xf]  ;;  %v16314_v57 = vld [vmem:[#allocation10 + $0xf8] sm:$0xf0]  ;;  %v16240_v62 = vld [vmem:[#allocation10 + $0x60] sm:$0xf] }
 0x66d   : > { %9876 = vmatpush.bf16.msra.mxu0 %v16249_v45  ;;  %v16317_v4 = vor.u32 %v17826_v54, %v16314_v57  ;;  %v17809_v5 = vld [vmem:[#allocation10 + $0x64] sm:$0xf0]  ;;  %v16304_v58 = vld [vmem:[#allocation10 + $0xe0] sm:$0xf]  ;;  %v17808_v10 = vld [vmem:[#allocation10 + $0x64] sm:$0xf] }
 0x66e   : > { %v17825_v59 = vld [vmem:[#allocation10 + $0xe4] sm:$0xf0]  ;;  %9889 = vmatpush.bf16.msra.mxu1 %v16313_v51  ;;  %9902 = vmatpush.bf16.msra.mxu2 %v16253_v53  ;;  %v16241_v30 = vor.u32 %v17809_v5, %v16240_v62  ;;  %v16242_v11 = vld [vmem:[#allocation10 + $0x68] sm:$0xf0]  ;;  %v17824_v12 = vld [vmem:[#allocation10 + $0xe4] sm:$0xf] }
 0x66f   : > { %v16305_v63 = vor.u32 %v17825_v59, %v16304_v58  ;;  %9915 = vmatpush.bf16.msra.mxu3 %v16317_v4  ;;  %v16245_v0 = vor.u32 %v17808_v10, %v16242_v11  ;;  %v16306_v1 = vld [vmem:[#allocation10 + $0xe8] sm:$0xf0]  ;;  %v16232_v2 = vld [vmem:[#allocation10 + $0x50] sm:$0xf]  ;;  %v17807_v6 = vld [vmem:[#allocation10 + $0x54] sm:$0xf0] }
 0x670   : > { %v16309_v13 = vor.u32 %v17824_v12, %v16306_v1  ;;  %v16296_v18 = vld [vmem:[#allocation10 + $0xd0] sm:$0xf]  ;;  %v17823_v61 = vld [vmem:[#allocation10 + $0xd4] sm:$0xf0]  ;;  %v17806_v19 = vld [vmem:[#allocation10 + $0x54] sm:$0xf]  ;;  %v16233_v7 = vor.u32 %v17807_v6, %v16232_v2 }
 0x671   : > { %9877 = vmatpush.bf16.msra.mxu0 %v16241_v30  ;;  %v16234_v8 = vld [vmem:[#allocation10 + $0x58] sm:$0xf0]  ;;  %v17822_v9 = vld [vmem:[#allocation10 + $0xd4] sm:$0xf]  ;;  %v16297_v23 = vor.u32 %v17823_v61, %v16296_v18  ;;  %v16224_v25 = vld [vmem:[#allocation10 + $0x40] sm:$0xf] }
 0x672   : > { %v16298_v14 = vld [vmem:[#allocation10 + $0xd8] sm:$0xf0]  ;;  %9890 = vmatpush.bf16.msra.mxu1 %v16305_v63  ;;  %9903 = vmatpush.bf16.msra.mxu2 %v16245_v0  ;;  %v16237_v24 = vor.u32 %v17806_v19, %v16234_v8  ;;  %v17805_v15 = vld [vmem:[#allocation10 + $0x44] sm:$0xf0]  ;;  %v16288_v16 = vld [vmem:[#allocation10 + $0xc0] sm:$0xf] }
 0x673   : > { %9916 = vmatpush.bf16.msra.mxu3 %v16309_v13  ;;  %v16301_v17 = vor.u32 %v17822_v9, %v16298_v14  ;;  %v17821_v20 = vld [vmem:[#allocation10 + $0xc4] sm:$0xf0]  ;;  %v17804_v28 = vld [vmem:[#allocation10 + $0x44] sm:$0xf]  ;;  %v16226_v33 = vld [vmem:[#allocation10 + $0x48] sm:$0xf0]  ;;  %v16225_v21 = vor.u32 %v17805_v15, %v16224_v25 }
 0x674   : > { %v17820_v34 = vld [vmem:[#allocation10 + $0xc4] sm:$0xf]  ;;  %v16290_v52 = vld [vmem:[#allocation10 + $0xc8] sm:$0xf0]  ;;  %v16289_v22 = vor.u32 %v17821_v20, %v16288_v16  ;;  %v16229_v26 = vor.u32 %v17804_v28, %v16226_v33  ;;  %v16216_v40 = vld [vmem:[#allocation10 + $0x30] sm:$0xf] }
 0x675   : > { %9878 = vmatpush.bf16.msra.mxu0 %v16233_v7  ;;  %v17803_v41 = vld [vmem:[#allocation10 + $0x34] sm:$0xf0]  ;;  %v16280_v3 = vld [vmem:[#allocation10 + $0xb0] sm:$0xf]  ;;  %v16293_v35 = vor.u32 %v17820_v34, %v16290_v52  ;;  %v17802_v29 = vld [vmem:[#allocation10 + $0x34] sm:$0xf] }
 0x676   : > { %9891 = vmatpush.bf16.msra.mxu1 %v16297_v23  ;;  %9904 = vmatpush.bf16.msra.mxu2 %v16237_v24  ;;  %v17819_v27 = vld [vmem:[#allocation10 + $0xb4] sm:$0xf0]  ;;  %v16218_v32 = vld [vmem:[#allocation10 + $0x38] sm:$0xf0]  ;;  %v17818_v36 = vld [vmem:[#allocation10 + $0xb4] sm:$0xf]  ;;  %v16217_v48 = vor.u32 %v17803_v41, %v16216_v40 }
 0x677   : > { %9917 = vmatpush.bf16.msra.mxu3 %v16301_v17  ;;  %v16282_v46 = vld [vmem:[#allocation10 + $0xb8] sm:$0xf0]  ;;  %v16281_v37 = vor.u32 %v17819_v27, %v16280_v3  ;;  %v16221_v38 = vor.u32 %v17802_v29, %v16218_v32  ;;  %v16208_v39 = vld [vmem:[#allocation10 + $0x20] sm:$0xf]  ;;  %v17801_v42 = vld [vmem:[#allocation10 + $0x24] sm:$0xf0] }
 0x678   : > { %v16272_v47 = vld [vmem:[#allocation10 + $0xa0] sm:$0xf]  ;;  %v16285_v55 = vor.u32 %v17818_v36, %v16282_v46  ;;  %v17817_v49 = vld [vmem:[#allocation10 + $0xa4] sm:$0xf0]  ;;  %v17800_v56 = vld [vmem:[#allocation10 + $0x24] sm:$0xf]  ;;  %v16209_v50 = vor.u32 %v17801_v42, %v16208_v39 }
 0x679   : > { %9879 = vmatpush.bf16.msra.mxu0 %v16225_v21  ;;  %v16210_v43 = vld [vmem:[#allocation10 + $0x28] sm:$0xf0]  ;;  %v17816_v44 = vld [vmem:[#allocation10 + $0xa4] sm:$0xf]  ;;  %v16200_v60 = vld [vmem:[#allocation10 + $0x10] sm:$0xf]  ;;  %v16273_v53 = vor.u32 %v17817_v49, %v16272_v47 }
 0x67a   : > { %9892 = vmatpush.bf16.msra.mxu1 %v16289_v22  ;;  %9905 = vmatpush.bf16.msra.mxu2 %v16229_v26  ;;  %v16274_v45 = vld [vmem:[#allocation10 + $0xa8] sm:$0xf0]  ;;  %v17799_v31 = vld [vmem:[#allocation10 + $0x14] sm:$0xf0]  ;;  %v16264_v51 = vld [vmem:[#allocation10 + $0x90] sm:$0xf]  ;;  %v16213_v54 = vor.u32 %v17800_v56, %v16210_v43 }
 0x67b   : > { %9918 = vmatpush.bf16.msra.mxu3 %v16293_v35  ;;  %v17815_v57 = vld [vmem:[#allocation10 + $0x94] sm:$0xf0]  ;;  %v17798_v62 = vld [vmem:[#allocation10 + $0x14] sm:$0xf]  ;;  %v16202_v4 = vld [vmem:[#allocation10 + $0x18] sm:$0xf0]  ;;  %v16277_v5 = vor.u32 %v17816_v44, %v16274_v45  ;;  %v16201_v0 = vor.u32 %v17799_v31, %v16200_v60 }
 0x67c   : > { %v17814_v58 = vld [vmem:[#allocation10 + $0x94] sm:$0xf]  ;;  %v9664_v59 = vld [vmem:[#allocation3] sm:$0xff]  ;;  %v9666_v30 = vld [vmem:[#allocation9] sm:$0x3]  ;;  %v16265_v1 = vor.u32 %v17815_v57, %v16264_v51  ;;  %v16205_v13 = vor.u32 %v17798_v62, %v16202_v4 }
 0x67d   : > { %9880 = vmatpush.bf16.msra.mxu0 %v16217_v48  ;;  %v16266_v63 = vld [vmem:[#allocation10 + $0x98] sm:$0xf0]  ;;  %v9668_v10 = vperm.slane %v9666_v30, 0  ;;  %v9665_v11 = vld [vmem:[#allocation3 + $0x8] sm:$0xff]  ;;  %v9669_v12 = vperm.slane %v9666_v30, 1 }
 0x67e   : > { %9893 = vmatpush.bf16.msra.mxu1 %v16281_v37  ;;  %9906 = vmatpush.bf16.msra.mxu2 %v16221_v38  ;;  %v16192_v2 = vld [vmem:[#allocation10] sm:$0xf]  ;;  %v17797_v6 = vld [vmem:[#allocation10 + $0x4] sm:$0xf0]  ;;  %v17796_v19 = vld [vmem:[#allocation10 + $0x4] sm:$0xf]  ;;  %v16269_v9 = vor.u32 %v17814_v58, %v16266_v63 }
 0x67f   : > { %9919 = vmatpush.bf16.msra.mxu3 %v16285_v55  ;;  %v16256_v18 = vld [vmem:[#allocation10 + $0x80] sm:$0xf]  ;;  %v17813_v61 = vld [vmem:[#allocation10 + $0x84] sm:$0xf0]  ;;  %v9672_v7 = vadd.f32 %v9668_v10, %v9664_v59  ;;  %v9673_v8 = vadd.f32 %v9669_v12, %v9665_v11  ;;  %v16194_v14 = vld [vmem:[#allocation10 + $0x8] sm:$0xf0]  ;;  %v16193_v17 = vor.u32 %v17797_v6, %v16192_v2 }
 0x680   : > { %v17812_v23 = vld [vmem:[#allocation10 + $0x84] sm:$0xf]  ;;  %v16258_v24 = vld [vmem:[#allocation10 + $0x88] sm:$0xf0]  ;;  %v16376_v15 = vld [vmem:[#allocation10 + $0x170] sm:$0xf]  ;;  %v16257_v34 = vor.u32 %v17813_v61, %v16256_v18  ;;  %v16197_v52 = vor.u32 %v17796_v19, %v16194_v14 }
 0x681   : > { %9881 = vmatpush.bf16.msra.mxu0 %v16209_v50  ;;  %v9674_v25 = vmax.f32 %v9672_v7, 0.0  ;;  %v17843_v16 = vld [vmem:[#allocation10 + $0x174] sm:$0xf0]  ;;  %v9675_v20 = vmax.f32 %v9673_v8, 0.0  ;;  %v17842_v28 = vld [vmem:[#allocation10 + $0x174] sm:$0xf]  ;;  %v16261_v21 = vor.u32 %v17812_v23, %v16258_v24 }
 0x682   : > { %9894 = vmatpush.bf16.msra.mxu1 %v16273_v53  ;;  %9907 = vmatpush.bf16.msra.mxu2 %v16213_v54  ;;  %v16378_v33 = vld [vmem:[#allocation10 + $0x178] sm:$0xf0]  ;;  %v16377_v22 = vor.u32 %v17843_v16, %v16376_v15  ;;  %v16368_v26 = vld [vmem:[#allocation10 + $0x160] sm:$0xf]  ;;  %v16440_v40 = vld [vmem:[#allocation10 + $0x1f0] sm:$0xf] }
 0x683   : > { %9920 = vmatpush.bf16.msra.mxu3 %v16277_v5  ;;  %v17859_v41 = vld [vmem:[#allocation10 + $0x1f4] sm:$0xf0]  ;;  %v9676_v3 = vpack.c.bf16 %v9674_v25, %v9674_v25  ;;  %v16381_v35 = vor.u32 %v17842_v28, %v16378_v33  ;;  %v17841_v27 = vld [vmem:[#allocation10 + $0x164] sm:$0xf0]  ;;  %v17858_v29 = vld [vmem:[#allocation10 + $0x1f4] sm:$0xf]  ;;  %v9677_v36 = vpack.c.bf16 %v9675_v20, %v9675_v20 }
 0x684   : > { %v16442_v32 = vld [vmem:[#allocation10 + $0x1f8] sm:$0xf0]  ;;  %v17840_v46 = vld [vmem:[#allocation10 + $0x164] sm:$0xf]  ;;  %v16370_v48 = vld [vmem:[#allocation10 + $0x168] sm:$0xf0]  ;;  %v16441_v37 = vor.u32 %v17859_v41, %v16440_v40  ;;  %v16369_v38 = vor.u32 %v17841_v27, %v16368_v26 }
 0x685   : > { %9882 = vmatpush.bf16.msra.mxu0 %v16201_v0  ;;  %v16445_v39 = vor.u32 %v17858_v29, %v16442_v32  ;;  %v16360_v42 = vld [vmem:[#allocation10 + $0x150] sm:$0xf]  ;;  %v16432_v47 = vld [vmem:[#allocation10 + $0x1e0] sm:$0xf]  ;;  %v17857_v55 = vld [vmem:[#allocation10 + $0x1e4] sm:$0xf0]  ;;  %v16373_v49 = vor.u32 %v17840_v46, %v16370_v48 }
 0x686   : > { %9895 = vmatpush.bf16.msra.mxu1 %v16265_v1  ;;  %9908 = vmatpush.bf16.msra.mxu2 %v16205_v13  ;;  %v17839_v56 = vld [vmem:[#allocation10 + $0x154] sm:$0xf0]  ;;  %v17856_v43 = vld [vmem:[#allocation10 + $0x1e4] sm:$0xf]  ;;  %v16434_v44 = vld [vmem:[#allocation10 + $0x1e8] sm:$0xf0]  ;;  %v16433_v60 = vor.u32 %v17857_v55, %v16432_v47 }
 0x687   : > { %9921 = vmatpush.bf16.msra.mxu3 %v16269_v9  ;;  %v17838_v45 = vld [vmem:[#allocation10 + $0x154] sm:$0xf]  ;;  %v16362_v50 = vld [vmem:[#allocation10 + $0x158] sm:$0xf0]  ;;  %v16361_v31 = vor.u32 %v17839_v56, %v16360_v42  ;;  %v16437_v51 = vor.u32 %v17856_v43, %v16434_v44  ;;  %v16352_v53 = vld [vmem:[#allocation10 + $0x140] sm:$0xf] }
 0x688   : > { %v16424_v54 = vld [vmem:[#allocation10 + $0x1d0] sm:$0xf]  ;;  %v17855_v57 = vld [vmem:[#allocation10 + $0x1d4] sm:$0xf0]  ;;  %v16365_v62 = vor.u32 %v17838_v45, %v16362_v50  ;;  %v17837_v4 = vld [vmem:[#allocation10 + $0x144] sm:$0xf0] }
 0x689   : > { %9883 = vmatpush.bf16.msra.mxu0 %v16193_v17  ;;  %v17854_v5 = vld [vmem:[#allocation10 + $0x1d4] sm:$0xf]  ;;  %v16426_v58 = vld [vmem:[#allocation10 + $0x1d8] sm:$0xf0]  ;;  %v17836_v59 = vld [vmem:[#allocation10 + $0x144] sm:$0xf]  ;;  %v16425_v63 = vor.u32 %v17855_v57, %v16424_v54  ;;  %v16353_v10 = vor.u32 %v17837_v4, %v16352_v53 }
 0x68a   : > { %9896 = vmatpush.bf16.msra.mxu1 %v16257_v34  ;;  %9909 = vmatpush.bf16.msra.mxu2 %v16197_v52  ;;  %v16354_v30 = vld [vmem:[#allocation10 + $0x148] sm:$0xf0]  ;;  %v16429_v11 = vor.u32 %v17854_v5, %v16426_v58  ;;  %v16344_v12 = vld [vmem:[#allocation10 + $0x130] sm:$0xf]  ;;  %v16416_v0 = vld [vmem:[#allocation10 + $0x1c0] sm:$0xf] }
 0x68b   : > { %9922 = vmatpush.bf16.msra.mxu3 %v16261_v21  ;;  %v17853_v1 = vld [vmem:[#allocation10 + $0x1c4] sm:$0xf0]  ;;  %v16357_v2 = vor.u32 %v17836_v59, %v16354_v30  ;;  %v17835_v6 = vld [vmem:[#allocation10 + $0x134] sm:$0xf0]  ;;  %v17852_v13 = vld [vmem:[#allocation10 + $0x1c4] sm:$0xf] }
 0x68c   : > { %9884 = vmatmul.bf16.vlgmr.msra.gmra.mxu0 %v9676_v3  ;;  %v16418_v18 = vld [vmem:[#allocation10 + $0x1c8] sm:$0xf0]  ;;  %v17834_v61 = vld [vmem:[#allocation10 + $0x134] sm:$0xf]  ;;  %v16346_v19 = vld [vmem:[#allocation10 + $0x138] sm:$0xf0]  ;;  %v16417_v7 = vor.u32 %v17853_v1, %v16416_v0  ;;  %v16345_v8 = vor.u32 %v17835_v6, %v16344_v12 }
 0x68d   : > { %10132 = vmatpush.bf16.msrb.mxu0 %v16377_v22  ;;  %9897 = vmatmul.bf16.vlgmr.msra.gmra.mxu1 %v9677_v36  ;;  %v16421_v9 = vor.u32 %v17852_v13, %v16418_v18  ;;  %v16349_v14 = vor.u32 %v17834_v61, %v16346_v19  ;;  %v16336_v23 = vld [vmem:[#allocation10 + $0x120] sm:$0xf]  ;;  %v17833_v24 = vld [vmem:[#allocation10 + $0x124] sm:$0xf0]  ;;  %v17832_v25 = vld [vmem:[#allocation10 + $0x124] sm:$0xf] }
 0x68e   : > { %10158 = vmatpush.bf16.msrb.mxu2 %v16381_v35  ;;  %9923 = vmatmul.bf16.vlgmr.msra.gmra.mxu3 %v9677_v36  ;;  %v16338_v15 = vld [vmem:[#allocation10 + $0x128] sm:$0xf0]  ;;  %v16337_v16 = vor.u32 %v17833_v24, %v16336_v23  ;;  %v16408_v20 = vld [vmem:[#allocation10 + $0x1b0] sm:$0xf]  ;;  %v17851_v28 = vld [vmem:[#allocation10 + $0x1b4] sm:$0xf0] }
 0x68f   : > { %9910 = vmatmul.bf16.vlgmr.msra.gmra.mxu2 %v9676_v3  ;;  %10145 = vmatpush.bf16.msrb.mxu1 %v16441_v37  ;;  %v16341_v17 = vor.u32 %v17832_v25, %v16338_v15  ;;  %v17850_v33 = vld [vmem:[#allocation10 + $0x1b4] sm:$0xf]  ;;  %v16409_v34 = vor.u32 %v17851_v28, %v16408_v20  ;;  %v16410_v52 = vld [vmem:[#allocation10 + $0x1b8] sm:$0xf0]  ;;  %v16328_v22 = vld [vmem:[#allocation10 + $0x110] sm:$0xf] }
 0x690   : > { %10171 = vmatpush.bf16.msrb.mxu3 %v16445_v39  ;;  %v16413_v21 = vor.u32 %v17850_v33, %v16410_v52  ;;  %v17831_v26 = vld [vmem:[#allocation10 + $0x114] sm:$0xf0]  ;;  %v17830_v40 = vld [vmem:[#allocation10 + $0x114] sm:$0xf]  ;;  %v16330_v3 = vld [vmem:[#allocation10 + $0x118] sm:$0xf0] }
 0x691   : > { %10133 = vmatpush.bf16.msrb.mxu0 %v16369_v38  ;;  %v16329_v41 = vor.u32 %v17831_v26, %v16328_v22  ;;  %v16333_v35 = vor.u32 %v17830_v40, %v16330_v3  ;;  %v16400_v27 = vld [vmem:[#allocation10 + $0x1a0] sm:$0xf]  ;;  %v17849_v29 = vld [vmem:[#allocation10 + $0x1a4] sm:$0xf0]  ;;  %v17848_v32 = vld [vmem:[#allocation10 + $0x1a4] sm:$0xf] }
 0x692   : > { %10159 = vmatpush.bf16.msrb.mxu2 %v16373_v49  ;;  %v16401_v36 = vor.u32 %v17849_v29, %v16400_v27  ;;  %v16402_v46 = vld [vmem:[#allocation10 + $0x1a8] sm:$0xf0]  ;;  %v16320_v37 = vld [vmem:[#allocation10 + $0x100] sm:$0xf]  ;;  %v17829_v38 = vld [vmem:[#allocation10 + $0x104] sm:$0xf0] }
 0x693   : > { %10146 = vmatpush.bf16.msrb.mxu1 %v16433_v60  ;;  %v16405_v48 = vor.u32 %v17848_v32, %v16402_v46  ;;  %v17828_v39 = vld [vmem:[#allocation10 + $0x104] sm:$0xf]  ;;  %v16321_v42 = vor.u32 %v17829_v38, %v16320_v37  ;;  %v16322_v47 = vld [vmem:[#allocation10 + $0x108] sm:$0xf0]  ;;  %v16392_v49 = vld [vmem:[#allocation10 + $0x190] sm:$0xf] }
 0x694   : > { %10172 = vmatpush.bf16.msrb.mxu3 %v16437_v51  ;;  %v16325_v55 = vor.u32 %v17828_v39, %v16322_v47  ;;  %v17847_v56 = vld [vmem:[#allocation10 + $0x194] sm:$0xf0]  ;;  %v17846_v44 = vld [vmem:[#allocation10 + $0x194] sm:$0xf]  ;;  %v16394_v45 = vld [vmem:[#allocation10 + $0x198] sm:$0xf0] }
 0x695   : > { %10134 = vmatpush.bf16.msrb.mxu0 %v16361_v31  ;;  %v16393_v43 = vor.u32 %v17847_v56, %v16392_v49  ;;  %v16397_v50 = vor.u32 %v17846_v44, %v16394_v45  ;;  %v16384_v60 = vld [vmem:[#allocation10 + $0x180] sm:$0xf]  ;;  %v17845_v31 = vld [vmem:[#allocation10 + $0x184] sm:$0xf0]  ;;  %v17844_v51 = vld [vmem:[#allocation10 + $0x184] sm:$0xf] }
 0x696   : > { %10160 = vmatpush.bf16.msrb.mxu2 %v16365_v62  ;;  %v16385_v53 = vor.u32 %v17845_v31, %v16384_v60  ;;  %v16386_v54 = vld [vmem:[#allocation10 + $0x188] sm:$0xf0]  ;;  %v16504_v62 = vld [vmem:[#allocation10 + $0x270] sm:$0xf]  ;;  %v17875_v4 = vld [vmem:[#allocation10 + $0x274] sm:$0xf0] }
 0x697   : > { %10147 = vmatpush.bf16.msrb.mxu1 %v16425_v63  ;;  %v16389_v57 = vor.u32 %v17844_v51, %v16386_v54  ;;  %v17874_v5 = vld [vmem:[#allocation10 + $0x274] sm:$0xf]  ;;  %v16505_v58 = vor.u32 %v17875_v4, %v16504_v62  ;;  %v16506_v59 = vld [vmem:[#allocation10 + $0x278] sm:$0xf0]  ;;  %v16496_v30 = vld [vmem:[#allocation10 + $0x260] sm:$0xf] }
 0x698   : > { %10173 = vmatpush.bf16.msrb.mxu3 %v16429_v11  ;;  %v17873_v63 = vld [vmem:[#allocation10 + $0x264] sm:$0xf0]  ;;  %v17872_v11 = vld [vmem:[#allocation10 + $0x264] sm:$0xf]  ;;  %v16498_v12 = vld [vmem:[#allocation10 + $0x268] sm:$0xf0] }
 0x699   : > { %10135 = vmatpush.bf16.msrb.mxu0 %v16353_v10  ;;  %v16509_v10 = vor.u32 %v17874_v5, %v16506_v59  ;;  %v16568_v0 = vld [vmem:[#allocation10 + $0x2f0] sm:$0xf]  ;;  %v16497_v1 = vor.u32 %v17873_v63, %v16496_v30  ;;  %v17890_v6 = vld [vmem:[#allocation10 + $0x2f4] sm:$0xf]  ;;  %v16570_v13 = vld [vmem:[#allocation10 + $0x2f8] sm:$0xf0]  ;;  %v16501_v18 = vor.u32 %v17872_v11, %v16498_v12 }
 0x69a   : > { %10161 = vmatpush.bf16.msrb.mxu2 %v16357_v2  ;;  %v17891_v2 = vld [vmem:[#allocation10 + $0x2f4] sm:$0xf0]  ;;  %v16573_v19 = vor.u32 %v17890_v6, %v16570_v13  ;;  %v16560_v23 = vld [vmem:[#allocation10 + $0x2e0] sm:$0xf]  ;;  %v17889_v24 = vld [vmem:[#allocation10 + $0x2e4] sm:$0xf0] }
 0x69b   : > { %10148 = vmatpush.bf16.msrb.mxu1 %v16417_v7  ;;  %v16569_v61 = vor.u32 %v17891_v2, %v16568_v0  ;;  %v16488_v7 = vld [vmem:[#allocation10 + $0x250] sm:$0xf]  ;;  %v16561_v25 = vor.u32 %v17889_v24, %v16560_v23  ;;  %v17888_v15 = vld [vmem:[#allocation10 + $0x2e4] sm:$0xf]  ;;  %v16480_v28 = vld [vmem:[#allocation10 + $0x240] sm:$0xf] }
 0x69c   : > { %10174 = vmatpush.bf16.msrb.mxu3 %v16421_v9  ;;  %v17870_v9 = vld [vmem:[#allocation10 + $0x254] sm:$0xf]  ;;  %v17869_v33 = vld [vmem:[#allocation10 + $0x244] sm:$0xf0]  ;;  %v16552_v52 = vld [vmem:[#allocation10 + $0x2d0] sm:$0xf] }
 0x69d   : > { %10136 = vmatpush.bf16.msrb.mxu0 %v16345_v8  ;;  %v17871_v8 = vld [vmem:[#allocation10 + $0x254] sm:$0xf0]  ;;  %v17886_v22 = vld [vmem:[#allocation10 + $0x2d4] sm:$0xf]  ;;  %v17868_v26 = vld [vmem:[#allocation10 + $0x244] sm:$0xf]  ;;  %v16481_v29 = vor.u32 %v17869_v33, %v16480_v28 }
 0x69e   : > { %10162 = vmatpush.bf16.msrb.mxu2 %v16349_v14  ;;  %v16490_v14 = vld [vmem:[#allocation10 + $0x258] sm:$0xf0]  ;;  %v16482_v40 = vld [vmem:[#allocation10 + $0x248] sm:$0xf0]  ;;  %v9710_v3 = vld [vmem:[#allocation12] sm:$0x3] }
 0x69f   : > { %10149 = vmatpush.bf16.msrb.mxu1 %v16409_v34  ;;  %v16493_v34 = vor.u32 %v17870_v9, %v16490_v14  ;;  %v16485_v32 = vor.u32 %v17868_v26, %v16482_v40  ;;  %v17867_v46 = vld [vmem:[#allocation10 + $0x234] sm:$0xf0]  ;;  %v17866_v37 = vld [vmem:[#allocation10 + $0x234] sm:$0xf]  ;;  %v16474_v38 = vld [vmem:[#allocation10 + $0x238] sm:$0xf0] }
 0x6a0   : > { %10175 = vmatpush.bf16.msrb.mxu3 %v16413_v21  ;;  %v17887_v21 = vld [vmem:[#allocation10 + $0x2d4] sm:$0xf0]  ;;  %v16477_v47 = vor.u32 %v17866_v37, %v16474_v38  ;;  %v17885_v59 = vld [vmem:[#allocation10 + $0x2c4] sm:$0xf0]  ;;  %v17884_v30 = vld [vmem:[#allocation10 + $0x2c4] sm:$0xf] }
 0x6a1   : > { %10137 = vmatpush.bf16.msrb.mxu0 %v16337_v16  ;;  %v16562_v16 = vld [vmem:[#allocation10 + $0x2e8] sm:$0xf0]  ;;  %v16464_v12 = vld [vmem:[#allocation10 + $0x220] sm:$0xf]  ;;  %v17865_v0 = vld [vmem:[#allocation10 + $0x224] sm:$0xf0] }
 0x6a2   : > { %10163 = vmatpush.bf16.msrb.mxu2 %v16341_v17  ;;  %v16489_v17 = vor.u32 %v17871_v8, %v16488_v7  ;;  %v16565_v20 = vor.u32 %v17888_v15, %v16562_v16  ;;  %v16465_v2 = vor.u32 %v17865_v0, %v16464_v12  ;;  %v16466_v6 = vld [vmem:[#allocation10 + $0x228] sm:$0xf0]  ;;  %v16536_v13 = vld [vmem:[#allocation10 + $0x2b0] sm:$0xf]  ;;  %v17882_v7 = vld [vmem:[#allocation10 + $0x2b4] sm:$0xf] }
 0x6a3   : > { %10150 = vmatpush.bf16.msrb.mxu1 %v16401_v36  ;;  %v16472_v36 = vld [vmem:[#allocation10 + $0x230] sm:$0xf]  ;;  %v16538_v8 = vld [vmem:[#allocation10 + $0x2b8] sm:$0xf0]  ;;  %v17863_v23 = vld [vmem:[#allocation10 + $0x214] sm:$0xf0] }
 0x6a4   : > { %10176 = vmatpush.bf16.msrb.mxu3 %v16405_v48  ;;  %v9712_v48 = vperm.slane %v9710_v3, 0  ;;  %v16473_v39 = vor.u32 %v17867_v46, %v16472_v36  ;;  %v16541_v9 = vor.u32 %v17882_v7, %v16538_v8  ;;  %v16456_v14 = vld [vmem:[#allocation10 + $0x210] sm:$0xf]  ;;  %v17862_v24 = vld [vmem:[#allocation10 + $0x214] sm:$0xf]  ;;  %v17892_v8 = vld [vmem:[#allocation13] sm:$0xff] }
 0x6a5   : > { %10138 = vmatpush.bf16.msrb.mxu0 %v16329_v41  ;;  %v16554_v41 = vld [vmem:[#allocation10 + $0x2d8] sm:$0xf0]  ;;  %v17880_v28 = vld [vmem:[#allocation10 + $0x2a4] sm:$0xf]  ;;  %v17877_v37 = vld [vmem:[#allocation10 + $0x284] sm:$0xf0] }
 0x6a6   : > { %10164 = vmatpush.bf16.msrb.mxu2 %v16333_v35  ;;  %v16553_v35 = vor.u32 %v17887_v21, %v16552_v52  ;;  %v16557_v27 = vor.u32 %v17886_v22, %v16554_v41  ;;  %v16458_v15 = vld [vmem:[#allocation10 + $0x218] sm:$0xf0]  ;;  %v16448_v21 = vld [vmem:[#allocation10 + $0x200] sm:$0xf]  ;;  %v17861_v22 = vld [vmem:[#allocation10 + $0x204] sm:$0xf0] }
 0x6a7   : > { %10151 = vmatpush.bf16.msrb.mxu1 %v16393_v43  ;;  %v9713_v43 = vperm.slane %v9710_v3, 1  ;;  %v16461_v16 = vor.u32 %v17862_v24, %v16458_v15  ;;  %v17860_v26 = vld [vmem:[#allocation10 + $0x204] sm:$0xf]  ;;  %v16449_v40 = vor.u32 %v17861_v22, %v16448_v21  ;;  %v16450_v41 = vld [vmem:[#allocation10 + $0x208] sm:$0xf0]  ;;  %v17902_v7 = vld [vmem:[#allocation13 + $0x50] sm:$0xff] }
 0x6a8   : > { %10177 = vmatpush.bf16.msrb.mxu3 %v16397_v50  ;;  %v16453_v3 = vor.u32 %v17860_v26, %v16450_v41  ;;  %v16522_v36 = vld [vmem:[#allocation10 + $0x298] sm:$0xf0]  ;;  %v17876_v38 = vld [vmem:[#allocation10 + $0x284] sm:$0xf] }
 0x6a9   : > { %10139 = vmatpush.bf16.msrb.mxu0 %v16321_v42 }
 0x6aa   : > { %10165 = vmatpush.bf16.msrb.mxu2 %v16325_v55 }
 0x6ab   : > { %10152 = vmatpush.bf16.msrb.mxu1 %v16385_v53 }
 0x6ac   : > { %10178 = vmatpush.bf16.msrb.mxu3 %v16389_v57 }
 0x6ad   : > { %10388 = vmatpush.bf16.msra.mxu0 %v16505_v58  ;;  %v16544_v58 = vld [vmem:[#allocation10 + $0x2c0] sm:$0xf] }
 0x6ae   : > { %10414 = vmatpush.bf16.msra.mxu2 %v16509_v10  ;;  %v16545_v63 = vor.u32 %v17885_v59, %v16544_v58  ;;  %v16546_v10 = vld [vmem:[#allocation10 + $0x2c8] sm:$0xf0] }
 0x6af   : > { %10401 = vmatpush.bf16.msra.mxu1 %v16569_v61  ;;  %v16549_v11 = vor.u32 %v17884_v30, %v16546_v10 }
 0x6b0   : > { %10427 = vmatpush.bf16.msra.mxu3 %v16573_v19 }
 0x6b1   : > { %10389 = vmatpush.bf16.msra.mxu0 %v16497_v1  ;;  %v17864_v1 = vld [vmem:[#allocation10 + $0x224] sm:$0xf] }
 0x6b2   : > { %10415 = vmatpush.bf16.msra.mxu2 %v16501_v18  ;;  %v17883_v18 = vld [vmem:[#allocation10 + $0x2b4] sm:$0xf0]  ;;  %v16469_v61 = vor.u32 %v17864_v1, %v16466_v6 }
 0x6b3   : > { %10402 = vmatpush.bf16.msra.mxu1 %v16561_v25  ;;  %v16537_v19 = vor.u32 %v17883_v18, %v16536_v13  ;;  %v16457_v25 = vor.u32 %v17863_v23, %v16456_v14  ;;  %v17904_v13 = vld [vmem:[#allocation13 + $0x60] sm:$0xff]  ;;  %v17894_v18 = vld [vmem:[#allocation13 + $0x10] sm:$0xff]  ;;  %v10222_v23 = vld [vmem:[#allocation12 + $0x4] sm:$0x3] }
 0x6b4   : > { %10428 = vmatpush.bf16.msra.mxu3 %v16565_v20  ;;  %v17881_v20 = vld [vmem:[#allocation10 + $0x2a4] sm:$0xf0] }
 0x6b5   : > { %10390 = vmatpush.bf16.msra.mxu0 %v16489_v17  ;;  %v16528_v17 = vld [vmem:[#allocation10 + $0x2a0] sm:$0xf]  ;;  %v17900_v14 = vld [vmem:[#allocation13 + $0x40] sm:$0xff] }
 0x6b6   : > { %10416 = vmatpush.bf16.msra.mxu2 %v16493_v34  ;;  %v16529_v33 = vor.u32 %v17881_v20, %v16528_v17  ;;  %v16530_v34 = vld [vmem:[#allocation10 + $0x2a8] sm:$0xf0] }
 0x6b7   : > { %10403 = vmatpush.bf16.msra.mxu1 %v16553_v35  ;;  %v16533_v52 = vor.u32 %v17880_v28, %v16530_v34  ;;  %v16520_v35 = vld [vmem:[#allocation10 + $0x290] sm:$0xf]  ;;  %v10225_v28 = vperm.slane %v10222_v23, 1 }
 0x6b8   : > { %10429 = vmatpush.bf16.msra.mxu3 %v16557_v27  ;;  %v17879_v27 = vld [vmem:[#allocation10 + $0x294] sm:$0xf0] }
 0x6b9   : > { %10391 = vmatpush.bf16.msra.mxu0 %v16481_v29  ;;  %v16521_v29 = vor.u32 %v17879_v27, %v16520_v35 }
 0x6ba   : > { %10417 = vmatpush.bf16.msra.mxu2 %v16485_v32  ;;  %v17878_v32 = vld [vmem:[#allocation10 + $0x294] sm:$0xf] }
 0x6bb   : > { %10404 = vmatpush.bf16.msra.mxu1 %v16545_v63  ;;  %v16525_v46 = vor.u32 %v17878_v32, %v16522_v36  ;;  %v18060_v32 = vld [vmem:[#allocation15] ss:$0 sm:$0xff] }
 0x6bc   : > { %10430 = vmatpush.bf16.msra.mxu3 %v16549_v11 }
 0x6bd   : > { %10392 = vmatpush.bf16.msra.mxu0 %v16473_v39 }
 0x6be   : > { %10418 = vmatpush.bf16.msra.mxu2 %v16477_v47 }
 0x6bf   : > { %10405 = vmatpush.bf16.msra.mxu1 %v16537_v19  ;;  %v17893_v19 = vld [vmem:[#allocation13 + $0x8] sm:$0xff] }
 0x6c0   : > { %10431 = vmatpush.bf16.msra.mxu3 %v16541_v9  ;;  %v17901_v9 = vld [vmem:[#allocation13 + $0x48] sm:$0xff] }
 0x6c1   : > { %10393 = vmatpush.bf16.msra.mxu0 %v16465_v2 }
 0x6c2   : > { %10419 = vmatpush.bf16.msra.mxu2 %v16469_v61  ;;  %v17903_v61 = vld [vmem:[#allocation13 + $0x58] sm:$0xff] }
 0x6c3   : > { %10406 = vmatpush.bf16.msra.mxu1 %v16529_v33 }
 0x6c4   : > { %10432 = vmatpush.bf16.msra.mxu3 %v16533_v52 }
 0x6c5   : > { %10394 = vmatpush.bf16.msra.mxu0 %v16457_v25  ;;  %v10224_v25 = vperm.slane %v10222_v23, 0 }
 0x6c6   : > { %10420 = vmatpush.bf16.msra.mxu2 %v16461_v16 }
 0x6c7   : > { %10407 = vmatpush.bf16.msra.mxu1 %v16521_v29 }
 0x6c8   : > { %10433 = vmatpush.bf16.msra.mxu3 %v16525_v46 }
 0x6c9   : > { %10395 = vmatpush.bf16.msra.mxu0 %v16449_v40 }
 0x6ca   : > { %10421 = vmatpush.bf16.msra.mxu2 %v16453_v3 }
 0x709   : > { %v9885_v42 = vpop.f32.mrf.mxu0 }
 0x70a   : > { %v9886_v55 = vadd.f32 %v9885_v42, %v9712_v48  ;;  %v9898_v49 = vpop.f32.mrf.mxu1  ;;  %v16512_v48 = vld [vmem:[#allocation10 + $0x280] sm:$0xf]  ;;  %v16514_v42 = vld [vmem:[#allocation10 + $0x288] sm:$0xf0] }
 0x70b   : > { %v16513_v39 = vor.u32 %v17877_v37, %v16512_v48  ;;  %v16517_v47 = vor.u32 %v17876_v38, %v16514_v42 }
 0x70c   : > { %v9899_v56 = vadd.f32 %v9898_v49, %v9886_v55  ;;  %v17899_v55 = vld [vmem:[#allocation13 + $0x38] sm:$0xff] }
 0x70d   : > { %10408 = vmatpush.bf16.msra.mxu1 %v16513_v39  ;;  %10434 = vmatpush.bf16.msra.mxu3 %v16517_v47  ;;  %v17907_v49 = vld [vmem:[#allocation13 + $0x78] sm:$0xff] }
 0x70e   : > { %v9928_v44 = vmax.f32 %v9899_v56, 0.0  ;;  %v17898_v56 = vld [vmem:[#allocation13 + $0x30] sm:$0xff] }
 0x710   : > { %v9930_v45 = vpack.c.bf16 %v9928_v44, %v9928_v44  ;;  %v17897_v44 = vld [vmem:[#allocation13 + $0x28] sm:$0xff] }
 0x711   : > { %v9924_v31 = vpop.f32.mrf.mxu3  ;;  %v9887_v51 = vpop.f32.mrf.mxu0 }
 0x712   : > { %v9911_v50 = vpop.f32.mrf.mxu2  ;;  %v9900_v53 = vpop.f32.mrf.mxu1  ;;  %10140 = vmatmul.bf16.vlgmr.msrb.gmra.mxu0 %v9930_v45  ;;  %10166 = vmatmul.bf16.vlgmr.msrb.gmra.mxu2 %v9930_v45  ;;  %v17905_v45 = vld [vmem:[#allocation13 + $0x68] sm:$0xff] }
 0x713   : > { %v9912_v60 = vadd.f32 %v9911_v50, %v9713_v43  ;;  %10576 = vmatpush.bf16.msrb.mxu0 %v17899_v55  ;;  %v17906_v43 = vld [vmem:[#allocation13 + $0x70] sm:$0xff]  ;;  %v9966_v50 = vld [vmem:[#allocation12 + $0x2] sm:$0x3] }
 0x714   : > { %v17895_v53 = vld [vmem:[#allocation13 + $0x18] sm:$0xff] }
 0x715   : > { %v9925_v54 = vadd.f32 %v9924_v31, %v9912_v60  ;;  %v17896_v60 = vld [vmem:[#allocation13 + $0x20] sm:$0xff]  ;;  %v9968_v31 = vperm.slane %v9966_v50, 0 }
 0x717   : > { %v9929_v57 = vmax.f32 %v9925_v54, 0.0  ;;  %10577 = vmatpush.bf16.msrb.mxu0 %v17898_v56 }
 0x719   : > { %v9931_v62 = vpack.c.bf16 %v9929_v57, %v9929_v57  ;;  %v9926_v5 = vpop.f32.mrf.mxu3  ;;  %v9969_v57 = vperm.slane %v9966_v50, 1 }
 0x71a   : > { %v9913_v4 = vpop.f32.mrf.mxu2 }
 0x71b   : > { %10153 = vmatmul.bf16.vlgmr.msrb.gmra.mxu1 %v9931_v62  ;;  %10179 = vmatmul.bf16.vlgmr.msrb.gmra.mxu3 %v9931_v62 }
 0x71c   : > { %10589 = vmatpush.bf16.msrb.mxu1 %v17907_v49  ;;  %10578 = vmatpush.bf16.msrb.mxu0 %v17897_v44 }
 0x720   : > { %10590 = vmatpush.bf16.msrb.mxu1 %v17906_v43  ;;  %10579 = vmatpush.bf16.msrb.mxu0 %v17896_v60 }
 0x724   : > { %10591 = vmatpush.bf16.msrb.mxu1 %v17905_v45  ;;  %10580 = vmatpush.bf16.msrb.mxu0 %v17895_v53 }
 0x728   : > { %10592 = vmatpush.bf16.msrb.mxu1 %v17904_v13  ;;  %10581 = vmatpush.bf16.msrb.mxu0 %v17894_v18 }
 0x72c   : > { %10593 = vmatpush.bf16.msrb.mxu1 %v17903_v61  ;;  %10582 = vmatpush.bf16.msrb.mxu0 %v17893_v19 }
 0x730   : > { %10594 = vmatpush.bf16.msrb.mxu1 %v17902_v7  ;;  %10583 = vmatpush.bf16.msrb.mxu0 %v17892_v8 }
 0x734   : > { %10595 = vmatpush.bf16.msrb.mxu1 %v17901_v9 }
 0x738   : > { %10596 = vmatpush.bf16.msrb.mxu1 %v17900_v14 }
 0x78f   : > { %v10141_v51 = vpop.f32.mrf.mxu0 }
 0x790   : > { %v10142_v54 = vadd.f32 %v10141_v51, %v9968_v31 }
 0x795   : > { %v10167_v62 = vpop.f32.mrf.mxu2 }
 0x796   : > { %v10168_v30 = vadd.f32 %v10167_v62, %v9969_v57 }
 0x797   : > { %v10143_v58 = vpop.f32.mrf.mxu0 }
 0x798   : > { %v10154_v4 = vpop.f32.mrf.mxu1 }
 0x799   : > { %v10155_v5 = vadd.f32 %v10154_v4, %v10142_v54 }
 0x79b   : > { %v10184_v59 = vmax.f32 %v10155_v5, 0.0 }
 0x79d   : > { %v10186_v63 = vpack.c.bf16 %v10184_v59, %v10184_v59  ;;  %v10169_v12 = vpop.f32.mrf.mxu2 }
 0x79e   : > { %v10180_v10 = vpop.f32.mrf.mxu3 }
 0x79f   : > { %v10181_v11 = vadd.f32 %v10180_v10, %v10168_v30  ;;  %10396 = vmatmul.bf16.vlgmr.msra.gmra.mxu0 %v10186_v63  ;;  %10422 = vmatmul.bf16.vlgmr.msra.gmra.mxu2 %v10186_v63 }
 0x7a0   : > { %v10156_v0 = vpop.f32.mrf.mxu1 }
 0x7a1   : > { %v10185_v1 = vmax.f32 %v10181_v11, 0.0 }
 0x7a3   : > { %v10187_v2 = vpack.c.bf16 %v10185_v1, %v10185_v1 }
 0x7a5   : > { %10409 = vmatmul.bf16.vlgmr.msra.gmra.mxu1 %v10187_v2  ;;  %10435 = vmatmul.bf16.vlgmr.msra.gmra.mxu3 %v10187_v2 }
 0x7a6   : > { %v10182_v6 = vpop.f32.mrf.mxu3 }
 0x81c   : > { %v10397_v24 = vpop.f32.mrf.mxu0 }
 0x81d   : > { %v10398_v15 = vadd.f32 %v10397_v24, %v10224_v25 }
 0x822   : > { %v10410_v16 = vpop.f32.mrf.mxu1  ;;  %v10423_v17 = vpop.f32.mrf.mxu2 }
 0x823   : > { %v10411_v20 = vadd.f32 %v10410_v16, %v10398_v15  ;;  %v10424_v21 = vadd.f32 %v10423_v17, %v10225_v28 }
 0x824   : > { %v10399_v33 = vpop.f32.mrf.mxu0 }
 0x825   : > { %v10440_v34 = vmax.f32 %v10411_v20, 0.0 }
 0x827   : > { %v10442_v52 = vpack.c.bf16 %v10440_v34, %v10440_v34 }
 0x828   : > { %v10436_v22 = vpop.f32.mrf.mxu3 }
 0x829   : > { %v10437_v26 = vadd.f32 %v10436_v22, %v10424_v21  ;;  %10584 = vmatmul.bf16.vlgmr.msrb.gmra.mxu0 %v10442_v52 }
 0x82a   : > { %v10412_v40 = vpop.f32.mrf.mxu1  ;;  %v10425_v41 = vpop.f32.mrf.mxu2 }
 0x82b   : > { %v10441_v3 = vmax.f32 %v10437_v26, 0.0 }
 0x82d   : > { %v10443_v35 = vpack.c.bf16 %v10441_v3, %v10441_v3 }
 0x82f   : > { %10597 = vmatmul.bf16.vlgmr.msrb.gmra.mxu1 %v10443_v35 }
 0x830   : > { %v10438_v27 = vpop.f32.mrf.mxu3 }
 0x8a6   : > { %v10585_v29 = vpop.f32.mrf.mxu0 }
 0x8a7   : > { %v10586_v36 = vadd.f32 %v18060_v32, %v10585_v29 }
 0x8ac   : > { %v10598_v46 = vpop.f32.mrf.mxu1 }
 0x8ad   : > { %v10599_v48 = vadd.f32 %v10598_v46, %v10586_v36 }
 0x8ae   : > { %v10587_v37 = vpop.f32.mrf.mxu0 }
 0x8af   : > { %10602 = vst [vmem:[%s21292_s9] sm:$0xff] %v10599_v48 }
 0x8b4   : > { %v10600_v38 = vpop.f32.mrf.mxu1 }
 0x8b5 PF: > { %p20_p3 = scmp.ge.s32.totalorder %s18502_s28, 4   ;;  %s21303_s30 = smov %s18347_s10 }
 0x8b6   : > { %s21304_s10 = smov %s18351_s11  ;;  %s21305_s11 = smov %s18513_s21 }
 0x8b7   : > { %s21306_s12 = smov %s18502_s28  ;;  %22 = sbr.rel (!%p20_p3) target bundleno = 8 (0x8), region = 194 }
 0x8bc   :  { %10614 = vsyncpa [#allocation5], 1 }
 0x8bd   :  { %10616 = vsyncpa [#allocation5 + $0x1], 1 }
 0x8be   :  { %10617 = vsyncpa [#allocation7], 1 }
 0x8bf   :  { %10618 = vsyncpa [#allocation11], 1 }
 0x8c0   :  { %10619 = vsyncpa [#allocation14], 1 }

</bundles_post_ra>
